<compile_context>
chip_gen: v7x
topology: tpu7x:2x2x1
jax: 0.10.0
libtpu: 0.0.40
codegen_flags: <defaults>
</compile_context>

<pallas_src>
import jax
import jax.numpy as jnp
from jax.experimental import pallas as pl
from jax.experimental.pallas import tpu as pltpu

LN_EPS = 1e-5

_VMEM_BUDGET = None


def _vmem_budget():
    """Per-generation scoped-VMEM budget (bytes) with headroom."""
    global _VMEM_BUDGET
    if _VMEM_BUDGET is None:
        cap = 64 * 1024 * 1024                       # conservative (v7x) fallback
        try:
            cap = int(pltpu.get_tpu_info().vmem_capacity_bytes)
        except Exception:
            pass
        _VMEM_BUDGET = max(32 * 1024 * 1024,
                           min(cap * 3 // 4, cap - 16 * 1024 * 1024))
    return _VMEM_BUDGET


def _ln(x, g, b):
    # one-pass mean / E[x^2] variance (fewer VPU passes than two-pass)
    m = jnp.mean(x, axis=-1, keepdims=True)
    m2 = jnp.mean(x * x, axis=-1, keepdims=True)
    v = jnp.maximum(m2 - m * m, 0.0)
    return (x - m) * jax.lax.rsqrt(v + LN_EPS) * g + b


def _silu(x):
    return x * jax.nn.sigmoid(x)


def _largest_divisor_leq(n, cap):
    cap = int(max(1, min(n, cap)))
    for d in range(cap, 0, -1):
        if n % d == 0:
            return d
    return 1


def _pick_tile_rows(H, W, cin, cout, fixed_bytes):
    """Output rows per grid step: aim for >=512 (up to ~2048) matmul rows while
    keeping f32 accumulators / bf16 taps / double-buffered outputs in budget."""
    avail = max(_vmem_budget() - fixed_bytes, 0)
    per_row = W * (3 * cout * 4 + 2 * cin * 2 + 4 * cout * 2)   # rough bytes/row
    rows_fit = max(8, avail // max(per_row, 1))
    rows_cap = max(8, 2048 // max(W, 1))
    want = min(H, rows_fit, rows_cap)
    return _largest_divisor_leq(H, max(want, 1))


def _pick_tile_hw(HW, cin_total, cout, fixed_bytes):
    avail = max(_vmem_budget() - fixed_bytes, 0)
    per_row = 2 * cin_total * 2 * 2 + 3 * cout * 4
    want = min(HW, max(8, avail // max(per_row, 1)), 4096)
    return _largest_divisor_leq(HW, want)


def _vmem_spec():
    # Whole array resident in VMEM, single copy (no pipelining / double-buffer).
    return pl.BlockSpec(memory_space=pltpu.MemorySpace.VMEM)


def _cparams():
    return pltpu.CompilerParams(
        dimension_semantics=("parallel", "parallel"),
        vmem_limit_bytes=_vmem_budget())


# ---------------------------------------------------------------------------
# Stage 1: conv1(3x3)+bias+LN+SiLU -> conv2(1x1)+bias+LN+SiLU, CSP split outputs
# ---------------------------------------------------------------------------
def csp_stage1(x_nhwc, p):
    N, H, W, Cin = x_nhwc.shape
    w1, w2 = p["conv1_w"], p["conv2_w"]          # bf16 (9*Cin, C2), (C2, C2)
    C2 = w1.shape[-1]
    C = C2 // 2
    assert W % 8 == 0, "kernel assumes W is a multiple of 8 (sublane tiling)"

    fixed = (w1.size + w2.size) * 2 + 8 * C2 * 4 \
        + 2 * (H + 2) * (W + 2) * Cin * 2 + (1 << 20)
    TH = _pick_tile_rows(H, W, Cin, C2, fixed)
    THW, HW = TH * W, H * W

    xpad = jnp.pad(x_nhwc.astype(jnp.bfloat16), ((0, 0), (1, 1), (1, 1), (0, 0)))

    def kernel(x_ref, w1_ref, b1_ref, g1_ref, be1_ref,
               w2_ref, b2_ref, g2_ref, be2_ref, xs_ref, xb_ref):
        row0 = pl.multiple_of(pl.program_id(1) * TH, TH)
        xt = x_ref[pl.ds(row0, TH + 2)]                     # (TH+2, W+2, Cin) bf16
        # conv1: 9 accumulating MXU dots (K = Cin), f32 accumulate
        acc = None
        for dy in range(3):
            for dx in range(3):
                tap = xt[dy:dy + TH, dx:dx + W, :].reshape(THW, Cin)
                k = (dy * 3 + dx) * Cin
                d = jnp.dot(tap, w1_ref[k:k + Cin, :],
                            preferred_element_type=jnp.float32)
                acc = d if acc is None else acc + d
        h = _silu(_ln(acc + b1_ref[...], g1_ref[...], be1_ref[...]))
        # conv2 (1x1) + bias + LN + SiLU fused in the epilogue
        h2 = jnp.dot(h.astype(jnp.bfloat16), w2_ref[...],
                     preferred_element_type=jnp.float32)
        h2 = _silu(_ln(h2 + b2_ref[...], g2_ref[...], be2_ref[...]))
        xs_ref[...] = h2[:, :C].astype(xs_ref.dtype)
        xb_ref[...] = h2[:, C:].astype(xb_ref.dtype)

    cost = pl.CostEstimate(
        flops=int(2 * N * HW * (9 * Cin + C2) * C2),
        transcendentals=int(2 * N * HW * C2),
        bytes_accessed=int(xpad.size * 2 + (w1.size + w2.size) * 2
                           + 2 * N * HW * C * 2))

    xs, xb = pl.pallas_call(
        kernel,
        grid=(N, H // TH),
        in_specs=[pl.BlockSpec((None, H + 2, W + 2, Cin),
                               lambda n, t: (n, 0, 0, 0))]
                 + [_vmem_spec() for _ in range(8)],
        out_specs=(pl.BlockSpec((None, THW, C), lambda n, t: (n, t, 0)),
                   pl.BlockSpec((None, THW, C), lambda n, t: (n, t, 0))),
        out_shape=(jax.ShapeDtypeStruct((N, HW, C), jnp.bfloat16),
                   jax.ShapeDtypeStruct((N, HW, C), jnp.bfloat16)),
        compiler_params=_cparams(),
        cost_estimate=cost,
    )(xpad, w1, p["conv1_b"], p["bn1_g"], p["bn1_b"],
      w2, p["conv2_b"], p["bn2_g"], p["bn2_b"])
    return xs, xb


# ---------------------------------------------------------------------------
# Fused BasicBlock: conv3x3+LN+SiLU -> conv3x3+LN + residual + SiLU in ONE kernel
# (intermediate activation stays in VMEM; halo rows are recomputed)
# ---------------------------------------------------------------------------
def basic_block_fused(xb_flat, blk, *, H, W):
    N, HW, C = xb_flat.shape
    assert W % 8 == 0, "kernel assumes W is a multiple of 8 (sublane tiling)"
    w1, w2 = blk["conv1_w"], blk["conv2_w"]      # bf16 (9*C, C)

    fixed = (w1.size + w2.size) * 2 + 4 * C * 4 \
        + 2 * (H + 4) * (W + 4) * C * 2 + (1 << 20)
    TH = _pick_tile_rows(H, W, C, C, fixed)
    THW = TH * W

    xpad2 = jnp.pad(xb_flat.reshape(N, H, W, C), ((0, 0), (2, 2), (2, 2), (0, 0)))

    def kernel(x_ref, w1_ref, g1_ref, b1_ref, w2_ref, g2_ref, b2_ref, out_ref):
        row0 = pl.multiple_of(pl.program_id(1) * TH, TH)
        xt = x_ref[pl.ds(row0, TH + 4)]                     # (TH+4, W+4, C) bf16

        def conv9(win, w_ref, rows, col0):
            acc = None
            for dy in range(3):
                for dx in range(3):
                    tap = win[dy:dy + rows, col0 + dx:col0 + dx + W, :]
                    tap = tap.reshape(rows * W, C)
                    k = (dy * 3 + dx) * C
                    d = jnp.dot(tap, w_ref[k:k + C, :],
                                preferred_element_type=jnp.float32)
                    acc = d if acc is None else acc + d
            return acc

        # conv1 + LN + SiLU on a (TH+2)-row halo window (recomputed, stays in VMEM)
        t = _silu(_ln(conv9(xt, w1_ref, TH + 2, 1), g1_ref[...], b1_ref[...]))
        t = t.reshape(TH + 2, W, C)
        # zero halo rows that fall outside the image, zero-pad W edges so conv2
        # sees the same zero padding as the unfused computation
        img_row = jax.lax.broadcasted_iota(jnp.int32, (TH + 2, 1), 0) + (row0 - 1)
        valid = jnp.logical_and(img_row >= 0, img_row < H)
        t = jnp.where(valid[:, :, None], t, 0.0).astype(jnp.bfloat16)
        zc = jnp.zeros((TH + 2, 1, C), jnp.bfloat16)
        tp = jnp.concatenate([zc, t, zc], axis=1)           # (TH+2, W+2, C)

        # conv2 + LN + residual + SiLU
        u = _ln(conv9(tp, w2_ref, TH, 0), g2_ref[...], b2_ref[...])
        res = xt[2:2 + TH, 2:2 + W, :].reshape(THW, C).astype(jnp.float32)
        out_ref[...] = _silu(res + u).astype(out_ref.dtype)

    cost = pl.CostEstimate(
        flops=int(4 * N * HW * 9 * C * C),
        transcendentals=int(2 * N * HW * C),
        bytes_accessed=int(xpad2.size * 2 + (w1.size + w2.size) * 2
                           + N * HW * C * 2))

    return pl.pallas_call(
        kernel,
        grid=(N, H // TH),
        in_specs=[pl.BlockSpec((None, H + 4, W + 4, C),
                               lambda n, t: (n, 0, 0, 0))]
                 + [_vmem_spec() for _ in range(6)],
        out_specs=pl.BlockSpec((None, THW, C), lambda n, t: (n, t, 0)),
        out_shape=jax.ShapeDtypeStruct((N, HW, C), jnp.bfloat16),
        compiler_params=_cparams(),
        cost_estimate=cost,
    )(xpad2, w1, blk["bn1_g"], blk["bn1_b"], w2, blk["bn2_g"], blk["bn2_b"])


# ---------------------------------------------------------------------------
# Transition: 1x1 conv over cat([xs, xb]) without materializing the concat
# ---------------------------------------------------------------------------
def transition_1x1(xs, xb, p):
    N, HW, C = xs.shape
    ws, wb, b = p["trans_ws"], p["trans_wb"], p["trans_b"]
    Cout = ws.shape[-1]

    fixed = (ws.size + wb.size) * 2 + Cout * 4 + (1 << 20)
    T = _pick_tile_hw(HW, 2 * C, Cout, fixed)

    def kernel(xs_ref, xb_ref, ws_ref, wb_ref, b_ref, out_ref):
        acc = jnp.dot(xs_ref[...], ws_ref[...], preferred_element_type=jnp.float32)
        acc = acc + jnp.dot(xb_ref[...], wb_ref[...],
                            preferred_element_type=jnp.float32)
        out_ref[...] = (acc + b_ref[...]).astype(out_ref.dtype)

    cost = pl.CostEstimate(
        flops=int(4 * N * HW * C * Cout),
        transcendentals=0,
        bytes_accessed=int(2 * N * HW * C * 2 + (ws.size + wb.size) * 2
                           + N * HW * Cout * 4))

    return pl.pallas_call(
        kernel,
        grid=(N, HW // T),
        in_specs=[pl.BlockSpec((None, T, C), lambda n, t: (n, t, 0)),
                  pl.BlockSpec((None, T, C), lambda n, t: (n, t, 0)),
                  _vmem_spec(), _vmem_spec(), _vmem_spec()],
        out_specs=pl.BlockSpec((None, T, Cout), lambda n, t: (n, t, 0)),
        out_shape=jax.ShapeDtypeStruct((N, HW, Cout), jnp.float32),
        compiler_params=_cparams(),
        cost_estimate=cost,
    )(xs, xb, ws, wb, b)


# ---------------------------------------------------------------------------
# ScalableCSPResBlock forward
# ---------------------------------------------------------------------------
def scalable_csp_resblock(x_nchw, prepared):
    """x_nchw: (N, in_ch, H, W) float32, matching the PyTorch module."""
    x = jnp.transpose(x_nchw, (0, 2, 3, 1))                 # NHWC
    N, H, W, _ = x.shape

    xs, xb = csp_stage1(x, prepared)                        # bf16 (N, H*W, in_ch)
    for blk in prepared["basic"]:
        xb = basic_block_fused(xb, blk, H=H, W=W)
    out = transition_1x1(xs, xb, prepared)                  # f32 (N, H*W, in_ch)
    return jnp.transpose(out.reshape(N, H, W, -1), (0, 3, 1, 2))


# ---------------------------------------------------------------------------
# Parameter prep (once, outside the jitted forward) and deterministic init
# ---------------------------------------------------------------------------
def prepare_params(p):
    def w2d(w):
        kh, kw, ci, co = w.shape
        return w.reshape(kh * kw * ci, co).astype(jnp.bfloat16)

    def row(v):
        return v.reshape(1, -1).astype(jnp.float32)

    C = p["conv1_w"].shape[-1] // 2
    wt = w2d(p["trans_w"])
    out = {
        "conv1_w": w2d(p["conv1_w"]), "conv1_b": row(p["conv1_b"]),
        "bn1_g": row(p["bn1_g"]), "bn1_b": row(p["bn1_b"]),
        "conv2_w": w2d(p["conv2_w"]), "conv2_b": row(p["conv2_b"]),
        "bn2_g": row(p["bn2_g"]), "bn2_b": row(p["bn2_b"]),
        "trans_ws": wt[:C], "trans_wb": wt[C:], "trans_b": row(p["trans_b"]),
        "basic": [],
    }
    for bl in p["basic"]:
        out["basic"].append({
            "conv1_w": w2d(bl["conv1_w"]),
            "bn1_g": row(bl["bn1_g"]), "bn1_b": row(bl["bn1_b"]),
            "conv2_w": w2d(bl["conv2_w"]),
            "bn2_g": row(bl["bn2_g"]), "bn2_b": row(bl["bn2_b"]),
        })
    return out


def init_params(key, in_ch, num_basic_layers):
    def nxt():
        nonlocal key
        key, sub = jax.random.split(key)
        return sub

    def conv_w(kh, kw, ci, co):
        return 0.1 * jax.random.normal(nxt(), (kh, kw, ci, co), jnp.float32)

    def vec(c, base=0.0):
        return base + 0.1 * jax.random.normal(nxt(), (c,), jnp.float32)

    c2 = in_ch * 2
    p = {
        "conv1_w": conv_w(3, 3, in_ch, c2), "conv1_b": vec(c2),
        "bn1_g": vec(c2, 1.0), "bn1_b": vec(c2),
        "conv2_w": conv_w(1, 1, c2, c2), "conv2_b": vec(c2),
        "bn2_g": vec(c2, 1.0), "bn2_b": vec(c2),
        "trans_w": conv_w(1, 1, c2, in_ch), "trans_b": vec(in_ch),
        "basic": [],
    }
    for _ in range(num_basic_layers):
        p["basic"].append({
            "conv1_w": conv_w(3, 3, in_ch, in_ch),
            "bn1_g": vec(in_ch, 1.0), "bn1_b": vec(in_ch),
            "conv2_w": conv_w(3, 3, in_ch, in_ch),
            "bn2_g": vec(in_ch, 1.0), "bn2_b": vec(in_ch),
        })
    return p


# ---------------------------------------------------------------------------
# Pure-JAX reference (lax.conv, bf16 matmul inputs like the kernels)
# ---------------------------------------------------------------------------
def _ref_conv(x, w, b=None):
    out = jax.lax.conv_general_dilated(
        x.astype(jnp.bfloat16), w.astype(jnp.bfloat16), (1, 1), "SAME",
        dimension_numbers=("NHWC", "HWIO", "NHWC"),
        preferred_element_type=jnp.float32)
    return out if b is None else out + b


def reference_forward(x_nchw, p):
    x = jnp.transpose(x_nchw, (0, 2, 3, 1))
    h = _silu(_ln(_ref_conv(x, p["conv1_w"], p["conv1_b"]), p["bn1_g"], p["bn1_b"]))
    h = _silu(_ln(_ref_conv(h, p["conv2_w"], p["conv2_b"]), p["bn2_g"], p["bn2_b"]))
    C = h.shape[-1] // 2
    xs, xb = h[..., :C], h[..., C:]
    for bl in p["basic"]:
        xb_in = xb
        t = _silu(_ln(_ref_conv(xb_in, bl["conv1_w"]), bl["bn1_g"], bl["bn1_b"]))
        t = _ln(_ref_conv(t, bl["conv2_w"]), bl["bn2_g"], bl["bn2_b"])
        xb = _silu(xb_in + t)
    cat = jnp.concatenate([xs, xb], axis=-1)
    out = _ref_conv(cat, p["trans_w"], p["trans_b"])
    return jnp.transpose(out, (0, 3, 1, 2))


if __name__ == "__main__":
    N, IN_CH, H, W = 2, 8, 16, 16
    NUM_BASIC = 2

    key = jax.random.PRNGKey(0)
    key, xkey = jax.random.split(key)
    x = jax.random.normal(xkey, (N, IN_CH, H, W), jnp.float32)   # NCHW like PyTorch
    raw_params = init_params(key, IN_CH, NUM_BASIC)
    prepared = prepare_params(raw_params)                        # once, outside jit

    fwd = jax.jit(scalable_csp_resblock)
    out = jax.block_until_ready(fwd(x, prepared))
    ref = jax.block_until_ready(reference_forward(x, raw_params))

    assert out.shape == (N, IN_CH, H, W), out.shape
    max_err = float(jnp.abs(out - ref).max())
    # bf16 matmul inputs + bf16-stored inter-stage activations
    assert jnp.allclose(out, ref, rtol=2e-2, atol=2e-2), max_err

    print("KERNEL_OK")
</pallas_src>

<mosaic_0001>
module attributes {stable_mosaic.version = 11 : i64} {
  func.func @kernel(%arg0: i32, %arg1: i32, %arg2: memref<1x18x18x8xbf16, #tpu.memory_space<vmem>>, %arg3: memref<72x16xbf16, #tpu.memory_space<vmem>>, %arg4: memref<1x16xf32, #tpu.memory_space<vmem>>, %arg5: memref<1x16xf32, #tpu.memory_space<vmem>>, %arg6: memref<1x16xf32, #tpu.memory_space<vmem>>, %arg7: memref<16x16xbf16, #tpu.memory_space<vmem>>, %arg8: memref<1x16xf32, #tpu.memory_space<vmem>>, %arg9: memref<1x16xf32, #tpu.memory_space<vmem>>, %arg10: memref<1x16xf32, #tpu.memory_space<vmem>>, %arg11: memref<1x256x8xbf16, #tpu.memory_space<vmem>>, %arg12: memref<1x256x8xbf16, #tpu.memory_space<vmem>>) attributes {dimension_semantics = [#tpu.dimension_semantics<parallel>, #tpu.dimension_semantics<parallel>], iteration_bounds = array<i64: 2, 1>, scalar_prefetch = 0 : i64, scratch_operands = 0 : i64, tpu.core_type = #tpu.core_type<tc>, window_params = [{transform_indices = @transform_0, window_bounds = array<i64: 1, 18, 18, 8>}, {pipeline_mode = #tpu.pipeline_mode<synchronous>, transform_indices = @transform_1, window_bounds = array<i64: 72, 16>}, {pipeline_mode = #tpu.pipeline_mode<synchronous>, transform_indices = @transform_2, window_bounds = array<i64: 1, 16>}, {pipeline_mode = #tpu.pipeline_mode<synchronous>, transform_indices = @transform_3, window_bounds = array<i64: 1, 16>}, {pipeline_mode = #tpu.pipeline_mode<synchronous>, transform_indices = @transform_4, window_bounds = array<i64: 1, 16>}, {pipeline_mode = #tpu.pipeline_mode<synchronous>, transform_indices = @transform_5, window_bounds = array<i64: 16, 16>}, {pipeline_mode = #tpu.pipeline_mode<synchronous>, transform_indices = @transform_6, window_bounds = array<i64: 1, 16>}, {pipeline_mode = #tpu.pipeline_mode<synchronous>, transform_indices = @transform_7, window_bounds = array<i64: 1, 16>}, {pipeline_mode = #tpu.pipeline_mode<synchronous>, transform_indices = @transform_8, window_bounds = array<i64: 1, 16>}, {transform_indices = @transform_9, window_bounds = array<i64: 1, 256, 8>}, {transform_indices = @transform_10, window_bounds = array<i64: 1, 256, 8>}]} {
    %c16_i32 = arith.constant 16 : i32
    %0 = arith.muli %arg1, %c16_i32 : i32
    %1 = tpu.assume_multiple %0, 16 : i32
    %c0 = arith.constant 0 : index
    %2 = arith.index_cast %1 : i32 to index
    %c0_0 = arith.constant 0 : index
    %c0_1 = arith.constant 0 : index
    %3 = vector.load %arg2[%c0, %2, %c0_0, %c0_1] : memref<1x18x18x8xbf16, #tpu.memory_space<vmem>>, vector<1x18x18x8xbf16>
    %4 = vector.shape_cast %3 : vector<1x18x18x8xbf16> to vector<18x18x8xbf16>
    %5 = vector.extract_strided_slice %4 {offsets = [0, 0, 0], sizes = [16, 16, 8], strides = [1, 1, 1]} : vector<18x18x8xbf16> to vector<16x16x8xbf16>
    %6 = vector.shape_cast %5 : vector<16x16x8xbf16> to vector<256x8xbf16>
    %c0_2 = arith.constant 0 : index
    %c0_3 = arith.constant 0 : index
    %7 = vector.load %arg3[%c0_2, %c0_3] : memref<72x16xbf16, #tpu.memory_space<vmem>>, vector<8x16xbf16>
    %cst = arith.constant dense<0.000000e+00> : vector<256x16xf32>
    %8 = tpu.matmul %6, %7, %cst {dimension_numbers = #tpu.dot_dimension_numbers<[1], [0], [0], [1], [0, 0, 1, 1], [], []>} : vector<256x8xbf16>, vector<8x16xbf16>, vector<256x16xf32> -> vector<256x16xf32>
    %9 = vector.extract_strided_slice %4 {offsets = [0, 1, 0], sizes = [16, 16, 8], strides = [1, 1, 1]} : vector<18x18x8xbf16> to vector<16x16x8xbf16>
    %10 = vector.shape_cast %9 : vector<16x16x8xbf16> to vector<256x8xbf16>
    %c8 = arith.constant 8 : index
    %c0_4 = arith.constant 0 : index
    %11 = vector.load %arg3[%c8, %c0_4] : memref<72x16xbf16, #tpu.memory_space<vmem>>, vector<8x16xbf16>
    %cst_5 = arith.constant dense<0.000000e+00> : vector<256x16xf32>
    %12 = tpu.matmul %10, %11, %cst_5 {dimension_numbers = #tpu.dot_dimension_numbers<[1], [0], [0], [1], [0, 0, 1, 1], [], []>} : vector<256x8xbf16>, vector<8x16xbf16>, vector<256x16xf32> -> vector<256x16xf32>
    %13 = arith.addf %8, %12 : vector<256x16xf32>
    %14 = vector.extract_strided_slice %4 {offsets = [0, 2, 0], sizes = [16, 16, 8], strides = [1, 1, 1]} : vector<18x18x8xbf16> to vector<16x16x8xbf16>
    %15 = vector.shape_cast %14 : vector<16x16x8xbf16> to vector<256x8xbf16>
    %c16 = arith.constant 16 : index
    %c0_6 = arith.constant 0 : index
    %16 = vector.load %arg3[%c16, %c0_6] : memref<72x16xbf16, #tpu.memory_space<vmem>>, vector<8x16xbf16>
    %cst_7 = arith.constant dense<0.000000e+00> : vector<256x16xf32>
    %17 = tpu.matmul %15, %16, %cst_7 {dimension_numbers = #tpu.dot_dimension_numbers<[1], [0], [0], [1], [0, 0, 1, 1], [], []>} : vector<256x8xbf16>, vector<8x16xbf16>, vector<256x16xf32> -> vector<256x16xf32>
    %18 = arith.addf %13, %17 : vector<256x16xf32>
    %19 = vector.extract_strided_slice %4 {offsets = [1, 0, 0], sizes = [16, 16, 8], strides = [1, 1, 1]} : vector<18x18x8xbf16> to vector<16x16x8xbf16>
    %20 = vector.shape_cast %19 : vector<16x16x8xbf16> to vector<256x8xbf16>
    %c24 = arith.constant 24 : index
    %c0_8 = arith.constant 0 : index
    %21 = vector.load %arg3[%c24, %c0_8] : memref<72x16xbf16, #tpu.memory_space<vmem>>, vector<8x16xbf16>
    %cst_9 = arith.constant dense<0.000000e+00> : vector<256x16xf32>
    %22 = tpu.matmul %20, %21, %cst_9 {dimension_numbers = #tpu.dot_dimension_numbers<[1], [0], [0], [1], [0, 0, 1, 1], [], []>} : vector<256x8xbf16>, vector<8x16xbf16>, vector<256x16xf32> -> vector<256x16xf32>
    %23 = arith.addf %18, %22 : vector<256x16xf32>
    %24 = vector.extract_strided_slice %4 {offsets = [1, 1, 0], sizes = [16, 16, 8], strides = [1, 1, 1]} : vector<18x18x8xbf16> to vector<16x16x8xbf16>
    %25 = vector.shape_cast %24 : vector<16x16x8xbf16> to vector<256x8xbf16>
    %c32 = arith.constant 32 : index
    %c0_10 = arith.constant 0 : index
    %26 = vector.load %arg3[%c32, %c0_10] : memref<72x16xbf16, #tpu.memory_space<vmem>>, vector<8x16xbf16>
    %cst_11 = arith.constant dense<0.000000e+00> : vector<256x16xf32>
    %27 = tpu.matmul %25, %26, %cst_11 {dimension_numbers = #tpu.dot_dimension_numbers<[1], [0], [0], [1], [0, 0, 1, 1], [], []>} : vector<256x8xbf16>, vector<8x16xbf16>, vector<256x16xf32> -> vector<256x16xf32>
    %28 = arith.addf %23, %27 : vector<256x16xf32>
    %29 = vector.extract_strided_slice %4 {offsets = [1, 2, 0], sizes = [16, 16, 8], strides = [1, 1, 1]} : vector<18x18x8xbf16> to vector<16x16x8xbf16>
    %30 = vector.shape_cast %29 : vector<16x16x8xbf16> to vector<256x8xbf16>
    %c40 = arith.constant 40 : index
    %c0_12 = arith.constant 0 : index
    %31 = vector.load %arg3[%c40, %c0_12] : memref<72x16xbf16, #tpu.memory_space<vmem>>, vector<8x16xbf16>
    %cst_13 = arith.constant dense<0.000000e+00> : vector<256x16xf32>
    %32 = tpu.matmul %30, %31, %cst_13 {dimension_numbers = #tpu.dot_dimension_numbers<[1], [0], [0], [1], [0, 0, 1, 1], [], []>} : vector<256x8xbf16>, vector<8x16xbf16>, vector<256x16xf32> -> vector<256x16xf32>
    %33 = arith.addf %28, %32 : vector<256x16xf32>
    %34 = vector.extract_strided_slice %4 {offsets = [2, 0, 0], sizes = [16, 16, 8], strides = [1, 1, 1]} : vector<18x18x8xbf16> to vector<16x16x8xbf16>
    %35 = vector.shape_cast %34 : vector<16x16x8xbf16> to vector<256x8xbf16>
    %c48 = arith.constant 48 : index
    %c0_14 = arith.constant 0 : index
    %36 = vector.load %arg3[%c48, %c0_14] : memref<72x16xbf16, #tpu.memory_space<vmem>>, vector<8x16xbf16>
    %cst_15 = arith.constant dense<0.000000e+00> : vector<256x16xf32>
    %37 = tpu.matmul %35, %36, %cst_15 {dimension_numbers = #tpu.dot_dimension_numbers<[1], [0], [0], [1], [0, 0, 1, 1], [], []>} : vector<256x8xbf16>, vector<8x16xbf16>, vector<256x16xf32> -> vector<256x16xf32>
    %38 = arith.addf %33, %37 : vector<256x16xf32>
    %39 = vector.extract_strided_slice %4 {offsets = [2, 1, 0], sizes = [16, 16, 8], strides = [1, 1, 1]} : vector<18x18x8xbf16> to vector<16x16x8xbf16>
    %40 = vector.shape_cast %39 : vector<16x16x8xbf16> to vector<256x8xbf16>
    %c56 = arith.constant 56 : index
    %c0_16 = arith.constant 0 : index
    %41 = vector.load %arg3[%c56, %c0_16] : memref<72x16xbf16, #tpu.memory_space<vmem>>, vector<8x16xbf16>
    %cst_17 = arith.constant dense<0.000000e+00> : vector<256x16xf32>
    %42 = tpu.matmul %40, %41, %cst_17 {dimension_numbers = #tpu.dot_dimension_numbers<[1], [0], [0], [1], [0, 0, 1, 1], [], []>} : vector<256x8xbf16>, vector<8x16xbf16>, vector<256x16xf32> -> vector<256x16xf32>
    %43 = arith.addf %38, %42 : vector<256x16xf32>
    %44 = vector.extract_strided_slice %4 {offsets = [2, 2, 0], sizes = [16, 16, 8], strides = [1, 1, 1]} : vector<18x18x8xbf16> to vector<16x16x8xbf16>
    %45 = vector.shape_cast %44 : vector<16x16x8xbf16> to vector<256x8xbf16>
    %c64 = arith.constant 64 : index
    %c0_18 = arith.constant 0 : index
    %46 = vector.load %arg3[%c64, %c0_18] : memref<72x16xbf16, #tpu.memory_space<vmem>>, vector<8x16xbf16>
    %cst_19 = arith.constant dense<0.000000e+00> : vector<256x16xf32>
    %47 = tpu.matmul %45, %46, %cst_19 {dimension_numbers = #tpu.dot_dimension_numbers<[1], [0], [0], [1], [0, 0, 1, 1], [], []>} : vector<256x8xbf16>, vector<8x16xbf16>, vector<256x16xf32> -> vector<256x16xf32>
    %48 = arith.addf %43, %47 : vector<256x16xf32>
    %c0_20 = arith.constant 0 : index
    %c0_21 = arith.constant 0 : index
    %49 = vector.load %arg4[%c0_20, %c0_21] : memref<1x16xf32, #tpu.memory_space<vmem>>, vector<1x16xf32>
    %50 = vector.broadcast %49 : vector<1x16xf32> to vector<256x16xf32>
    %51 = arith.addf %48, %50 : vector<256x16xf32>
    %c0_22 = arith.constant 0 : index
    %c0_23 = arith.constant 0 : index
    %52 = vector.load %arg5[%c0_22, %c0_23] : memref<1x16xf32, #tpu.memory_space<vmem>>, vector<1x16xf32>
    %c0_24 = arith.constant 0 : index
    %c0_25 = arith.constant 0 : index
    %53 = vector.load %arg6[%c0_24, %c0_25] : memref<1x16xf32, #tpu.memory_space<vmem>>, vector<1x16xf32>
    %cst_26 = arith.constant dense<0.000000e+00> : vector<256xf32>
    %54 = vector.multi_reduction <add>, %51, %cst_26 [1] : vector<256x16xf32> to vector<256xf32>
    %55 = vector.shape_cast %54 : vector<256xf32> to vector<256x1xf32>
    %cst_27 = arith.constant 1.600000e+01 : f32
    %56 = vector.broadcast %cst_27 : f32 to vector<256x1xf32>
    %57 = arith.divf %55, %56 : vector<256x1xf32>
    %58 = arith.mulf %51, %51 : vector<256x16xf32>
    %cst_28 = arith.constant dense<0.000000e+00> : vector<256xf32>
    %59 = vector.multi_reduction <add>, %58, %cst_28 [1] : vector<256x16xf32> to vector<256xf32>
    %60 = vector.shape_cast %59 : vector<256xf32> to vector<256x1xf32>
    %cst_29 = arith.constant 1.600000e+01 : f32
    %61 = vector.broadcast %cst_29 : f32 to vector<256x1xf32>
    %62 = arith.divf %60, %61 : vector<256x1xf32>
    %63 = arith.mulf %57, %57 : vector<256x1xf32>
    %64 = arith.subf %62, %63 : vector<256x1xf32>
    %cst_30 = arith.constant 0.000000e+00 : f32
    %65 = vector.broadcast %cst_30 : f32 to vector<256x1xf32>
    %66 = arith.maximumf %64, %65 : vector<256x1xf32>
    %67 = vector.broadcast %57 : vector<256x1xf32> to vector<256x16xf32>
    %68 = arith.subf %51, %67 : vector<256x16xf32>
    %cst_31 = arith.constant 9.99999974E-6 : f32
    %69 = vector.broadcast %cst_31 : f32 to vector<256x1xf32>
    %70 = arith.addf %66, %69 : vector<256x1xf32>
    %71 = math.rsqrt %70 : vector<256x1xf32>
    %72 = vector.broadcast %71 : vector<256x1xf32> to vector<256x16xf32>
    %73 = arith.mulf %68, %72 : vector<256x16xf32>
    %74 = vector.broadcast %52 : vector<1x16xf32> to vector<256x16xf32>
    %75 = arith.mulf %73, %74 : vector<256x16xf32>
    %76 = vector.broadcast %53 : vector<1x16xf32> to vector<256x16xf32>
    %77 = arith.addf %75, %76 : vector<256x16xf32>
    %78 = arith.negf %77 : vector<256x16xf32>
    %79 = math.exp %78 : vector<256x16xf32>
    %cst_32 = arith.constant 1.000000e+00 : f32
    %80 = vector.broadcast %cst_32 : f32 to vector<256x16xf32>
    %81 = arith.addf %80, %79 : vector<256x16xf32>
    %82 = arith.divf %80, %81 : vector<256x16xf32>
    %83 = arith.mulf %77, %82 : vector<256x16xf32>
    %84 = arith.truncf %83 : vector<256x16xf32> to vector<256x16xbf16>
    %c0_33 = arith.constant 0 : index
    %c0_34 = arith.constant 0 : index
    %85 = vector.load %arg7[%c0_33, %c0_34] : memref<16x16xbf16, #tpu.memory_space<vmem>>, vector<16x16xbf16>
    %cst_35 = arith.constant dense<0.000000e+00> : vector<256x16xf32>
    %86 = tpu.matmul %84, %85, %cst_35 {dimension_numbers = #tpu.dot_dimension_numbers<[1], [0], [0], [1], [0, 0, 1, 1], [], []>} : vector<256x16xbf16>, vector<16x16xbf16>, vector<256x16xf32> -> vector<256x16xf32>
    %c0_36 = arith.constant 0 : index
    %c0_37 = arith.constant 0 : index
    %87 = vector.load %arg8[%c0_36, %c0_37] : memref<1x16xf32, #tpu.memory_space<vmem>>, vector<1x16xf32>
    %88 = vector.broadcast %87 : vector<1x16xf32> to vector<256x16xf32>
    %89 = arith.addf %86, %88 : vector<256x16xf32>
    %c0_38 = arith.constant 0 : index
    %c0_39 = arith.constant 0 : index
    %90 = vector.load %arg9[%c0_38, %c0_39] : memref<1x16xf32, #tpu.memory_space<vmem>>, vector<1x16xf32>
    %c0_40 = arith.constant 0 : index
    %c0_41 = arith.constant 0 : index
    %91 = vector.load %arg10[%c0_40, %c0_41] : memref<1x16xf32, #tpu.memory_space<vmem>>, vector<1x16xf32>
    %cst_42 = arith.constant dense<0.000000e+00> : vector<256xf32>
    %92 = vector.multi_reduction <add>, %89, %cst_42 [1] : vector<256x16xf32> to vector<256xf32>
    %93 = vector.shape_cast %92 : vector<256xf32> to vector<256x1xf32>
    %cst_43 = arith.constant 1.600000e+01 : f32
    %94 = vector.broadcast %cst_43 : f32 to vector<256x1xf32>
    %95 = arith.divf %93, %94 : vector<256x1xf32>
    %96 = arith.mulf %89, %89 : vector<256x16xf32>
    %cst_44 = arith.constant dense<0.000000e+00> : vector<256xf32>
    %97 = vector.multi_reduction <add>, %96, %cst_44 [1] : vector<256x16xf32> to vector<256xf32>
    %98 = vector.shape_cast %97 : vector<256xf32> to vector<256x1xf32>
    %cst_45 = arith.constant 1.600000e+01 : f32
    %99 = vector.broadcast %cst_45 : f32 to vector<256x1xf32>
    %100 = arith.divf %98, %99 : vector<256x1xf32>
    %101 = arith.mulf %95, %95 : vector<256x1xf32>
    %102 = arith.subf %100, %101 : vector<256x1xf32>
    %cst_46 = arith.constant 0.000000e+00 : f32
    %103 = vector.broadcast %cst_46 : f32 to vector<256x1xf32>
    %104 = arith.maximumf %102, %103 : vector<256x1xf32>
    %105 = vector.broadcast %95 : vector<256x1xf32> to vector<256x16xf32>
    %106 = arith.subf %89, %105 : vector<256x16xf32>
    %cst_47 = arith.constant 9.99999974E-6 : f32
    %107 = vector.broadcast %cst_47 : f32 to vector<256x1xf32>
    %108 = arith.addf %104, %107 : vector<256x1xf32>
    %109 = math.rsqrt %108 : vector<256x1xf32>
    %110 = vector.broadcast %109 : vector<256x1xf32> to vector<256x16xf32>
    %111 = arith.mulf %106, %110 : vector<256x16xf32>
    %112 = vector.broadcast %90 : vector<1x16xf32> to vector<256x16xf32>
    %113 = arith.mulf %111, %112 : vector<256x16xf32>
    %114 = vector.broadcast %91 : vector<1x16xf32> to vector<256x16xf32>
    %115 = arith.addf %113, %114 : vector<256x16xf32>
    %116 = arith.negf %115 : vector<256x16xf32>
    %117 = math.exp %116 : vector<256x16xf32>
    %cst_48 = arith.constant 1.000000e+00 : f32
    %118 = vector.broadcast %cst_48 : f32 to vector<256x16xf32>
    %119 = arith.addf %118, %117 : vector<256x16xf32>
    %120 = arith.divf %118, %119 : vector<256x16xf32>
    %121 = arith.mulf %115, %120 : vector<256x16xf32>
    %122 = vector.extract_strided_slice %121 {offsets = [0, 0], sizes = [256, 8], strides = [1, 1]} : vector<256x16xf32> to vector<256x8xf32>
    %123 = arith.truncf %122 : vector<256x8xf32> to vector<256x8xbf16>
    %c0_49 = arith.constant 0 : index
    %c0_50 = arith.constant 0 : index
    %c0_51 = arith.constant 0 : index
    %124 = vector.load %arg11[%c0_49, %c0_50, %c0_51] : memref<1x256x8xbf16, #tpu.memory_space<vmem>>, vector<1x256x8xbf16>
    %125 = vector.shape_cast %124 : vector<1x256x8xbf16> to vector<256x8xbf16>
    %126 = vector.shape_cast %123 : vector<256x8xbf16> to vector<1x256x8xbf16>
    tpu.vector_store %arg11[%c0_49, %c0_50, %c0_51], %126 {strides = array<i32>} : memref<1x256x8xbf16, #tpu.memory_space<vmem>>, vector<1x256x8xbf16>,
    %127 = vector.extract_strided_slice %121 {offsets = [0, 8], sizes = [256, 8], strides = [1, 1]} : vector<256x16xf32> to vector<256x8xf32>
    %128 = arith.truncf %127 : vector<256x8xf32> to vector<256x8xbf16>
    %c0_52 = arith.constant 0 : index
    %c0_53 = arith.constant 0 : index
    %c0_54 = arith.constant 0 : index
    %129 = vector.load %arg12[%c0_52, %c0_53, %c0_54] : memref<1x256x8xbf16, #tpu.memory_space<vmem>>, vector<1x256x8xbf16>
    %130 = vector.shape_cast %129 : vector<1x256x8xbf16> to vector<256x8xbf16>
    %131 = vector.shape_cast %128 : vector<256x8xbf16> to vector<1x256x8xbf16>
    tpu.vector_store %arg12[%c0_52, %c0_53, %c0_54], %131 {strides = array<i32>} : memref<1x256x8xbf16, #tpu.memory_space<vmem>>, vector<1x256x8xbf16>,
    return
  }
  func.func @transform_0(%arg0: i32, %arg1: i32) -> (i32, i32, i32, i32) {
    %c0_i32 = arith.constant 0 : i32
    %c0_i32_0 = arith.constant 0 : i32
    %c0_i32_1 = arith.constant 0 : i32
    %c0_i32_2 = arith.constant 0 : i32
    return %arg0, %c0_i32, %c0_i32_0, %c0_i32_1 : i32, i32, i32, i32
  }
  func.func @transform_1(%arg0: i32, %arg1: i32) -> (i32, i32) {
    %c0_i32 = arith.constant 0 : i32
    %c0_i32_0 = arith.constant 0 : i32
    %c0_i32_1 = arith.constant 0 : i32
    return %c0_i32, %c0_i32_0 : i32, i32
  }
  func.func @transform_2(%arg0: i32, %arg1: i32) -> (i32, i32) {
    %c0_i32 = arith.constant 0 : i32
    %c0_i32_0 = arith.constant 0 : i32
    %c0_i32_1 = arith.constant 0 : i32
    return %c0_i32, %c0_i32_0 : i32, i32
  }
  func.func @transform_3(%arg0: i32, %arg1: i32) -> (i32, i32) {
    %c0_i32 = arith.constant 0 : i32
    %c0_i32_0 = arith.constant 0 : i32
    %c0_i32_1 = arith.constant 0 : i32
    return %c0_i32, %c0_i32_0 : i32, i32
  }
  func.func @transform_4(%arg0: i32, %arg1: i32) -> (i32, i32) {
    %c0_i32 = arith.constant 0 : i32
    %c0_i32_0 = arith.constant 0 : i32
    %c0_i32_1 = arith.constant 0 : i32
    return %c0_i32, %c0_i32_0 : i32, i32
  }
  func.func @transform_5(%arg0: i32, %arg1: i32) -> (i32, i32) {
    %c0_i32 = arith.constant 0 : i32
    %c0_i32_0 = arith.constant 0 : i32
    %c0_i32_1 = arith.constant 0 : i32
    return %c0_i32, %c0_i32_0 : i32, i32
  }
  func.func @transform_6(%arg0: i32, %arg1: i32) -> (i32, i32) {
    %c0_i32 = arith.constant 0 : i32
    %c0_i32_0 = arith.constant 0 : i32
    %c0_i32_1 = arith.constant 0 : i32
    return %c0_i32, %c0_i32_0 : i32, i32
  }
  func.func @transform_7(%arg0: i32, %arg1: i32) -> (i32, i32) {
    %c0_i32 = arith.constant 0 : i32
    %c0_i32_0 = arith.constant 0 : i32
    %c0_i32_1 = arith.constant 0 : i32
    return %c0_i32, %c0_i32_0 : i32, i32
  }
  func.func @transform_8(%arg0: i32, %arg1: i32) -> (i32, i32) {
    %c0_i32 = arith.constant 0 : i32
    %c0_i32_0 = arith.constant 0 : i32
    %c0_i32_1 = arith.constant 0 : i32
    return %c0_i32, %c0_i32_0 : i32, i32
  }
  func.func @transform_9(%arg0: i32, %arg1: i32) -> (i32, i32, i32) {
    %c0_i32 = arith.constant 0 : i32
    %c0_i32_0 = arith.constant 0 : i32
    return %arg0, %arg1, %c0_i32 : i32, i32, i32
  }
  func.func @transform_10(%arg0: i32, %arg1: i32) -> (i32, i32, i32) {
    %c0_i32 = arith.constant 0 : i32
    %c0_i32_0 = arith.constant 0 : i32
    return %arg0, %arg1, %c0_i32 : i32, i32, i32
  }
}

module attributes {stable_mosaic.version = 11 : i64} {
  func.func @kernel(%arg0: i32, %arg1: i32, %arg2: memref<1x256x8xbf16, #tpu.memory_space<vmem>>, %arg3: memref<1x256x8xbf16, #tpu.memory_space<vmem>>, %arg4: memref<8x8xbf16, #tpu.memory_space<vmem>>, %arg5: memref<8x8xbf16, #tpu.memory_space<vmem>>, %arg6: memref<1x8xf32, #tpu.memory_space<vmem>>, %arg7: memref<1x256x8xf32, #tpu.memory_space<vmem>>) attributes {dimension_semantics = [#tpu.dimension_semantics<parallel>, #tpu.dimension_semantics<parallel>], iteration_bounds = array<i64: 2, 1>, scalar_prefetch = 0 : i64, scratch_operands = 0 : i64, tpu.core_type = #tpu.core_type<tc>, window_params = [{transform_indices = @transform_0, window_bounds = array<i64: 1, 256, 8>}, {transform_indices = @transform_1, window_bounds = array<i64: 1, 256, 8>}, {pipeline_mode = #tpu.pipeline_mode<synchronous>, transform_indices = @transform_2, window_bounds = array<i64: 8, 8>}, {pipeline_mode = #tpu.pipeline_mode<synchronous>, transform_indices = @transform_3, window_bounds = array<i64: 8, 8>}, {pipeline_mode = #tpu.pipeline_mode<synchronous>, transform_indices = @transform_4, window_bounds = array<i64: 1, 8>}, {transform_indices = @transform_5, window_bounds = array<i64: 1, 256, 8>}]} {
    %c0 = arith.constant 0 : index
    %c0_0 = arith.constant 0 : index
    %c0_1 = arith.constant 0 : index
    %0 = vector.load %arg2[%c0, %c0_0, %c0_1] : memref<1x256x8xbf16, #tpu.memory_space<vmem>>, vector<1x256x8xbf16>
    %1 = vector.shape_cast %0 : vector<1x256x8xbf16> to vector<256x8xbf16>
    %c0_2 = arith.constant 0 : index
    %c0_3 = arith.constant 0 : index
    %2 = vector.load %arg4[%c0_2, %c0_3] : memref<8x8xbf16, #tpu.memory_space<vmem>>, vector<8x8xbf16>
    %cst = arith.constant dense<0.000000e+00> : vector<256x8xf32>
    %3 = tpu.matmul %1, %2, %cst {dimension_numbers = #tpu.dot_dimension_numbers<[1], [0], [0], [1], [0, 0, 1, 1], [], []>} : vector<256x8xbf16>, vector<8x8xbf16>, vector<256x8xf32> -> vector<256x8xf32>
    %c0_4 = arith.constant 0 : index
    %c0_5 = arith.constant 0 : index
    %c0_6 = arith.constant 0 : index
    %4 = vector.load %arg3[%c0_4, %c0_5, %c0_6] : memref<1x256x8xbf16, #tpu.memory_space<vmem>>, vector<1x256x8xbf16>
    %5 = vector.shape_cast %4 : vector<1x256x8xbf16> to vector<256x8xbf16>
    %c0_7 = arith.constant 0 : index
    %c0_8 = arith.constant 0 : index
    %6 = vector.load %arg5[%c0_7, %c0_8] : memref<8x8xbf16, #tpu.memory_space<vmem>>, vector<8x8xbf16>
    %cst_9 = arith.constant dense<0.000000e+00> : vector<256x8xf32>
    %7 = tpu.matmul %5, %6, %cst_9 {dimension_numbers = #tpu.dot_dimension_numbers<[1], [0], [0], [1], [0, 0, 1, 1], [], []>} : vector<256x8xbf16>, vector<8x8xbf16>, vector<256x8xf32> -> vector<256x8xf32>
    %8 = arith.addf %3, %7 : vector<256x8xf32>
    %c0_10 = arith.constant 0 : index
    %c0_11 = arith.constant 0 : index
    %9 = vector.load %arg6[%c0_10, %c0_11] : memref<1x8xf32, #tpu.memory_space<vmem>>, vector<1x8xf32>
    %10 = vector.broadcast %9 : vector<1x8xf32> to vector<256x8xf32>
    %11 = arith.addf %8, %10 : vector<256x8xf32>
    %c0_12 = arith.constant 0 : index
    %c0_13 = arith.constant 0 : index
    %c0_14 = arith.constant 0 : index
    %12 = vector.load %arg7[%c0_12, %c0_13, %c0_14] : memref<1x256x8xf32, #tpu.memory_space<vmem>>, vector<1x256x8xf32>
    %13 = vector.shape_cast %12 : vector<1x256x8xf32> to vector<256x8xf32>
    %14 = vector.shape_cast %11 : vector<256x8xf32> to vector<1x256x8xf32>
    tpu.vector_store %arg7[%c0_12, %c0_13, %c0_14], %14 {strides = array<i32>} : memref<1x256x8xf32, #tpu.memory_space<vmem>>, vector<1x256x8xf32>,
    return
  }
  func.func @transform_0(%arg0: i32, %arg1: i32) -> (i32, i32, i32) {
    %c0_i32 = arith.constant 0 : i32
    %c0_i32_0 = arith.constant 0 : i32
    return %arg0, %arg1, %c0_i32 : i32, i32, i32
  }
  func.func @transform_1(%arg0: i32, %arg1: i32) -> (i32, i32, i32) {
    %c0_i32 = arith.constant 0 : i32
    %c0_i32_0 = arith.constant 0 : i32
    return %arg0, %arg1, %c0_i32 : i32, i32, i32
  }
  func.func @transform_2(%arg0: i32, %arg1: i32) -> (i32, i32) {
    %c0_i32 = arith.constant 0 : i32
    %c0_i32_0 = arith.constant 0 : i32
    %c0_i32_1 = arith.constant 0 : i32
    return %c0_i32, %c0_i32_0 : i32, i32
  }
  func.func @transform_3(%arg0: i32, %arg1: i32) -> (i32, i32) {
    %c0_i32 = arith.constant 0 : i32
    %c0_i32_0 = arith.constant 0 : i32
    %c0_i32_1 = arith.constant 0 : i32
    return %c0_i32, %c0_i32_0 : i32, i32
  }
  func.func @transform_4(%arg0: i32, %arg1: i32) -> (i32, i32) {
    %c0_i32 = arith.constant 0 : i32
    %c0_i32_0 = arith.constant 0 : i32
    %c0_i32_1 = arith.constant 0 : i32
    return %c0_i32, %c0_i32_0 : i32, i32
  }
  func.func @transform_5(%arg0: i32, %arg1: i32) -> (i32, i32, i32) {
    %c0_i32 = arith.constant 0 : i32
    %c0_i32_0 = arith.constant 0 : i32
    return %arg0, %arg1, %c0_i32 : i32, i32, i32
  }
}

module attributes {stable_mosaic.version = 11 : i64} {
  func.func @kernel(%arg0: i32, %arg1: i32, %arg2: memref<1x20x20x8xbf16, #tpu.memory_space<vmem>>, %arg3: memref<72x8xbf16, #tpu.memory_space<vmem>>, %arg4: memref<1x8xf32, #tpu.memory_space<vmem>>, %arg5: memref<1x8xf32, #tpu.memory_space<vmem>>, %arg6: memref<72x8xbf16, #tpu.memory_space<vmem>>, %arg7: memref<1x8xf32, #tpu.memory_space<vmem>>, %arg8: memref<1x8xf32, #tpu.memory_space<vmem>>, %arg9: memref<1x256x8xbf16, #tpu.memory_space<vmem>>) attributes {dimension_semantics = [#tpu.dimension_semantics<parallel>, #tpu.dimension_semantics<parallel>], iteration_bounds = array<i64: 2, 1>, scalar_prefetch = 0 : i64, scratch_operands = 0 : i64, tpu.core_type = #tpu.core_type<tc>, window_params = [{transform_indices = @transform_0, window_bounds = array<i64: 1, 20, 20, 8>}, {pipeline_mode = #tpu.pipeline_mode<synchronous>, transform_indices = @transform_1, window_bounds = array<i64: 72, 8>}, {pipeline_mode = #tpu.pipeline_mode<synchronous>, transform_indices = @transform_2, window_bounds = array<i64: 1, 8>}, {pipeline_mode = #tpu.pipeline_mode<synchronous>, transform_indices = @transform_3, window_bounds = array<i64: 1, 8>}, {pipeline_mode = #tpu.pipeline_mode<synchronous>, transform_indices = @transform_4, window_bounds = array<i64: 72, 8>}, {pipeline_mode = #tpu.pipeline_mode<synchronous>, transform_indices = @transform_5, window_bounds = array<i64: 1, 8>}, {pipeline_mode = #tpu.pipeline_mode<synchronous>, transform_indices = @transform_6, window_bounds = array<i64: 1, 8>}, {transform_indices = @transform_7, window_bounds = array<i64: 1, 256, 8>}]} {
    %c16_i32 = arith.constant 16 : i32
    %0 = arith.muli %arg1, %c16_i32 : i32
    %1 = tpu.assume_multiple %0, 16 : i32
    %c0 = arith.constant 0 : index
    %2 = arith.index_cast %1 : i32 to index
    %c0_0 = arith.constant 0 : index
    %c0_1 = arith.constant 0 : index
    %3 = vector.load %arg2[%c0, %2, %c0_0, %c0_1] : memref<1x20x20x8xbf16, #tpu.memory_space<vmem>>, vector<1x20x20x8xbf16>
    %4 = vector.shape_cast %3 : vector<1x20x20x8xbf16> to vector<20x20x8xbf16>
    %5 = vector.extract_strided_slice %4 {offsets = [0, 1, 0], sizes = [18, 16, 8], strides = [1, 1, 1]} : vector<20x20x8xbf16> to vector<18x16x8xbf16>
    %6 = vector.shape_cast %5 : vector<18x16x8xbf16> to vector<288x8xbf16>
    %c0_2 = arith.constant 0 : index
    %c0_3 = arith.constant 0 : index
    %7 = vector.load %arg3[%c0_2, %c0_3] : memref<72x8xbf16, #tpu.memory_space<vmem>>, vector<8x8xbf16>
    %cst = arith.constant dense<0.000000e+00> : vector<288x8xf32>
    %8 = tpu.matmul %6, %7, %cst {dimension_numbers = #tpu.dot_dimension_numbers<[1], [0], [0], [1], [0, 0, 1, 1], [], []>} : vector<288x8xbf16>, vector<8x8xbf16>, vector<288x8xf32> -> vector<288x8xf32>
    %9 = vector.extract_strided_slice %4 {offsets = [0, 2, 0], sizes = [18, 16, 8], strides = [1, 1, 1]} : vector<20x20x8xbf16> to vector<18x16x8xbf16>
    %10 = vector.shape_cast %9 : vector<18x16x8xbf16> to vector<288x8xbf16>
    %c8 = arith.constant 8 : index
    %c0_4 = arith.constant 0 : index
    %11 = vector.load %arg3[%c8, %c0_4] : memref<72x8xbf16, #tpu.memory_space<vmem>>, vector<8x8xbf16>
    %cst_5 = arith.constant dense<0.000000e+00> : vector<288x8xf32>
    %12 = tpu.matmul %10, %11, %cst_5 {dimension_numbers = #tpu.dot_dimension_numbers<[1], [0], [0], [1], [0, 0, 1, 1], [], []>} : vector<288x8xbf16>, vector<8x8xbf16>, vector<288x8xf32> -> vector<288x8xf32>
    %13 = arith.addf %8, %12 : vector<288x8xf32>
    %14 = vector.extract_strided_slice %4 {offsets = [0, 3, 0], sizes = [18, 16, 8], strides = [1, 1, 1]} : vector<20x20x8xbf16> to vector<18x16x8xbf16>
    %15 = vector.shape_cast %14 : vector<18x16x8xbf16> to vector<288x8xbf16>
    %c16 = arith.constant 16 : index
    %c0_6 = arith.constant 0 : index
    %16 = vector.load %arg3[%c16, %c0_6] : memref<72x8xbf16, #tpu.memory_space<vmem>>, vector<8x8xbf16>
    %cst_7 = arith.constant dense<0.000000e+00> : vector<288x8xf32>
    %17 = tpu.matmul %15, %16, %cst_7 {dimension_numbers = #tpu.dot_dimension_numbers<[1], [0], [0], [1], [0, 0, 1, 1], [], []>} : vector<288x8xbf16>, vector<8x8xbf16>, vector<288x8xf32> -> vector<288x8xf32>
    %18 = arith.addf %13, %17 : vector<288x8xf32>
    %19 = vector.extract_strided_slice %4 {offsets = [1, 1, 0], sizes = [18, 16, 8], strides = [1, 1, 1]} : vector<20x20x8xbf16> to vector<18x16x8xbf16>
    %20 = vector.shape_cast %19 : vector<18x16x8xbf16> to vector<288x8xbf16>
    %c24 = arith.constant 24 : index
    %c0_8 = arith.constant 0 : index
    %21 = vector.load %arg3[%c24, %c0_8] : memref<72x8xbf16, #tpu.memory_space<vmem>>, vector<8x8xbf16>
    %cst_9 = arith.constant dense<0.000000e+00> : vector<288x8xf32>
    %22 = tpu.matmul %20, %21, %cst_9 {dimension_numbers = #tpu.dot_dimension_numbers<[1], [0], [0], [1], [0, 0, 1, 1], [], []>} : vector<288x8xbf16>, vector<8x8xbf16>, vector<288x8xf32> -> vector<288x8xf32>
    %23 = arith.addf %18, %22 : vector<288x8xf32>
    %24 = vector.extract_strided_slice %4 {offsets = [1, 2, 0], sizes = [18, 16, 8], strides = [1, 1, 1]} : vector<20x20x8xbf16> to vector<18x16x8xbf16>
    %25 = vector.shape_cast %24 : vector<18x16x8xbf16> to vector<288x8xbf16>
    %c32 = arith.constant 32 : index
    %c0_10 = arith.constant 0 : index
    %26 = vector.load %arg3[%c32, %c0_10] : memref<72x8xbf16, #tpu.memory_space<vmem>>, vector<8x8xbf16>
    %cst_11 = arith.constant dense<0.000000e+00> : vector<288x8xf32>
    %27 = tpu.matmul %25, %26, %cst_11 {dimension_numbers = #tpu.dot_dimension_numbers<[1], [0], [0], [1], [0, 0, 1, 1], [], []>} : vector<288x8xbf16>, vector<8x8xbf16>, vector<288x8xf32> -> vector<288x8xf32>
    %28 = arith.addf %23, %27 : vector<288x8xf32>
    %29 = vector.extract_strided_slice %4 {offsets = [1, 3, 0], sizes = [18, 16, 8], strides = [1, 1, 1]} : vector<20x20x8xbf16> to vector<18x16x8xbf16>
    %30 = vector.shape_cast %29 : vector<18x16x8xbf16> to vector<288x8xbf16>
    %c40 = arith.constant 40 : index
    %c0_12 = arith.constant 0 : index
    %31 = vector.load %arg3[%c40, %c0_12] : memref<72x8xbf16, #tpu.memory_space<vmem>>, vector<8x8xbf16>
    %cst_13 = arith.constant dense<0.000000e+00> : vector<288x8xf32>
    %32 = tpu.matmul %30, %31, %cst_13 {dimension_numbers = #tpu.dot_dimension_numbers<[1], [0], [0], [1], [0, 0, 1, 1], [], []>} : vector<288x8xbf16>, vector<8x8xbf16>, vector<288x8xf32> -> vector<288x8xf32>
    %33 = arith.addf %28, %32 : vector<288x8xf32>
    %34 = vector.extract_strided_slice %4 {offsets = [2, 1, 0], sizes = [18, 16, 8], strides = [1, 1, 1]} : vector<20x20x8xbf16> to vector<18x16x8xbf16>
    %35 = vector.shape_cast %34 : vector<18x16x8xbf16> to vector<288x8xbf16>
    %c48 = arith.constant 48 : index
    %c0_14 = arith.constant 0 : index
    %36 = vector.load %arg3[%c48, %c0_14] : memref<72x8xbf16, #tpu.memory_space<vmem>>, vector<8x8xbf16>
    %cst_15 = arith.constant dense<0.000000e+00> : vector<288x8xf32>
    %37 = tpu.matmul %35, %36, %cst_15 {dimension_numbers = #tpu.dot_dimension_numbers<[1], [0], [0], [1], [0, 0, 1, 1], [], []>} : vector<288x8xbf16>, vector<8x8xbf16>, vector<288x8xf32> -> vector<288x8xf32>
    %38 = arith.addf %33, %37 : vector<288x8xf32>
    %39 = vector.extract_strided_slice %4 {offsets = [2, 2, 0], sizes = [18, 16, 8], strides = [1, 1, 1]} : vector<20x20x8xbf16> to vector<18x16x8xbf16>
    %40 = vector.shape_cast %39 : vector<18x16x8xbf16> to vector<288x8xbf16>
    %c56 = arith.constant 56 : index
    %c0_16 = arith.constant 0 : index
    %41 = vector.load %arg3[%c56, %c0_16] : memref<72x8xbf16, #tpu.memory_space<vmem>>, vector<8x8xbf16>
    %cst_17 = arith.constant dense<0.000000e+00> : vector<288x8xf32>
    %42 = tpu.matmul %40, %41, %cst_17 {dimension_numbers = #tpu.dot_dimension_numbers<[1], [0], [0], [1], [0, 0, 1, 1], [], []>} : vector<288x8xbf16>, vector<8x8xbf16>, vector<288x8xf32> -> vector<288x8xf32>
    %43 = arith.addf %38, %42 : vector<288x8xf32>
    %44 = vector.extract_strided_slice %4 {offsets = [2, 3, 0], sizes = [18, 16, 8], strides = [1, 1, 1]} : vector<20x20x8xbf16> to vector<18x16x8xbf16>
    %45 = vector.shape_cast %44 : vector<18x16x8xbf16> to vector<288x8xbf16>
    %c64 = arith.constant 64 : index
    %c0_18 = arith.constant 0 : index
    %46 = vector.load %arg3[%c64, %c0_18] : memref<72x8xbf16, #tpu.memory_space<vmem>>, vector<8x8xbf16>
    %cst_19 = arith.constant dense<0.000000e+00> : vector<288x8xf32>
    %47 = tpu.matmul %45, %46, %cst_19 {dimension_numbers = #tpu.dot_dimension_numbers<[1], [0], [0], [1], [0, 0, 1, 1], [], []>} : vector<288x8xbf16>, vector<8x8xbf16>, vector<288x8xf32> -> vector<288x8xf32>
    %48 = arith.addf %43, %47 : vector<288x8xf32>
    %c0_20 = arith.constant 0 : index
    %c0_21 = arith.constant 0 : index
    %49 = vector.load %arg4[%c0_20, %c0_21] : memref<1x8xf32, #tpu.memory_space<vmem>>, vector<1x8xf32>
    %c0_22 = arith.constant 0 : index
    %c0_23 = arith.constant 0 : index
    %50 = vector.load %arg5[%c0_22, %c0_23] : memref<1x8xf32, #tpu.memory_space<vmem>>, vector<1x8xf32>
    %cst_24 = arith.constant dense<0.000000e+00> : vector<288xf32>
    %51 = vector.multi_reduction <add>, %48, %cst_24 [1] : vector<288x8xf32> to vector<288xf32>
    %52 = vector.shape_cast %51 : vector<288xf32> to vector<288x1xf32>
    %cst_25 = arith.constant 8.000000e+00 : f32
    %53 = vector.broadcast %cst_25 : f32 to vector<288x1xf32>
    %54 = arith.divf %52, %53 : vector<288x1xf32>
    %55 = arith.mulf %48, %48 : vector<288x8xf32>
    %cst_26 = arith.constant dense<0.000000e+00> : vector<288xf32>
    %56 = vector.multi_reduction <add>, %55, %cst_26 [1] : vector<288x8xf32> to vector<288xf32>
    %57 = vector.shape_cast %56 : vector<288xf32> to vector<288x1xf32>
    %cst_27 = arith.constant 8.000000e+00 : f32
    %58 = vector.broadcast %cst_27 : f32 to vector<288x1xf32>
    %59 = arith.divf %57, %58 : vector<288x1xf32>
    %60 = arith.mulf %54, %54 : vector<288x1xf32>
    %61 = arith.subf %59, %60 : vector<288x1xf32>
    %cst_28 = arith.constant 0.000000e+00 : f32
    %62 = vector.broadcast %cst_28 : f32 to vector<288x1xf32>
    %63 = arith.maximumf %61, %62 : vector<288x1xf32>
    %64 = vector.broadcast %54 : vector<288x1xf32> to vector<288x8xf32>
    %65 = arith.subf %48, %64 : vector<288x8xf32>
    %cst_29 = arith.constant 9.99999974E-6 : f32
    %66 = vector.broadcast %cst_29 : f32 to vector<288x1xf32>
    %67 = arith.addf %63, %66 : vector<288x1xf32>
    %68 = math.rsqrt %67 : vector<288x1xf32>
    %69 = vector.broadcast %68 : vector<288x1xf32> to vector<288x8xf32>
    %70 = arith.mulf %65, %69 : vector<288x8xf32>
    %71 = vector.broadcast %49 : vector<1x8xf32> to vector<288x8xf32>
    %72 = arith.mulf %70, %71 : vector<288x8xf32>
    %73 = vector.broadcast %50 : vector<1x8xf32> to vector<288x8xf32>
    %74 = arith.addf %72, %73 : vector<288x8xf32>
    %75 = arith.negf %74 : vector<288x8xf32>
    %76 = math.exp %75 : vector<288x8xf32>
    %cst_30 = arith.constant 1.000000e+00 : f32
    %77 = vector.broadcast %cst_30 : f32 to vector<288x8xf32>
    %78 = arith.addf %77, %76 : vector<288x8xf32>
    %79 = arith.divf %77, %78 : vector<288x8xf32>
    %80 = arith.mulf %74, %79 : vector<288x8xf32>
    %81 = vector.shape_cast %80 : vector<288x8xf32> to vector<18x16x8xf32>
    %82 = tpu.iota {dimensions = array<i32: 0>} : vector<18x1xi32>
    %c1_i32 = arith.constant 1 : i32
    %83 = arith.subi %1, %c1_i32 : i32
    %84 = vector.broadcast %83 : i32 to vector<18x1xi32>
    %85 = arith.addi %82, %84 : vector<18x1xi32>
    %c0_i32 = arith.constant 0 : i32
    %86 = vector.broadcast %c0_i32 : i32 to vector<18x1xi32>
    %87 = arith.cmpi sge, %85, %86 : vector<18x1xi32>
    %c16_i32_31 = arith.constant 16 : i32
    %88 = vector.broadcast %c16_i32_31 : i32 to vector<18x1xi32>
    %89 = arith.cmpi slt, %85, %88 : vector<18x1xi32>
    %90 = arith.andi %87, %89 : vector<18x1xi1>
    %91 = vector.shape_cast %90 : vector<18x1xi1> to vector<18x1x1xi1>
    %cst_32 = arith.constant 0.000000e+00 : f32
    %92 = vector.shape_cast %91 : vector<18x1x1xi1> to vector<18x1x1xi1>
    %93 = vector.broadcast %92 : vector<18x1x1xi1> to vector<18x16x8xi1>
    %94 = vector.broadcast %cst_32 : f32 to vector<18x16x8xf32>
    %95 = arith.select %93, %81, %94 : vector<18x16x8xi1>, vector<18x16x8xf32>
    %96 = arith.truncf %95 : vector<18x16x8xf32> to vector<18x16x8xbf16>
    %cst_33 = arith.constant 0.000000e+00 : bf16
    %97 = vector.broadcast %cst_33 : bf16 to vector<18x1x8xbf16>
    %98 = tpu.concatenate %97, %96, %97 in 1 : vector<18x1x8xbf16>, vector<18x16x8xbf16>, vector<18x1x8xbf16> -> vector<18x18x8xbf16>
    %99 = vector.extract_strided_slice %98 {offsets = [0, 0, 0], sizes = [16, 16, 8], strides = [1, 1, 1]} : vector<18x18x8xbf16> to vector<16x16x8xbf16>
    %100 = vector.shape_cast %99 : vector<16x16x8xbf16> to vector<256x8xbf16>
    %c0_34 = arith.constant 0 : index
    %c0_35 = arith.constant 0 : index
    %101 = vector.load %arg6[%c0_34, %c0_35] : memref<72x8xbf16, #tpu.memory_space<vmem>>, vector<8x8xbf16>
    %cst_36 = arith.constant dense<0.000000e+00> : vector<256x8xf32>
    %102 = tpu.matmul %100, %101, %cst_36 {dimension_numbers = #tpu.dot_dimension_numbers<[1], [0], [0], [1], [0, 0, 1, 1], [], []>} : vector<256x8xbf16>, vector<8x8xbf16>, vector<256x8xf32> -> vector<256x8xf32>
    %103 = vector.extract_strided_slice %98 {offsets = [0, 1, 0], sizes = [16, 16, 8], strides = [1, 1, 1]} : vector<18x18x8xbf16> to vector<16x16x8xbf16>
    %104 = vector.shape_cast %103 : vector<16x16x8xbf16> to vector<256x8xbf16>
    %c8_37 = arith.constant 8 : index
    %c0_38 = arith.constant 0 : index
    %105 = vector.load %arg6[%c8_37, %c0_38] : memref<72x8xbf16, #tpu.memory_space<vmem>>, vector<8x8xbf16>
    %cst_39 = arith.constant dense<0.000000e+00> : vector<256x8xf32>
    %106 = tpu.matmul %104, %105, %cst_39 {dimension_numbers = #tpu.dot_dimension_numbers<[1], [0], [0], [1], [0, 0, 1, 1], [], []>} : vector<256x8xbf16>, vector<8x8xbf16>, vector<256x8xf32> -> vector<256x8xf32>
    %107 = arith.addf %102, %106 : vector<256x8xf32>
    %108 = vector.extract_strided_slice %98 {offsets = [0, 2, 0], sizes = [16, 16, 8], strides = [1, 1, 1]} : vector<18x18x8xbf16> to vector<16x16x8xbf16>
    %109 = vector.shape_cast %108 : vector<16x16x8xbf16> to vector<256x8xbf16>
    %c16_40 = arith.constant 16 : index
    %c0_41 = arith.constant 0 : index
    %110 = vector.load %arg6[%c16_40, %c0_41] : memref<72x8xbf16, #tpu.memory_space<vmem>>, vector<8x8xbf16>
    %cst_42 = arith.constant dense<0.000000e+00> : vector<256x8xf32>
    %111 = tpu.matmul %109, %110, %cst_42 {dimension_numbers = #tpu.dot_dimension_numbers<[1], [0], [0], [1], [0, 0, 1, 1], [], []>} : vector<256x8xbf16>, vector<8x8xbf16>, vector<256x8xf32> -> vector<256x8xf32>
    %112 = arith.addf %107, %111 : vector<256x8xf32>
    %113 = vector.extract_strided_slice %98 {offsets = [1, 0, 0], sizes = [16, 16, 8], strides = [1, 1, 1]} : vector<18x18x8xbf16> to vector<16x16x8xbf16>
    %114 = vector.shape_cast %113 : vector<16x16x8xbf16> to vector<256x8xbf16>
    %c24_43 = arith.constant 24 : index
    %c0_44 = arith.constant 0 : index
    %115 = vector.load %arg6[%c24_43, %c0_44] : memref<72x8xbf16, #tpu.memory_space<vmem>>, vector<8x8xbf16>
    %cst_45 = arith.constant dense<0.000000e+00> : vector<256x8xf32>
    %116 = tpu.matmul %114, %115, %cst_45 {dimension_numbers = #tpu.dot_dimension_numbers<[1], [0], [0], [1], [0, 0, 1, 1], [], []>} : vector<256x8xbf16>, vector<8x8xbf16>, vector<256x8xf32> -> vector<256x8xf32>
    %117 = arith.addf %112, %116 : vector<256x8xf32>
    %118 = vector.extract_strided_slice %98 {offsets = [1, 1, 0], sizes = [16, 16, 8], strides = [1, 1, 1]} : vector<18x18x8xbf16> to vector<16x16x8xbf16>
    %119 = vector.shape_cast %118 : vector<16x16x8xbf16> to vector<256x8xbf16>
    %c32_46 = arith.constant 32 : index
    %c0_47 = arith.constant 0 : index
    %120 = vector.load %arg6[%c32_46, %c0_47] : memref<72x8xbf16, #tpu.memory_space<vmem>>, vector<8x8xbf16>
    %cst_48 = arith.constant dense<0.000000e+00> : vector<256x8xf32>
    %121 = tpu.matmul %119, %120, %cst_48 {dimension_numbers = #tpu.dot_dimension_numbers<[1], [0], [0], [1], [0, 0, 1, 1], [], []>} : vector<256x8xbf16>, vector<8x8xbf16>, vector<256x8xf32> -> vector<256x8xf32>
    %122 = arith.addf %117, %121 : vector<256x8xf32>
    %123 = vector.extract_strided_slice %98 {offsets = [1, 2, 0], sizes = [16, 16, 8], strides = [1, 1, 1]} : vector<18x18x8xbf16> to vector<16x16x8xbf16>
    %124 = vector.shape_cast %123 : vector<16x16x8xbf16> to vector<256x8xbf16>
    %c40_49 = arith.constant 40 : index
    %c0_50 = arith.constant 0 : index
    %125 = vector.load %arg6[%c40_49, %c0_50] : memref<72x8xbf16, #tpu.memory_space<vmem>>, vector<8x8xbf16>
    %cst_51 = arith.constant dense<0.000000e+00> : vector<256x8xf32>
    %126 = tpu.matmul %124, %125, %cst_51 {dimension_numbers = #tpu.dot_dimension_numbers<[1], [0], [0], [1], [0, 0, 1, 1], [], []>} : vector<256x8xbf16>, vector<8x8xbf16>, vector<256x8xf32> -> vector<256x8xf32>
    %127 = arith.addf %122, %126 : vector<256x8xf32>
    %128 = vector.extract_strided_slice %98 {offsets = [2, 0, 0], sizes = [16, 16, 8], strides = [1, 1, 1]} : vector<18x18x8xbf16> to vector<16x16x8xbf16>
    %129 = vector.shape_cast %128 : vector<16x16x8xbf16> to vector<256x8xbf16>
    %c48_52 = arith.constant 48 : index
    %c0_53 = arith.constant 0 : index
    %130 = vector.load %arg6[%c48_52, %c0_53] : memref<72x8xbf16, #tpu.memory_space<vmem>>, vector<8x8xbf16>
    %cst_54 = arith.constant dense<0.000000e+00> : vector<256x8xf32>
    %131 = tpu.matmul %129, %130, %cst_54 {dimension_numbers = #tpu.dot_dimension_numbers<[1], [0], [0], [1], [0, 0, 1, 1], [], []>} : vector<256x8xbf16>, vector<8x8xbf16>, vector<256x8xf32> -> vector<256x8xf32>
    %132 = arith.addf %127, %131 : vector<256x8xf32>
    %133 = vector.extract_strided_slice %98 {offsets = [2, 1, 0], sizes = [16, 16, 8], strides = [1, 1, 1]} : vector<18x18x8xbf16> to vector<16x16x8xbf16>
    %134 = vector.shape_cast %133 : vector<16x16x8xbf16> to vector<256x8xbf16>
    %c56_55 = arith.constant 56 : index
    %c0_56 = arith.constant 0 : index
    %135 = vector.load %arg6[%c56_55, %c0_56] : memref<72x8xbf16, #tpu.memory_space<vmem>>, vector<8x8xbf16>
    %cst_57 = arith.constant dense<0.000000e+00> : vector<256x8xf32>
    %136 = tpu.matmul %134, %135, %cst_57 {dimension_numbers = #tpu.dot_dimension_numbers<[1], [0], [0], [1], [0, 0, 1, 1], [], []>} : vector<256x8xbf16>, vector<8x8xbf16>, vector<256x8xf32> -> vector<256x8xf32>
    %137 = arith.addf %132, %136 : vector<256x8xf32>
    %138 = vector.extract_strided_slice %98 {offsets = [2, 2, 0], sizes = [16, 16, 8], strides = [1, 1, 1]} : vector<18x18x8xbf16> to vector<16x16x8xbf16>
    %139 = vector.shape_cast %138 : vector<16x16x8xbf16> to vector<256x8xbf16>
    %c64_58 = arith.constant 64 : index
    %c0_59 = arith.constant 0 : index
    %140 = vector.load %arg6[%c64_58, %c0_59] : memref<72x8xbf16, #tpu.memory_space<vmem>>, vector<8x8xbf16>
    %cst_60 = arith.constant dense<0.000000e+00> : vector<256x8xf32>
    %141 = tpu.matmul %139, %140, %cst_60 {dimension_numbers = #tpu.dot_dimension_numbers<[1], [0], [0], [1], [0, 0, 1, 1], [], []>} : vector<256x8xbf16>, vector<8x8xbf16>, vector<256x8xf32> -> vector<256x8xf32>
    %142 = arith.addf %137, %141 : vector<256x8xf32>
    %c0_61 = arith.constant 0 : index
    %c0_62 = arith.constant 0 : index
    %143 = vector.load %arg7[%c0_61, %c0_62] : memref<1x8xf32, #tpu.memory_space<vmem>>, vector<1x8xf32>
    %c0_63 = arith.constant 0 : index
    %c0_64 = arith.constant 0 : index
    %144 = vector.load %arg8[%c0_63, %c0_64] : memref<1x8xf32, #tpu.memory_space<vmem>>, vector<1x8xf32>
    %cst_65 = arith.constant dense<0.000000e+00> : vector<256xf32>
    %145 = vector.multi_reduction <add>, %142, %cst_65 [1] : vector<256x8xf32> to vector<256xf32>
    %146 = vector.shape_cast %145 : vector<256xf32> to vector<256x1xf32>
    %cst_66 = arith.constant 8.000000e+00 : f32
    %147 = vector.broadcast %cst_66 : f32 to vector<256x1xf32>
    %148 = arith.divf %146, %147 : vector<256x1xf32>
    %149 = arith.mulf %142, %142 : vector<256x8xf32>
    %cst_67 = arith.constant dense<0.000000e+00> : vector<256xf32>
    %150 = vector.multi_reduction <add>, %149, %cst_67 [1] : vector<256x8xf32> to vector<256xf32>
    %151 = vector.shape_cast %150 : vector<256xf32> to vector<256x1xf32>
    %cst_68 = arith.constant 8.000000e+00 : f32
    %152 = vector.broadcast %cst_68 : f32 to vector<256x1xf32>
    %153 = arith.divf %151, %152 : vector<256x1xf32>
    %154 = arith.mulf %148, %148 : vector<256x1xf32>
    %155 = arith.subf %153, %154 : vector<256x1xf32>
    %cst_69 = arith.constant 0.000000e+00 : f32
    %156 = vector.broadcast %cst_69 : f32 to vector<256x1xf32>
    %157 = arith.maximumf %155, %156 : vector<256x1xf32>
    %158 = vector.broadcast %148 : vector<256x1xf32> to vector<256x8xf32>
    %159 = arith.subf %142, %158 : vector<256x8xf32>
    %cst_70 = arith.constant 9.99999974E-6 : f32
    %160 = vector.broadcast %cst_70 : f32 to vector<256x1xf32>
    %161 = arith.addf %157, %160 : vector<256x1xf32>
    %162 = math.rsqrt %161 : vector<256x1xf32>
    %163 = vector.broadcast %162 : vector<256x1xf32> to vector<256x8xf32>
    %164 = arith.mulf %159, %163 : vector<256x8xf32>
    %165 = vector.broadcast %143 : vector<1x8xf32> to vector<256x8xf32>
    %166 = arith.mulf %164, %165 : vector<256x8xf32>
    %167 = vector.broadcast %144 : vector<1x8xf32> to vector<256x8xf32>
    %168 = arith.addf %166, %167 : vector<256x8xf32>
    %169 = vector.extract_strided_slice %4 {offsets = [2, 2, 0], sizes = [16, 16, 8], strides = [1, 1, 1]} : vector<20x20x8xbf16> to vector<16x16x8xbf16>
    %170 = vector.shape_cast %169 : vector<16x16x8xbf16> to vector<256x8xbf16>
    %171 = arith.extf %170 : vector<256x8xbf16> to vector<256x8xf32>
    %172 = arith.addf %171, %168 : vector<256x8xf32>
    %173 = arith.negf %172 : vector<256x8xf32>
    %174 = math.exp %173 : vector<256x8xf32>
    %cst_71 = arith.constant 1.000000e+00 : f32
    %175 = vector.broadcast %cst_71 : f32 to vector<256x8xf32>
    %176 = arith.addf %175, %174 : vector<256x8xf32>
    %177 = arith.divf %175, %176 : vector<256x8xf32>
    %178 = arith.mulf %172, %177 : vector<256x8xf32>
    %179 = arith.truncf %178 : vector<256x8xf32> to vector<256x8xbf16>
    %c0_72 = arith.constant 0 : index
    %c0_73 = arith.constant 0 : index
    %c0_74 = arith.constant 0 : index
    %180 = vector.load %arg9[%c0_72, %c0_73, %c0_74] : memref<1x256x8xbf16, #tpu.memory_space<vmem>>, vector<1x256x8xbf16>
    %181 = vector.shape_cast %180 : vector<1x256x8xbf16> to vector<256x8xbf16>
    %182 = vector.shape_cast %179 : vector<256x8xbf16> to vector<1x256x8xbf16>
    tpu.vector_store %arg9[%c0_72, %c0_73, %c0_74], %182 {strides = array<i32>} : memref<1x256x8xbf16, #tpu.memory_space<vmem>>, vector<1x256x8xbf16>,
    return
  }
  func.func @transform_0(%arg0: i32, %arg1: i32) -> (i32, i32, i32, i32) {
    %c0_i32 = arith.constant 0 : i32
    %c0_i32_0 = arith.constant 0 : i32
    %c0_i32_1 = arith.constant 0 : i32
    %c0_i32_2 = arith.constant 0 : i32
    return %arg0, %c0_i32, %c0_i32_0, %c0_i32_1 : i32, i32, i32, i32
  }
  func.func @transform_1(%arg0: i32, %arg1: i32) -> (i32, i32) {
    %c0_i32 = arith.constant 0 : i32
    %c0_i32_0 = arith.constant 0 : i32
    %c0_i32_1 = arith.constant 0 : i32
    return %c0_i32, %c0_i32_0 : i32, i32
  }
  func.func @transform_2(%arg0: i32, %arg1: i32) -> (i32, i32) {
    %c0_i32 = arith.constant 0 : i32
    %c0_i32_0 = arith.constant 0 : i32
    %c0_i32_1 = arith.constant 0 : i32
    return %c0_i32, %c0_i32_0 : i32, i32
  }
  func.func @transform_3(%arg0: i32, %arg1: i32) -> (i32, i32) {
    %c0_i32 = arith.constant 0 : i32
    %c0_i32_0 = arith.constant 0 : i32
    %c0_i32_1 = arith.constant 0 : i32
    return %c0_i32, %c0_i32_0 : i32, i32
  }
  func.func @transform_4(%arg0: i32, %arg1: i32) -> (i32, i32) {
    %c0_i32 = arith.constant 0 : i32
    %c0_i32_0 = arith.constant 0 : i32
    %c0_i32_1 = arith.constant 0 : i32
    return %c0_i32, %c0_i32_0 : i32, i32
  }
  func.func @transform_5(%arg0: i32, %arg1: i32) -> (i32, i32) {
    %c0_i32 = arith.constant 0 : i32
    %c0_i32_0 = arith.constant 0 : i32
    %c0_i32_1 = arith.constant 0 : i32
    return %c0_i32, %c0_i32_0 : i32, i32
  }
  func.func @transform_6(%arg0: i32, %arg1: i32) -> (i32, i32) {
    %c0_i32 = arith.constant 0 : i32
    %c0_i32_0 = arith.constant 0 : i32
    %c0_i32_1 = arith.constant 0 : i32
    return %c0_i32, %c0_i32_0 : i32, i32
  }
  func.func @transform_7(%arg0: i32, %arg1: i32) -> (i32, i32, i32) {
    %c0_i32 = arith.constant 0 : i32
    %c0_i32_0 = arith.constant 0 : i32
    return %arg0, %arg1, %c0_i32 : i32, i32, i32
  }
}

</mosaic_0001>

<bundles_post_ra>
// kernel: scalable_csp_resblock.7
= control target key start
LH: loop header
LB: loop body
LE: loop exit
PB: predicated region body
PF: predicated region fallthrough
CT: control target
= control target key end

     0   :  { %s1456_s18 = smov 0   ;;  %s1458_s19 = smov 0   ;;  %s1673_s0 = inlined_call_operand.vmem [shape: bf16[2,256,8], index: 0, kind: input, shape index: {}]   ;;  %s1674_s1 = inlined_call_operand.vmem [shape: bf16[2,256,8], index: 1, kind: input, shape index: {}]   ;;  %s1675_s2 = inlined_call_operand.vmem [shape: bf16[8,8], index: 2, kind: input, shape index: {}]   ;;  %s1676_s3 = inlined_call_operand.vmem [shape: bf16[8,8], index: 3, kind: input, shape index: {}]   ;;  %s1677_s4 = inlined_call_operand.vmem [shape: f32[1,8], index: 4, kind: input, shape index: {}]   ;;  %s1678_s5 = inlined_call_operand.vmem [shape: f32[2,256,8], index: 5, kind: output, shape index: {}]  }
   0x1   :  { %s1460_s20 = smov 0  }
   0x2 LB: > { %s27_s21 = sadd.s32 1, %s1420_s19  ;;  %p1133_p0 = scmp.ge.s32.totalorder %s1424_s20, 1  ;;  %s1424_s20 = sphi %s1460_s20, %s15_s20   ;;  %s1420_s19 = sphi %s1458_s19, %s1680_s19   ;;  %s1416_s18 = sphi %s1456_s18, %s1679_s18  }
   0x3   : > { %p29_p1 = scmp.ge.s32.totalorder %s27_s21, 2  ;;  %p225_p2 = scmp.lt.s32.totalorder %s1424_s20, 3 }
   0x5   : > { %s1682_s21 = smov (%p29_p1, %s27_s21), 0  ;;  %p226_p3 = pnand %p1133_p0, %p225_p2 }
   0x6   : > { %v366_v0 = vld [vmem:[%s1676_s3] sm:$0xf] (!%p226_p3)  ;;  %vm496_vm0 = vcmask (!%p226_p3), 1043456   ;;  %p271_p4 = scmp.lt.s32.totalorder (!%p226_p3), %s1416_s18, 1  ;;  %vm447_vm1 = vcmask (!%p226_p3), 64512  }
   0x7   : > { %229 = sbr.rel (%p226_p3) target bundleno = 296 (0x128), region = 40  ;;  %v333_v1 = vld [vmem:[%s1675_s2] sm:$0xf] (!%p226_p3)  ;;  %1344 = vmatprep.subr.msk.bf16.mxu1 (!%p226_p3), %vm496_vm0, %v366_v0  ;;  %v498_v2 = vsel (!%p226_p3), %vm496_vm0, %v366_v0, 0 }
   0x8   : > { %1345 = vmatprep.subr.msk.bf16.mxu0 (!%p226_p3), %vm496_vm0, %v333_v1  ;;  %v790_v3 = vsel (!%p226_p3), %vm496_vm0, %v333_v1, 0  ;;  %1245 = vmatpush3.bf16.msra.mxu1 (!%p226_p3), %v498_v2  ;;  %v1561_v38 = vld [vmem:[%s1677_s4] ss:$0 sm:$0xff] (!%p226_p3) }
   0x9   : > { %1279 = vmatpush3.bf16.msra.mxu0 (!%p226_p3), %v790_v3 }
   0xe   : > { %s1684_s18 = smov (!%p271_p4, %s1416_s18), 1 }
   0xf   : > { %s1207_s26 = sshll.u32 %s1684_s18, 7  ;;  %s1209_s8 = sshll.u32 %s1684_s18, 8 }
  0x10   : > { %s1486_s29 = scalar_lea.vmem %s1674_s1, %s1207_s26  ;;  %s1491_s7 = scalar_lea.vmem %s1673_s0, %s1207_s26 }
  0x11   : > { %v1370_v4 = vld [vmem:[%s1486_s29] sm:$0xff]   ;;  %v1372_v6 = vld [vmem:[%s1486_s29 + $0x8] sm:$0xff]   ;;  %v1374_v8 = vld [vmem:[%s1486_s29 + $0x10] sm:$0xff]   ;;  %s1566_s13 = scalar_lea.vmem %s1678_s5, %s1209_s8 }
  0x12   : > { %v1371_v5 = vld [vmem:[%s1491_s7] sm:$0xff]   ;;  %1246 = vmatprep.mubr.msk.bf16.mxu1 %vm447_vm1, %v1370_v4  ;;  %v1373_v7 = vld [vmem:[%s1491_s7 + $0x8] sm:$0xff]   ;;  %v1375_v9 = vld [vmem:[%s1491_s7 + $0x10] sm:$0xff]  }
  0x13   : > { %1280 = vmatprep.mubr.msk.bf16.mxu0 %vm447_vm1, %v1371_v5  ;;  %1247 = vmatmul.mubr.msk.bf16.vlgmr.msra.gmra.mrb[0].mxu1 %vm447_vm1, %v1372_v6  ;;  %v1376_v10 = vld [vmem:[%s1486_s29 + $0x18] sm:$0xff]   ;;  %v1378_v12 = vld [vmem:[%s1486_s29 + $0x20] sm:$0xff]   ;;  %v1380_v14 = vld [vmem:[%s1486_s29 + $0x28] sm:$0xff]  }
  0x14   : > { %1281 = vmatmul.mubr.msk.bf16.vlgmr.msra.gmra.mrb[0].mxu0 %vm447_vm1, %v1373_v7  ;;  %1250 = vmatprep.mubr.msk.bf16.mxu1 %vm447_vm1, %v1374_v8  ;;  %v1377_v11 = vld [vmem:[%s1491_s7 + $0x18] sm:$0xff]   ;;  %v1379_v13 = vld [vmem:[%s1491_s7 + $0x20] sm:$0xff]   ;;  %v1381_v15 = vld [vmem:[%s1491_s7 + $0x28] sm:$0xff]  }
  0x15   : > { %1284 = vmatprep.mubr.msk.bf16.mxu0 %vm447_vm1, %v1375_v9  ;;  %v1382_v16 = vld [vmem:[%s1486_s29 + $0x30] sm:$0xff]   ;;  %v1384_v18 = vld [vmem:[%s1486_s29 + $0x38] sm:$0xff]   ;;  %v1386_v20 = vld [vmem:[%s1486_s29 + $0x40] sm:$0xff]  }
  0x16   : > { %v1383_v17 = vld [vmem:[%s1491_s7 + $0x30] sm:$0xff]   ;;  %v1385_v19 = vld [vmem:[%s1491_s7 + $0x38] sm:$0xff]   ;;  %v1387_v21 = vld [vmem:[%s1491_s7 + $0x40] sm:$0xff]  }
  0x17   : > { %v1388_v22 = vld [vmem:[%s1486_s29 + $0x48] sm:$0xff]   ;;  %v1390_v24 = vld [vmem:[%s1486_s29 + $0x50] sm:$0xff]   ;;  %v1392_v26 = vld [vmem:[%s1486_s29 + $0x58] sm:$0xff]  }
  0x18   : > { %v1389_v23 = vld [vmem:[%s1491_s7 + $0x48] sm:$0xff]   ;;  %v1391_v25 = vld [vmem:[%s1491_s7 + $0x50] sm:$0xff]   ;;  %v1393_v27 = vld [vmem:[%s1491_s7 + $0x58] sm:$0xff]  }
  0x19   : > { %v1394_v28 = vld [vmem:[%s1486_s29 + $0x60] sm:$0xff]   ;;  %v1396_v30 = vld [vmem:[%s1486_s29 + $0x68] sm:$0xff]   ;;  %v1398_v32 = vld [vmem:[%s1486_s29 + $0x70] sm:$0xff]  }
  0x1a   : > { %v1395_v29 = vld [vmem:[%s1491_s7 + $0x60] sm:$0xff]   ;;  %v1397_v31 = vld [vmem:[%s1491_s7 + $0x68] sm:$0xff]   ;;  %v1399_v33 = vld [vmem:[%s1491_s7 + $0x70] sm:$0xff]  }
  0x1b   : > { %1251 = vmatmul.mubr.msk.bf16.gmra.mrb[4].mxu1 %vm447_vm1, %v1376_v10  ;;  %v1400_v34 = vld [vmem:[%s1486_s29 + $0x78] sm:$0xff]  }
  0x1c   : > { %1285 = vmatmul.mubr.msk.bf16.gmra.mrb[4].mxu0 %vm447_vm1, %v1377_v11  ;;  %1254 = vmatprep.mubr.msk.bf16.mxu1 %vm447_vm1, %v1378_v12  ;;  %v1401_v35 = vld [vmem:[%s1491_s7 + $0x78] sm:$0xff]  }
  0x1d   : > { %1288 = vmatprep.mubr.msk.bf16.mxu0 %vm447_vm1, %v1379_v13 }
  0x23   : > { %1255 = vmatmul.mubr.msk.bf16.gmra.mrb[8].mxu1 %vm447_vm1, %v1380_v14 }
  0x24   : > { %1289 = vmatmul.mubr.msk.bf16.gmra.mrb[8].mxu0 %vm447_vm1, %v1381_v15  ;;  %1258 = vmatprep.mubr.msk.bf16.mxu1 %vm447_vm1, %v1382_v16 }
  0x25   : > { %1292 = vmatprep.mubr.msk.bf16.mxu0 %vm447_vm1, %v1383_v17 }
  0x2b   : > { %1259 = vmatmul.mubr.msk.bf16.gmra.mrb[12].mxu1 %vm447_vm1, %v1384_v18 }
  0x2c   : > { %1293 = vmatmul.mubr.msk.bf16.gmra.mrb[12].mxu0 %vm447_vm1, %v1385_v19  ;;  %1262 = vmatprep.mubr.msk.bf16.mxu1 %vm447_vm1, %v1386_v20 }
  0x2d   : > { %1296 = vmatprep.mubr.msk.bf16.mxu0 %vm447_vm1, %v1387_v21 }
  0x33   : > { %1263 = vmatmul.mubr.msk.bf16.gmra.mrb[16].mxu1 %vm447_vm1, %v1388_v22 }
  0x34   : > { %1297 = vmatmul.mubr.msk.bf16.gmra.mrb[16].mxu0 %vm447_vm1, %v1389_v23  ;;  %1266 = vmatprep.mubr.msk.bf16.mxu1 %vm447_vm1, %v1390_v24 }
  0x35   : > { %1300 = vmatprep.mubr.msk.bf16.mxu0 %vm447_vm1, %v1391_v25 }
  0x3b   : > { %1267 = vmatmul.mubr.msk.bf16.gmra.mrb[20].mxu1 %vm447_vm1, %v1392_v26 }
  0x3c   : > { %1301 = vmatmul.mubr.msk.bf16.gmra.mrb[20].mxu0 %vm447_vm1, %v1393_v27  ;;  %1270 = vmatprep.mubr.msk.bf16.mxu1 %vm447_vm1, %v1394_v28 }
  0x3d   : > { %1304 = vmatprep.mubr.msk.bf16.mxu0 %vm447_vm1, %v1395_v29 }
  0x43   : > { %1271 = vmatmul.mubr.msk.bf16.gmra.mrb[24].mxu1 %vm447_vm1, %v1396_v30 }
  0x44   : > { %1305 = vmatmul.mubr.msk.bf16.gmra.mrb[24].mxu0 %vm447_vm1, %v1397_v31  ;;  %1274 = vmatprep.mubr.msk.bf16.mxu1 %vm447_vm1, %v1398_v32 }
  0x45   : > { %1308 = vmatprep.mubr.msk.bf16.mxu0 %vm447_vm1, %v1399_v33 }
  0x4b   : > { %1275 = vmatmul.mubr.msk.bf16.gmra.mrb[28].mxu1 %vm447_vm1, %v1400_v34 }
  0x4c   : > { %1309 = vmatmul.mubr.msk.bf16.gmra.mrb[28].mxu0 %vm447_vm1, %v1401_v35 }
  0xe6   : > { %v1248_v36 = vpop.f32.mrb[0].mxu1 }
  0xe7   : > { %v1282_v37 = vpop.f32.mrb[0].mxu0  ;;  %v534_v39 = vpop.f32.mrb[1].mxu1 }
  0xe8   : > { %v835_v40 = vadd.f32 %v1282_v37, %v1248_v36  ;;  %v826_v41 = vpop.f32.mrb[1].mxu0  ;;  %v1249_v42 = vpop.f32.mrb[2].mxu1 }
  0xe9   : > { %v827_v43 = vadd.f32 %v826_v41, %v534_v39  ;;  %v1283_v44 = vpop.f32.mrb[2].mxu0  ;;  %v537_v45 = vpop.f32.mrb[3].mxu1 }
  0xea   : > { %v962_v46 = vadd.f32 %v1561_v38, %v835_v40  ;;  %v838_v47 = vadd.f32 %v1283_v44, %v1249_v42  ;;  %v829_v48 = vpop.f32.mrb[3].mxu0 }
  0xeb   : > { %v960_v49 = vadd.f32 %v1561_v38, %v827_v43  ;;  %v830_v50 = vadd.f32 %v829_v48, %v537_v45 }
  0xec   : > { %994 = vst.msk [vmem:[%s1566_s13 + $0x10] sm:$0xff] %vm447_vm1, %v962_v46  ;;  %v963_v51 = vadd.f32 %v1561_v38, %v838_v47 }
  0xed   : > { %992 = vst.msk [vmem:[%s1566_s13] sm:$0xff] %vm447_vm1, %v960_v49  ;;  %v961_v52 = vadd.f32 %v1561_v38, %v830_v50 }
  0xee   : > { %995 = vst.msk [vmem:[%s1566_s13 + $0x18] sm:$0xff] %vm447_vm1, %v963_v51  ;;  %v1252_v53 = vpop.f32.mrb[4].mxu1 }
  0xef   : > { %993 = vst.msk [vmem:[%s1566_s13 + $0x8] sm:$0xff] %vm447_vm1, %v961_v52  ;;  %v1286_v54 = vpop.f32.mrb[4].mxu0  ;;  %v550_v55 = vpop.f32.mrb[5].mxu1 }
  0xf0   : > { %v851_v56 = vadd.f32 %v1286_v54, %v1252_v53  ;;  %v842_v57 = vpop.f32.mrb[5].mxu0  ;;  %v1253_v58 = vpop.f32.mrb[6].mxu1 }
  0xf1   : > { %v843_v59 = vadd.f32 %v842_v57, %v550_v55  ;;  %v1287_v60 = vpop.f32.mrb[6].mxu0  ;;  %v553_v61 = vpop.f32.mrb[7].mxu1 }
  0xf2   : > { %v966_v62 = vadd.f32 %v1561_v38, %v851_v56  ;;  %v854_v63 = vadd.f32 %v1287_v60, %v1253_v58  ;;  %v845_v0 = vpop.f32.mrb[7].mxu0 }
  0xf3   : > { %v964_v1 = vadd.f32 %v1561_v38, %v843_v59  ;;  %v846_v2 = vadd.f32 %v845_v0, %v553_v61 }
  0xf4   : > { %998 = vst.msk [vmem:[%s1566_s13 + $0x30] sm:$0xff] %vm447_vm1, %v966_v62  ;;  %v967_v3 = vadd.f32 %v1561_v38, %v854_v63 }
  0xf5   : > { %996 = vst.msk [vmem:[%s1566_s13 + $0x20] sm:$0xff] %vm447_vm1, %v964_v1  ;;  %v965_v4 = vadd.f32 %v1561_v38, %v846_v2 }
  0xf6   : > { %999 = vst.msk [vmem:[%s1566_s13 + $0x38] sm:$0xff] %vm447_vm1, %v967_v3  ;;  %v1256_v5 = vpop.f32.mrb[8].mxu1 }
  0xf7   : > { %997 = vst.msk [vmem:[%s1566_s13 + $0x28] sm:$0xff] %vm447_vm1, %v965_v4  ;;  %v1290_v6 = vpop.f32.mrb[8].mxu0  ;;  %v566_v7 = vpop.f32.mrb[9].mxu1 }
  0xf8   : > { %v867_v8 = vadd.f32 %v1290_v6, %v1256_v5  ;;  %v858_v9 = vpop.f32.mrb[9].mxu0  ;;  %v1257_v10 = vpop.f32.mrb[10].mxu1 }
  0xf9   : > { %v859_v11 = vadd.f32 %v858_v9, %v566_v7  ;;  %v1291_v12 = vpop.f32.mrb[10].mxu0  ;;  %v569_v13 = vpop.f32.mrb[11].mxu1 }
  0xfa   : > { %v970_v14 = vadd.f32 %v1561_v38, %v867_v8  ;;  %v870_v15 = vadd.f32 %v1291_v12, %v1257_v10  ;;  %v861_v16 = vpop.f32.mrb[11].mxu0 }
  0xfb   : > { %v968_v17 = vadd.f32 %v1561_v38, %v859_v11  ;;  %v862_v18 = vadd.f32 %v861_v16, %v569_v13 }
  0xfc   : > { %1002 = vst.msk [vmem:[%s1566_s13 + $0x50] sm:$0xff] %vm447_vm1, %v970_v14  ;;  %v971_v19 = vadd.f32 %v1561_v38, %v870_v15 }
  0xfd   : > { %1000 = vst.msk [vmem:[%s1566_s13 + $0x40] sm:$0xff] %vm447_vm1, %v968_v17  ;;  %v969_v20 = vadd.f32 %v1561_v38, %v862_v18 }
  0xfe   : > { %1003 = vst.msk [vmem:[%s1566_s13 + $0x58] sm:$0xff] %vm447_vm1, %v971_v19  ;;  %v1260_v21 = vpop.f32.mrb[12].mxu1 }
  0xff   : > { %1001 = vst.msk [vmem:[%s1566_s13 + $0x48] sm:$0xff] %vm447_vm1, %v969_v20  ;;  %v1294_v22 = vpop.f32.mrb[12].mxu0  ;;  %v582_v23 = vpop.f32.mrb[13].mxu1 }
 0x100   : > { %v883_v24 = vadd.f32 %v1294_v22, %v1260_v21  ;;  %v874_v25 = vpop.f32.mrb[13].mxu0  ;;  %v1261_v26 = vpop.f32.mrb[14].mxu1 }
 0x101   : > { %v875_v27 = vadd.f32 %v874_v25, %v582_v23  ;;  %v1295_v28 = vpop.f32.mrb[14].mxu0  ;;  %v585_v29 = vpop.f32.mrb[15].mxu1 }
 0x102   : > { %v974_v30 = vadd.f32 %v1561_v38, %v883_v24  ;;  %v886_v31 = vadd.f32 %v1295_v28, %v1261_v26  ;;  %v877_v32 = vpop.f32.mrb[15].mxu0 }
 0x103   : > { %v972_v33 = vadd.f32 %v1561_v38, %v875_v27  ;;  %v878_v34 = vadd.f32 %v877_v32, %v585_v29 }
 0x104   : > { %1006 = vst.msk [vmem:[%s1566_s13 + $0x70] sm:$0xff] %vm447_vm1, %v974_v30  ;;  %v975_v35 = vadd.f32 %v1561_v38, %v886_v31 }
 0x105   : > { %1004 = vst.msk [vmem:[%s1566_s13 + $0x60] sm:$0xff] %vm447_vm1, %v972_v33  ;;  %v973_v36 = vadd.f32 %v1561_v38, %v878_v34 }
 0x106   : > { %1007 = vst.msk [vmem:[%s1566_s13 + $0x78] sm:$0xff] %vm447_vm1, %v975_v35  ;;  %v1264_v37 = vpop.f32.mrb[16].mxu1 }
 0x107   : > { %1005 = vst.msk [vmem:[%s1566_s13 + $0x68] sm:$0xff] %vm447_vm1, %v973_v36  ;;  %v1298_v39 = vpop.f32.mrb[16].mxu0  ;;  %v598_v40 = vpop.f32.mrb[17].mxu1 }
 0x108   : > { %v899_v41 = vadd.f32 %v1298_v39, %v1264_v37  ;;  %v890_v42 = vpop.f32.mrb[17].mxu0  ;;  %v1265_v43 = vpop.f32.mrb[18].mxu1 }
 0x109   : > { %v891_v44 = vadd.f32 %v890_v42, %v598_v40  ;;  %v1299_v45 = vpop.f32.mrb[18].mxu0  ;;  %v601_v46 = vpop.f32.mrb[19].mxu1 }
 0x10a   : > { %v978_v47 = vadd.f32 %v1561_v38, %v899_v41  ;;  %v902_v48 = vadd.f32 %v1299_v45, %v1265_v43  ;;  %v893_v49 = vpop.f32.mrb[19].mxu0 }
 0x10b   : > { %v976_v50 = vadd.f32 %v1561_v38, %v891_v44  ;;  %v894_v51 = vadd.f32 %v893_v49, %v601_v46 }
 0x10c   : > { %1010 = vst.msk [vmem:[%s1566_s13 + $0x90] sm:$0xff] %vm447_vm1, %v978_v47  ;;  %v979_v52 = vadd.f32 %v1561_v38, %v902_v48 }
 0x10d   : > { %1008 = vst.msk [vmem:[%s1566_s13 + $0x80] sm:$0xff] %vm447_vm1, %v976_v50  ;;  %v977_v53 = vadd.f32 %v1561_v38, %v894_v51 }
 0x10e   : > { %1011 = vst.msk [vmem:[%s1566_s13 + $0x98] sm:$0xff] %vm447_vm1, %v979_v52  ;;  %v1268_v54 = vpop.f32.mrb[20].mxu1 }
 0x10f   : > { %1009 = vst.msk [vmem:[%s1566_s13 + $0x88] sm:$0xff] %vm447_vm1, %v977_v53  ;;  %v1302_v55 = vpop.f32.mrb[20].mxu0  ;;  %v614_v56 = vpop.f32.mrb[21].mxu1 }
 0x110   : > { %v915_v57 = vadd.f32 %v1302_v55, %v1268_v54  ;;  %v906_v58 = vpop.f32.mrb[21].mxu0  ;;  %v1269_v59 = vpop.f32.mrb[22].mxu1 }
 0x111   : > { %v907_v60 = vadd.f32 %v906_v58, %v614_v56  ;;  %v1303_v61 = vpop.f32.mrb[22].mxu0  ;;  %v617_v62 = vpop.f32.mrb[23].mxu1 }
 0x112   : > { %v982_v63 = vadd.f32 %v1561_v38, %v915_v57  ;;  %v918_v0 = vadd.f32 %v1303_v61, %v1269_v59  ;;  %v909_v1 = vpop.f32.mrb[23].mxu0 }
 0x113   : > { %v980_v2 = vadd.f32 %v1561_v38, %v907_v60  ;;  %v910_v3 = vadd.f32 %v909_v1, %v617_v62 }
 0x114   : > { %1014 = vst.msk [vmem:[%s1566_s13 + $0xb0] sm:$0xff] %vm447_vm1, %v982_v63  ;;  %v983_v4 = vadd.f32 %v1561_v38, %v918_v0 }
 0x115   : > { %1012 = vst.msk [vmem:[%s1566_s13 + $0xa0] sm:$0xff] %vm447_vm1, %v980_v2  ;;  %v981_v5 = vadd.f32 %v1561_v38, %v910_v3 }
 0x116   : > { %1015 = vst.msk [vmem:[%s1566_s13 + $0xb8] sm:$0xff] %vm447_vm1, %v983_v4  ;;  %v1272_v6 = vpop.f32.mrb[24].mxu1 }
 0x117   : > { %1013 = vst.msk [vmem:[%s1566_s13 + $0xa8] sm:$0xff] %vm447_vm1, %v981_v5  ;;  %v1306_v7 = vpop.f32.mrb[24].mxu0  ;;  %v630_v8 = vpop.f32.mrb[25].mxu1 }
 0x118   : > { %v931_v9 = vadd.f32 %v1306_v7, %v1272_v6  ;;  %v922_v10 = vpop.f32.mrb[25].mxu0  ;;  %v1273_v11 = vpop.f32.mrb[26].mxu1 }
 0x119   : > { %v923_v12 = vadd.f32 %v922_v10, %v630_v8  ;;  %v1307_v13 = vpop.f32.mrb[26].mxu0  ;;  %v633_v14 = vpop.f32.mrb[27].mxu1 }
 0x11a   : > { %v986_v15 = vadd.f32 %v1561_v38, %v931_v9  ;;  %v934_v16 = vadd.f32 %v1307_v13, %v1273_v11  ;;  %v925_v17 = vpop.f32.mrb[27].mxu0 }
 0x11b   : > { %v984_v18 = vadd.f32 %v1561_v38, %v923_v12  ;;  %v926_v19 = vadd.f32 %v925_v17, %v633_v14 }
 0x11c   : > { %1018 = vst.msk [vmem:[%s1566_s13 + $0xd0] sm:$0xff] %vm447_vm1, %v986_v15  ;;  %v987_v20 = vadd.f32 %v1561_v38, %v934_v16 }
 0x11d   : > { %1016 = vst.msk [vmem:[%s1566_s13 + $0xc0] sm:$0xff] %vm447_vm1, %v984_v18  ;;  %v985_v21 = vadd.f32 %v1561_v38, %v926_v19 }
 0x11e   : > { %1019 = vst.msk [vmem:[%s1566_s13 + $0xd8] sm:$0xff] %vm447_vm1, %v987_v20  ;;  %v1276_v22 = vpop.f32.mrb[28].mxu1 }
 0x11f   : > { %1017 = vst.msk [vmem:[%s1566_s13 + $0xc8] sm:$0xff] %vm447_vm1, %v985_v21  ;;  %v1310_v23 = vpop.f32.mrb[28].mxu0  ;;  %v646_v24 = vpop.f32.mrb[29].mxu1 }
 0x120   : > { %v947_v25 = vadd.f32 %v1310_v23, %v1276_v22  ;;  %v938_v26 = vpop.f32.mrb[29].mxu0  ;;  %v1277_v27 = vpop.f32.mrb[30].mxu1 }
 0x121   : > { %v939_v28 = vadd.f32 %v938_v26, %v646_v24  ;;  %v1311_v29 = vpop.f32.mrb[30].mxu0  ;;  %v649_v30 = vpop.f32.mrb[31].mxu1 }
 0x122   : > { %v990_v31 = vadd.f32 %v1561_v38, %v947_v25  ;;  %v950_v32 = vadd.f32 %v1311_v29, %v1277_v27  ;;  %v941_v33 = vpop.f32.mrb[31].mxu0 }
 0x123   : > { %v988_v34 = vadd.f32 %v1561_v38, %v939_v28  ;;  %v942_v35 = vadd.f32 %v941_v33, %v649_v30 }
 0x124   : > { %1022 = vst.msk [vmem:[%s1566_s13 + $0xf0] sm:$0xff] %vm447_vm1, %v990_v31  ;;  %v991_v36 = vadd.f32 %v1561_v38, %v950_v32 }
 0x125   : > { %1020 = vst.msk [vmem:[%s1566_s13 + $0xe0] sm:$0xff] %vm447_vm1, %v988_v34  ;;  %v989_v37 = vadd.f32 %v1561_v38, %v942_v35 }
 0x126   : > { %1023 = vst.msk [vmem:[%s1566_s13 + $0xf8] sm:$0xff] %vm447_vm1, %v991_v36 }
 0x127   : > { %1021 = vst.msk [vmem:[%s1566_s13 + $0xe8] sm:$0xff] %vm447_vm1, %v989_v37 }
 0x128 PF: > { %s15_s20 = sadd.s32 1, %s1424_s20   ;;  %s1679_s18 = smov %s1420_s19 }
 0x129   : > { %p12_p5 = scmp.ge.s32.totalorder %s15_s20, 4   ;;  %s1680_s19 = smov %s1682_s21 }
 0x12b   :  { %14 = sbr.rel (!%p12_p5) target bundleno = 2 (0x2), region = 73 }

// kernel: scalable_csp_resblock.4
= control target key start
LH: loop header
LB: loop body
LE: loop exit
PB: predicated region body
PF: predicated region fallthrough
CT: control target
= control target key end

     0   :  { %s7122_s13 = smov 0   ;;  %s7124_s14 = smov 0   ;;  %s9768_s0 = inlined_call_operand.vmem [shape: bf16[2,18,18,8], index: 0, kind: input, shape index: {}]   ;;  %s9769_s1 = inlined_call_operand.vmem [shape: bf16[72,16], index: 1, kind: input, shape index: {}]   ;;  %s9770_s2 = inlined_call_operand.vmem [shape: f32[1,16], index: 2, kind: input, shape index: {}]   ;;  %s9771_s3 = inlined_call_operand.vmem [shape: f32[1,16], index: 3, kind: input, shape index: {}]   ;;  %s9772_s4 = inlined_call_operand.vmem [shape: f32[1,16], index: 4, kind: input, shape index: {}]   ;;  %s9773_s5 = inlined_call_operand.vmem [shape: bf16[16,16], index: 5, kind: input, shape index: {}]   ;;  %s9774_s6 = inlined_call_operand.vmem [shape: f32[1,16], index: 6, kind: input, shape index: {}]   ;;  %s9775_s7 = inlined_call_operand.vmem [shape: f32[1,16], index: 7, kind: input, shape index: {}]   ;;  %s9776_s8 = inlined_call_operand.vmem [shape: f32[1,16], index: 8, kind: input, shape index: {}]   ;;  %s9777_s9 = inlined_call_operand.vmem [shape: bf16[2,256,8], index: 9, kind: output, shape index: {0}]   ;;  %s9778_s10 = inlined_call_operand.vmem [shape: bf16[2,256,8], index: 10, kind: output, shape index: {1}]  }
   0x1   :  { %s7126_s15 = smov 0  }
   0x2 LB: > { %s33_s16 = sadd.s32 1, %s7060_s14  ;;  %p5454_p0 = scmp.ge.s32.totalorder %s7064_s15, 1  ;;  %s7064_s15 = sphi %s7126_s15, %s21_s15   ;;  %s7060_s14 = sphi %s7124_s14, %s9876_s14   ;;  %s7056_s13 = sphi %s7122_s13, %s9875_s13  }
   0x3   : > { %p35_p1 = scmp.ge.s32.totalorder %s33_s16, 2  ;;  %p331_p2 = scmp.lt.s32.totalorder %s7064_s15, 3 }
   0x5   : > { %s9878_s16 = smov (%p35_p1, %s33_s16), 0  ;;  %p332_p3 = pnand %p5454_p0, %p331_p2 }
   0x7   : > { %335 = sbr.rel (%p332_p3) target bundleno = 1395 (0x573), region = 56 }
   0xe   : > { %vm952_vm0 = vcmask 1043456   ;;  %v2062_v0 = vld [vmem:[%s9769_s1 + $0x10] sm:$0xf]  ;;  %v854_v1 = vld [vmem:[%s9769_s1 + $0x4] sm:$0xf]  ;;  %p382_p4 = scmp.lt.s32.totalorder %s7056_s13, 1 }
   0xf   : > { %6601 = vmatprep.subr.msk.bf16.mxu0 %vm952_vm0, %v2062_v0  ;;  %6597 = vmatprep.subr.msk.bf16.mxu1 %vm952_vm0, %v854_v1  ;;  %v2070_v2 = vsel %vm952_vm0, %v2062_v0, 0  ;;  %v954_v3 = vsel %vm952_vm0, %v854_v1, 0  ;;  %v2273_v4 = vld [vmem:[%s9769_s1 + $0x14] sm:$0xf]  ;;  %v466_v5 = vld [vmem:[%s9769_s1] sm:$0xf] }
  0x10   : > { %6138 = vmatpush3.bf16.msra.mxu0 %v2070_v2  ;;  %6002 = vmatpush3.bf16.msra.mxu1 %v954_v3  ;;  %s9880_s13 = smov (!%p382_p4, %s7056_s13), 1  ;;  %vm467_vm1 = vsmask.f32 3328  ;;  %vm468_vm2 = vsmask.f32 7440  ;;  %v7167_v6 = vsel %vm952_vm0, %v2273_v4, 0 }
  0x11   : > { %6602 = vmatprep.subr.msk.bf16.mxu0 %vm952_vm0, %v2273_v4  ;;  %6598 = vmatprep.subr.msk.bf16.mxu1 %vm952_vm0, %v466_v5  ;;  %s6606_s25 = smul.u32 216, %s9880_s13  ;;  %v7170_v7 = vsel %vm952_vm0, %v466_v5, 0  ;;  %v7175_v8 = vld [vmem:[%s9769_s1 + $0x18] sm:$0xf]  ;;  %vm903_vm3 = vcmask 64512   ;;  %vm7213_vm4 = vmor %vm467_vm1, %vm468_vm2  ;;  %vm1425_vm5 = vcmask 1042432  }
  0x12   : > { %v7201_v21 = vsel %vm952_vm0, %v7175_v8, 0  ;;  %vm1426_vm6 = vcmask 1046532   ;;  %vm3160_vm8 = vcmask 130048   ;;  %vm5156_vm9 = vcmask 60416   ;;  %s7066_s29 = smov 120  }
  0x13   : > { %s7164_s28 = scalar_lea.vmem %s9768_s0, %s6606_s25  ;;  %vm7581_vm7 = vmor %vm1425_vm5, %vm1426_vm6  ;;  %s5797_s25 = sshll.u32 %s9880_s13, 7 }
  0x14   : > { %v7178_v9 = vld [vmem:[%s7164_s28] sm:$0xf]  ;;  %v7181_v10 = vld [vmem:[%s7164_s28 + $0x4] sm:$0xf]  ;;  %v414_v11 = vld [vmem:[%s7164_s28 + $0x8] sm:$0x1]  ;;  %s9673_s20 = scalar_lea.vmem %s9778_s10, %s5797_s25 }
  0x15   : > { %v471_v12 = vshrl.u32 %v7178_v9, 16  ;;  %v474_v13 = vshll.u32 %v7178_v9, 16  ;;  %v480_v14 = vshll.u32 %v7181_v10, 16  ;;  %v484_v15 = vshrl.u32 %v7181_v10, 16  ;;  %v7189_v16 = vld [vmem:[%s7164_s28 + $0xc] sm:$0xf] }
  0x16   : > { %v490_v17 = vshll.u32 %v414_v11, 16  ;;  %v7192_v18 = vld [vmem:[%s7164_s28 + $0x10] sm:$0xf]  ;;  %v7195_v19 = vld [vmem:[%s7164_s28 + $0x14] sm:$0x1]  ;;  %v495_v27 = vshrl.u32 %v7189_v16, 16 }
  0x17   : > { %v473_v22 = vrot.slane %v471_v12, 4  ;;  %v476_v23 = vrot.slane %v474_v13, 5  ;;  %v482_v24 = vrot.slane %v480_v14, 5  ;;  %v486_v25 = vrot.slane %v484_v15, 4  ;;  %v7209_v34 = vld [vmem:[%s7164_s28 + $0x18] sm:$0xf] }
  0x18   : > { %v492_v26 = vrot.slane %v490_v17, 5  ;;  %v498_v28 = vshll.u32 %v7189_v16, 16  ;;  %v504_v29 = vshll.u32 %v7192_v18, 16  ;;  %v508_v32 = vshrl.u32 %v7192_v18, 16  ;;  %v7222_v40 = vld [vmem:[%s7164_s28 + $0x1c] sm:$0xf] }
  0x19   : > { %v477_v30 = vor.u32 %v476_v23, %v473_v22  ;;  %v487_v31 = vor.u32 %v486_v25, %v482_v24  ;;  %v514_v33 = vshll.u32 %v7195_v19, 16  ;;  %v497_v36 = vrot.slane %v495_v27, 4  ;;  %v7226_v47 = vld [vmem:[%s7164_s28 + $0x20] sm:$0x1]  ;;  %v7236_v58 = vld [vmem:[%s7164_s28 + $0x24] sm:$0xf] }
  0x1a   : > { %v500_v37 = vrot.slane %v498_v28, 5  ;;  %v506_v38 = vrot.slane %v504_v29, 5  ;;  %v7219_v39 = vcombine.low %v7189_v16, %v7192_v18  ;;  %v510_v43 = vrot.slane %v508_v32, 4  ;;  %v7241_v63 = vld [vmem:[%s7164_s28 + $0x28] sm:$0xf] }
  0x1b   : > { %v478_v41 = vrot.slane %v477_v30, 4  ;;  %v488_v42 = vrot.slane %v487_v31, 4  ;;  %v516_v44 = vrot.slane %v514_v33, 5  ;;  %v519_v48 = vshrl.u32 %v7209_v34, 16  ;;  %v7249_v4 = vld [vmem:[%s7164_s28 + $0x2c] sm:$0x1] }
  0x1c   : > { %v501_v45 = vor.u32 %v500_v37, %v497_v36  ;;  %v522_v49 = vshll.u32 %v7209_v34, 16  ;;  %v511_v52 = vor.u32 %v510_v43, %v506_v38  ;;  %v528_v53 = vshll.u32 %v7222_v40, 16  ;;  %v7255_v14 = vld [vmem:[%s7164_s28 + $0x30] sm:$0xf]  ;;  %v7262_v28 = vld [vmem:[%s7164_s28 + $0x34] sm:$0xf] }
  0x1d   : > { %v483_v50 = vsel %vm7213_vm4, %v478_v41, %v482_v24  ;;  %v493_v51 = vsel %vm7213_vm4, %v488_v42, %v492_v26  ;;  %v521_v56 = vrot.slane %v519_v48, 4  ;;  %v532_v61 = vshrl.u32 %v7222_v40, 16  ;;  %v7269_v32 = vld [vmem:[%s7164_s28 + $0x38] sm:$0x1]  ;;  %v7277_v48 = vld [vmem:[%s7164_s28 + $0x3c] sm:$0xf] }
  0x1e   : > { %v5460_v54 = vcombine.low %v483_v50, %v493_v51  ;;  %v502_v55 = vrot.slane %v501_v45, 4  ;;  %v524_v57 = vrot.slane %v522_v49, 5  ;;  %v512_v59 = vrot.slane %v511_v52, 4  ;;  %v7420_v20 = vld [vmem:[%s7164_s28 + $0x80] sm:$0x1] }
  0x1f   : > { %v530_v60 = vrot.slane %v528_v53, 5  ;;  %v538_v62 = vshll.u32 %v7226_v47, 16  ;;  %v534_v11 = vrot.slane %v532_v61, 4  ;;  %v543_v13 = vshrl.u32 %v7236_v58, 16  ;;  %v7283_v53 = vld [vmem:[%s7164_s28 + $0x40] sm:$0xf] }
  0x20   : > { %6003 = vmatprep.mubr.msk.bf16.mxu1 %vm903_vm3, %v5460_v54  ;;  %v507_v0 = vsel %vm7213_vm4, %v502_v55, %v506_v38  ;;  %v525_v1 = vor.u32 %v524_v57, %v521_v56  ;;  %v517_v5 = vsel %vm7213_vm4, %v512_v59, %v516_v44  ;;  %v546_v22 = vshll.u32 %v7236_v58, 16 }
  0x21   : > { %v540_v12 = vrot.slane %v538_v62, 5  ;;  %v5461_v15 = vcombine.low %v507_v0, %v517_v5  ;;  %v552_v23 = vshll.u32 %v7241_v63, 16  ;;  %v535_v24 = vor.u32 %v534_v11, %v530_v60 }
  0x22   : > { %v526_v17 = vrot.slane %v525_v1, 4  ;;  %v545_v25 = vrot.slane %v543_v13, 4  ;;  %v556_v26 = vshrl.u32 %v7241_v63, 16  ;;  %v562_v27 = vshll.u32 %v7249_v4, 16  ;;  %v7295_v1 = vld [vmem:[%s7164_s28 + $0x44] sm:$0x1] }
  0x23   : > { %6139 = vmatprep.mubr.msk.bf16.mxu0 %vm903_vm3, %v5461_v15  ;;  %6004 = vmatmul.mubr.msk.bf16.vlgmr.msra.gmra.mrb[0].mxu1 %vm903_vm3, %v5461_v15  ;;  %v548_v30 = vrot.slane %v546_v22, 5  ;;  %v554_v31 = vrot.slane %v552_v23, 5  ;;  %v567_v33 = vshrl.u32 %v7255_v14, 16  ;;  %v536_v36 = vrot.slane %v535_v24, 4  ;;  %v7307_v23 = vld [vmem:[%s7164_s28 + $0x4c] sm:$0xf] }
  0x24   : > { %v531_v29 = vsel %vm7213_vm4, %v526_v17, %v530_v60  ;;  %v558_v37 = vrot.slane %v556_v26, 4  ;;  %v564_v38 = vrot.slane %v562_v27, 5  ;;  %v570_v41 = vshll.u32 %v7255_v14, 16  ;;  %6036 = vmatpush3.bf16.msra.mxu1 %v7170_v7 }
  0x25   : > { %v549_v42 = vor.u32 %v548_v30, %v545_v25  ;;  %v569_v43 = vrot.slane %v567_v33, 4  ;;  %v576_v44 = vshll.u32 %v7262_v28, 16  ;;  %v580_v45 = vshrl.u32 %v7262_v28, 16 }
  0x26   : > { %v541_v49 = vsel %vm7213_vm4, %v536_v36, %v540_v12  ;;  %v559_v50 = vor.u32 %v558_v37, %v554_v31  ;;  %v572_v51 = vrot.slane %v570_v41, 5  ;;  %v586_v52 = vshll.u32 %v7269_v32, 16  ;;  %v7300_v12 = vld [vmem:[%s7164_s28 + $0x48] sm:$0xf]  ;;  %v7329_v41 = vld [vmem:[%s7164_s28 + $0x54] sm:$0xf] }
  0x27   : > { %v7285_v7 = vcombine.low %v531_v29, %v541_v49  ;;  %v550_v54 = vrot.slane %v549_v42, 4  ;;  %v578_v55 = vrot.slane %v576_v44, 5  ;;  %v582_v56 = vrot.slane %v580_v45, 4  ;;  %v7334_v49 = vld [vmem:[%s7164_s28 + $0x58] sm:$0xf] }
  0x28   : > { %v560_v57 = vrot.slane %v559_v50, 4  ;;  %v573_v59 = vor.u32 %v572_v51, %v569_v43  ;;  %v588_v60 = vrot.slane %v586_v52, 5  ;;  %v591_v61 = vshrl.u32 %v7277_v48, 16 }
  0x29   : > { %9814 = vst [vmem:[#allocation2_spill] sm:$0xff] %v7285_v7  ;;  %6140 = vmatmul.mubr.msk.bf16.vlgmr.msra.gmra.mrb[0].mxu0 %vm903_vm3, %v7285_v7  ;;  %6007 = vmatprep.mubr.msk.bf16.mxu1 %vm903_vm3, %v7285_v7  ;;  %v555_v62 = vsel %vm7213_vm4, %v550_v54, %v554_v31  ;;  %v583_v0 = vor.u32 %v582_v56, %v578_v55  ;;  %v594_v5 = vshll.u32 %v7277_v48, 16  ;;  %v600_v11 = vshll.u32 %v7283_v53, 16 }
  0x2a   : > { %6172 = vmatpush3.bf16.msra.mxu0 %v7167_v6  ;;  %v565_v13 = vsel %vm7213_vm4, %v560_v57, %v564_v38  ;;  %v574_v15 = vrot.slane %v573_v59, 4  ;;  %v593_v17 = vrot.slane %v591_v61, 4  ;;  %v604_v22 = vshrl.u32 %v7283_v53, 16 }
  0x2b   : > { %v7309_v24 = vcombine.low %v555_v62, %v565_v13  ;;  %v584_v25 = vrot.slane %v583_v0, 4  ;;  %v596_v26 = vrot.slane %v594_v5, 5  ;;  %v602_v27 = vrot.slane %v600_v11, 5  ;;  %6603 = vmatprep.subr.msk.bf16.mxu0 %vm952_vm0, %v7175_v8  ;;  %v7324_v8 = vld [vmem:[%s7164_s28 + $0x50] sm:$0x1] }
  0x2c   : > { %v579_v6 = vsel %vm7213_vm4, %v574_v15, %v578_v55  ;;  %v606_v29 = vrot.slane %v604_v22, 4  ;;  %v610_v30 = vshll.u32 %v7295_v1, 16  ;;  %v615_v31 = vshrl.u32 %v7300_v12, 16  ;;  %v7347_v0 = vld [vmem:[%s7164_s28 + $0x5c] sm:$0x1] }
  0x2d   : > { %9815 = vst [vmem:[#allocation3_spill] sm:$0xff] %v7309_v24  ;;  %6143 = vmatprep.mubr.msk.bf16.mxu0 %vm903_vm3, %v7309_v24  ;;  %6008 = vmatmul.mubr.msk.bf16.gmra.mrb[4].mxu1 %vm903_vm3, %v7309_v24  ;;  %v589_v33 = vsel %vm7213_vm4, %v584_v25, %v588_v60  ;;  %v597_v36 = vor.u32 %v596_v26, %v593_v17  ;;  %v618_v37 = vshll.u32 %v7300_v12, 16  ;;  %v624_v38 = vshll.u32 %v7307_v23, 16  ;;  %v7351_v11 = vld [vmem:[%s7164_s28 + $0x60] sm:$0xf] }
  0x2e   : > { %v7331_v42 = vcombine.low %v579_v6, %v589_v33  ;;  %v607_v43 = vor.u32 %v606_v29, %v602_v27  ;;  %v612_v44 = vrot.slane %v610_v30, 5  ;;  %v617_v45 = vrot.slane %v615_v31, 4  ;;  %v7356_v25 = vld [vmem:[%s7164_s28 + $0x64] sm:$0xf] }
  0x2f   : > { %v598_v50 = vrot.slane %v597_v36, 4  ;;  %v620_v51 = vrot.slane %v618_v37, 5  ;;  %v626_v52 = vrot.slane %v624_v38, 5  ;;  %v628_v54 = vshrl.u32 %v7307_v23, 16 }
  0x30   : > { %9816 = vst [vmem:[#allocation4_spill] sm:$0xff] %v7331_v42  ;;  %6011 = vmatprep.mubr.msk.bf16.mxu1 %vm903_vm3, %v7331_v42  ;;  %v608_v55 = vrot.slane %v607_v43, 4  ;;  %v634_v56 = vshll.u32 %v7324_v8, 16  ;;  %v639_v57 = vshrl.u32 %v7329_v41, 16  ;;  %v642_v59 = vshll.u32 %v7329_v41, 16 }
  0x31   : > { %6144 = vmatmul.mubr.msk.bf16.gmra.mrb[4].mxu0 %vm903_vm3, %v7331_v42  ;;  %v603_v60 = vsel %vm7213_vm4, %v598_v50, %v602_v27  ;;  %v621_v61 = vor.u32 %v620_v51, %v617_v45  ;;  %v630_v62 = vrot.slane %v628_v54, 4  ;;  %v648_v5 = vshll.u32 %v7334_v49, 16  ;;  %v7370_v43 = vld [vmem:[%s7164_s28 + $0x68] sm:$0x1] }
  0x32   : > { %v613_v13 = vsel %vm7213_vm4, %v608_v55, %v612_v44  ;;  %v636_v15 = vrot.slane %v634_v56, 5  ;;  %v641_v17 = vrot.slane %v639_v57, 4  ;;  %v644_v22 = vrot.slane %v642_v59, 5  ;;  %v7375_v56 = vld [vmem:[%s7164_s28 + $0x6c] sm:$0xf] }
  0x33   : > { %v7358_v26 = vcombine.low %v603_v60, %v613_v13  ;;  %v622_v27 = vrot.slane %v621_v61, 4  ;;  %v631_v6 = vor.u32 %v630_v62, %v626_v52  ;;  %v650_v29 = vrot.slane %v648_v5, 5  ;;  %v7381_v61 = vld [vmem:[%s7164_s28 + $0x70] sm:$0xf] }
  0x34   : > { %v645_v30 = vor.u32 %v644_v22, %v641_v17  ;;  %v652_v31 = vshrl.u32 %v7334_v49, 16  ;;  %v658_v33 = vshll.u32 %v7347_v0, 16  ;;  %v663_v36 = vshrl.u32 %v7351_v11, 16  ;;  %v7389_v22 = vld [vmem:[%s7164_s28 + $0x74] sm:$0x1] }
  0x35   : > { %9817 = vst [vmem:[#allocation5_spill] sm:$0xff] %v7358_v26  ;;  %6147 = vmatprep.mubr.msk.bf16.mxu0 %vm903_vm3, %v7358_v26  ;;  %6012 = vmatmul.mubr.msk.bf16.gmra.mrb[8].mxu1 %vm903_vm3, %v7358_v26  ;;  %v627_v37 = vsel %vm7213_vm4, %v622_v27, %v626_v52  ;;  %v632_v38 = vrot.slane %v631_v6, 4  ;;  %v666_v44 = vshll.u32 %v7351_v11, 16  ;;  %v672_v45 = vshll.u32 %v7356_v25, 16 }
  0x36   : > { %v646_v50 = vrot.slane %v645_v30, 4  ;;  %v654_v51 = vrot.slane %v652_v31, 4  ;;  %v660_v54 = vrot.slane %v658_v33, 5  ;;  %v665_v55 = vrot.slane %v663_v36, 4  ;;  %v7396_v31 = vld [vmem:[%s9769_s1 + $0x8] sm:$0xf] }
  0x37   : > { %v637_v57 = vsel %vm7213_vm4, %v632_v38, %v636_v15  ;;  %v668_v59 = vrot.slane %v666_v44, 5  ;;  %v674_v60 = vrot.slane %v672_v45, 5  ;;  %v676_v52 = vshrl.u32 %v7356_v25, 16  ;;  %9819 = vst [vmem:[#allocation7_spill] sm:$0xff] %v7396_v31  ;;  %6599 = vmatprep.subr.msk.bf16.mxu1 %vm952_vm0, %v7396_v31  ;;  %v7502_v31 = vld [vmem:[%s7164_s28 + $0xa8] sm:$0xf] }
  0x38   : > { %v7383_v62 = vcombine.low %v627_v37, %v637_v57  ;;  %v651_v5 = vsel %vm7213_vm4, %v646_v50, %v650_v29  ;;  %v655_v13 = vor.u32 %v654_v51, %v650_v29  ;;  %v682_v17 = vshll.u32 %v7370_v43, 16  ;;  %v7405_v51 = vld [vmem:[%s7164_s28 + $0x78] sm:$0xf]  ;;  %9829 = vst [vmem:[#allocation17_spill] sm:$0xff] %v7502_v31 }
  0x39   : > { %v669_v27 = vor.u32 %v668_v59, %v665_v55  ;;  %v678_v6 = vrot.slane %v676_v52, 4  ;;  %v687_v15 = vshrl.u32 %v7375_v56, 16  ;;  %v690_v30 = vshll.u32 %v7375_v56, 16 }
  0x3a   : > { %9818 = vst [vmem:[#allocation6_spill] sm:$0xff] %v7383_v62  ;;  %6148 = vmatmul.mubr.msk.bf16.gmra.mrb[8].mxu0 %vm903_vm3, %v7383_v62  ;;  %6015 = vmatprep.mubr.msk.bf16.mxu1 %vm903_vm3, %v7383_v62  ;;  %v656_v29 = vrot.slane %v655_v13, 4  ;;  %v684_v33 = vrot.slane %v682_v17, 5  ;;  %v696_v36 = vshll.u32 %v7381_v61, 16  ;;  %v700_v37 = vshrl.u32 %v7381_v61, 16 }
  0x3b   : > { %v670_v38 = vrot.slane %v669_v27, 4  ;;  %v679_v44 = vor.u32 %v678_v6, %v674_v60  ;;  %v689_v45 = vrot.slane %v687_v15, 4  ;;  %v692_v50 = vrot.slane %v690_v30, 5  ;;  %v7413_v13 = vld [vmem:[%s7164_s28 + $0x7c] sm:$0xf] }
  0x3c   : > { %v661_v55 = vsel %vm7213_vm4, %v656_v29, %v660_v54  ;;  %v698_v57 = vrot.slane %v696_v36, 5  ;;  %v702_v59 = vrot.slane %v700_v37, 4  ;;  %v706_v52 = vshll.u32 %v7389_v22, 16  ;;  %v7475_v62 = vld [vmem:[%s7164_s28 + $0x9c] sm:$0xf] }
  0x3d   : > { %v7415_v17 = vcombine.low %v651_v5, %v661_v55  ;;  %v675_v27 = vsel %vm7213_vm4, %v670_v38, %v674_v60  ;;  %v680_v6 = vrot.slane %v679_v44, 4  ;;  %v693_v15 = vor.u32 %v692_v50, %v689_v45  ;;  %v7433_v38 = vld [vmem:[%s7164_s28 + $0x84] sm:$0xf]  ;;  %9826 = vst [vmem:[#allocation14_spill] sm:$0xff] %v7475_v62 }
  0x3e   : > { %v703_v30 = vor.u32 %v702_v59, %v698_v57  ;;  %v708_v3 = vrot.slane %v706_v52, 5  ;;  %v711_v54 = vshrl.u32 %v7405_v51, 16  ;;  %v714_v29 = vshll.u32 %v7405_v51, 16  ;;  %v7438_v59 = vld [vmem:[%s7164_s28 + $0x88] sm:$0xf] }
  0x3f   : > { %9820 = vst [vmem:[#allocation8_spill] sm:$0xff] %v7415_v17  ;;  %6151 = vmatprep.mubr.msk.bf16.mxu0 %vm903_vm3, %v7415_v17  ;;  %6016 = vmatmul.mubr.msk.bf16.gmra.mrb[12].mxu1 %vm903_vm3, %v7415_v17  ;;  %v685_v60 = vsel %vm7213_vm4, %v680_v6, %v684_v33  ;;  %v694_v5 = vrot.slane %v693_v15, 4  ;;  %v720_v36 = vshll.u32 %v7413_v13, 16  ;;  %v724_v37 = vshrl.u32 %v7413_v13, 16 }
  0x40   : > { %v7435_v44 = vcombine.low %v675_v27, %v685_v60  ;;  %v704_v45 = vrot.slane %v703_v30, 4  ;;  %v713_v50 = vrot.slane %v711_v54, 4  ;;  %v716_v55 = vrot.slane %v714_v29, 5  ;;  %v7450_v54 = vld [vmem:[%s7164_s28 + $0x8c] sm:$0x1] }
  0x41   : > { %v699_v52 = vsel %vm7213_vm4, %v694_v5, %v698_v57  ;;  %v722_v33 = vrot.slane %v720_v36, 5  ;;  %v726_v6 = vrot.slane %v724_v37, 4  ;;  %v730_v15 = vshll.u32 %v7420_v20, 16  ;;  %v7455_v60 = vld [vmem:[%s7164_s28 + $0x90] sm:$0xf] }
  0x42   : > { %9821 = vst [vmem:[#allocation9_spill] sm:$0xff] %v7435_v44  ;;  %6152 = vmatmul.mubr.msk.bf16.gmra.mrb[12].mxu0 %vm903_vm3, %v7435_v44  ;;  %6019 = vmatprep.mubr.msk.bf16.mxu1 %vm903_vm3, %v7435_v44  ;;  %v709_v27 = vsel %vm7213_vm4, %v704_v45, %v708_v3  ;;  %v717_v30 = vor.u32 %v716_v55, %v713_v50  ;;  %v735_v29 = vshrl.u32 %v7433_v38, 16  ;;  %v738_v57 = vshll.u32 %v7433_v38, 16  ;;  %v7462_v50 = vld [vmem:[%s7164_s28 + $0x94] sm:$0xf] }
  0x43   : > { %9822 = vst [vmem:[#allocation10_spill] sm:$0xff] %v7455_v60  ;;  %v7457_v5 = vcombine.low %v699_v52, %v709_v27  ;;  %v727_v36 = vor.u32 %v726_v6, %v722_v33  ;;  %v732_v37 = vrot.slane %v730_v15, 5  ;;  %v744_v46 = vshll.u32 %v7438_v59, 16  ;;  %9824 = vst [vmem:[#allocation12_spill] sm:$0xff] %v7462_v50 }
  0x44   : > { %v718_v2 = vrot.slane %v717_v30, 4  ;;  %v737_v44 = vrot.slane %v735_v29, 4  ;;  %v740_v3 = vrot.slane %v738_v57, 5  ;;  %v748_v45 = vshrl.u32 %v7438_v59, 16  ;;  %v7471_v29 = vld [vmem:[%s7164_s28 + $0x98] sm:$0x1] }
  0x45   : > { %9823 = vst [vmem:[#allocation11_spill] sm:$0xff] %v7457_v5  ;;  %6155 = vmatprep.mubr.msk.bf16.mxu0 %vm903_vm3, %v7457_v5  ;;  %v728_v55 = vrot.slane %v727_v36, 4  ;;  %v746_v17 = vrot.slane %v744_v46, 5  ;;  %v754_v52 = vshll.u32 %v7450_v54, 16  ;;  %v759_v6 = vshrl.u32 %v7455_v60, 16  ;;  %9825 = vst [vmem:[#allocation13_spill] sm:$0xff] %v7471_v29 }
  0x46   : > { %v723_v15 = vsel %vm7213_vm4, %v718_v2, %v722_v33  ;;  %v741_v27 = vor.u32 %v740_v3, %v737_v44  ;;  %v750_v30 = vrot.slane %v748_v45, 4  ;;  %v762_v57 = vshll.u32 %v7455_v60, 16  ;;  %v7485_v45 = vld [vmem:[%s7164_s28 + $0xa0] sm:$0xf]  ;;  %v7516_v60 = vld [vmem:[%s7164_s28 + $0xb0] sm:$0x1] }
  0x47   : > { %6020 = vmatmul.mubr.msk.bf16.gmra.mrb[16].mxu1 %vm903_vm3, %v7457_v5  ;;  %v733_v46 = vsel %vm7213_vm4, %v728_v55, %v732_v37  ;;  %v756_v36 = vrot.slane %v754_v52, 5  ;;  %v761_v26 = vrot.slane %v759_v6, 4  ;;  %v768_v42 = vshll.u32 %v7462_v50, 16 }
  0x48   : > { %v7482_v2 = vcombine.low %v723_v15, %v733_v46  ;;  %v742_v44 = vrot.slane %v741_v27, 4  ;;  %v751_v33 = vor.u32 %v750_v30, %v746_v17  ;;  %v764_v3 = vrot.slane %v762_v57, 5  ;;  %v7497_v15 = vld [vmem:[%s7164_s28 + $0xa4] sm:$0x1] }
  0x49   : > { %v770_v24 = vrot.slane %v768_v42, 5  ;;  %v772_v7 = vshrl.u32 %v7462_v50, 16  ;;  %v778_v5 = vshll.u32 %v7471_v29, 16  ;;  %v783_v37 = vshrl.u32 %v7475_v62, 16  ;;  %9828 = vst [vmem:[#allocation16_spill] sm:$0xff] %v7497_v15 }
  0x4a   : > { %9827 = vst [vmem:[#allocation15_spill] sm:$0xff] %v7482_v2  ;;  %6156 = vmatmul.mubr.msk.bf16.gmra.mrb[16].mxu0 %vm903_vm3, %v7482_v2  ;;  %6023 = vmatprep.mubr.msk.bf16.mxu1 %vm903_vm3, %v7482_v2  ;;  %v747_v55 = vsel %vm7213_vm4, %v742_v44, %v746_v17  ;;  %v752_v52 = vrot.slane %v751_v33, 4  ;;  %v765_v6 = vor.u32 %v764_v3, %v761_v26  ;;  %v786_v42 = vshll.u32 %v7475_v62, 16  ;;  %v7508_v26 = vld [vmem:[%s7164_s28 + $0xac] sm:$0xf] }
  0x4b   : > { %v774_v27 = vrot.slane %v772_v7, 4  ;;  %v780_v30 = vrot.slane %v778_v5, 5  ;;  %v785_v57 = vrot.slane %v783_v37, 4  ;;  %v792_v46 = vshll.u32 %v7485_v45, 16  ;;  %9830 = vst [vmem:[#allocation18_spill] sm:$0xff] %v7508_v26 }
  0x4c   : > { %v757_v2 = vsel %vm7213_vm4, %v752_v52, %v756_v36  ;;  %v766_v29 = vrot.slane %v765_v6, 4  ;;  %v788_v50 = vrot.slane %v786_v42, 5  ;;  %v796_v17 = vshrl.u32 %v7485_v45, 16 }
  0x4d   : > { %v7510_v44 = vcombine.low %v747_v55, %v757_v2  ;;  %v775_v33 = vor.u32 %v774_v27, %v770_v24  ;;  %v794_v7 = vrot.slane %v792_v46, 5  ;;  %v802_v5 = vshll.u32 %v7497_v15, 16  ;;  %v7527_v27 = vld [vmem:[%s7164_s28 + $0xb4] sm:$0xf]  ;;  %v7540_v15 = vld [vmem:[%s7164_s28 + $0xbc] sm:$0x1] }
  0x4e   : > { %v771_v3 = vsel %vm7213_vm4, %v766_v29, %v770_v24  ;;  %v789_v37 = vor.u32 %v788_v50, %v785_v57  ;;  %v798_v62 = vrot.slane %v796_v17, 4  ;;  %v807_v36 = vshrl.u32 %v7502_v31, 16  ;;  %9832 = vst [vmem:[#allocation20_spill] sm:$0xff] %v7527_v27  ;;  %9835 = vst [vmem:[#allocation23_spill] sm:$0xff] %v7540_v15 }
  0x4f   : > { %9831 = vst [vmem:[#allocation19_spill] sm:$0xff] %v7510_v44  ;;  %6159 = vmatprep.mubr.msk.bf16.mxu0 %vm903_vm3, %v7510_v44  ;;  %6024 = vmatmul.mubr.msk.bf16.gmra.mrb[20].mxu1 %vm903_vm3, %v7510_v44  ;;  %v776_v2 = vrot.slane %v775_v33, 4  ;;  %v804_v55 = vrot.slane %v802_v5, 5  ;;  %v810_v52 = vshll.u32 %v7502_v31, 16  ;;  %v816_v24 = vshll.u32 %v7508_v26, 16 }
  0x50   : > { %v790_v50 = vrot.slane %v789_v37, 4  ;;  %v799_v29 = vor.u32 %v798_v62, %v794_v7  ;;  %v809_v6 = vrot.slane %v807_v36, 4  ;;  %v820_v42 = vshrl.u32 %v7508_v26, 16  ;;  %v7533_v5 = vld [vmem:[%s7164_s28 + $0xb8] sm:$0xf] }
  0x51   : > { %v781_v57 = vsel %vm7213_vm4, %v776_v2, %v780_v30  ;;  %v812_v46 = vrot.slane %v810_v52, 5  ;;  %v818_v17 = vrot.slane %v816_v24, 5  ;;  %v826_v33 = vshll.u32 %v7516_v60, 16  ;;  %9833 = vst [vmem:[#allocation21_spill] sm:$0xff] %v7533_v5 }
  0x52   : > { %v7535_v44 = vcombine.low %v771_v3, %v781_v57  ;;  %v795_v62 = vsel %vm7213_vm4, %v790_v50, %v794_v7  ;;  %v800_v37 = vrot.slane %v799_v29, 4  ;;  %v822_v36 = vrot.slane %v820_v42, 4  ;;  %v7553_v50 = vld [vmem:[%s7164_s28 + $0xc0] sm:$0xf] }
  0x53   : > { %v813_v26 = vor.u32 %v812_v46, %v809_v6  ;;  %v828_v31 = vrot.slane %v826_v33, 5  ;;  %v831_v30 = vshrl.u32 %v7527_v27, 16  ;;  %v834_v2 = vshll.u32 %v7527_v27, 16  ;;  %9836 = vst [vmem:[#allocation24_spill] sm:$0xff] %v7553_v50  ;;  %v7558_v46 = vld [vmem:[%s7164_s28 + $0xc4] sm:$0xf] }
  0x54   : > { %9834 = vst [vmem:[#allocation22_spill] sm:$0xff] %v7535_v44  ;;  %6160 = vmatmul.mubr.msk.bf16.gmra.mrb[20].mxu0 %vm903_vm3, %v7535_v44  ;;  %6027 = vmatprep.mubr.msk.bf16.mxu1 %vm903_vm3, %v7535_v44  ;;  %v805_v7 = vsel %vm7213_vm4, %v800_v37, %v804_v55  ;;  %v823_v3 = vor.u32 %v822_v36, %v818_v17  ;;  %v840_v52 = vshll.u32 %v7533_v5, 16  ;;  %v844_v24 = vshrl.u32 %v7533_v5, 16 }
  0x55   : > { %v7555_v29 = vcombine.low %v795_v62, %v805_v7  ;;  %v814_v6 = vrot.slane %v813_v26, 4  ;;  %v833_v42 = vrot.slane %v831_v30, 4  ;;  %v836_v57 = vrot.slane %v834_v2, 5  ;;  %v7568_v26 = vld [vmem:[%s7164_s28 + $0xc8] sm:$0x1] }
  0x56   : > { %v824_v33 = vrot.slane %v823_v3, 4  ;;  %v842_v44 = vrot.slane %v840_v52, 5  ;;  %v846_v27 = vrot.slane %v844_v24, 4  ;;  %v850_v55 = vshll.u32 %v7540_v15, 16 }
  0x57   : > { %9837 = vst [vmem:[#allocation25_spill] sm:$0xff] %v7555_v29  ;;  %6163 = vmatprep.mubr.msk.bf16.mxu0 %vm903_vm3, %v7555_v29  ;;  %6028 = vmatmul.mubr.msk.bf16.gmra.mrb[24].mxu1 %vm903_vm3, %v7555_v29  ;;  %v819_v62 = vsel %vm7213_vm4, %v814_v6, %v818_v17  ;;  %v837_v37 = vor.u32 %v836_v57, %v833_v42  ;;  %v2039_v36 = vshrl.u32 %v7553_v50, 16  ;;  %v2042_v30 = vshll.u32 %v7553_v50, 16 }
  0x58   : > { %v829_v2 = vsel %vm7213_vm4, %v824_v33, %v828_v31  ;;  %v847_v7 = vor.u32 %v846_v27, %v842_v44  ;;  %v852_v3 = vrot.slane %v850_v55, 5  ;;  %v2048_v52 = vshll.u32 %v7558_v46, 16 }
  0x59   : > { %v7575_v24 = vcombine.low %v819_v62, %v829_v2  ;;  %v838_v29 = vrot.slane %v837_v37, 4  ;;  %v2041_v15 = vrot.slane %v2039_v36, 4  ;;  %v2044_v5 = vrot.slane %v2042_v30, 5 }
  0x5a   : > { %v848_v17 = vrot.slane %v847_v7, 4  ;;  %v2050_v6 = vrot.slane %v2048_v52, 5  ;;  %v2052_v42 = vshrl.u32 %v7558_v46, 16  ;;  %v2058_v57 = vshll.u32 %v7568_v26, 16 }
  0x5b   : > { %6031 = vmatprep.mubr.msk.bf16.mxu1 %vm903_vm3, %v7575_v24  ;;  %v843_v31 = vsel %vm7213_vm4, %v838_v29, %v842_v44  ;;  %v2045_v27 = vor.u32 %v2044_v5, %v2041_v15  ;;  %v5525_v33 = vrot.slane %v7189_v16, 9  ;;  %v1437_v55 = vrot.slane %v7192_v18, 5 }
  0x5c   : > { %6164 = vmatmul.mubr.msk.bf16.gmra.mrb[24].mxu0 %vm903_vm3, %v7575_v24  ;;  %v853_v62 = vsel %vm7213_vm4, %v848_v17, %v852_v3  ;;  %v2054_v37 = vrot.slane %v2052_v42, 4  ;;  %v2060_v36 = vrot.slane %v2058_v57, 5  ;;  %v5526_v30 = vrot.slane %v7209_v34, 9 }
  0x5d   : > { %v7596_v2 = vcombine.low %v843_v31, %v853_v62  ;;  %v2046_v7 = vrot.slane %v2045_v27, 4  ;;  %v1438_v15 = vsel %vm7581_vm7, %v5525_v33, %v1437_v55  ;;  %v1439_v44 = vrot.slane %v1437_v55, 4 }
  0x5e   : > { %v2055_v16 = vor.u32 %v2054_v37, %v2050_v6  ;;  %v9840_v18 = vrot.slane %v7222_v40, 5  ;;  %v7608_v52 = vcombine.low %v7209_v34, %v7222_v40  ;;  %v9842_v42 = vrot.slane %v7195_v19, 5 }
  0x5f   : > { %6167 = vmatprep.mubr.msk.bf16.mxu0 %vm903_vm3, %v7596_v2  ;;  %6032 = vmatmul.mubr.msk.bf16.gmra.mrb[28].mxu1 %vm903_vm3, %v7596_v2  ;;  %v2051_v17 = vsel %vm7213_vm4, %v2046_v7, %v2050_v6  ;;  %v5527_v31 = vrot.slane %v7236_v58, 9  ;;  %v1451_v27 = vrot.slane %v7241_v63, 5  ;;  %v9843_v40 = vcombine.low %v7178_v9, %v7181_v10 }
  0x60   : > { %v1445_v5 = vsel %vm7581_vm7, %v5526_v30, %v9840_v18  ;;  %v9841_v29 = vmov %v9840_v18  ;;  %v1441_v57 = vsel %vm7581_vm7, %v1439_v44, %v9842_v42  ;;  %v2056_v34 = vrot.slane %v2055_v16, 4 }
  0x61   : > { %v1446_v3 = vrot.slane %v9841_v29, 4  ;;  %6037 = vmatprep.mubr.msk.bf16.mxu1 %vm903_vm3, %v9843_v40  ;;  %v7626_v33 = vcombine.low %v1438_v15, %v1441_v57  ;;  %v9844_v55 = vrot.slane %v7226_v47, 5  ;;  %v1454_v6 = vrot.slane %v7249_v4, 5 }
  0x62   : > { %v1452_v37 = vsel %vm7581_vm7, %v5527_v31, %v1451_v27  ;;  %v1453_v30 = vrot.slane %v1451_v27, 4  ;;  %v7639_v9 = vcombine.low %v7236_v58, %v7241_v63  ;;  %v2061_v10 = vsel %vm7213_vm4, %v2056_v34, %v2060_v36 }
  0x63   : > { %v1448_v19 = vsel %vm7581_vm7, %v1446_v3, %v9844_v55  ;;  %v5528_v47 = vrot.slane %v7255_v14, 9  ;;  %v1458_v7 = vrot.slane %v7262_v28, 5  ;;  %v1461_v15 = vrot.slane %v7269_v32, 5 }
  0x64   : > { %v7633_v62 = vcombine.low %v1445_v5, %v1448_v19  ;;  %v7646_v4 = vcombine.low %v2051_v17, %v2061_v10  ;;  %v1455_v44 = vsel %vm7581_vm7, %v1453_v30, %v1454_v6  ;;  %v7652_v16 = vcombine.low %v7255_v14, %v7262_v28 }
  0x65   : > { %v5529_v58 = vrot.slane %v7277_v48, 9  ;;  %v7655_v63 = vcombine.low %v1452_v37, %v1455_v44  ;;  %v1459_v36 = vsel %vm7581_vm7, %v5528_v47, %v1458_v7  ;;  %v1460_v18 = vrot.slane %v1458_v7, 4 }
  0x66   : > { %v1465_v5 = vrot.slane %v7283_v53, 5  ;;  %6168 = vmatmul.mubr.msk.bf16.gmra.mrb[28].mxu0 %vm903_vm3, %v7646_v4  ;;  %v1468_v32 = vrot.slane %v7295_v1, 5  ;;  %v7665_v29 = vcombine.low %v7277_v48, %v7283_v53  ;;  %v5530_v14 = vrot.slane %v7300_v12, 9 }
  0x67   : > { %v1472_v28 = vrot.slane %v7307_v23, 5  ;;  %6173 = vmatprep.mubr.msk.bf16.mxu0 %vm903_vm3, %v7626_v33  ;;  %v1462_v3 = vsel %vm7581_vm7, %v1460_v18, %v1461_v15  ;;  %v1475_v1 = vrot.slane %v7324_v8, 5  ;;  %6038 = vmatmul.mubr.msk.bf16.vlgmr.msra.gmra.mrb[0].mxu1 %vm903_vm3, %v7219_v39  ;;  %v7684_v31 = vcombine.low %v7300_v12, %v7307_v23 }
  0x68   : > { %v1466_v17 = vsel %vm7581_vm7, %v5529_v58, %v1465_v5  ;;  %v1467_v42 = vrot.slane %v1465_v5, 4  ;;  %v7678_v48 = vcombine.low %v1459_v36, %v1462_v3  ;;  %6041 = vmatprep.mubr.msk.bf16.mxu1 %vm903_vm3, %v7608_v52  ;;  %v5531_v8 = vrot.slane %v7329_v41, 9 }
  0x69   : > { %v1473_v53 = vsel %vm7581_vm7, %v5530_v14, %v1472_v28  ;;  %v1474_v57 = vrot.slane %v1472_v28, 4  ;;  %v1479_v34 = vrot.slane %v7334_v49, 5  ;;  %v1482_v40 = vrot.slane %v7347_v0, 5 }
  0x6a   : > { %v1469_v27 = vsel %vm7581_vm7, %v1467_v42, %v1468_v32  ;;  %v7699_v12 = vcombine.low %v7329_v41, %v7334_v49  ;;  %v5532_v23 = vrot.slane %v7351_v11, 9  ;;  %v1486_v10 = vrot.slane %v7356_v25, 5 }
  0x6b   : > { %v7693_v55 = vcombine.low %v1466_v17, %v1469_v27  ;;  %v1476_v19 = vsel %vm7581_vm7, %v1474_v57, %v1475_v1  ;;  %v1480_v37 = vsel %vm7581_vm7, %v5531_v8, %v1479_v34  ;;  %v1481_v30 = vrot.slane %v1479_v34, 4  ;;  %v9846_v57 = vld [vmem:[#allocation12_spill] sm:$0xff] }
  0x6c   : > { %v7702_v6 = vcombine.low %v1473_v53, %v1476_v19  ;;  %v1489_v0 = vrot.slane %v7370_v43, 5  ;;  %v7710_v47 = vcombine.low %v7351_v11, %v7356_v25  ;;  %v5533_v7 = vrot.slane %v7375_v56, 9  ;;  %v7722_v43 = vld [vmem:[%s9769_s1 + $0x1c] sm:$0xf] }
  0x6d   : > { %v1493_v41 = vrot.slane %v7381_v61, 5  ;;  %v1483_v49 = vsel %vm7581_vm7, %v1481_v30, %v1482_v40  ;;  %v1487_v15 = vsel %vm7581_vm7, %v5532_v23, %v1486_v10  ;;  %v1488_v44 = vrot.slane %v1486_v10, 4  ;;  %v9847_v19 = vld [vmem:[#allocation13_spill] sm:$0xff]  ;;  %v9848_v10 = vld [vmem:[#allocation14_spill] sm:$0xff] }
  0x6e   : > { %v1496_v58 = vrot.slane %v7389_v22, 5  ;;  %6174 = vmatmul.mubr.msk.bf16.vlgmr.msra.gmra.mrb[0].mxu0 %vm903_vm3, %v7633_v62  ;;  %v7726_v11 = vcombine.low %v1480_v37, %v1483_v49  ;;  %v7732_v18 = vcombine.low %v7375_v56, %v7381_v61  ;;  %v5534_v5 = vrot.slane %v7405_v51, 9 }
  0x6f   : > { %v1494_v25 = vsel %vm7581_vm7, %v5533_v7, %v1493_v41  ;;  %v1495_v36 = vrot.slane %v1493_v41, 4  ;;  %6206 = vmatpush3.bf16.msra.mxu0 %v7201_v21  ;;  %6177 = vmatprep.mubr.msk.bf16.mxu0 %vm903_vm3, %v7655_v63  ;;  %v1490_v22 = vsel %vm7581_vm7, %v1488_v44, %v1489_v0  ;;  %v1500_v32 = vrot.slane %v7413_v13, 5  ;;  %v9849_v41 = vld [vmem:[#allocation16_spill] sm:$0xff] }
  0x70   : > { %v1503_v14 = vrot.slane %v7420_v20, 5  ;;  %6042 = vmatmul.mubr.msk.bf16.gmra.mrb[4].mxu1 %vm903_vm3, %v7639_v9  ;;  %v7744_v28 = vcombine.low %v1487_v15, %v1490_v22  ;;  %v7750_v56 = vcombine.low %v7405_v51, %v7413_v13  ;;  %v5535_v61 = vrot.slane %v7433_v38, 9  ;;  %6604 = vmatprep.subr.msk.bf16.mxu0 %vm952_vm0, %v7722_v43  ;;  %v9845_v13 = vld [vmem:[#allocation10_spill] sm:$0xff] }
  0x71   : > { %v1497_v21 = vsel %vm7581_vm7, %v1495_v36, %v1496_v58  ;;  %6045 = vmatprep.mubr.msk.bf16.mxu1 %vm903_vm3, %v7652_v16  ;;  %v1501_v3 = vsel %vm7581_vm7, %v5534_v5, %v1500_v32  ;;  %v1502_v17 = vrot.slane %v1500_v32, 4  ;;  %v1507_v42 = vrot.slane %v7438_v59, 5 }
  0x72   : > { %v7757_v20 = vcombine.low %v1494_v25, %v1497_v21  ;;  %v1510_v1 = vrot.slane %v7450_v54, 5  ;;  %v7765_v51 = vcombine.low %v7433_v38, %v7438_v59  ;;  %v5536_v53 = vrot.slane %v9845_v13, 9  ;;  %v9850_v25 = vld [vmem:[#allocation17_spill] sm:$0xff] }
  0x73   : > { %v1514_v27 = vrot.slane %v9846_v57, 5  ;;  %v1504_v8 = vsel %vm7581_vm7, %v1502_v17, %v1503_v14  ;;  %v1508_v34 = vsel %vm7581_vm7, %v5535_v61, %v1507_v42  ;;  %v1509_v40 = vrot.slane %v1507_v42, 4  ;;  %v9851_v14 = vld [vmem:[#allocation18_spill] sm:$0xff]  ;;  %v9853_v42 = vld [vmem:[#allocation21_spill] sm:$0xff] }
  0x74   : > { %v1517_v23 = vrot.slane %v9847_v19, 5  ;;  %v7774_v37 = vcombine.low %v1501_v3, %v1504_v8  ;;  %v7780_v59 = vcombine.low %v9845_v13, %v9846_v57  ;;  %v5537_v0 = vrot.slane %v9848_v10, 9  ;;  %v9852_v3 = vld [vmem:[#allocation20_spill] sm:$0xff] }
  0x75   : > { %v1515_v54 = vsel %vm7581_vm7, %v5536_v53, %v1514_v27  ;;  %v1516_v38 = vrot.slane %v1514_v27, 4  ;;  %v1511_v30 = vsel %vm7581_vm7, %v1509_v40, %v1510_v1  ;;  %v1521_v7 = vrot.slane %v7485_v45, 5  ;;  %v9854_v27 = vld [vmem:[#allocation23_spill] sm:$0xff] }
  0x76   : > { %v1524_v49 = vrot.slane %v9849_v41, 5  ;;  %6178 = vmatmul.mubr.msk.bf16.gmra.mrb[4].mxu0 %vm903_vm3, %v7678_v48  ;;  %v7789_v15 = vcombine.low %v1508_v34, %v1511_v30  ;;  %v7795_v58 = vcombine.low %v9848_v10, %v7485_v45  ;;  %v5538_v36 = vrot.slane %v9850_v25, 9 }
  0x77   : > { %v1518_v44 = vsel %vm7581_vm7, %v1516_v38, %v1517_v23  ;;  %6181 = vmatprep.mubr.msk.bf16.mxu0 %vm903_vm3, %v7693_v55  ;;  %v1522_v5 = vsel %vm7581_vm7, %v5537_v0, %v1521_v7  ;;  %v1523_v32 = vrot.slane %v1521_v7, 4  ;;  %v1528_v21 = vrot.slane %v9851_v14, 5  ;;  %v1833_v0 = vld [vmem:[%s9769_s1 + $0xc] sm:$0xf] }
  0x78   : > { %v7800_v22 = vcombine.low %v1515_v54, %v1518_v44  ;;  %6046 = vmatmul.mubr.msk.bf16.gmra.mrb[8].mxu1 %vm903_vm3, %v7665_v29  ;;  %v1531_v61 = vrot.slane %v7516_v60, 5  ;;  %v7810_v45 = vcombine.low %v9850_v25, %v9851_v14  ;;  %v5539_v17 = vrot.slane %v9852_v3, 9  ;;  %v9855_v54 = vld [vmem:[#allocation24_spill] sm:$0xff] }
  0x79   : > { %v1535_v1 = vrot.slane %v9853_v42, 5  ;;  %6049 = vmatprep.mubr.msk.bf16.mxu1 %vm903_vm3, %v7684_v31  ;;  %v1525_v13 = vsel %vm7581_vm7, %v1523_v32, %v1524_v49  ;;  %v1529_v53 = vsel %vm7581_vm7, %v5538_v36, %v1528_v21  ;;  %v1530_v57 = vrot.slane %v1528_v21, 4  ;;  %v9856_v49 = vld [vmem:[#allocation7_spill] sm:$0xff] }
  0x7a   : > { %v1538_v60 = vrot.slane %v9854_v27, 5  ;;  %v7821_v8 = vcombine.low %v1522_v5, %v1525_v13  ;;  %v7827_v19 = vcombine.low %v9852_v3, %v9853_v42  ;;  %v5606_v38 = vrot.slane %v9855_v54, 9 }
  0x7b   : > { %v1536_v34 = vsel %vm7581_vm7, %v5539_v17, %v1535_v1  ;;  %v1537_v40 = vrot.slane %v1535_v1, 4  ;;  %v1532_v23 = vsel %vm7581_vm7, %v1530_v57, %v1531_v61  ;;  %v2268_v30 = vrot.slane %v7558_v46, 5  ;;  %v7036_v61 = vld [vmem:[%s7164_s28 + $0x8] sm:$0x1]  ;;  %v7037_v17 = vld [vmem:[%s7164_s28] sm:$0xf] }
  0x7c   : > { %v2271_v10 = vrot.slane %v7568_v26, 5  ;;  %v7837_v7 = vcombine.low %v1529_v53, %v1532_v23  ;;  %v1638_v44 = vsel %vm952_vm0, %v9856_v49, 0  ;;  %v7851_v26 = vcombine.low %v9855_v54, %v7558_v46  ;;  %v7035_v46 = vld [vmem:[%s7164_s28 + $0x4] sm:$0xf] }
  0x7d   : > { %v1539_v41 = vsel %vm7581_vm7, %v1537_v40, %v1538_v60  ;;  %v2269_v36 = vsel %vm7581_vm7, %v5606_v38, %v2268_v30  ;;  %v2270_v5 = vrot.slane %v2268_v30, 4  ;;  %6070 = vmatpush3.bf16.msra.mxu1 %v1638_v44  ;;  %v1430_v21 = vrot.slane %v7035_v46, 5  ;;  %v9857_v23 = vld [vmem:[#allocation2_spill] sm:$0xff]  ;;  %v9858_v38 = vld [vmem:[#allocation3_spill] sm:$0xff]  ;;  %v9860_v30 = vld [vmem:[#allocation5_spill] sm:$0xff] }
  0x7e   : > { %v7843_v25 = vcombine.low %v1536_v34, %v1539_v41  ;;  %6182 = vmatmul.mubr.msk.bf16.gmra.mrb[8].mxu0 %vm903_vm3, %v7702_v6  ;;  %6600 = vmatprep.subr.msk.bf16.mxu1 %vm952_vm0, %v1833_v0  ;;  %v1433_v3 = vrot.slane %v7036_v61, 5  ;;  %v5524_v42 = vrot.slane %v7037_v17, 9  ;;  %v1843_v27 = vsel %vm952_vm0, %v1833_v0, 0  ;;  %v2916_v34 = vld [vmem:[%s9769_s1 + $0x20] sm:$0xf] }
  0x7f   : > { %6185 = vmatprep.mubr.msk.bf16.mxu0 %vm903_vm3, %v7726_v11  ;;  %v2272_v32 = vsel %vm7581_vm7, %v2270_v5, %v2271_v10  ;;  %v1432_v1 = vrot.slane %v1430_v21, 4  ;;  %v2713_v60 = vsel %vm952_vm0, %v7722_v43, 0  ;;  %v7973_v43 = vld [vmem:[%s7164_s28 + $0xd0] sm:$0xf]  ;;  %v2924_v54 = vsel %vm952_vm0, %v2916_v34, 0  ;;  %v9863_v10 = vld [vmem:[#allocation9_spill] sm:$0xff] }
  0x80   : > { %6050 = vmatmul.mubr.msk.bf16.gmra.mrb[12].mxu1 %vm903_vm3, %v7699_v12  ;;  %v7860_v14 = vcombine.low %v2269_v36, %v2272_v32  ;;  %v1431_v13 = vsel %vm7581_vm7, %v5524_v42, %v1430_v21  ;;  %v9867_v0 = vld [vmem:[#allocation22_spill] sm:$0xff]  ;;  %v2691_v41 = vshll.u32 %v7973_v43, 16  ;;  %v465_v36 = vld [vmem:[%s7164_s28 + $0xd4] sm:$0x1]  ;;  %v9868_v5 = vld [vmem:[#allocation25_spill] sm:$0xff]  ;;  %v2911_v35 = vrot.slane %v7973_v43, 5 }
  0x81   : > { %6053 = vmatprep.mubr.msk.bf16.mxu1 %vm903_vm3, %v7710_v47  ;;  %v1434_v53 = vsel %vm7581_vm7, %v1432_v1, %v1433_v3  ;;  %v2701_v21 = vshll.u32 %v465_v36, 16 }
  0x82   : > { %v5540_v57 = vcombine.low %v1431_v13, %v1434_v53  ;;  %v2693_v49 = vrot.slane %v2691_v41, 5 }
  0x83   : > { %v2703_v61 = vrot.slane %v2701_v21, 5 }
  0x86   : > { %6186 = vmatmul.mubr.msk.bf16.gmra.mrb[12].mxu0 %vm903_vm3, %v7744_v28 }
  0x87   : > { %6189 = vmatprep.mubr.msk.bf16.mxu0 %vm903_vm3, %v7757_v20 }
  0x88   : > { %6054 = vmatmul.mubr.msk.bf16.gmra.mrb[16].mxu1 %vm903_vm3, %v7732_v18 }
  0x89   : > { %6057 = vmatprep.mubr.msk.bf16.mxu1 %vm903_vm3, %v7750_v56 }
  0x8e   : > { %6190 = vmatmul.mubr.msk.bf16.gmra.mrb[16].mxu0 %vm903_vm3, %v7774_v37 }
  0x8f   : > { %6193 = vmatprep.mubr.msk.bf16.mxu0 %vm903_vm3, %v7789_v15 }
  0x90   : > { %6058 = vmatmul.mubr.msk.bf16.gmra.mrb[20].mxu1 %vm903_vm3, %v7765_v51 }
  0x91   : > { %6061 = vmatprep.mubr.msk.bf16.mxu1 %vm903_vm3, %v7780_v59 }
  0x96   : > { %6194 = vmatmul.mubr.msk.bf16.gmra.mrb[20].mxu0 %vm903_vm3, %v7800_v22 }
  0x97   : > { %6197 = vmatprep.mubr.msk.bf16.mxu0 %vm903_vm3, %v7821_v8 }
  0x98   : > { %6062 = vmatmul.mubr.msk.bf16.gmra.mrb[24].mxu1 %vm903_vm3, %v7795_v58 }
  0x99   : > { %6065 = vmatprep.mubr.msk.bf16.mxu1 %vm903_vm3, %v7810_v45 }
  0x9e   : > { %6198 = vmatmul.mubr.msk.bf16.gmra.mrb[24].mxu0 %vm903_vm3, %v7837_v7 }
  0x9f   : > { %6201 = vmatprep.mubr.msk.bf16.mxu0 %vm903_vm3, %v7843_v25 }
  0xa0   : > { %6066 = vmatmul.mubr.msk.bf16.gmra.mrb[28].mxu1 %vm903_vm3, %v7827_v19 }
  0xa1   : > { %6071 = vmatprep.mubr.msk.bf16.mxu1 %vm903_vm3, %v5540_v57 }
  0xa6   : > { %6202 = vmatmul.mubr.msk.bf16.gmra.mrb[28].mxu0 %vm903_vm3, %v7860_v14 }
  0xa7   : > { %6207 = vmatprep.mubr.msk.bf16.mxu0 %vm903_vm3, %v7608_v52 }
  0xa8   : > { %6072 = vmatmul.mubr.msk.bf16.vlgmr.msra.gmra.mrb[0].mxu1 %vm903_vm3, %v7626_v33  ;;  %v7970_v33 = vld [vmem:[%s7164_s28 + $0xcc] sm:$0xf]  ;;  %s9267_s28 = scalar_lea.vmem %s9777_s9, %s5797_s25 }
  0xa9   : > { %6075 = vmatprep.mubr.msk.bf16.mxu1 %vm903_vm3, %v7633_v62  ;;  %6104 = vmatpush3.bf16.msra.mxu1 %v1843_v27  ;;  %v5624_v40 = vcombine.low %v7970_v33, %v7973_v43 }
  0xae   : > { %6208 = vmatmul.mubr.msk.bf16.vlgmr.msra.gmra.mrb[0].mxu0 %vm903_vm3, %v7639_v9 }
  0xaf   : > { %6240 = vmatpush3.bf16.msra.mxu0 %v2713_v60  ;;  %6211 = vmatprep.mubr.msk.bf16.mxu0 %vm903_vm3, %v7652_v16 }
  0xb0   : > { %6076 = vmatmul.mubr.msk.bf16.gmra.mrb[4].mxu1 %vm903_vm3, %v7655_v63  ;;  %6605 = vmatprep.subr.msk.bf16.mxu0 %vm952_vm0, %v2916_v34 }
  0xb1   : > { %6079 = vmatprep.mubr.msk.bf16.mxu1 %vm903_vm3, %v7678_v48 }
  0xb6   : > { %6212 = vmatmul.mubr.msk.bf16.gmra.mrb[4].mxu0 %vm903_vm3, %v7665_v29 }
  0xb7   : > { %6215 = vmatprep.mubr.msk.bf16.mxu0 %vm903_vm3, %v7684_v31 }
  0xb8   : > { %6080 = vmatmul.mubr.msk.bf16.gmra.mrb[8].mxu1 %vm903_vm3, %v7693_v55 }
  0xb9   : > { %6083 = vmatprep.mubr.msk.bf16.mxu1 %vm903_vm3, %v7702_v6 }
  0xbe   : > { %6216 = vmatmul.mubr.msk.bf16.gmra.mrb[8].mxu0 %vm903_vm3, %v7699_v12 }
  0xbf   : > { %6219 = vmatprep.mubr.msk.bf16.mxu0 %vm903_vm3, %v7710_v47 }
  0xc0   : > { %6084 = vmatmul.mubr.msk.bf16.gmra.mrb[12].mxu1 %vm903_vm3, %v7726_v11 }
  0xc1   : > { %6087 = vmatprep.mubr.msk.bf16.mxu1 %vm903_vm3, %v7744_v28 }
  0xc6   : > { %6220 = vmatmul.mubr.msk.bf16.gmra.mrb[12].mxu0 %vm903_vm3, %v7732_v18 }
  0xc7   : > { %6223 = vmatprep.mubr.msk.bf16.mxu0 %vm903_vm3, %v7750_v56 }
  0xc8   : > { %6088 = vmatmul.mubr.msk.bf16.gmra.mrb[16].mxu1 %vm903_vm3, %v7757_v20 }
  0xc9   : > { %6091 = vmatprep.mubr.msk.bf16.mxu1 %vm903_vm3, %v7774_v37 }
  0xce   : > { %6224 = vmatmul.mubr.msk.bf16.gmra.mrb[16].mxu0 %vm903_vm3, %v7765_v51 }
  0xcf   : > { %6227 = vmatprep.mubr.msk.bf16.mxu0 %vm903_vm3, %v7780_v59 }
  0xd0   : > { %6092 = vmatmul.mubr.msk.bf16.gmra.mrb[20].mxu1 %vm903_vm3, %v7789_v15 }
  0xd1   : > { %6095 = vmatprep.mubr.msk.bf16.mxu1 %vm903_vm3, %v7800_v22 }
  0xd6   : > { %6228 = vmatmul.mubr.msk.bf16.gmra.mrb[20].mxu0 %vm903_vm3, %v7795_v58 }
  0xd7   : > { %6231 = vmatprep.mubr.msk.bf16.mxu0 %vm903_vm3, %v7810_v45 }
  0xd8   : > { %6096 = vmatmul.mubr.msk.bf16.gmra.mrb[24].mxu1 %vm903_vm3, %v7821_v8 }
  0xd9   : > { %6099 = vmatprep.mubr.msk.bf16.mxu1 %vm903_vm3, %v7837_v7 }
  0xde   : > { %6232 = vmatmul.mubr.msk.bf16.gmra.mrb[24].mxu0 %vm903_vm3, %v7827_v19 }
  0xdf   : > { %6235 = vmatprep.mubr.msk.bf16.mxu0 %vm903_vm3, %v7851_v26 }
  0xe0   : > { %6100 = vmatmul.mubr.msk.bf16.gmra.mrb[28].mxu1 %vm903_vm3, %v7843_v25 }
  0xe1   : > { %6105 = vmatprep.mubr.msk.bf16.mxu1 %vm903_vm3, %v7219_v39  ;;  %v9859_v39 = vld [vmem:[#allocation4_spill] sm:$0xff] }
  0xe6   : > { %6236 = vmatmul.mubr.msk.bf16.gmra.mrb[28].mxu0 %vm903_vm3, %v5624_v40 }
  0xe7   : > { %6241 = vmatprep.mubr.msk.bf16.mxu0 %vm903_vm3, %v9857_v23 }
  0xe8   : > { %6106 = vmatmul.mubr.msk.bf16.vlgmr.msra.gmra.mrb[0].mxu1 %vm903_vm3, %v7608_v52  ;;  %v9861_v52 = vld [vmem:[#allocation6_spill] sm:$0xff] }
  0xe9   : > { %6109 = vmatprep.mubr.msk.bf16.mxu1 %vm903_vm3, %v7639_v9  ;;  %v9862_v9 = vld [vmem:[#allocation8_spill] sm:$0xff] }
  0xee   : > { %6242 = vmatmul.mubr.msk.bf16.vlgmr.msra.gmra.mrb[0].mxu0 %vm903_vm3, %v9858_v38 }
  0xef   : > { %6274 = vmatpush3.bf16.msra.mxu0 %v2924_v54  ;;  %6245 = vmatprep.mubr.msk.bf16.mxu0 %vm903_vm3, %v9859_v39 }
  0xf0   : > { %6110 = vmatmul.mubr.msk.bf16.gmra.mrb[4].mxu1 %vm903_vm3, %v7652_v16  ;;  %v9864_v16 = vld [vmem:[#allocation11_spill] sm:$0xff] }
  0xf1   : > { %6113 = vmatprep.mubr.msk.bf16.mxu1 %vm903_vm3, %v7665_v29  ;;  %v9865_v29 = vld [vmem:[#allocation15_spill] sm:$0xff] }
  0xf6   : > { %6246 = vmatmul.mubr.msk.bf16.gmra.mrb[4].mxu0 %vm903_vm3, %v9860_v30 }
  0xf7   : > { %6249 = vmatprep.mubr.msk.bf16.mxu0 %vm903_vm3, %v9861_v52 }
  0xf8   : > { %6114 = vmatmul.mubr.msk.bf16.gmra.mrb[8].mxu1 %vm903_vm3, %v7684_v31  ;;  %v9866_v31 = vld [vmem:[#allocation19_spill] sm:$0xff] }
  0xf9   : > { %6117 = vmatprep.mubr.msk.bf16.mxu1 %vm903_vm3, %v7699_v12  ;;  %v2682_v12 = vshrl.u32 %v7970_v33, 16 }
  0xfe   : > { %6250 = vmatmul.mubr.msk.bf16.gmra.mrb[8].mxu0 %vm903_vm3, %v9862_v9 }
  0xff   : > { %6253 = vmatprep.mubr.msk.bf16.mxu0 %vm903_vm3, %v9863_v10  ;;  %v8141_v10 = vld [vmem:[%s9770_s2] ss:$0 sm:$0xff] }
 0x100   : > { %6118 = vmatmul.mubr.msk.bf16.gmra.mrb[12].mxu1 %vm903_vm3, %v7710_v47  ;;  %v2685_v47 = vshll.u32 %v7970_v33, 16 }
 0x101   : > { %6121 = vmatprep.mubr.msk.bf16.mxu1 %vm903_vm3, %v7732_v18  ;;  %v2695_v18 = vshrl.u32 %v7973_v43, 16 }
 0x103   : > { %v2697_v44 = vrot.slane %v2695_v18, 4 }
 0x105   : > { %v2698_v46 = vor.u32 %v2697_v44, %v2693_v49 }
 0x106   : > { %6254 = vmatmul.mubr.msk.bf16.gmra.mrb[12].mxu0 %vm903_vm3, %v9864_v16 }
 0x107   : > { %6257 = vmatprep.mubr.msk.bf16.mxu0 %vm903_vm3, %v9865_v29 }
 0x108   : > { %6122 = vmatmul.mubr.msk.bf16.gmra.mrb[16].mxu1 %vm903_vm3, %v7750_v56  ;;  %v2684_v56 = vrot.slane %v2682_v12, 4 }
 0x109   : > { %6125 = vmatprep.mubr.msk.bf16.mxu1 %vm903_vm3, %v7765_v51  ;;  %v2687_v51 = vrot.slane %v2685_v47, 5 }
 0x10b   : > { %v2688_v32 = vor.u32 %v2687_v51, %v2684_v56 }
 0x10e   : > { %6258 = vmatmul.mubr.msk.bf16.gmra.mrb[16].mxu0 %vm903_vm3, %v9866_v31 }
 0x10f   : > { %6261 = vmatprep.mubr.msk.bf16.mxu0 %vm903_vm3, %v9867_v0 }
 0x110   : > { %6126 = vmatmul.mubr.msk.bf16.gmra.mrb[20].mxu1 %vm903_vm3, %v7780_v59  ;;  %v2689_v59 = vrot.slane %v2688_v32, 4 }
 0x111   : > { %6129 = vmatprep.mubr.msk.bf16.mxu1 %vm903_vm3, %v7795_v58  ;;  %v2699_v58 = vrot.slane %v2698_v46, 4 }
 0x113   : > { %v2704_v3 = vsel %vm7213_vm4, %v2699_v58, %v2703_v61 }
 0x116   : > { %6262 = vmatmul.mubr.msk.bf16.gmra.mrb[20].mxu0 %vm903_vm3, %v9868_v5 }
 0x117   : > { %6265 = vmatprep.mubr.msk.bf16.mxu0 %vm903_vm3, %v7575_v24  ;;  %v2694_v24 = vsel %vm7213_vm4, %v2689_v59, %v2693_v49 }
 0x118   : > { %6130 = vmatmul.mubr.msk.bf16.gmra.mrb[24].mxu1 %vm903_vm3, %v7810_v45  ;;  %v5641_v45 = vcombine.low %v2694_v24, %v2704_v3 }
 0x119   : > { %6133 = vmatprep.mubr.msk.bf16.mxu1 %vm903_vm3, %v7827_v19 }
 0x11e   : > { %6266 = vmatmul.mubr.msk.bf16.gmra.mrb[24].mxu0 %vm903_vm3, %v7596_v2  ;;  %v5658_v2 = vrot.slane %v7970_v33, 9 }
 0x11f   : > { %6269 = vmatprep.mubr.msk.bf16.mxu0 %vm903_vm3, %v7646_v4  ;;  %v2914_v4 = vrot.slane %v465_v36, 5 }
 0x120   : > { %6134 = vmatmul.mubr.msk.bf16.gmra.mrb[28].mxu1 %vm903_vm3, %v7851_v26 }
 0x126   : > { %6270 = vmatmul.mubr.msk.bf16.gmra.mrb[28].mxu0 %vm903_vm3, %v5641_v45 }
 0x127   : > { %6275 = vmatprep.mubr.msk.bf16.mxu0 %vm903_vm3, %v7633_v62  ;;  %v2913_v62 = vrot.slane %v2911_v35, 4 }
 0x12e   : > { %6276 = vmatmul.mubr.msk.bf16.vlgmr.msra.gmra.mrb[0].mxu0 %vm903_vm3, %v7655_v63  ;;  %v2912_v63 = vsel %vm7581_vm7, %v5658_v2, %v2911_v35 }
 0x12f   : > { %6279 = vmatprep.mubr.msk.bf16.mxu0 %vm903_vm3, %v7678_v48  ;;  %v2915_v48 = vsel %vm7581_vm7, %v2913_v62, %v2914_v4 }
 0x136   : > { %6280 = vmatmul.mubr.msk.bf16.gmra.mrb[4].mxu0 %vm903_vm3, %v7693_v55  ;;  %v5659_v55 = vcombine.low %v2912_v63, %v2915_v48 }
 0x137   : > { %6283 = vmatprep.mubr.msk.bf16.mxu0 %vm903_vm3, %v7702_v6 }
 0x13e   : > { %6284 = vmatmul.mubr.msk.bf16.gmra.mrb[8].mxu0 %vm903_vm3, %v7726_v11 }
 0x13f   : > { %6287 = vmatprep.mubr.msk.bf16.mxu0 %vm903_vm3, %v7744_v28 }
 0x146   : > { %6288 = vmatmul.mubr.msk.bf16.gmra.mrb[12].mxu0 %vm903_vm3, %v7757_v20 }
 0x147   : > { %6291 = vmatprep.mubr.msk.bf16.mxu0 %vm903_vm3, %v7774_v37 }
 0x14e   : > { %6292 = vmatmul.mubr.msk.bf16.gmra.mrb[16].mxu0 %vm903_vm3, %v7789_v15 }
 0x14f   : > { %6295 = vmatprep.mubr.msk.bf16.mxu0 %vm903_vm3, %v7800_v22 }
 0x156   : > { %6296 = vmatmul.mubr.msk.bf16.gmra.mrb[20].mxu0 %vm903_vm3, %v7821_v8 }
 0x157   : > { %6299 = vmatprep.mubr.msk.bf16.mxu0 %vm903_vm3, %v7837_v7 }
 0x15e   : > { %6300 = vmatmul.mubr.msk.bf16.gmra.mrb[24].mxu0 %vm903_vm3, %v7843_v25 }
 0x15f   : > { %6303 = vmatprep.mubr.msk.bf16.mxu0 %vm903_vm3, %v7860_v14 }
 0x166   : > { %6304 = vmatmul.mubr.msk.bf16.gmra.mrb[28].mxu0 %vm903_vm3, %v5659_v55 }
 0x1bb   : > { %v6107_v6 = vpop.f32.mrb[0].mxu1 }
 0x1bc   : > { %v1879_v11 = vpop.f32.mrb[1].mxu1 }
 0x1bd   : > { %v6108_v28 = vpop.f32.mrb[2].mxu1 }
 0x1be   : > { %v1882_v20 = vpop.f32.mrb[3].mxu1 }
 0x1c3   : > { %v6111_v37 = vpop.f32.mrb[4].mxu1 }
 0x1c4   : > { %v1895_v15 = vpop.f32.mrb[5].mxu1 }
 0x1c5   : > { %v6112_v22 = vpop.f32.mrb[6].mxu1 }
 0x1c6   : > { %v1898_v8 = vpop.f32.mrb[7].mxu1 }
 0x1cb   : > { %v8090_v19 = vpop.f32.mrb[8].mxu1 }
 0x1cc   : > { %v8092_v7 = vpop.f32.mrb[9].mxu1 }
 0x1cd   : > { %v8094_v25 = vpop.f32.mrb[10].mxu1 }
 0x1ce   : > { %v8096_v26 = vpop.f32.mrb[11].mxu1 }
 0x1d3   : > { %v8098_v50 = vpop.f32.mrb[12].mxu1 }
 0x1d4   : > { %v8100_v14 = vpop.f32.mrb[13].mxu1 }
 0x1d5   : > { %v8102_v17 = vpop.f32.mrb[14].mxu1 }
 0x1d6   : > { %v8104_v42 = vpop.f32.mrb[15].mxu1 }
 0x1db   : > { %v8106_v1 = vpop.f32.mrb[16].mxu1 }
 0x1dc   : > { %v8108_v13 = vpop.f32.mrb[17].mxu1 }
 0x1dd   : > { %v8110_v53 = vpop.f32.mrb[18].mxu1 }
 0x1de   : > { %v8112_v57 = vpop.f32.mrb[19].mxu1 }
 0x1e3   : > { %v8114_v27 = vpop.f32.mrb[20].mxu1 }
 0x1e4   : > { %v8116_v60 = vpop.f32.mrb[21].mxu1 }
 0x1e5   : > { %v8118_v34 = vpop.f32.mrb[22].mxu1 }
 0x1e6   : > { %v8120_v33 = vpop.f32.mrb[23].mxu1 }
 0x1eb   : > { %v8122_v43 = vpop.f32.mrb[24].mxu1 }
 0x1ec   : > { %v8124_v40 = vpop.f32.mrb[25].mxu1 }
 0x1ed   : > { %v8126_v23 = vpop.f32.mrb[26].mxu1 }
 0x1ee   : > { %v8128_v54 = vpop.f32.mrb[27].mxu1 }
 0x1f3   : > { %v8130_v38 = vpop.f32.mrb[28].mxu1 }
 0x1f4   : > { %v8132_v39 = vpop.f32.mrb[29].mxu1 }
 0x1f5   : > { %v8134_v30 = vpop.f32.mrb[30].mxu1 }
 0x1f6   : > { %v8136_v52 = vpop.f32.mrb[31].mxu1 }
 0x201   : > { %v6277_v9 = vpop.f32.mrb[0].mxu0 }
 0x202   : > { %v6341_v16 = vadd.f32 %v6277_v9, %v6107_v6  ;;  %v2960_v29 = vpop.f32.mrb[1].mxu0 }
 0x203   : > { %v6342_v31 = vadd.f32 %v2960_v29, %v1879_v11  ;;  %v6278_v12 = vpop.f32.mrb[2].mxu0 }
 0x204   : > { %v8144_v47 = vadd.f32 %v6341_v16, %v8141_v10  ;;  %v6343_v18 = vadd.f32 %v6278_v12, %v6108_v28  ;;  %v2963_v0 = vpop.f32.mrb[3].mxu0 }
 0x205   : > { %v8147_v41 = vadd.f32 %v6342_v31, %v8141_v10  ;;  %v6344_v56 = vadd.f32 %v2963_v0, %v1882_v20 }
 0x206   : > { %v8150_v51 = vadd.f32 %v6343_v18, %v8141_v10  ;;  %v3167_v49 = vsel %vm3160_vm8, %v8144_v47, 0.0  ;;  %v3292_v36 = vmul.f32 %v8144_v47, %v8144_v47 }
 0x207   : > { %3168 = vadd.xlane.f32.xlu1 %v3167_v49  ;;  %v3161_v44 = vsel %vm3160_vm8, %v8147_v41, 0.0  ;;  %v8159_v32 = vadd.f32 %v6344_v56, %v8141_v10  ;;  %v3290_v48 = vmul.f32 %v8147_v41, %v8147_v41 }
 0x208   : > { %3162 = vadd.xlane.f32.xlu0 %v3161_v44  ;;  %v3170_v59 = vsel %vm3160_vm8, %v8150_v51, 0.0  ;;  %v3293_v58 = vmul.f32 %v8150_v51, %v8150_v51  ;;  %v3328_v3 = vsel %vm3160_vm8, %v3292_v36, 0.0 }
 0x209   : > { %v6281_v5 = vpop.f32.mrb[4].mxu0  ;;  %v3291_v4 = vmul.f32 %v8159_v32, %v8159_v32  ;;  %v3164_v63 = vsel %vm3160_vm8, %v8159_v32, 0.0 }
 0x20a   : > { %v6345_v46 = vadd.f32 %v6281_v5, %v6111_v37  ;;  %v2976_v21 = vpop.f32.mrb[5].mxu0  ;;  %v3331_v62 = vsel %vm3160_vm8, %v3293_v58, 0.0 }
 0x20b   : > { %v6346_v61 = vadd.f32 %v2976_v21, %v1895_v15  ;;  %v6282_v24 = vpop.f32.mrb[6].mxu0  ;;  %3171 = vadd.xlane.f32.xlu1 %v3170_v59  ;;  %v3325_v20 = vsel %vm3160_vm8, %v3291_v4, 0.0 }
 0x20c   : > { %v6347_v45 = vadd.f32 %v6282_v24, %v6112_v22  ;;  %v2979_v35 = vpop.f32.mrb[7].mxu0  ;;  %3329 = vadd.xlane.f32.xlu0 %v3328_v3  ;;  %v8179_v37 = vadd.f32 %v6345_v46, %v8141_v10 }
 0x20d   : > { %v6348_v2 = vadd.f32 %v2979_v35, %v1898_v8  ;;  %v3322_v8 = vsel %vm3160_vm8, %v3290_v48, 0.0  ;;  %v8191_v12 = vadd.f32 %v6346_v61, %v8141_v10 }
 0x20e   : > { %v8174_v6 = vadd.f32 %v6347_v45, %v8141_v10  ;;  %v3296_v5 = vmul.f32 %v8179_v37, %v8179_v37 }
 0x20f   : > { %3332 = vadd.xlane.f32.xlu1 %v3331_v62  ;;  %v3173_v36 = vsel %vm3160_vm8, %v8191_v12, 0.0  ;;  %v3294_v24 = vmul.f32 %v8191_v12, %v8191_v12 }
 0x210   : > { %3165 = vadd.xlane.f32.xlu0 %v3164_v63  ;;  %v3182_v31 = vsel %vm3160_vm8, %v8174_v6, 0.0  ;;  %v3297_v56 = vmul.f32 %v8174_v6, %v8174_v6  ;;  %v3340_v61 = vsel %vm3160_vm8, %v3296_v5, 0.0 }
 0x211   : > { %v6285_v55 = vpop.f32.mrb[8].mxu0  ;;  %v3334_v63 = vsel %vm3160_vm8, %v3294_v24, 0.0 }
 0x212   : > { %v6349_v11 = vadd.f32 %v6285_v55, %v8090_v19  ;;  %v2992_v28 = vpop.f32.mrb[9].mxu0  ;;  %v8186_v19 = vadd.f32 %v6348_v2, %v8141_v10 }
 0x213   : > { %v6350_v15 = vadd.f32 %v2992_v28, %v8092_v7  ;;  %v6286_v22 = vpop.f32.mrb[10].mxu0  ;;  %3326 = vadd.xlane.f32.xlu1 %v3325_v20  ;;  %v3179_v7 = vsel %vm3160_vm8, %v8179_v37, 0.0 }
 0x214   : > { %v6351_v9 = vadd.f32 %v6286_v22, %v8094_v25  ;;  %v2995_v16 = vpop.f32.mrb[11].mxu0  ;;  %3323 = vadd.xlane.f32.xlu0 %v3322_v8  ;;  %v3295_v58 = vmul.f32 %v8186_v19, %v8186_v19  ;;  %v8228_v2 = vadd.f32 %v6349_v11, %v8141_v10 }
 0x215   : > { %v6352_v29 = vadd.f32 %v2995_v16, %v8096_v26  ;;  %v3176_v26 = vsel %vm3160_vm8, %v8186_v19, 0.0  ;;  %v8249_v8 = vadd.f32 %v6350_v15, %v8141_v10 }
 0x216   : > { %v8223_v3 = vadd.f32 %v6351_v9, %v8141_v10  ;;  %v3337_v35 = vsel %vm3160_vm8, %v3295_v58, 0.0  ;;  %v3191_v9 = vsel %vm3160_vm8, %v8228_v2, 0.0 }
 0x217   : > { %3183 = vadd.xlane.f32.xlu1 %v3182_v31  ;;  %v8241_v11 = vadd.f32 %v6352_v29, %v8141_v10  ;;  %v3298_v58 = vmul.f32 %v8249_v8, %v8249_v8 }
 0x218   : > { %3180 = vadd.xlane.f32.xlu0 %v3179_v7  ;;  %v3194_v22 = vsel %vm3160_vm8, %v8223_v3, 0.0  ;;  %v3301_v7 = vmul.f32 %v8223_v3, %v8223_v3 }
 0x219   : > { %v6289_v18 = vpop.f32.mrb[12].mxu0  ;;  %v3188_v31 = vsel %vm3160_vm8, %v8241_v11, 0.0 }
 0x21a   : > { %v8196_v25 = vadd.f32 %v6289_v18, %v8098_v50  ;;  %v3008_v0 = vpop.f32.mrb[13].mxu0  ;;  %v6650_v50 = vld [vmem:[%s9773_s5] sm:$0xff]  }
 0x21b   : > { %v8203_v49 = vadd.f32 %v3008_v0, %v8100_v14  ;;  %v6290_v44 = vpop.f32.mrb[14].mxu0  ;;  %3177 = vadd.xlane.f32.xlu1 %v3176_v26  ;;  %6307 = vmatprep.subr.bf16.mxu1 %v6650_v50  ;;  %v3343_v14 = vsel %vm3160_vm8, %v3297_v56, 0.0  ;;  %v3185_v0 = vsel %vm3160_vm8, %v8249_v8, 0.0  ;;  %v3300_v26 = vmul.f32 %v8228_v2, %v8228_v2 }
 0x21c   : > { %v6355_v46 = vadd.f32 %v6290_v44, %v8102_v17  ;;  %v3011_v21 = vpop.f32.mrb[15].mxu0  ;;  %3174 = vadd.xlane.f32.xlu0 %v3173_v36  ;;  %6308 = vmatpush3.bf16.msra.mxu1 %v6650_v50  ;;  %v3355_v50 = vsel %vm3160_vm8, %v3301_v7, 0.0 }
 0x21d   : > { %v8214_v59 = vadd.f32 %v3011_v21, %v8104_v42  ;;  %v3299_v21 = vmul.f32 %v8241_v11, %v8241_v11 }
 0x21f   : > { %3344 = vadd.xlane.f32.xlu1 %v3343_v14 }
 0x220   : > { %3341 = vadd.xlane.f32.xlu0 %v3340_v61 }
 0x221   : > { %v6293_v17 = vpop.f32.mrb[16].mxu0 }
 0x222   : > { %v6357_v42 = vadd.f32 %v6293_v17, %v8106_v1  ;;  %v3024_v45 = vpop.f32.mrb[17].mxu0 }
 0x223   : > { %v6358_v62 = vadd.f32 %v3024_v45, %v8108_v13  ;;  %v6294_v4 = vpop.f32.mrb[18].mxu0  ;;  %3338 = vadd.xlane.f32.xlu1 %v3337_v35  ;;  %v8293_v45 = vadd.f32 %v8196_v25, %v8141_v10  ;;  %v8307_v25 = vadd.f32 %v8214_v59, %v8141_v10 }
 0x224   : > { %v8233_v48 = vadd.f32 %v6357_v42, %v8141_v10  ;;  %v6359_v55 = vadd.f32 %v6294_v4, %v8110_v53  ;;  %v3027_v28 = vpop.f32.mrb[19].mxu0  ;;  %3335 = vadd.xlane.f32.xlu0 %v3334_v63  ;;  %v3349_v42 = vsel %vm3160_vm8, %v3299_v21, 0.0  ;;  %v3346_v4 = vsel %vm3160_vm8, %v3298_v58, 0.0 }
 0x225   : > { %v8237_v1 = vadd.f32 %v6358_v62, %v8141_v10  ;;  %v6360_v20 = vadd.f32 %v3027_v28, %v8112_v57 }
 0x226   : > { %v8244_v13 = vadd.f32 %v6359_v55, %v8141_v10 }
 0x227   : > { %v8252_v53 = vadd.f32 %v6360_v20, %v8141_v10  ;;  %3195 = vadd.xlane.f32.xlu1 %v3194_v22 }
 0x228   : > { %3192 = vadd.xlane.f32.xlu0 %v3191_v9  ;;  %v3218_v58 = vsel %vm3160_vm8, %v8244_v13, 0.0 }
 0x229   : > { %v6297_v57 = vpop.f32.mrb[20].mxu0 }
 0x22a   : > { %v6361_v16 = vadd.f32 %v6297_v57, %v8114_v27  ;;  %v3040_v29 = vpop.f32.mrb[21].mxu0 }
 0x22b   : > { %v6362_v15 = vadd.f32 %v3040_v29, %v8116_v60  ;;  %v6298_v18 = vpop.f32.mrb[22].mxu0  ;;  %3189 = vadd.xlane.f32.xlu1 %v3188_v31 }
 0x22c   : > { %v8267_v56 = vadd.f32 %v6361_v16, %v8141_v10  ;;  %v6363_v27 = vadd.f32 %v6298_v18, %v8118_v34  ;;  %v3043_v44 = vpop.f32.mrb[23].mxu0  ;;  %3186 = vadd.xlane.f32.xlu0 %v3185_v0  ;;  %v3352_v34 = vsel %vm3160_vm8, %v3300_v26, 0.0  ;;  %v3200_v16 = vsel %vm3160_vm8, %v8307_v25, 0.0 }
 0x22d   : > { %v8271_v36 = vadd.f32 %v6362_v15, %v8141_v10  ;;  %v6364_v60 = vadd.f32 %v3043_v44, %v8120_v33  ;;  %v8287_v33 = vadd.f32 %v6355_v46, %v8141_v10  ;;  %v3304_v15 = vmul.f32 %v8293_v45, %v8293_v45 }
 0x22e   : > { %v8275_v5 = vadd.f32 %v6363_v27, %v8141_v10 }
 0x22f   : > { %v8281_v14 = vadd.f32 %v6364_v60, %v8141_v10  ;;  %3356 = vadd.xlane.f32.xlu1 %v3355_v50  ;;  %v3206_v20 = vsel %vm3160_vm8, %v8287_v33, 0.0  ;;  %v3305_v29 = vmul.f32 %v8287_v33, %v8287_v33  ;;  %v3303_v60 = vmul.f32 %v8307_v25, %v8307_v25 }
 0x230   : > { %3353 = vadd.xlane.f32.xlu0 %v3352_v34 }
 0x231   : > { %v6301_v61 = vpop.f32.mrb[24].mxu0  ;;  %v3367_v44 = vsel %vm3160_vm8, %v3305_v29, 0.0 }
 0x232   : > { %v6365_v24 = vadd.f32 %v6301_v61, %v8122_v43  ;;  %v3056_v17 = vpop.f32.mrb[25].mxu0  ;;  %v3212_v61 = vsel %vm3160_vm8, %v8252_v53, 0.0 }
 0x233   : > { %v6366_v35 = vadd.f32 %v3056_v17, %v8124_v40  ;;  %v6302_v62 = vpop.f32.mrb[26].mxu0  ;;  %3350 = vadd.xlane.f32.xlu1 %v3349_v42  ;;  %v3209_v17 = vsel %vm3160_vm8, %v8237_v1, 0.0  ;;  %v3308_v42 = vmul.f32 %v8233_v48, %v8233_v48 }
 0x234   : > { %v8298_v63 = vadd.f32 %v6365_v24, %v8141_v10  ;;  %v6367_v46 = vadd.f32 %v6302_v62, %v8126_v23  ;;  %v3059_v55 = vpop.f32.mrb[27].mxu0  ;;  %3347 = vadd.xlane.f32.xlu0 %v3346_v4  ;;  %v8316_v23 = vadd.f32 %v8203_v49, %v8141_v10  ;;  %v3309_v24 = vmul.f32 %v8244_v13, %v8244_v13 }
 0x235   : > { %v8302_v43 = vadd.f32 %v6366_v35, %v8141_v10  ;;  %v6368_v28 = vadd.f32 %v3059_v55, %v8128_v54  ;;  %v3203_v54 = vsel %vm3160_vm8, %v8293_v45, 0.0  ;;  %v3307_v62 = vmul.f32 %v8252_v53, %v8252_v53 }
 0x236   : > { %v8310_v40 = vadd.f32 %v6367_v46, %v8141_v10  ;;  %v3197_v7 = vsel %vm3160_vm8, %v8316_v23, 0.0  ;;  %v3302_v21 = vmul.f32 %v8316_v23, %v8316_v23  ;;  %v3379_v35 = vsel %vm3160_vm8, %v3309_v24, 0.0 }
 0x237   : > { %v8319_v22 = vadd.f32 %v6368_v28, %v8141_v10  ;;  %3207 = vadd.xlane.f32.xlu1 %v3206_v20  ;;  %v3376_v4 = vsel %vm3160_vm8, %v3308_v42, 0.0  ;;  %v3306_v46 = vmul.f32 %v8237_v1, %v8237_v1  ;;  %v3373_v55 = vsel %vm3160_vm8, %v3307_v62, 0.0 }
 0x238   : > { %3204 = vadd.xlane.f32.xlu0 %v3203_v54  ;;  %v3358_v34 = vsel %vm3160_vm8, %v3302_v21, 0.0  ;;  %v3230_v20 = vsel %vm3160_vm8, %v8275_v5, 0.0  ;;  %v3227_v54 = vsel %vm3160_vm8, %v8267_v56, 0.0  ;;  %v3316_v21 = vmul.f32 %v8298_v63, %v8298_v63 }
 0x239   : > { %v6305_v59 = vpop.f32.mrb[28].mxu0  ;;  %v3370_v28 = vsel %vm3160_vm8, %v3306_v46, 0.0 }
 0x23a   : > { %v6369_v9 = vadd.f32 %v6305_v59, %v8130_v38  ;;  %v3072_v57 = vpop.f32.mrb[29].mxu0  ;;  %v3224_v59 = vsel %vm3160_vm8, %v8281_v14, 0.0 }
 0x23b   : > { %v6370_v49 = vadd.f32 %v3072_v57, %v8132_v39  ;;  %v6306_v31 = vpop.f32.mrb[30].mxu0  ;;  %3201 = vadd.xlane.f32.xlu1 %v3200_v16  ;;  %v3221_v57 = vsel %vm3160_vm8, %v8271_v36, 0.0  ;;  %v3312_v16 = vmul.f32 %v8267_v56, %v8267_v56 }
 0x23c   : > { %v8334_v18 = vadd.f32 %v6369_v9, %v8141_v10  ;;  %v6371_v38 = vadd.f32 %v6306_v31, %v8134_v30  ;;  %v3075_v0 = vpop.f32.mrb[31].mxu0  ;;  %3198 = vadd.xlane.f32.xlu0 %v3197_v7  ;;  %v3364_v30 = vsel %vm3160_vm8, %v3304_v15, 0.0  ;;  %v3313_v9 = vmul.f32 %v8275_v5, %v8275_v5 }
 0x23d   : > { %v8338_v26 = vadd.f32 %v6370_v49, %v8141_v10  ;;  %v6372_v39 = vadd.f32 %v3075_v0, %v8136_v52  ;;  %v3361_v52 = vsel %vm3160_vm8, %v3303_v60, 0.0  ;;  %v3311_v49 = vmul.f32 %v8281_v14, %v8281_v14 }
 0x23e   : > { %9869 = vst [vmem:[#allocation10_spill] sm:$0xff] %v8334_v18  ;;  %v8342_v27 = vadd.f32 %v6371_v38, %v8141_v10  ;;  %v3391_v29 = vsel %vm3160_vm8, %v3313_v9, 0.0  ;;  %v3388_v31 = vsel %vm3160_vm8, %v3312_v16, 0.0  ;;  %v3310_v7 = vmul.f32 %v8271_v36, %v8271_v36 }
 0x23f   : > { %v8348_v50 = vadd.f32 %v6372_v39, %v8141_v10  ;;  %3368 = vadd.xlane.f32.xlu1 %v3367_v44  ;;  %v3215_v10 = vsel %vm3160_vm8, %v8233_v48, 0.0  ;;  %v3385_v15 = vsel %vm3160_vm8, %v3311_v49, 0.0  ;;  %v3242_v0 = vsel %vm3160_vm8, %v8310_v40, 0.0 }
 0x240   : > { %3365 = vadd.xlane.f32.xlu0 %v3364_v30  ;;  %v3382_v38 = vsel %vm3160_vm8, %v3310_v7, 0.0  ;;  %v3239_v39 = vsel %vm3160_vm8, %v8298_v63, 0.0  ;;  %v3236_v44 = vsel %vm3160_vm8, %v8319_v22, 0.0  ;;  %v3317_v60 = vmul.f32 %v8310_v40, %v8310_v40 }
 0x241   : > { %v3233_v30 = vsel %vm3160_vm8, %v8302_v43, 0.0  ;;  %v3251_v42 = vsel %vm3160_vm8, %v8334_v18, 0.0  ;;  %v3319_v62 = vmul.f32 %v8348_v50, %v8348_v50  ;;  %v3318_v46 = vmul.f32 %v8338_v26, %v8338_v26 }
 0x243   : > { %3362 = vadd.xlane.f32.xlu1 %v3361_v52  ;;  %v3403_v52 = vsel %vm3160_vm8, %v3317_v60, 0.0 }
 0x244   : > { %3359 = vadd.xlane.f32.xlu0 %v3358_v34  ;;  %v3315_v34 = vmul.f32 %v8319_v22, %v8319_v22 }
 0x247   : > { %3219 = vadd.xlane.f32.xlu1 %v3218_v58  ;;  %v3400_v58 = vsel %vm3160_vm8, %v3316_v21, 0.0 }
 0x248   : > { %3216 = vadd.xlane.f32.xlu0 %v3215_v10  ;;  %v3314_v10 = vmul.f32 %v8302_v43, %v8302_v43 }
 0x24a   : > { %v3394_v24 = vsel %vm3160_vm8, %v3314_v10, 0.0 }
 0x24b   : > { %3213 = vadd.xlane.f32.xlu1 %v3212_v61  ;;  %v3397_v61 = vsel %vm3160_vm8, %v3315_v34, 0.0 }
 0x24c   : > { %3210 = vadd.xlane.f32.xlu0 %v3209_v17  ;;  %v3254_v17 = vsel %vm3160_vm8, %v8342_v27, 0.0 }
 0x24f   : > { %3380 = vadd.xlane.f32.xlu1 %v3379_v35  ;;  %v3248_v35 = vsel %vm3160_vm8, %v8348_v50, 0.0 }
 0x250   : > { %3377 = vadd.xlane.f32.xlu0 %v3376_v4  ;;  %v3245_v4 = vsel %vm3160_vm8, %v8338_v26, 0.0 }
 0x253   : > { %3374 = vadd.xlane.f32.xlu1 %v3373_v55  ;;  %v3409_v55 = vsel %vm3160_vm8, %v3319_v62, 0.0 }
 0x254   : > { %3371 = vadd.xlane.f32.xlu0 %v3370_v28  ;;  %v3321_v28 = vmul.f32 %v8342_v27, %v8342_v27 }
 0x257   : > { %3231 = vadd.xlane.f32.xlu1 %v3230_v20  ;;  %v3406_v20 = vsel %vm3160_vm8, %v3318_v46, 0.0 }
 0x258   : > { %3228 = vadd.xlane.f32.xlu0 %v3227_v54  ;;  %v3320_v54 = vmul.f32 %v8334_v18, %v8334_v18 }
 0x25a   : > { %v3412_v9 = vsel %vm3160_vm8, %v3320_v54, 0.0 }
 0x25b   : > { %3225 = vadd.xlane.f32.xlu1 %v3224_v59  ;;  %v3415_v59 = vsel %vm3160_vm8, %v3321_v28, 0.0 }
 0x25c   : > { %3222 = vadd.xlane.f32.xlu0 %v3221_v57 }
 0x25f   : > { %3392 = vadd.xlane.f32.xlu1 %v3391_v29 }
 0x260   : > { %3389 = vadd.xlane.f32.xlu0 %v3388_v31 }
 0x263   : > { %3386 = vadd.xlane.f32.xlu1 %v3385_v15 }
 0x264   : > { %3383 = vadd.xlane.f32.xlu0 %v3382_v38 }
 0x267   : > { %3243 = vadd.xlane.f32.xlu1 %v3242_v0 }
 0x268   : > { %3240 = vadd.xlane.f32.xlu0 %v3239_v39 }
 0x26b   : > { %3237 = vadd.xlane.f32.xlu1 %v3236_v44 }
 0x26c   : > { %3234 = vadd.xlane.f32.xlu0 %v3233_v30 }
 0x26f   : > { %3404 = vadd.xlane.f32.xlu1 %v3403_v52 }
 0x270   : > { %3401 = vadd.xlane.f32.xlu0 %v3400_v58 }
 0x273   : > { %3398 = vadd.xlane.f32.xlu1 %v3397_v61 }
 0x274   : > { %3395 = vadd.xlane.f32.xlu0 %v3394_v24 }
 0x277   : > { %3255 = vadd.xlane.f32.xlu1 %v3254_v17 }
 0x278   : > { %3252 = vadd.xlane.f32.xlu0 %v3251_v42 }
 0x27b   : > { %3249 = vadd.xlane.f32.xlu1 %v3248_v35 }
 0x27c   : > { %3246 = vadd.xlane.f32.xlu0 %v3245_v4 }
 0x27f   : > { %3410 = vadd.xlane.f32.xlu1 %v3409_v55 }
 0x280   : > { %3407 = vadd.xlane.f32.xlu0 %v3406_v20 }
 0x283   : > { %3416 = vadd.xlane.f32.xlu1 %v3415_v59 }
 0x284   : > { %3413 = vadd.xlane.f32.xlu0 %v3412_v9 }
 0x294   : > { %v3169_v57 = vpop.xlane.xlu1 %3168 }
 0x295   : > { %v3163_v16 = vpop.xlane.xlu0 %3162  ;;  %v3260_v29 = vmul.f32 0.0625, %v3169_v57 }
 0x296   : > { %v8435_v21 = vmul.f32 0.0625, %v3163_v16 }
 0x297   : > { %v3452_v15 = vmul.f32 %v3260_v29, %v3260_v29 }
 0x298   : > { %v3172_v49 = vpop.xlane.xlu1 %3171  ;;  %v3450_v62 = vmul.f32 %v8435_v21, %v8435_v21 }
 0x299   : > { %v3261_v31 = vmul.f32 0.0625, %v3172_v49  ;;  %v3330_v7 = vpop.xlane.xlu0 %3329 }
 0x29a   : > { %v3420_v38 = vmul.f32 0.0625, %v3330_v7 }
 0x29b   : > { %v3453_v44 = vmul.f32 %v3261_v31, %v3261_v31 }
 0x29c   : > { %v3484_v0 = vsub.f32 %v3420_v38, %v3452_v15  ;;  %v3333_v39 = vpop.xlane.xlu1 %3332 }
 0x29d   : > { %v3421_v60 = vmul.f32 0.0625, %v3333_v39  ;;  %v3166_v30 = vpop.xlane.xlu0 %3165 }
 0x29e   : > { %v3516_v52 = vmax.f32 %v3484_v0, 0.0  ;;  %v8437_v34 = vmul.f32 0.0625, %v3166_v30  ;;  %v3548_v0 = vsub.f32 %v8144_v47, %v3260_v29  ;;  %v8461_v47 = vld [vmem:[%s9772_s4] ss:$0 sm:$0xff] }
 0x29f   : > { %v3485_v58 = vsub.f32 %v3421_v60, %v3453_v44  ;;  %v8451_v44 = vld [vmem:[%s9771_s3] ss:$0 sm:$0xff] }
 0x2a0   : > { %v3580_v10 = vadd.f32 1e-05, %v3516_v52  ;;  %v3451_v61 = vmul.f32 %v8437_v34, %v8437_v34  ;;  %v3327_v24 = vpop.xlane.xlu1 %3326 }
 0x2a1   : > { %v3517_v17 = vmax.f32 %v3485_v58, 0.0  ;;  %v3419_v42 = vmul.f32 0.0625, %v3327_v24  ;;  %v3324_v35 = vpop.xlane.xlu0 %3323  ;;  %v3549_v24 = vsub.f32 %v8150_v51, %v3261_v31 }
 0x2a2   : > { %6651 = vrsqrt.f32 %v3580_v10  ;;  %v3418_v4 = vmul.f32 0.0625, %v3324_v35 }
 0x2a3   : > { %v3581_v46 = vadd.f32 1e-05, %v3517_v17  ;;  %v3483_v55 = vsub.f32 %v3419_v42, %v3451_v61 }
 0x2a4   : > { %v3482_v28 = vsub.f32 %v3418_v4, %v3450_v62  ;;  %v3184_v20 = vpop.xlane.xlu1 %3183 }
 0x2a5   : > { %6653 = vrsqrt.f32 %v3581_v46  ;;  %v3515_v54 = vmax.f32 %v3483_v55, 0.0  ;;  %v3181_v59 = vpop.xlane.xlu0 %3180  ;;  %v8443_v7 = vmul.f32 0.0625, %v3184_v20  ;;  %v3546_v46 = vsub.f32 %v8147_v41, %v8435_v21 }
 0x2a6   : > { %v3514_v9 = vmax.f32 %v3482_v28, 0.0  ;;  %v8445_v38 = vmul.f32 0.0625, %v3181_v59 }
 0x2a7   : > { %v3579_v57 = vadd.f32 1e-05, %v3515_v54  ;;  %v3457_v52 = vmul.f32 %v8443_v7, %v8443_v7 }
 0x2a8   : > { %v3578_v16 = vadd.f32 1e-05, %v3514_v9  ;;  %v3178_v49 = vpop.xlane.xlu1 %3177  ;;  %v3456_v29 = vmul.f32 %v8445_v38, %v8445_v38 }
 0x2a9   : > { %6655 = vrsqrt.f32 %v3579_v57  ;;  %v3175_v15 = vpop.xlane.xlu0 %3174  ;;  %v8455_v58 = vmul.f32 0.0625, %v3178_v49 }
 0x2aa   : > { %6657 = vrsqrt.f32 %v3578_v16  ;;  %v8465_v17 = vmul.f32 0.0625, %v3175_v15 }
 0x2ab   : > { %v3455_v20 = vmul.f32 %v8455_v58, %v8455_v58 }
 0x2ac   : > { %v6652_v39 = vpop.eup %6651  ;;  %v3345_v60 = vpop.xlane.xlu1 %3344  ;;  %v3454_v16 = vmul.f32 %v8465_v17, %v8465_v17 }
 0x2ad   : > { %v3644_v30 = vmul.f32 %v6652_v39, %v3548_v0  ;;  %v3425_v10 = vmul.f32 0.0625, %v3345_v60  ;;  %v3342_v61 = vpop.xlane.xlu0 %3341  ;;  %v3547_v0 = vsub.f32 %v8159_v32, %v8437_v34 }
 0x2ae   : > { %v3424_v42 = vmul.f32 0.0625, %v3342_v61 }
 0x2af   : > { %v6654_v35 = vpop.eup %6653  ;;  %v3682_v62 = vmul.f32 %v8451_v44, %v3644_v30  ;;  %v3489_v4 = vsub.f32 %v3425_v10, %v3457_v52 }
 0x2b0   : > { %v3645_v55 = vmul.f32 %v6654_v35, %v3549_v24  ;;  %v3488_v51 = vsub.f32 %v3424_v42, %v3456_v29  ;;  %v3339_v31 = vpop.xlane.xlu1 %3338 }
 0x2b1   : > { %v8471_v28 = vadd.f32 %v8461_v47, %v3682_v62  ;;  %v3521_v54 = vmax.f32 %v3489_v4, 0.0  ;;  %v3423_v59 = vmul.f32 0.0625, %v3339_v31  ;;  %v3336_v9 = vpop.xlane.xlu0 %3335 }
 0x2b2   : > { %v3683_v57 = vmul.f32 %v8451_v44, %v3645_v55  ;;  %v3520_v49 = vmax.f32 %v3488_v51, 0.0  ;;  %v3422_v15 = vmul.f32 0.0625, %v3336_v9 }
 0x2b3   : > { %v6656_v41 = vpop.eup %6655  ;;  %v5681_v21 = vmul.f32 -1.442695, %v8471_v28  ;;  %v3585_v39 = vadd.f32 1e-05, %v3521_v54  ;;  %v3487_v60 = vsub.f32 %v3423_v59, %v3455_v20 }
 0x2b4   : > { %v6658_v30 = vpop.eup %6657  ;;  %v8482_v52 = vadd.f32 %v8461_v47, %v3683_v57  ;;  %v3584_v10 = vadd.f32 1e-05, %v3520_v49  ;;  %v3486_v61 = vsub.f32 %v3422_v15, %v3454_v16  ;;  %v3196_v24 = vpop.xlane.xlu1 %3195  ;;  %v3643_v62 = vmul.f32 %v6656_v41, %v3547_v0 }
 0x2b5   : > { %6659 = vpow2.f32 %v5681_v21  ;;  %v3519_v29 = vmax.f32 %v3487_v60, 0.0  ;;  %v3193_v42 = vpop.xlane.xlu0 %3192  ;;  %v3642_v35 = vmul.f32 %v6658_v30, %v3546_v46  ;;  %v8485_v51 = vmul.f32 0.0625, %v3196_v24 }
 0x2b6   : > { %v5682_v4 = vmul.f32 -1.442695, %v8482_v52  ;;  %6661 = vrsqrt.f32 %v3585_v39  ;;  %v3518_v55 = vmax.f32 %v3486_v61, 0.0  ;;  %v3681_v59 = vmul.f32 %v8451_v44, %v3643_v62 }
 0x2b7   : > { %6663 = vrsqrt.f32 %v3584_v10  ;;  %v3583_v32 = vadd.f32 1e-05, %v3519_v29  ;;  %v3680_v54 = vmul.f32 %v8451_v44, %v3642_v35  ;;  %v8489_v46 = vmul.f32 0.0625, %v3193_v42 }
 0x2b8   : > { %6665 = vpow2.f32 %v5682_v4  ;;  %v3582_v34 = vadd.f32 1e-05, %v3518_v55  ;;  %v3190_v31 = vpop.xlane.xlu1 %3189  ;;  %v8495_v57 = vadd.f32 %v8461_v47, %v3681_v59  ;;  %v3461_v16 = vmul.f32 %v8485_v51, %v8485_v51 }
 0x2b9   : > { %6667 = vrsqrt.f32 %v3583_v32  ;;  %v3187_v20 = vpop.xlane.xlu0 %3186  ;;  %v8492_v9 = vadd.f32 %v8461_v47, %v3680_v54  ;;  %v8499_v15 = vmul.f32 0.0625, %v3190_v31  ;;  %v3460_v60 = vmul.f32 %v8489_v46, %v8489_v46 }
 0x2ba   : > { %6669 = vrsqrt.f32 %v3582_v34  ;;  %v5680_v39 = vmul.f32 -1.442695, %v8495_v57  ;;  %v8505_v30 = vmul.f32 0.0625, %v3187_v20  ;;  %v3553_v24 = vsub.f32 %v8174_v6, %v8443_v7 }
 0x2bb   : > { %v5679_v0 = vmul.f32 -1.442695, %v8492_v9  ;;  %v3552_v62 = vsub.f32 %v8179_v37, %v8445_v38  ;;  %v3551_v34 = vsub.f32 %v8186_v19, %v8455_v58  ;;  %v3459_v31 = vmul.f32 %v8499_v15, %v8499_v15 }
 0x2bc   : > { %v3357_v49 = vpop.xlane.xlu1 %3356  ;;  %v3458_v59 = vmul.f32 %v8505_v30, %v8505_v30 }
 0x2bd   : > { %v3429_v41 = vmul.f32 0.0625, %v3357_v49  ;;  %v3354_v21 = vpop.xlane.xlu0 %3353  ;;  %6671 = vpow2.f32 %v5679_v0 }
 0x2be   : > { %v3428_v10 = vmul.f32 0.0625, %v3354_v21  ;;  %6673 = vpow2.f32 %v5680_v39  ;;  %v3550_v21 = vsub.f32 %v8191_v12, %v8465_v17 }
 0x2bf   : > { %v6660_v61 = vpop.eup %6659  ;;  %v3493_v29 = vsub.f32 %v3429_v41, %v3461_v16 }
 0x2c0   : > { %v6662_v42 = vpop.eup %6661  ;;  %v3848_v35 = vadd.f32 1.0, %v6660_v61  ;;  %v3492_v4 = vsub.f32 %v3428_v10, %v3460_v60  ;;  %v3351_v55 = vpop.xlane.xlu1 %3350 }
 0x2c1   : > { %v6664_v32 = vpop.eup %6663  ;;  %v3525_v20 = vmax.f32 %v3493_v29, 0.0  ;;  %v3427_v54 = vmul.f32 0.0625, %v3351_v55  ;;  %v3348_v6 = vpop.xlane.xlu0 %3347 }
 0x2c2   : > { %v6666_v7 = vpop.eup %6665  ;;  %v3524_v16 = vmax.f32 %v3492_v4, 0.0  ;;  %v3426_v49 = vmul.f32 0.0625, %v3348_v6  ;;  %v3648_v37 = vmul.f32 %v6664_v32, %v3552_v62  ;;  %6675 = vrcp.f32 %v3848_v35 }
 0x2c3   : > { %v6668_v38 = vpop.eup %6667  ;;  %v3849_v41 = vadd.f32 1.0, %v6666_v7  ;;  %v3589_v0 = vadd.f32 1e-05, %v3525_v20  ;;  %v3491_v19 = vsub.f32 %v3427_v54, %v3459_v31  ;;  %v3649_v4 = vmul.f32 %v6662_v42, %v3553_v24 }
 0x2c4   : > { %v6670_v58 = vpop.eup %6669  ;;  %v3588_v39 = vadd.f32 1e-05, %v3524_v16  ;;  %v3490_v60 = vsub.f32 %v3426_v49, %v3458_v59  ;;  %v3208_v10 = vpop.xlane.xlu1 %3207  ;;  %v3647_v61 = vmul.f32 %v6668_v38, %v3551_v34  ;;  %v3686_v6 = vmul.f32 %v8451_v44, %v3648_v37 }
 0x2c5   : > { %6677 = vrcp.f32 %v3849_v41  ;;  %v3523_v29 = vmax.f32 %v3491_v19, 0.0  ;;  %v3205_v55 = vpop.xlane.xlu0 %3204  ;;  %v3646_v18 = vmul.f32 %v6670_v58, %v3550_v21  ;;  %v8521_v31 = vmul.f32 0.0625, %v3208_v10 }
 0x2c6   : > { %6679 = vrsqrt.f32 %v3589_v0  ;;  %v3522_v62 = vmax.f32 %v3490_v60, 0.0  ;;  %v3685_v32 = vmul.f32 %v8451_v44, %v3647_v61  ;;  %v8523_v35 = vmul.f32 0.0625, %v3205_v55 }
 0x2c7   : > { %6681 = vrsqrt.f32 %v3588_v39  ;;  %v3587_v12 = vadd.f32 1e-05, %v3523_v29  ;;  %v3684_v34 = vmul.f32 %v8451_v44, %v3646_v18  ;;  %v6672_v54 = vpop.eup %6671  ;;  %v3557_v24 = vsub.f32 %v8223_v3, %v8485_v51 }
 0x2c8   : > { %v3586_v17 = vadd.f32 1e-05, %v3522_v62  ;;  %v3202_v20 = vpop.xlane.xlu1 %3201  ;;  %v8529_v7 = vadd.f32 %v8461_v47, %v3685_v32  ;;  %v3687_v59 = vmul.f32 %v8451_v44, %v3649_v4  ;;  %v6674_v16 = vpop.eup %6673  ;;  %v3846_v49 = vadd.f32 1.0, %v6672_v54 }
 0x2c9   : > { %6683 = vrsqrt.f32 %v3587_v12  ;;  %v3199_v42 = vpop.xlane.xlu0 %3198  ;;  %v8533_v37 = vadd.f32 %v8461_v47, %v3684_v34  ;;  %v8536_v38 = vadd.f32 %v8461_v47, %v3686_v6  ;;  %v3556_v18 = vsub.f32 %v8228_v2, %v8489_v46 }
 0x2ca   : > { %6685 = vrsqrt.f32 %v3586_v17  ;;  %v3555_v3 = vsub.f32 %v8241_v11, %v8499_v15  ;;  %v3847_v51 = vadd.f32 1.0, %v6674_v16  ;;  %v5684_v41 = vmul.f32 -1.442695, %v8529_v7 }
 0x2cb   : > { %v3465_v21 = vmul.f32 %v8521_v31, %v8521_v31  ;;  %v3464_v0 = vmul.f32 %v8523_v35, %v8523_v35  ;;  %6687 = vrcp.f32 %v3846_v49  ;;  %v5683_v58 = vmul.f32 -1.442695, %v8533_v37 }
 0x2cc   : > { %v3369_v19 = vpop.xlane.xlu1 %3368  ;;  %v8548_v39 = vmul.f32 0.0625, %v3202_v20  ;;  %6689 = vrcp.f32 %v3847_v51  ;;  %v8551_v11 = vadd.f32 %v8461_v47, %v3687_v59  ;;  %v6676_v46 = vpop.eup %6675  ;;  %v8553_v15 = vmul.f32 0.0625, %v3199_v42 }
 0x2cd   : > { %v3433_v60 = vmul.f32 0.0625, %v3369_v19  ;;  %v3366_v2 = vpop.xlane.xlu0 %3365  ;;  %6691 = vpow2.f32 %v5683_v58  ;;  %v5685_v61 = vmul.f32 -1.442695, %v8536_v38  ;;  %v3554_v55 = vsub.f32 %v8249_v8, %v8505_v30 }
 0x2ce   : > { %v3432_v10 = vmul.f32 0.0625, %v3366_v2  ;;  %6693 = vpow2.f32 %v5684_v41  ;;  %v5686_v62 = vmul.f32 -1.442695, %v8551_v11  ;;  %v3463_v54 = vmul.f32 %v8548_v39, %v8548_v39 }
 0x2cf   : > { %v6678_v29 = vpop.eup %6677  ;;  %v3497_v4 = vsub.f32 %v3433_v60, %v3465_v21  ;;  %6695 = vpow2.f32 %v5685_v61  ;;  %v3462_v16 = vmul.f32 %v8553_v15, %v8553_v15  ;;  %v3944_v19 = vmul.f32 %v6676_v46, %v8471_v28 }
 0x2d0   : > { %v6680_v32 = vpop.eup %6679  ;;  %v3496_v17 = vsub.f32 %v3432_v10, %v3464_v0  ;;  %v3363_v20 = vpop.xlane.xlu1 %3362  ;;  %6697 = vpow2.f32 %v5686_v62  ;;  %v3945_v58 = vmul.f32 %v6678_v29, %v8482_v52 }
 0x2d1   : > { %v6682_v34 = vpop.eup %6681  ;;  %v3529_v42 = vmax.f32 %v3497_v4, 0.0  ;;  %v3431_v8 = vmul.f32 0.0625, %v3363_v20  ;;  %v3360_v30 = vpop.xlane.xlu0 %3359  ;;  %v3653_v62 = vmul.f32 %v6680_v32, %v3557_v24 }
 0x2d2   : > { %v3528_v49 = vmax.f32 %v3496_v17, 0.0  ;;  %v3430_v51 = vmul.f32 0.0625, %v3360_v30  ;;  %v3652_v4 = vmul.f32 %v6682_v34, %v3556_v18  ;;  %v3975_v24 = vpack.c.bf16 %v3945_v58, %v3944_v19 }
 0x2d3   : > { %v6684_v41 = vpop.eup %6683  ;;  %v3593_v21 = vadd.f32 1e-05, %v3529_v42  ;;  %v3495_v0 = vsub.f32 %v3431_v8, %v3463_v54  ;;  %v3558_v42 = vsub.f32 %v8316_v23, %v8553_v15  ;;  %v3691_v30 = vmul.f32 %v8451_v44, %v3653_v62 }
 0x2d4   : > { %v6686_v60 = vpop.eup %6685  ;;  %v3592_v2 = vadd.f32 1e-05, %v3528_v49  ;;  %v3494_v10 = vsub.f32 %v3430_v51, %v3462_v16  ;;  %v3220_v61 = vpop.xlane.xlu1 %3219  ;;  %v3651_v12 = vmul.f32 %v6684_v41, %v3555_v3 }
 0x2d5   : > { %6699 = vrsqrt.f32 %v3593_v21  ;;  %v3527_v20 = vmax.f32 %v3495_v0, 0.0  ;;  %v3217_v59 = vpop.xlane.xlu0 %3216  ;;  %v3650_v6 = vmul.f32 %v6686_v60, %v3554_v55  ;;  %v6688_v17 = vpop.eup %6687  ;;  %v8573_v28 = vmul.f32 0.0625, %v3220_v61 }
 0x2d6   : > { %6701 = vrsqrt.f32 %v3592_v2  ;;  %v3526_v54 = vmax.f32 %v3494_v10, 0.0  ;;  %v6690_v52 = vpop.eup %6689  ;;  %v8575_v29 = vmul.f32 0.0625, %v3217_v59  ;;  %v3942_v18 = vmul.f32 %v6688_v17, %v8492_v9 }
 0x2d7   : > { %v3591_v46 = vadd.f32 1e-05, %v3527_v20  ;;  %v6692_v32 = vpop.eup %6691  ;;  %v3943_v3 = vmul.f32 %v6690_v52, %v8495_v57  ;;  %v3690_v55 = vmul.f32 %v8451_v44, %v3652_v4  ;;  %v3688_v41 = vmul.f32 %v8451_v44, %v3650_v6 }
 0x2d8   : > { %v3590_v34 = vadd.f32 1e-05, %v3526_v54  ;;  %v3214_v8 = vpop.xlane.xlu1 %3213  ;;  %v6694_v16 = vpop.eup %6693  ;;  %v3850_v51 = vadd.f32 1.0, %v6692_v32  ;;  %v3689_v59 = vmul.f32 %v8451_v44, %v3651_v12  ;;  %v3469_v9 = vmul.f32 %v8573_v28, %v8573_v28 }
 0x2d9   : > { %6703 = vrsqrt.f32 %v3591_v46  ;;  %v3211_v49 = vpop.xlane.xlu0 %3210  ;;  %v6696_v21 = vpop.eup %6695  ;;  %v3974_v0 = vpack.c.bf16 %v3943_v3, %v3942_v18  ;;  %v3851_v19 = vadd.f32 1.0, %v6694_v16  ;;  %v3468_v60 = vmul.f32 %v8575_v29, %v8575_v29 }
 0x2da   : > { %6705 = vrsqrt.f32 %v3590_v34  ;;  %v6698_v57 = vpop.eup %6697  ;;  %v3852_v2 = vadd.f32 1.0, %v6696_v21  ;;  %v8589_v10 = vmul.f32 0.0625, %v3214_v8  ;;  %v8592_v6 = vmul.f32 0.0625, %v3211_v49 }
 0x2db   : > { %6707 = vrcp.f32 %v3850_v51  ;;  %6309 = vmatprep.mubr.msk.bf16.mxu1 %vm3160_vm8, %v3974_v0  ;;  %v3853_v61 = vadd.f32 1.0, %v6698_v57  ;;  %v8596_v20 = vadd.f32 %v8461_v47, %v3688_v41  ;;  %v8599_v17 = vadd.f32 %v8461_v47, %v3689_v59 }
 0x2dc   : > { %v3381_v12 = vpop.xlane.xlu1 %3380  ;;  %6709 = vrcp.f32 %v3851_v19  ;;  %6310 = vmatmul.mubr.msk.bf16.vlgmr.msra.gmra.mrb[32].mxu1 %vm3160_vm8, %v3975_v24  ;;  %v8602_v52 = vadd.f32 %v8461_v47, %v3690_v55  ;;  %v8605_v46 = vadd.f32 %v8461_v47, %v3691_v30  ;;  %v3564_v24 = vsub.f32 %v8233_v48, %v8575_v29 }
 0x2dd   : > { %v3437_v4 = vmul.f32 0.0625, %v3381_v12  ;;  %v3378_v62 = vpop.xlane.xlu0 %3377  ;;  %6711 = vrcp.f32 %v3852_v2  ;;  %v5687_v34 = vmul.f32 -1.442695, %v8596_v20  ;;  %v5688_v8 = vmul.f32 -1.442695, %v8599_v17 }
 0x2de   : > { %v3436_v54 = vmul.f32 0.0625, %v3378_v62  ;;  %6713 = vrcp.f32 %v3853_v61  ;;  %v3467_v16 = vmul.f32 %v8589_v10, %v8589_v10  ;;  %v5689_v55 = vmul.f32 -1.442695, %v8602_v52 }
 0x2df   : > { %v6700_v18 = vpop.eup %6699  ;;  %v3501_v32 = vsub.f32 %v3437_v4, %v3469_v9  ;;  %v5690_v30 = vmul.f32 -1.442695, %v8605_v46  ;;  %v3563_v41 = vsub.f32 %v8252_v53, %v8589_v10  ;;  %6715 = vpow2.f32 %v5687_v34 }
 0x2e0   : > { %v6702_v3 = vpop.eup %6701  ;;  %v3500_v49 = vsub.f32 %v3436_v54, %v3468_v60  ;;  %v3375_v51 = vpop.xlane.xlu1 %3374  ;;  %v3466_v0 = vmul.f32 %v8592_v6, %v8592_v6  ;;  %6717 = vpow2.f32 %v5688_v8  ;;  %v9870_v12 = vsub.f32 %v8293_v45, %v8523_v35 }
 0x2e1   : > { %v3533_v59 = vmax.f32 %v3501_v32, 0.0  ;;  %v3435_v21 = vmul.f32 0.0625, %v3375_v51  ;;  %v3372_v9 = vpop.xlane.xlu0 %3371  ;;  %6719 = vpow2.f32 %v5689_v55  ;;  %v9871_v4 = vsub.f32 %v8287_v33, %v8521_v31 }
 0x2e2   : > { %v3532_v19 = vmax.f32 %v3500_v49, 0.0  ;;  %v3434_v57 = vmul.f32 0.0625, %v3372_v9  ;;  %v3656_v61 = vmul.f32 %v6702_v3, %v9870_v12  ;;  %6721 = vpow2.f32 %v5690_v30 }
 0x2e3   : > { %v6704_v2 = vpop.eup %6703  ;;  %v3499_v60 = vsub.f32 %v3435_v21, %v3467_v16  ;;  %v3657_v62 = vmul.f32 %v6700_v18, %v9871_v4  ;;  %v3597_v32 = vadd.f32 1e-05, %v3533_v59  ;;  %v3562_v8 = vsub.f32 %v8237_v1, %v8592_v6 }
 0x2e4   : > { %v6706_v54 = vpop.eup %6705  ;;  %v3596_v34 = vadd.f32 1e-05, %v3532_v19  ;;  %v3498_v51 = vsub.f32 %v3434_v57, %v3466_v0  ;;  %v3232_v58 = vpop.xlane.xlu1 %3231  ;;  %v9872_v45 = vsub.f32 %v8307_v25, %v8548_v39 }
 0x2e5   : > { %v6708_v49 = vpop.eup %6707  ;;  %v3531_v16 = vmax.f32 %v3499_v60, 0.0  ;;  %v8627_v55 = vmul.f32 0.0625, %v3232_v58  ;;  %v3229_v21 = vpop.xlane.xlu0 %3228  ;;  %v3654_v3 = vmul.f32 %v6706_v54, %v3558_v42  ;;  %v3695_v0 = vmul.f32 %v8451_v44, %v3657_v62 }
 0x2e6   : > { %v3655_v35 = vmul.f32 %v6704_v2, %v9872_v45  ;;  %v6710_v33 = vpop.eup %6709  ;;  %6723 = vrsqrt.f32 %v3596_v34  ;;  %v3530_v31 = vmax.f32 %v3498_v51, 0.0  ;;  %v3946_v18 = vmul.f32 %v6708_v49, %v8533_v37 }
 0x2e7   : > { %v6712_v30 = vpop.eup %6711  ;;  %v3595_v59 = vadd.f32 1e-05, %v3531_v16  ;;  %v8636_v9 = vmul.f32 0.0625, %v3229_v21  ;;  %v3947_v58 = vmul.f32 %v6710_v33, %v8529_v7  ;;  %6725 = vrsqrt.f32 %v3597_v32 }
 0x2e8   : > { %v6714_v19 = vpop.eup %6713  ;;  %v3594_v25 = vadd.f32 1e-05, %v3530_v31  ;;  %v3226_v39 = vpop.xlane.xlu1 %3225  ;;  %v3948_v57 = vmul.f32 %v6712_v30, %v8536_v38  ;;  %v3694_v37 = vmul.f32 %v8451_v44, %v3656_v61  ;;  %v3473_v23 = vmul.f32 %v8627_v55, %v8627_v55 }
 0x2e9   : > { %6727 = vrsqrt.f32 %v3595_v59  ;;  %v3976_v15 = vpack.c.bf16 %v3947_v58, %v3946_v18  ;;  %v3223_v42 = vpop.xlane.xlu0 %3222  ;;  %v3949_v2 = vmul.f32 %v6714_v19, %v8551_v11  ;;  %v3569_v7 = vsub.f32 %v8275_v5, %v8627_v55  ;;  %v6716_v4 = vpop.eup %6715 }
 0x2ea   : > { %6729 = vrsqrt.f32 %v3594_v25  ;;  %v3692_v60 = vmul.f32 %v8451_v44, %v3654_v3  ;;  %v3693_v12 = vmul.f32 %v8451_v44, %v3655_v35  ;;  %v3472_v38 = vmul.f32 %v8636_v9, %v8636_v9  ;;  %v6718_v54 = vpop.eup %6717 }
 0x2eb   : > { %v3568_v61 = vsub.f32 %v8267_v56, %v8636_v9  ;;  %v8653_v62 = vmul.f32 0.0625, %v3226_v39  ;;  %6313 = vmatprep.mubr.msk.bf16.mxu1 %vm3160_vm8, %v3976_v15  ;;  %v3977_v11 = vpack.c.bf16 %v3949_v2, %v3948_v57  ;;  %v8656_v32 = vmul.f32 0.0625, %v3223_v42  ;;  %v6720_v21 = vpop.eup %6719 }
 0x2ec   : > { %v3393_v34 = vpop.xlane.xlu1 %3392  ;;  %v3854_v51 = vadd.f32 1.0, %v6716_v4  ;;  %v8659_v49 = vadd.f32 %v8461_v47, %v3692_v60  ;;  %v8662_v16 = vadd.f32 %v8461_v47, %v3694_v37  ;;  %v3855_v33 = vadd.f32 1.0, %v6718_v54  ;;  %v6722_v3 = vpop.eup %6721 }
 0x2ed   : > { %6314 = vmatmul.mubr.msk.bf16.gmra.mrb[36].mxu1 %vm3160_vm8, %v3977_v11  ;;  %v3441_v45 = vmul.f32 0.0625, %v3393_v34  ;;  %v3390_v35 = vpop.xlane.xlu0 %3389  ;;  %v8666_v31 = vadd.f32 %v8461_v47, %v3693_v12  ;;  %v8669_v18 = vadd.f32 %v8461_v47, %v3695_v0  ;;  %v3856_v59 = vadd.f32 1.0, %v6720_v21 }
 0x2ee   : > { %v3440_v30 = vmul.f32 0.0625, %v3390_v35  ;;  %6731 = vrcp.f32 %v3854_v51  ;;  %v5691_v58 = vmul.f32 -1.442695, %v8659_v49  ;;  %v3857_v25 = vadd.f32 1.0, %v6722_v3 }
 0x2ef   : > { %v3505_v19 = vsub.f32 %v3441_v45, %v3473_v23  ;;  %6733 = vrcp.f32 %v3855_v33  ;;  %v5692_v39 = vmul.f32 -1.442695, %v8666_v31  ;;  %v3471_v37 = vmul.f32 %v8653_v62, %v8653_v62 }
 0x2f0   : > { %v6724_v57 = vpop.eup %6723  ;;  %v3504_v15 = vsub.f32 %v3440_v30, %v3472_v38  ;;  %v3387_v42 = vpop.xlane.xlu1 %3386  ;;  %6735 = vrcp.f32 %v3856_v59  ;;  %v5693_v0 = vmul.f32 -1.442695, %v8662_v16  ;;  %v3470_v2 = vmul.f32 %v8656_v32, %v8656_v32 }
 0x2f1   : > { %v3537_v60 = vmax.f32 %v3505_v19, 0.0  ;;  %v3439_v12 = vmul.f32 0.0625, %v3387_v42  ;;  %v3384_v4 = vpop.xlane.xlu0 %3383  ;;  %6737 = vrcp.f32 %v3857_v25  ;;  %v6726_v23 = vpop.eup %6725  ;;  %v5694_v34 = vmul.f32 -1.442695, %v8669_v18 }
 0x2f2   : > { %v3536_v11 = vmax.f32 %v3504_v15, 0.0  ;;  %v3438_v54 = vmul.f32 0.0625, %v3384_v4  ;;  %6739 = vpow2.f32 %v5691_v58  ;;  %v3660_v45 = vmul.f32 %v6724_v57, %v3564_v24 }
 0x2f3   : > { %v6728_v51 = vpop.eup %6727  ;;  %v3601_v21 = vadd.f32 1e-05, %v3537_v60  ;;  %v3503_v38 = vsub.f32 %v3439_v12, %v3471_v37  ;;  %6741 = vpow2.f32 %v5692_v39  ;;  %v3567_v58 = vsub.f32 %v8281_v14, %v8653_v62 }
 0x2f4   : > { %v6730_v35 = vpop.eup %6729  ;;  %v3600_v33 = vadd.f32 1e-05, %v3536_v11  ;;  %v3502_v3 = vsub.f32 %v3438_v54, %v3470_v2  ;;  %v3244_v30 = vpop.xlane.xlu1 %3243  ;;  %6743 = vpow2.f32 %v5693_v0  ;;  %v3659_v59 = vmul.f32 %v6728_v51, %v3563_v41 }
 0x2f5   : > { %v3566_v19 = vsub.f32 %v8271_v36, %v8656_v32  ;;  %v3535_v25 = vmax.f32 %v3503_v38, 0.0  ;;  %v3241_v39 = vpop.xlane.xlu0 %3240  ;;  %v3658_v48 = vmul.f32 %v6730_v35, %v3562_v8  ;;  %6745 = vrsqrt.f32 %v3601_v21 }
 0x2f6   : > { %v3534_v29 = vmax.f32 %v3502_v3, 0.0  ;;  %v8692_v24 = vmul.f32 0.0625, %v3244_v30  ;;  %v3697_v57 = vmul.f32 %v8451_v44, %v3659_v59  ;;  %v8695_v10 = vmul.f32 0.0625, %v3241_v39 }
 0x2f7   : > { %v3599_v53 = vadd.f32 1e-05, %v3535_v25  ;;  %6747 = vpow2.f32 %v5694_v34  ;;  %v9873_v41 = vsub.f32 %v8244_v13, %v8573_v28  ;;  %v3696_v1 = vmul.f32 %v8451_v44, %v3658_v48 }
 0x2f8   : > { %v6732_v15 = vpop.eup %6731  ;;  %6749 = vrsqrt.f32 %v3600_v33  ;;  %v3598_v42 = vadd.f32 1e-05, %v3534_v29  ;;  %v3238_v0 = vpop.xlane.xlu1 %3237  ;;  %v3698_v6 = vmul.f32 %v8451_v44, %v3660_v45  ;;  %v8706_v4 = vadd.f32 %v8461_v47, %v3697_v57 }
 0x2f9   : > { %v3661_v37 = vmul.f32 %v6726_v23, %v9873_v41  ;;  %v6734_v8 = vpop.eup %6733  ;;  %6751 = vrsqrt.f32 %v3599_v53  ;;  %v8702_v2 = vmul.f32 0.0625, %v3238_v0  ;;  %v3950_v60 = vmul.f32 %v6732_v15, %v8596_v20  ;;  %v3235_v12 = vpop.xlane.xlu0 %3234 }
 0x2fa   : > { %v6736_v13 = vpop.eup %6735  ;;  %6753 = vrsqrt.f32 %v3598_v42  ;;  %v3477_v28 = vmul.f32 %v8692_v24, %v8692_v24  ;;  %v3951_v23 = vmul.f32 %v6734_v8, %v8599_v17  ;;  %v8712_v11 = vadd.f32 %v8461_v47, %v3696_v1 }
 0x2fb   : > { %v6738_v54 = vpop.eup %6737  ;;  %v3573_v34 = vsub.f32 %v8310_v40, %v8692_v24  ;;  %v3476_v20 = vmul.f32 %v8695_v10, %v8695_v10  ;;  %v3952_v51 = vmul.f32 %v6736_v13, %v8602_v52  ;;  %v5696_v21 = vmul.f32 -1.442695, %v8706_v4 }
 0x2fc   : > { %v6740_v38 = vpop.eup %6739  ;;  %v3475_v45 = vmul.f32 %v8702_v2, %v8702_v2  ;;  %v3978_v35 = vpack.c.bf16 %v3951_v23, %v3950_v60  ;;  %v8722_v17 = vmul.f32 0.0625, %v3235_v12  ;;  %v3953_v33 = vmul.f32 %v6738_v54, %v8605_v46  ;;  %v3405_v3 = vpop.xlane.xlu1 %3404 }
 0x2fd   : > { %v6742_v30 = vpop.eup %6741  ;;  %v3445_v59 = vmul.f32 0.0625, %v3405_v3  ;;  %v3402_v25 = vpop.xlane.xlu0 %3401  ;;  %v3858_v39 = vadd.f32 1.0, %v6740_v38  ;;  %v5695_v48 = vmul.f32 -1.442695, %v8712_v11  ;;  %6755 = vpow2.f32 %v5696_v21 }
 0x2fe   : > { %v6744_v52 = vpop.eup %6743  ;;  %6317 = vmatprep.mubr.msk.bf16.mxu1 %vm3160_vm8, %v3978_v35  ;;  %v3979_v29 = vpack.c.bf16 %v3953_v33, %v3952_v51  ;;  %v3444_v57 = vmul.f32 0.0625, %v3402_v25  ;;  %v3859_v53 = vadd.f32 1.0, %v6742_v30  ;;  %v3699_v41 = vmul.f32 %v8451_v44, %v3661_v37 }
 0x2ff   : > { %v3509_v15 = vsub.f32 %v3445_v59, %v3477_v28  ;;  %6757 = vrcp.f32 %v3858_v39  ;;  %v3860_v42 = vadd.f32 1.0, %v6744_v52  ;;  %v8729_v46 = vadd.f32 %v8461_v47, %v3698_v6  ;;  %v6746_v0 = vpop.eup %6745 }
 0x300   : > { %v3474_v1 = vmul.f32 %v8722_v17, %v8722_v17  ;;  %6318 = vmatmul.mubr.msk.bf16.gmra.mrb[40].mxu1 %vm3160_vm8, %v3979_v29  ;;  %v3508_v8 = vsub.f32 %v3444_v57, %v3476_v20  ;;  %v3399_v60 = vpop.xlane.xlu1 %3398  ;;  %6759 = vrcp.f32 %v3859_v53  ;;  %v8735_v12 = vadd.f32 %v8461_v47, %v3699_v41 }
 0x301   : > { %v6748_v13 = vpop.eup %6747  ;;  %v3541_v37 = vmax.f32 %v3509_v15, 0.0  ;;  %v3443_v28 = vmul.f32 0.0625, %v3399_v60  ;;  %v3396_v23 = vpop.xlane.xlu0 %3395  ;;  %6761 = vrcp.f32 %v3860_v42  ;;  %v5697_v6 = vmul.f32 -1.442695, %v8729_v46 }
 0x302   : > { %v6750_v54 = vpop.eup %6749  ;;  %v3540_v51 = vmax.f32 %v3508_v8, 0.0  ;;  %v3442_v21 = vmul.f32 0.0625, %v3396_v23  ;;  %v3861_v38 = vadd.f32 1.0, %v6748_v13  ;;  %6763 = vpow2.f32 %v5695_v48 }
 0x303   : > { %v6752_v35 = vpop.eup %6751  ;;  %v3605_v33 = vadd.f32 1e-05, %v3541_v37  ;;  %v3507_v20 = vsub.f32 %v3443_v28, %v3475_v45  ;;  %6765 = vpow2.f32 %v5697_v6  ;;  %v5698_v3 = vmul.f32 -1.442695, %v8735_v12 }
 0x304   : > { %v6754_v30 = vpop.eup %6753  ;;  %v3604_v59 = vadd.f32 1e-05, %v3540_v51  ;;  %v3506_v25 = vsub.f32 %v3442_v21, %v3474_v1  ;;  %v3256_v39 = vpop.xlane.xlu1 %3255  ;;  %6767 = vrcp.f32 %v3861_v38  ;;  %v3663_v52 = vmul.f32 %v6752_v35, %v3567_v58 }
 0x305   : > { %v3572_v29 = vsub.f32 %v8298_v63, %v8695_v10  ;;  %6769 = vrsqrt.f32 %v3605_v33  ;;  %v3539_v48 = vmax.f32 %v3507_v20, 0.0  ;;  %v3253_v57 = vpop.xlane.xlu0 %3252  ;;  %v3662_v45 = vmul.f32 %v6754_v30, %v3566_v19 }
 0x306   : > { %v3571_v53 = vsub.f32 %v8319_v22, %v8702_v2  ;;  %v3570_v41 = vsub.f32 %v8302_v43, %v8722_v17  ;;  %v3538_v15 = vmax.f32 %v3506_v25, 0.0  ;;  %v3701_v14 = vmul.f32 %v8451_v44, %v3663_v52 }
 0x307   : > { %v6756_v62 = vpop.eup %6755  ;;  %v3603_v58 = vadd.f32 1e-05, %v3539_v48  ;;  %v8752_v42 = vmul.f32 0.0625, %v3256_v39  ;;  %v8754_v1 = vmul.f32 0.0625, %v3253_v57  ;;  %6771 = vpow2.f32 %v5698_v3 }
 0x308   : > { %6773 = vrsqrt.f32 %v3604_v59  ;;  %v3602_v8 = vadd.f32 1e-05, %v3538_v15  ;;  %v3250_v36 = vpop.xlane.xlu1 %3249  ;;  %v3863_v32 = vadd.f32 1.0, %v6756_v62  ;;  %v3665_v19 = vmul.f32 %v6746_v0, %v3569_v7 }
 0x309   : > { %v6758_v60 = vpop.eup %6757  ;;  %6775 = vrsqrt.f32 %v3603_v58  ;;  %v8759_v13 = vmul.f32 0.0625, %v3250_v36  ;;  %v3247_v37 = vpop.xlane.xlu0 %3246  ;;  %v3700_v28 = vmul.f32 %v8451_v44, %v3662_v45  ;;  %v8763_v23 = vadd.f32 %v8461_v47, %v3701_v14 }
 0x30a   : > { %v6760_v6 = vpop.eup %6759  ;;  %6777 = vrsqrt.f32 %v3602_v8  ;;  %v3954_v51 = vmul.f32 %v6758_v60, %v8659_v49  ;;  %v8766_v21 = vmul.f32 0.0625, %v3247_v37  ;;  %v3664_v5 = vmul.f32 %v6750_v54, %v3568_v61 }
 0x30b   : > { %v6762_v55 = vpop.eup %6761  ;;  %v3481_v7 = vmul.f32 %v8752_v42, %v8752_v42  ;;  %v3480_v0 = vmul.f32 %v8754_v1, %v8754_v1  ;;  %v3955_v38 = vmul.f32 %v6760_v6, %v8666_v31  ;;  %6779 = vrcp.f32 %v3863_v32 }
 0x30c   : > { %v6764_v35 = vpop.eup %6763  ;;  %v3479_v49 = vmul.f32 %v8759_v13, %v8759_v13  ;;  %v3478_v33 = vmul.f32 %v8766_v21, %v8766_v21  ;;  %v3956_v56 = vmul.f32 %v6762_v55, %v8662_v16  ;;  %v3411_v9 = vpop.xlane.xlu1 %3410  ;;  %v8782_v61 = vadd.f32 %v8461_v47, %v3700_v28 }
 0x30d   : > { %v6766_v54 = vpop.eup %6765  ;;  %v3980_v20 = vpack.c.bf16 %v3955_v38, %v3954_v51  ;;  %v3447_v3 = vmul.f32 0.0625, %v3411_v9  ;;  %v3408_v30 = vpop.xlane.xlu0 %3407  ;;  %v3862_v59 = vadd.f32 1.0, %v6764_v35  ;;  %v5700_v31 = vmul.f32 -1.442695, %v8763_v23 }
 0x30e   : > { %v6768_v25 = vpop.eup %6767  ;;  %v3446_v39 = vmul.f32 0.0625, %v3408_v30  ;;  %v3864_v52 = vadd.f32 1.0, %v6766_v54  ;;  %v5699_v48 = vmul.f32 -1.442695, %v8782_v61  ;;  %v3702_v57 = vmul.f32 %v8451_v44, %v3664_v5 }
 0x30f   : > { %v6770_v45 = vpop.eup %6769  ;;  %6321 = vmatprep.mubr.msk.bf16.mxu1 %vm3160_vm8, %v3980_v20  ;;  %v3957_v16 = vmul.f32 %v6768_v25, %v8669_v18  ;;  %v3511_v15 = vsub.f32 %v3447_v3, %v3479_v49  ;;  %6781 = vrcp.f32 %v3862_v59  ;;  %v3703_v14 = vmul.f32 %v8451_v44, %v3665_v19 }
 0x310   : > { %v3510_v62 = vsub.f32 %v3446_v39, %v3478_v33  ;;  %v3417_v58 = vpop.xlane.xlu1 %3416  ;;  %6783 = vrcp.f32 %v3864_v52  ;;  %v8791_v8 = vadd.f32 %v8461_v47, %v3702_v57  ;;  %v3669_v36 = vmul.f32 %v6770_v45, %v3573_v34 }
 0x311   : > { %v6772_v32 = vpop.eup %6771  ;;  %v3981_v60 = vpack.c.bf16 %v3957_v16, %v3956_v56  ;;  %v3543_v37 = vmax.f32 %v3511_v15, 0.0  ;;  %v3449_v28 = vmul.f32 0.0625, %v3417_v58  ;;  %v3414_v6 = vpop.xlane.xlu0 %3413  ;;  %6785 = vpow2.f32 %v5699_v48 }
 0x312   : > { %v6774_v18 = vpop.eup %6773  ;;  %v3542_v51 = vmax.f32 %v3510_v62, 0.0  ;;  %v3448_v5 = vmul.f32 0.0625, %v3414_v6  ;;  %v3865_v44 = vadd.f32 1.0, %v6772_v32  ;;  %6787 = vpow2.f32 %v5700_v31 }
 0x313   : > { %v6776_v19 = vpop.eup %6775  ;;  %6322 = vmatmul.mubr.msk.bf16.gmra.mrb[44].mxu1 %vm3160_vm8, %v3981_v60  ;;  %v3607_v55 = vadd.f32 1e-05, %v3543_v37  ;;  %v3513_v38 = vsub.f32 %v3449_v28, %v3481_v7  ;;  %v8798_v35 = vadd.f32 %v8461_v47, %v3703_v14  ;;  %v5701_v40 = vmul.f32 -1.442695, %v8791_v8 }
 0x314   : > { %v6778_v24 = vpop.eup %6777  ;;  %v3606_v34 = vadd.f32 1e-05, %v3542_v51  ;;  %v3512_v49 = vsub.f32 %v3448_v5, %v3480_v0  ;;  %6789 = vrcp.f32 %v3865_v44  ;;  %v3667_v33 = vmul.f32 %v6776_v19, %v3571_v53  ;;  %v8812_v0 = vld [vmem:[%s9771_s3] ss:$0 sm:$0xff] }
 0x315   : > { %v6780_v56 = vpop.eup %6779  ;;  %6791 = vrsqrt.f32 %v3607_v55  ;;  %v3545_v9 = vmax.f32 %v3513_v38, 0.0  ;;  %v5702_v54 = vmul.f32 -1.442695, %v8798_v35  ;;  %v3666_v47 = vmul.f32 %v6778_v24, %v3570_v41 }
 0x316   : > { %6793 = vrsqrt.f32 %v3606_v34  ;;  %v3544_v7 = vmax.f32 %v3512_v49, 0.0  ;;  %v3959_v20 = vmul.f32 %v6780_v56, %v8706_v4  ;;  %v3705_v22 = vmul.f32 %v8812_v0, %v3667_v33  ;;  %v8822_v4 = vld [vmem:[%s9772_s4] ss:$0 sm:$0xff] }
 0x317   : > { %v3609_v2 = vadd.f32 1e-05, %v3545_v9  ;;  %6795 = vpow2.f32 %v5701_v40  ;;  %v3704_v53 = vmul.f32 %v8812_v0, %v3666_v47  ;;  %v3668_v43 = vmul.f32 %v6774_v18, %v3572_v29 }
 0x318   : > { %v3608_v17 = vadd.f32 1e-05, %v3544_v7  ;;  %6797 = vpow2.f32 %v5702_v54  ;;  %v8825_v41 = vadd.f32 %v8822_v4, %v3705_v22  ;;  %v3707_v3 = vmul.f32 %v8812_v0, %v3669_v36 }
 0x319   : > { %v6782_v30 = vpop.eup %6781  ;;  %6799 = vrsqrt.f32 %v3609_v2  ;;  %v8829_v59 = vadd.f32 %v8822_v4, %v3704_v53  ;;  %v3706_v63 = vmul.f32 %v8812_v0, %v3668_v43  ;;  %v3575_v36 = vsub.f32 %v8348_v50, %v8759_v13 }
 0x31a   : > { %v6784_v10 = vpop.eup %6783  ;;  %6801 = vrsqrt.f32 %v3608_v17  ;;  %v3958_v29 = vmul.f32 %v6782_v30, %v8712_v11  ;;  %v5704_v31 = vmul.f32 -1.442695, %v8825_v41  ;;  %v8835_v25 = vadd.f32 %v8822_v4, %v3707_v3 }
 0x31b   : > { %v6786_v39 = vpop.eup %6785  ;;  %v5703_v52 = vmul.f32 -1.442695, %v8829_v59  ;;  %v8839_v48 = vadd.f32 %v8822_v4, %v3706_v63  ;;  %v3960_v16 = vmul.f32 %v6784_v10, %v8729_v46  ;;  %v3574_v60 = vsub.f32 %v8338_v26, %v8766_v21  ;;  %v9874_v26 = vld [vmem:[#allocation10_spill] sm:$0xff] }
 0x31c   : > { %v6788_v57 = vpop.eup %6787  ;;  %v3982_v45 = vpack.c.bf16 %v3959_v20, %v3958_v29  ;;  %v3866_v15 = vadd.f32 1.0, %v6786_v39  ;;  %6803 = vpow2.f32 %v5704_v31  ;;  %v5706_v62 = vmul.f32 -1.442695, %v8835_v25 }
 0x31d   : > { %v3867_v14 = vadd.f32 1.0, %v6788_v57  ;;  %6805 = vpow2.f32 %v5703_v52  ;;  %v5705_v11 = vmul.f32 -1.442695, %v8839_v48  ;;  %v3577_v50 = vsub.f32 %v8342_v27, %v8752_v42 }
 0x31e   : > { %v6790_v58 = vpop.eup %6789  ;;  %6325 = vmatprep.mubr.msk.bf16.mxu1 %vm3160_vm8, %v3982_v45  ;;  %6807 = vrcp.f32 %v3866_v15  ;;  %v3576_v21 = vsub.f32 %v9874_v26, %v8754_v1 }
 0x31f   : > { %v6792_v32 = vpop.eup %6791  ;;  %v3961_v46 = vmul.f32 %v6790_v58, %v8735_v12  ;;  %6809 = vrcp.f32 %v3867_v14 }
 0x320   : > { %v6794_v37 = vpop.eup %6793  ;;  %6811 = vpow2.f32 %v5705_v11  ;;  %v3671_v28 = vmul.f32 %v6792_v32, %v3575_v36 }
 0x321   : > { %v6796_v6 = vpop.eup %6795  ;;  %v3670_v18 = vmul.f32 %v6794_v37, %v3574_v60  ;;  %v3983_v51 = vpack.c.bf16 %v3961_v46, %v3960_v16  ;;  %6813 = vpow2.f32 %v5706_v62 }
 0x322   : > { %v6798_v5 = vpop.eup %6797  ;;  %v3868_v13 = vadd.f32 1.0, %v6796_v6  ;;  %v3709_v44 = vmul.f32 %v8812_v0, %v3671_v28 }
 0x323   : > { %v6800_v19 = vpop.eup %6799  ;;  %6326 = vmatmul.mubr.msk.bf16.gmra.mrb[48].mxu1 %vm3160_vm8, %v3983_v51  ;;  %v3869_v12 = vadd.f32 1.0, %v6798_v5  ;;  %v3708_v55 = vmul.f32 %v8812_v0, %v3670_v18 }
 0x324   : > { %v6802_v38 = vpop.eup %6801  ;;  %6815 = vrcp.f32 %v3868_v13  ;;  %v8858_v40 = vadd.f32 %v8822_v4, %v3709_v44  ;;  %v3673_v24 = vmul.f32 %v6800_v19, %v3577_v50  ;;  %v8888_v19 = vld [vmem:[%s9774_s6] ss:$0 sm:$0xff] }
 0x325   : > { %v3672_v34 = vmul.f32 %v6802_v38, %v3576_v21  ;;  %6817 = vrcp.f32 %v3869_v12  ;;  %v8861_v27 = vadd.f32 %v8822_v4, %v3708_v55 }
 0x326   : > { %v6804_v42 = vpop.eup %6803  ;;  %v5708_v49 = vmul.f32 -1.442695, %v8858_v40  ;;  %v3711_v1 = vmul.f32 %v8812_v0, %v3673_v24 }
 0x327   : > { %v6806_v33 = vpop.eup %6805  ;;  %v3871_v56 = vadd.f32 1.0, %v6804_v42  ;;  %v5707_v9 = vmul.f32 -1.442695, %v8861_v27  ;;  %v3710_v54 = vmul.f32 %v8812_v0, %v3672_v34 }
 0x328   : > { %v6808_v47 = vpop.eup %6807  ;;  %v3870_v7 = vadd.f32 1.0, %v6806_v33  ;;  %6819 = vpow2.f32 %v5708_v49  ;;  %v3749_v20 = vadd.f32 %v8822_v4, %v3711_v1 }
 0x329   : > { %v6810_v22 = vpop.eup %6809  ;;  %v3962_v2 = vmul.f32 %v6808_v47, %v8782_v61  ;;  %6821 = vrcp.f32 %v3871_v56  ;;  %v3748_v53 = vadd.f32 %v8822_v4, %v3710_v54 }
 0x32a   : > { %v6812_v43 = vpop.eup %6811  ;;  %v3963_v17 = vmul.f32 %v6810_v22, %v8763_v23  ;;  %6823 = vrcp.f32 %v3870_v7  ;;  %v5710_v3 = vmul.f32 -1.442695, %v3749_v20 }
 0x32b   : > { %v6814_v30 = vpop.eup %6813  ;;  %v3872_v63 = vadd.f32 1.0, %v6812_v43  ;;  %6825 = vpow2.f32 %v5707_v9  ;;  %v5709_v0 = vmul.f32 -1.442695, %v3748_v53 }
 0x32c   : > { %v3984_v10 = vpack.c.bf16 %v3963_v17, %v3962_v2  ;;  %v3873_v29 = vadd.f32 1.0, %v6814_v30  ;;  %6827 = vpow2.f32 %v5710_v3 }
 0x32d   : > { %6829 = vrcp.f32 %v3872_v63 }
 0x32e   : > { %v6816_v31 = vpop.eup %6815  ;;  %6329 = vmatprep.mubr.msk.bf16.mxu1 %vm3160_vm8, %v3984_v10  ;;  %6831 = vrcp.f32 %v3873_v29 }
 0x32f   : > { %v6818_v61 = vpop.eup %6817  ;;  %v3964_v4 = vmul.f32 %v6816_v31, %v8791_v8  ;;  %6833 = vpow2.f32 %v5709_v0 }
 0x330   : > { %v3965_v23 = vmul.f32 %v6818_v61, %v8798_v35 }
 0x332   : > { %v6820_v39 = vpop.eup %6819  ;;  %v3985_v52 = vpack.c.bf16 %v3965_v23, %v3964_v4 }
 0x333   : > { %v6822_v57 = vpop.eup %6821  ;;  %v3875_v45 = vadd.f32 1.0, %v6820_v39 }
 0x334   : > { %v6824_v16 = vpop.eup %6823  ;;  %6330 = vmatmul.mubr.msk.bf16.gmra.mrb[52].mxu1 %vm3160_vm8, %v3985_v52  ;;  %v3967_v15 = vmul.f32 %v6822_v57, %v8825_v41 }
 0x335   : > { %v6826_v14 = vpop.eup %6825  ;;  %v3966_v11 = vmul.f32 %v6824_v16, %v8829_v59  ;;  %6835 = vrcp.f32 %v3875_v45 }
 0x336   : > { %v6828_v62 = vpop.eup %6827  ;;  %v3874_v58 = vadd.f32 1.0, %v6826_v14 }
 0x337   : > { %v6830_v36 = vpop.eup %6829  ;;  %v3986_v8 = vpack.c.bf16 %v3967_v15, %v3966_v11  ;;  %v3877_v32 = vadd.f32 1.0, %v6828_v62 }
 0x338   : > { %v6832_v60 = vpop.eup %6831  ;;  %v3968_v35 = vmul.f32 %v6830_v36, %v8839_v48  ;;  %6837 = vrcp.f32 %v3874_v58 }
 0x339   : > { %v6834_v46 = vpop.eup %6833  ;;  %6333 = vmatprep.mubr.msk.bf16.mxu1 %vm3160_vm8, %v3986_v8  ;;  %v3969_v37 = vmul.f32 %v6832_v60, %v8835_v25  ;;  %6839 = vrcp.f32 %v3877_v32 }
 0x33a   : > { %v3876_v41 = vadd.f32 1.0, %v6834_v46 }
 0x33b   : > { %v3987_v28 = vpack.c.bf16 %v3969_v37, %v3968_v35 }
 0x33c   : > { %6841 = vrcp.f32 %v3876_v41 }
 0x33d   : > { %6334 = vmatmul.mubr.msk.bf16.gmra.mrb[56].mxu1 %vm3160_vm8, %v3987_v28 }
 0x33f   : > { %v6836_v59 = vpop.eup %6835 }
 0x340   : > { %v3971_v6 = vmul.f32 %v6836_v59, %v8858_v40 }
 0x342   : > { %v6838_v18 = vpop.eup %6837 }
 0x343   : > { %v6840_v51 = vpop.eup %6839  ;;  %v3970_v5 = vmul.f32 %v6838_v18, %v8861_v27 }
 0x344   : > { %v3973_v50 = vmul.f32 %v6840_v51, %v3749_v20 }
 0x345   : > { %v3988_v48 = vpack.c.bf16 %v3971_v6, %v3970_v5 }
 0x346   : > { %v6842_v13 = vpop.eup %6841 }
 0x347   : > { %6337 = vmatprep.mubr.msk.bf16.mxu1 %vm3160_vm8, %v3988_v48  ;;  %v3972_v44 = vmul.f32 %v6842_v13, %v3748_v53 }
 0x349   : > { %v3989_v25 = vpack.c.bf16 %v3973_v50, %v3972_v44 }
 0x34b   : > { %6338 = vmatmul.mubr.msk.bf16.gmra.mrb[60].mxu1 %vm3160_vm8, %v3989_v25 }
 0x3af   : > { %v6311_v26 = vpop.f32.mrb[32].mxu1 }
 0x3b0   : > { %v8891_v21 = vadd.f32 %v6311_v26, %v8888_v19  ;;  %v4087_v12 = vpop.f32.mrb[33].mxu1 }
 0x3b1   : > { %v6312_v55 = vpop.f32.mrb[34].mxu1  ;;  %v8894_v38 = vadd.f32 %v8888_v19, %v4087_v12 }
 0x3b2   : > { %v8897_v40 = vadd.f32 %v6312_v55, %v8888_v19  ;;  %v4090_v24 = vpop.f32.mrb[35].mxu1  ;;  %v4222_v34 = vsel %vm3160_vm8, %v8891_v21, 0.0  ;;  %v4346_v1 = vmul.f32 %v8891_v21, %v8891_v21 }
 0x3b3   : > { %4223 = vadd.xlane.f32.xlu0 %v4222_v34  ;;  %v8902_v27 = vadd.f32 %v8888_v19, %v4090_v24  ;;  %v4216_v49 = vsel %vm3160_vm8, %v8894_v38, 0.0  ;;  %v4344_v54 = vmul.f32 %v8894_v38, %v8894_v38 }
 0x3b4   : > { %v4225_v42 = vsel %vm3160_vm8, %v8897_v40, 0.0  ;;  %v4347_v56 = vmul.f32 %v8897_v40, %v8897_v40  ;;  %v4382_v9 = vsel %vm3160_vm8, %v4346_v1, 0.0 }
 0x3b5   : > { %4226 = vadd.xlane.f32.xlu1 %v4225_v42  ;;  %v4219_v33 = vsel %vm3160_vm8, %v8902_v27, 0.0  ;;  %v4345_v7 = vmul.f32 %v8902_v27, %v8902_v27  ;;  %v4376_v20 = vsel %vm3160_vm8, %v4344_v54, 0.0 }
 0x3b6   : > { %v4385_v47 = vsel %vm3160_vm8, %v4347_v56, 0.0 }
 0x3b7   : > { %4217 = vadd.xlane.f32.xlu0 %v4216_v49  ;;  %v4379_v43 = vsel %vm3160_vm8, %v4345_v7, 0.0 }
 0x3b9   : > { %4220 = vadd.xlane.f32.xlu1 %v4219_v33 }
 0x3bb   : > { %4383 = vadd.xlane.f32.xlu0 %v4382_v9 }
 0x3bd   : > { %4386 = vadd.xlane.f32.xlu1 %v4385_v47 }
 0x3bf   : > { %4377 = vadd.xlane.f32.xlu0 %v4376_v20 }
 0x3c0   : > { %v6315_v22 = vpop.f32.mrb[36].mxu1 }
 0x3c1   : > { %v8922_v2 = vadd.f32 %v6315_v22, %v8888_v19  ;;  %v4103_v53 = vpop.f32.mrb[37].mxu1  ;;  %4380 = vadd.xlane.f32.xlu1 %v4379_v43 }
 0x3c2   : > { %v6316_v17 = vpop.f32.mrb[38].mxu1  ;;  %v8926_v3 = vadd.f32 %v8888_v19, %v4103_v53 }
 0x3c3   : > { %v8929_v30 = vadd.f32 %v6316_v17, %v8888_v19  ;;  %v4106_v63 = vpop.f32.mrb[39].mxu1  ;;  %v4234_v0 = vsel %vm3160_vm8, %v8922_v2, 0.0  ;;  %v4350_v61 = vmul.f32 %v8922_v2, %v8922_v2 }
 0x3c4   : > { %4235 = vadd.xlane.f32.xlu0 %v4234_v0  ;;  %v8934_v10 = vadd.f32 %v8888_v19, %v4106_v63  ;;  %v4228_v31 = vsel %vm3160_vm8, %v8926_v3, 0.0  ;;  %v4348_v52 = vmul.f32 %v8926_v3, %v8926_v3 }
 0x3c5   : > { %v4237_v29 = vsel %vm3160_vm8, %v8929_v30, 0.0  ;;  %v4351_v23 = vmul.f32 %v8929_v30, %v8929_v30  ;;  %v4394_v39 = vsel %vm3160_vm8, %v4350_v61, 0.0 }
 0x3c6   : > { %4238 = vadd.xlane.f32.xlu1 %v4237_v29  ;;  %v4231_v4 = vsel %vm3160_vm8, %v8934_v10, 0.0  ;;  %v4349_v45 = vmul.f32 %v8934_v10, %v8934_v10  ;;  %v4388_v16 = vsel %vm3160_vm8, %v4348_v52, 0.0 }
 0x3c7   : > { %v4397_v57 = vsel %vm3160_vm8, %v4351_v23, 0.0 }
 0x3c8   : > { %4229 = vadd.xlane.f32.xlu0 %v4228_v31  ;;  %v4391_v15 = vsel %vm3160_vm8, %v4349_v45, 0.0 }
 0x3ca   : > { %4232 = vadd.xlane.f32.xlu1 %v4231_v4 }
 0x3cc   : > { %4395 = vadd.xlane.f32.xlu0 %v4394_v39 }
 0x3ce   : > { %4398 = vadd.xlane.f32.xlu1 %v4397_v57 }
 0x3d0   : > { %4389 = vadd.xlane.f32.xlu0 %v4388_v16 }
 0x3d2   : > { %4392 = vadd.xlane.f32.xlu1 %v4391_v15 }
 0x3d3   : > { %v6319_v14 = vpop.f32.mrb[40].mxu1 }
 0x3d4   : > { %v8955_v11 = vadd.f32 %v6319_v14, %v8888_v19  ;;  %v4119_v62 = vpop.f32.mrb[41].mxu1 }
 0x3d5   : > { %v6320_v58 = vpop.f32.mrb[42].mxu1  ;;  %v8958_v36 = vadd.f32 %v8888_v19, %v4119_v62 }
 0x3d6   : > { %v8961_v8 = vadd.f32 %v6320_v58, %v8888_v19  ;;  %v4122_v32 = vpop.f32.mrb[43].mxu1  ;;  %v4246_v60 = vsel %vm3160_vm8, %v8955_v11, 0.0  ;;  %v4354_v41 = vmul.f32 %v8955_v11, %v8955_v11 }
 0x3d7   : > { %4247 = vadd.xlane.f32.xlu0 %v4246_v60  ;;  %v8966_v35 = vadd.f32 %v8888_v19, %v4122_v32  ;;  %v4240_v37 = vsel %vm3160_vm8, %v8958_v36, 0.0  ;;  %v4352_v18 = vmul.f32 %v8958_v36, %v8958_v36 }
 0x3d8   : > { %v4249_v46 = vsel %vm3160_vm8, %v8961_v8, 0.0  ;;  %v4355_v59 = vmul.f32 %v8961_v8, %v8961_v8  ;;  %v4406_v6 = vsel %vm3160_vm8, %v4354_v41, 0.0 }
 0x3d9   : > { %4250 = vadd.xlane.f32.xlu1 %v4249_v46  ;;  %v4243_v28 = vsel %vm3160_vm8, %v8966_v35, 0.0  ;;  %v4353_v5 = vmul.f32 %v8966_v35, %v8966_v35  ;;  %v4400_v48 = vsel %vm3160_vm8, %v4352_v18, 0.0 }
 0x3da   : > { %v4409_v51 = vsel %vm3160_vm8, %v4355_v59, 0.0 }
 0x3db   : > { %4241 = vadd.xlane.f32.xlu0 %v4240_v37  ;;  %v4403_v50 = vsel %vm3160_vm8, %v4353_v5, 0.0 }
 0x3dd   : > { %4244 = vadd.xlane.f32.xlu1 %v4243_v28 }
 0x3df   : > { %4407 = vadd.xlane.f32.xlu0 %v4406_v6 }
 0x3e1   : > { %4410 = vadd.xlane.f32.xlu1 %v4409_v51 }
 0x3e3   : > { %4401 = vadd.xlane.f32.xlu0 %v4400_v48 }
 0x3e5   : > { %4404 = vadd.xlane.f32.xlu1 %v4403_v50 }
 0x3e6   : > { %v6323_v13 = vpop.f32.mrb[44].mxu1 }
 0x3e7   : > { %v8987_v44 = vadd.f32 %v6323_v13, %v8888_v19  ;;  %v4135_v25 = vpop.f32.mrb[45].mxu1 }
 0x3e8   : > { %v6324_v26 = vpop.f32.mrb[46].mxu1  ;;  %v8990_v12 = vadd.f32 %v8888_v19, %v4135_v25 }
 0x3e9   : > { %v8993_v55 = vadd.f32 %v6324_v26, %v8888_v19  ;;  %v4138_v24 = vpop.f32.mrb[47].mxu1  ;;  %v4258_v34 = vsel %vm3160_vm8, %v8987_v44, 0.0  ;;  %v4358_v33 = vmul.f32 %v8987_v44, %v8987_v44 }
 0x3ea   : > { %4259 = vadd.xlane.f32.xlu0 %v4258_v34  ;;  %v8998_v42 = vadd.f32 %v8888_v19, %v4138_v24  ;;  %v4252_v1 = vsel %vm3160_vm8, %v8990_v12, 0.0  ;;  %v4356_v47 = vmul.f32 %v8990_v12, %v8990_v12 }
 0x3eb   : > { %v4261_v49 = vsel %vm3160_vm8, %v8993_v55, 0.0  ;;  %v4359_v9 = vmul.f32 %v8993_v55, %v8993_v55  ;;  %v4418_v54 = vsel %vm3160_vm8, %v4358_v33, 0.0 }
 0x3ec   : > { %4262 = vadd.xlane.f32.xlu1 %v4261_v49  ;;  %v4255_v56 = vsel %vm3160_vm8, %v8998_v42, 0.0  ;;  %v4357_v20 = vmul.f32 %v8998_v42, %v8998_v42  ;;  %v4412_v22 = vsel %vm3160_vm8, %v4356_v47, 0.0 }
 0x3ed   : > { %v4421_v7 = vsel %vm3160_vm8, %v4359_v9, 0.0 }
 0x3ee   : > { %4253 = vadd.xlane.f32.xlu0 %v4252_v1  ;;  %v4415_v63 = vsel %vm3160_vm8, %v4357_v20, 0.0 }
 0x3f0   : > { %4256 = vadd.xlane.f32.xlu1 %v4255_v56 }
 0x3f2   : > { %4419 = vadd.xlane.f32.xlu0 %v4418_v54 }
 0x3f4   : > { %4422 = vadd.xlane.f32.xlu1 %v4421_v7 }
 0x3f6   : > { %v6327_v53 = vpop.f32.mrb[48].mxu1  ;;  %4413 = vadd.xlane.f32.xlu0 %v4412_v22 }
 0x3f7   : > { %v9018_v43 = vadd.f32 %v6327_v53, %v8888_v19  ;;  %v4151_v17 = vpop.f32.mrb[49].mxu1 }
 0x3f8   : > { %v6328_v0 = vpop.f32.mrb[50].mxu1  ;;  %4416 = vadd.xlane.f32.xlu1 %v4415_v63  ;;  %v9022_v29 = vadd.f32 %v8888_v19, %v4151_v17 }
 0x3f9   : > { %v9025_v31 = vadd.f32 %v6328_v0, %v8888_v19  ;;  %v4154_v61 = vpop.f32.mrb[51].mxu1  ;;  %v4270_v4 = vsel %vm3160_vm8, %v9018_v43, 0.0  ;;  %v4362_v57 = vmul.f32 %v9018_v43, %v9018_v43 }
 0x3fa   : > { %4271 = vadd.xlane.f32.xlu0 %v4270_v4  ;;  %v9030_v23 = vadd.f32 %v8888_v19, %v4154_v61  ;;  %v4264_v52 = vsel %vm3160_vm8, %v9022_v29, 0.0  ;;  %v4360_v14 = vmul.f32 %v9022_v29, %v9022_v29 }
 0x3fb   : > { %v4273_v39 = vsel %vm3160_vm8, %v9025_v31, 0.0  ;;  %v4363_v16 = vmul.f32 %v9025_v31, %v9025_v31  ;;  %v4430_v15 = vsel %vm3160_vm8, %v4362_v57, 0.0 }
 0x3fc   : > { %4274 = vadd.xlane.f32.xlu1 %v4273_v39  ;;  %v4267_v45 = vsel %vm3160_vm8, %v9030_v23, 0.0  ;;  %v4361_v58 = vmul.f32 %v9030_v23, %v9030_v23  ;;  %v4424_v32 = vsel %vm3160_vm8, %v4360_v14, 0.0 }
 0x3fd   : > { %v4433_v62 = vsel %vm3160_vm8, %v4363_v16, 0.0 }
 0x3fe   : > { %4265 = vadd.xlane.f32.xlu0 %v4264_v52  ;;  %v4427_v46 = vsel %vm3160_vm8, %v4361_v58, 0.0 }
 0x400   : > { %4268 = vadd.xlane.f32.xlu1 %v4267_v45 }
 0x402   : > { %4431 = vadd.xlane.f32.xlu0 %v4430_v15 }
 0x404   : > { %4434 = vadd.xlane.f32.xlu1 %v4433_v62 }
 0x406   : > { %4425 = vadd.xlane.f32.xlu0 %v4424_v32 }
 0x407   : > { %v6331_v60 = vpop.f32.mrb[52].mxu1 }
 0x408   : > { %v9051_v37 = vadd.f32 %v6331_v60, %v8888_v19  ;;  %v4167_v41 = vpop.f32.mrb[53].mxu1  ;;  %4428 = vadd.xlane.f32.xlu1 %v4427_v46 }
 0x409   : > { %v6332_v28 = vpop.f32.mrb[54].mxu1  ;;  %v9054_v59 = vadd.f32 %v8888_v19, %v4167_v41 }
 0x40a   : > { %v9057_v6 = vadd.f32 %v6332_v28, %v8888_v19  ;;  %v4170_v18 = vpop.f32.mrb[55].mxu1  ;;  %v4282_v51 = vsel %vm3160_vm8, %v9051_v37, 0.0  ;;  %v4366_v13 = vmul.f32 %v9051_v37, %v9051_v37 }
 0x40b   : > { %4283 = vadd.xlane.f32.xlu0 %v4282_v51  ;;  %v9062_v5 = vadd.f32 %v8888_v19, %v4170_v18  ;;  %v4276_v50 = vsel %vm3160_vm8, %v9054_v59, 0.0  ;;  %v4364_v1 = vmul.f32 %v9054_v59, %v9054_v59 }
 0x40c   : > { %v4285_v48 = vsel %vm3160_vm8, %v9057_v6, 0.0  ;;  %v4367_v26 = vmul.f32 %v9057_v6, %v9057_v6  ;;  %v4442_v49 = vsel %vm3160_vm8, %v4366_v13, 0.0 }
 0x40d   : > { %4286 = vadd.xlane.f32.xlu1 %v4285_v48  ;;  %v4279_v25 = vsel %vm3160_vm8, %v9062_v5, 0.0  ;;  %v4365_v47 = vmul.f32 %v9062_v5, %v9062_v5  ;;  %v4436_v7 = vsel %vm3160_vm8, %v4364_v1, 0.0 }
 0x40e   : > { %v4445_v9 = vsel %vm3160_vm8, %v4367_v26, 0.0 }
 0x40f   : > { %4277 = vadd.xlane.f32.xlu0 %v4276_v50  ;;  %v4439_v22 = vsel %vm3160_vm8, %v4365_v47, 0.0 }
 0x410   : > { %v6335_v24 = vpop.f32.mrb[56].mxu1 }
 0x411   : > { %4280 = vadd.xlane.f32.xlu1 %v4279_v25  ;;  %v4183_v34 = vpop.f32.mrb[57].mxu1  ;;  %v9079_v54 = vadd.f32 %v6335_v24, %v8888_v19 }
 0x412   : > { %v6336_v33 = vpop.f32.mrb[58].mxu1  ;;  %v9091_v17 = vadd.f32 %v8888_v19, %v4183_v34 }
 0x413   : > { %4443 = vadd.xlane.f32.xlu0 %v4442_v49  ;;  %v4186_v56 = vpop.f32.mrb[59].mxu1  ;;  %v9085_v20 = vadd.f32 %v6336_v33, %v8888_v19  ;;  %v4294_v53 = vsel %vm3160_vm8, %v9079_v54, 0.0  ;;  %v4370_v4 = vmul.f32 %v9079_v54, %v9079_v54 }
 0x414   : > { %v9096_v0 = vadd.f32 %v8888_v19, %v4186_v56  ;;  %v4288_v61 = vsel %vm3160_vm8, %v9091_v17, 0.0  ;;  %v4368_v62 = vmul.f32 %v9091_v17, %v9091_v17 }
 0x415   : > { %4446 = vadd.xlane.f32.xlu1 %v4445_v9  ;;  %v4297_v63 = vsel %vm3160_vm8, %v9085_v20, 0.0  ;;  %v4371_v45 = vmul.f32 %v9085_v20, %v9085_v20  ;;  %v4454_v14 = vsel %vm3160_vm8, %v4370_v4, 0.0 }
 0x416   : > { %v4291_v57 = vsel %vm3160_vm8, %v9096_v0, 0.0  ;;  %v4369_v60 = vmul.f32 %v9096_v0, %v9096_v0  ;;  %v4448_v46 = vsel %vm3160_vm8, %v4368_v62, 0.0 }
 0x417   : > { %4437 = vadd.xlane.f32.xlu0 %v4436_v7  ;;  %v4457_v58 = vsel %vm3160_vm8, %v4371_v45, 0.0 }
 0x418   : > { %v4451_v28 = vsel %vm3160_vm8, %v4369_v60, 0.0 }
 0x419   : > { %4440 = vadd.xlane.f32.xlu1 %v4439_v22 }
 0x41b   : > { %4295 = vadd.xlane.f32.xlu0 %v4294_v53 }
 0x41d   : > { %4298 = vadd.xlane.f32.xlu1 %v4297_v63 }
 0x41e   : > { %v6339_v39 = vpop.f32.mrb[60].mxu1 }
 0x41f   : > { %4289 = vadd.xlane.f32.xlu0 %v4288_v61  ;;  %v4199_v52 = vpop.f32.mrb[61].mxu1  ;;  %v9111_v32 = vadd.f32 %v6339_v39, %v8888_v19 }
 0x420   : > { %v6340_v16 = vpop.f32.mrb[62].mxu1  ;;  %v9123_v51 = vadd.f32 %v8888_v19, %v4199_v52 }
 0x421   : > { %4292 = vadd.xlane.f32.xlu1 %v4291_v57  ;;  %v4202_v15 = vpop.f32.mrb[63].mxu1  ;;  %v9117_v41 = vadd.f32 %v6340_v16, %v8888_v19  ;;  %v4306_v18 = vsel %vm3160_vm8, %v9111_v32, 0.0 }
 0x422   : > { %v9128_v50 = vadd.f32 %v8888_v19, %v4202_v15  ;;  %v4300_v13 = vsel %vm3160_vm8, %v9123_v51, 0.0  ;;  %v4372_v25 = vmul.f32 %v9123_v51, %v9123_v51  ;;  %v4374_v19 = vmul.f32 %v9111_v32, %v9111_v32 }
 0x423   : > { %4455 = vadd.xlane.f32.xlu0 %v4454_v14  ;;  %v4309_v48 = vsel %vm3160_vm8, %v9117_v41, 0.0  ;;  %v4375_v1 = vmul.f32 %v9117_v41, %v9117_v41 }
 0x424   : > { %v4303_v26 = vsel %vm3160_vm8, %v9128_v50, 0.0  ;;  %v4373_v24 = vmul.f32 %v9128_v50, %v9128_v50  ;;  %v4460_v34 = vsel %vm3160_vm8, %v4372_v25, 0.0  ;;  %v4466_v33 = vsel %vm3160_vm8, %v4374_v19, 0.0 }
 0x425   : > { %4458 = vadd.xlane.f32.xlu1 %v4457_v58  ;;  %v4469_v56 = vsel %vm3160_vm8, %v4375_v1, 0.0 }
 0x426   : > { %v4463_v49 = vsel %vm3160_vm8, %v4373_v24, 0.0 }
 0x427   : > { %4449 = vadd.xlane.f32.xlu0 %v4448_v46 }
 0x429   : > { %4452 = vadd.xlane.f32.xlu1 %v4451_v28 }
 0x42b   : > { %4307 = vadd.xlane.f32.xlu0 %v4306_v18 }
 0x42d   : > { %4310 = vadd.xlane.f32.xlu1 %v4309_v48 }
 0x42f   : > { %4301 = vadd.xlane.f32.xlu0 %v4300_v13 }
 0x431   : > { %4304 = vadd.xlane.f32.xlu1 %v4303_v26 }
 0x433   : > { %4461 = vadd.xlane.f32.xlu0 %v4460_v34 }
 0x435   : > { %4464 = vadd.xlane.f32.xlu1 %v4463_v49 }
 0x437   : > { %4467 = vadd.xlane.f32.xlu0 %v4466_v33 }
 0x439   : > { %4470 = vadd.xlane.f32.xlu1 %v4469_v56 }
 0x440   : > { %v4224_v9 = vpop.xlane.xlu0 %4223 }
 0x441   : > { %v4314_v22 = vmul.f32 0.0625, %v4224_v9 }
 0x442   : > { %v4227_v47 = vpop.xlane.xlu1 %4226 }
 0x443   : > { %v9146_v63 = vmul.f32 0.0625, %v4227_v47  ;;  %v4506_v4 = vmul.f32 %v4314_v22, %v4314_v22 }
 0x444   : > { %v4218_v7 = vpop.xlane.xlu0 %4217 }
 0x445   : > { %v9148_v39 = vmul.f32 0.0625, %v4218_v7  ;;  %v4507_v16 = vmul.f32 %v9146_v63, %v9146_v63 }
 0x446   : > { %v4221_v53 = vpop.xlane.xlu1 %4220 }
 0x447   : > { %v9150_v57 = vmul.f32 0.0625, %v4221_v53  ;;  %v4504_v58 = vmul.f32 %v9148_v39, %v9148_v39 }
 0x448   : > { %v4384_v61 = vpop.xlane.xlu0 %4383 }
 0x449   : > { %v4474_v52 = vmul.f32 0.0625, %v4384_v61  ;;  %v4505_v18 = vmul.f32 %v9150_v57, %v9150_v57 }
 0x44a   : > { %v4387_v45 = vpop.xlane.xlu1 %4386 }
 0x44b   : > { %v4538_v15 = vsub.f32 %v4474_v52, %v4506_v4  ;;  %v4475_v14 = vmul.f32 0.0625, %v4387_v45 }
 0x44c   : > { %v4378_v62 = vpop.xlane.xlu0 %4377 }
 0x44d   : > { %v4570_v60 = vmax.f32 %v4538_v15, 0.0  ;;  %v4539_v46 = vsub.f32 %v4475_v14, %v4507_v16  ;;  %v4472_v28 = vmul.f32 0.0625, %v4378_v62  ;;  %v4602_v14 = vsub.f32 %v8891_v21, %v4314_v22 }
 0x44e   : > { %v4381_v48 = vpop.xlane.xlu1 %4380 }
 0x44f   : > { %v4634_v13 = vadd.f32 1e-05, %v4570_v60  ;;  %v4571_v25 = vmax.f32 %v4539_v46, 0.0  ;;  %v4536_v26 = vsub.f32 %v4472_v28, %v4504_v58  ;;  %v4473_v24 = vmul.f32 0.0625, %v4381_v48  ;;  %v9174_v48 = vld [vmem:[%s9775_s7] ss:$0 sm:$0xff] }
 0x451   : > { %v4236_v34 = vpop.xlane.xlu0 %4235  ;;  %6843 = vrsqrt.f32 %v4634_v13  ;;  %v4635_v19 = vadd.f32 1e-05, %v4571_v25  ;;  %v4568_v49 = vmax.f32 %v4536_v26, 0.0  ;;  %v4537_v1 = vsub.f32 %v4473_v24, %v4505_v18 }
 0x452   : > { %v9158_v53 = vmul.f32 0.0625, %v4236_v34  ;;  %v4603_v13 = vsub.f32 %v8897_v40, %v9146_v63 }
 0x453   : > { %v4239_v33 = vpop.xlane.xlu1 %4238  ;;  %6845 = vrsqrt.f32 %v4635_v19  ;;  %v4632_v56 = vadd.f32 1e-05, %v4568_v49  ;;  %v4569_v9 = vmax.f32 %v4537_v1, 0.0  ;;  %v9183_v49 = vld [vmem:[%s9776_s8] ss:$0 sm:$0xff]  ;;  %v4600_v1 = vsub.f32 %v8894_v38, %v9148_v39 }
 0x454   : > { %v9160_v4 = vmul.f32 0.0625, %v4239_v33  ;;  %v4510_v45 = vmul.f32 %v9158_v53, %v9158_v53 }
 0x455   : > { %v4230_v47 = vpop.xlane.xlu0 %4229  ;;  %6847 = vrsqrt.f32 %v4632_v56  ;;  %v4633_v7 = vadd.f32 1e-05, %v4569_v9 }
 0x456   : > { %v9164_v16 = vmul.f32 0.0625, %v4230_v47  ;;  %v4511_v46 = vmul.f32 %v9160_v4, %v9160_v4 }
 0x457   : > { %v4233_v61 = vpop.xlane.xlu1 %4232  ;;  %6849 = vrsqrt.f32 %v4633_v7 }
 0x458   : > { %v9167_v62 = vmul.f32 0.0625, %v4233_v61  ;;  %v4508_v22 = vmul.f32 %v9164_v16, %v9164_v16 }
 0x459   : > { %v4396_v52 = vpop.xlane.xlu0 %4395 }
 0x45a   : > { %v4478_v15 = vmul.f32 0.0625, %v4396_v52  ;;  %v4509_v40 = vmul.f32 %v9167_v62, %v9167_v62 }
 0x45b   : > { %v4399_v58 = vpop.xlane.xlu1 %4398  ;;  %v6844_v60 = vpop.eup %6843 }
 0x45c   : > { %v4542_v28 = vsub.f32 %v4478_v15, %v4510_v45  ;;  %v4479_v18 = vmul.f32 0.0625, %v4399_v58  ;;  %v4698_v26 = vmul.f32 %v6844_v60, %v4602_v14  ;;  %v4601_v45 = vsub.f32 %v8902_v27, %v9150_v57 }
 0x45d   : > { %v4390_v25 = vpop.xlane.xlu0 %4389  ;;  %v6846_v21 = vpop.eup %6845 }
 0x45e   : > { %v4574_v24 = vmax.f32 %v4542_v28, 0.0  ;;  %v4543_v34 = vsub.f32 %v4479_v18, %v4511_v46  ;;  %v4476_v19 = vmul.f32 0.0625, %v4390_v25  ;;  %v4736_v33 = vmul.f32 %v9174_v48, %v4698_v26 }
 0x45f   : > { %v4393_v63 = vpop.xlane.xlu1 %4392  ;;  %v4699_v56 = vmul.f32 %v6846_v21, %v4603_v13  ;;  %v6848_v9 = vpop.eup %6847 }
 0x460   : > { %v4638_v47 = vadd.f32 1e-05, %v4574_v24  ;;  %v4575_v7 = vmax.f32 %v4543_v34, 0.0  ;;  %v4540_v61 = vsub.f32 %v4476_v19, %v4508_v22  ;;  %v4477_v52 = vmul.f32 0.0625, %v4393_v63 }
 0x461   : > { %v9193_v15 = vadd.f32 %v9183_v49, %v4736_v33  ;;  %v4696_v14 = vmul.f32 %v6848_v9, %v4600_v1  ;;  %v4737_v38 = vmul.f32 %v9174_v48, %v4699_v56  ;;  %v6850_v39 = vpop.eup %6849 }
 0x462   : > { %6851 = vrsqrt.f32 %v4638_v47  ;;  %v4639_v58 = vadd.f32 1e-05, %v4575_v7  ;;  %v4572_v60 = vmax.f32 %v4540_v61, 0.0  ;;  %v4541_v46 = vsub.f32 %v4477_v52, %v4509_v40 }
 0x463   : > { %v5733_v28 = vmul.f32 -1.442695, %v9193_v15  ;;  %v4734_v18 = vmul.f32 %v9174_v48, %v4696_v14  ;;  %v9199_v13 = vadd.f32 %v9183_v49, %v4737_v38  ;;  %v4697_v25 = vmul.f32 %v6850_v39, %v4601_v45 }
 0x464   : > { %6853 = vrsqrt.f32 %v4639_v58  ;;  %v4636_v27 = vadd.f32 1e-05, %v4572_v60  ;;  %v4573_v57 = vmax.f32 %v4541_v46, 0.0  ;;  %v4248_v26 = vpop.xlane.xlu0 %4247  ;;  %v4606_v47 = vsub.f32 %v8922_v2, %v9158_v53 }
 0x465   : > { %6855 = vpow2.f32 %v5733_v28  ;;  %v9202_v21 = vadd.f32 %v9183_v49, %v4734_v18  ;;  %v5734_v24 = vmul.f32 -1.442695, %v9199_v13  ;;  %v4735_v34 = vmul.f32 %v9174_v48, %v4697_v25 }
 0x466   : > { %6857 = vrsqrt.f32 %v4636_v27  ;;  %v4251_v22 = vpop.xlane.xlu1 %4250  ;;  %v4637_v19 = vadd.f32 1e-05, %v4573_v57  ;;  %v9210_v33 = vmul.f32 0.0625, %v4248_v26  ;;  %v4607_v52 = vsub.f32 %v8929_v30, %v9160_v4 }
 0x467   : > { %v5731_v1 = vmul.f32 -1.442695, %v9202_v21  ;;  %v9208_v63 = vadd.f32 %v9183_v49, %v4735_v34  ;;  %v9215_v7 = vmul.f32 0.0625, %v4251_v22  ;;  %v4604_v27 = vsub.f32 %v8926_v3, %v9164_v16 }
 0x468   : > { %v4242_v40 = vpop.xlane.xlu0 %4241  ;;  %v4514_v14 = vmul.f32 %v9210_v33, %v9210_v33 }
 0x469   : > { %6859 = vpow2.f32 %v5731_v1  ;;  %v5732_v9 = vmul.f32 -1.442695, %v9208_v63  ;;  %v9221_v38 = vmul.f32 0.0625, %v4242_v40  ;;  %v4515_v28 = vmul.f32 %v9215_v7, %v9215_v7 }
 0x46a   : > { %v4245_v56 = vpop.xlane.xlu1 %4244  ;;  %6861 = vpow2.f32 %v5734_v24 }
 0x46b   : > { %6863 = vrsqrt.f32 %v4637_v19  ;;  %v9223_v46 = vmul.f32 0.0625, %v4245_v56  ;;  %v4512_v24 = vmul.f32 %v9221_v38, %v9221_v38 }
 0x46c   : > { %v6852_v61 = vpop.eup %6851  ;;  %v4408_v45 = vpop.xlane.xlu0 %4407  ;;  %6865 = vpow2.f32 %v5732_v9 }
 0x46d   : > { %v4482_v39 = vmul.f32 0.0625, %v4408_v45  ;;  %v4702_v58 = vmul.f32 %v6852_v61, %v4606_v47  ;;  %v4513_v40 = vmul.f32 %v9223_v46, %v9223_v46 }
 0x46e   : > { %v6854_v60 = vpop.eup %6853  ;;  %v4411_v2 = vpop.xlane.xlu1 %4410 }
 0x46f   : > { %v6856_v53 = vpop.eup %6855  ;;  %v4546_v18 = vsub.f32 %v4482_v39, %v4514_v14  ;;  %v4483_v25 = vmul.f32 0.0625, %v4411_v2  ;;  %v4703_v30 = vmul.f32 %v6854_v60, %v4607_v52  ;;  %v4740_v22 = vmul.f32 %v9174_v48, %v4702_v58 }
 0x470   : > { %v6858_v4 = vpop.eup %6857  ;;  %v4402_v57 = vpop.xlane.xlu0 %4401  ;;  %v4902_v26 = vadd.f32 1.0, %v6856_v53 }
 0x471   : > { %v4578_v34 = vmax.f32 %v4546_v18, 0.0  ;;  %v4547_v19 = vsub.f32 %v4483_v25, %v4515_v28  ;;  %v4480_v1 = vmul.f32 0.0625, %v4402_v57  ;;  %v4741_v9 = vmul.f32 %v9174_v48, %v4703_v30 }
 0x472   : > { %v4405_v56 = vpop.xlane.xlu1 %4404  ;;  %6867 = vrcp.f32 %v4902_v26  ;;  %v4700_v47 = vmul.f32 %v6858_v4, %v4604_v27  ;;  %v9236_v58 = vadd.f32 %v9183_v49, %v4740_v22  ;;  %v4605_v4 = vsub.f32 %v8934_v10, %v9167_v62 }
 0x473   : > { %v6860_v61 = vpop.eup %6859  ;;  %v4642_v3 = vadd.f32 1e-05, %v4578_v34  ;;  %v4579_v16 = vmax.f32 %v4547_v19, 0.0  ;;  %v4544_v52 = vsub.f32 %v4480_v1, %v4512_v24  ;;  %v4481_v45 = vmul.f32 0.0625, %v4405_v56 }
 0x474   : > { %v6862_v14 = vpop.eup %6861  ;;  %v4900_v39 = vadd.f32 1.0, %v6860_v61  ;;  %v9239_v60 = vadd.f32 %v9183_v49, %v4741_v9  ;;  %v4738_v2 = vmul.f32 %v9174_v48, %v4700_v47  ;;  %v5737_v19 = vmul.f32 -1.442695, %v9236_v58 }
 0x475   : > { %v6864_v53 = vpop.eup %6863  ;;  %6869 = vrsqrt.f32 %v4642_v3  ;;  %v4643_v28 = vadd.f32 1e-05, %v4579_v16  ;;  %v4576_v18 = vmax.f32 %v4544_v52, 0.0  ;;  %v4545_v25 = vsub.f32 %v4481_v45, %v4513_v40 }
 0x476   : > { %v6866_v30 = vpop.eup %6865  ;;  %6871 = vrcp.f32 %v4900_v39  ;;  %v4903_v27 = vadd.f32 1.0, %v6862_v14  ;;  %v9245_v57 = vadd.f32 %v9183_v49, %v4738_v2  ;;  %v4701_v1 = vmul.f32 %v6864_v53, %v4605_v4 }
 0x477   : > { %6873 = vrsqrt.f32 %v4643_v28  ;;  %v4640_v26 = vadd.f32 1e-05, %v4576_v18  ;;  %v4260_v22 = vpop.xlane.xlu0 %4259  ;;  %v4901_v24 = vadd.f32 1.0, %v6866_v30  ;;  %v4577_v34 = vmax.f32 %v4545_v25, 0.0 }
 0x478   : > { %6875 = vrcp.f32 %v4903_v27  ;;  %v5738_v56 = vmul.f32 -1.442695, %v9239_v60  ;;  %v5735_v10 = vmul.f32 -1.442695, %v9245_v57  ;;  %v9250_v62 = vmul.f32 0.0625, %v4260_v22 }
 0x479   : > { %6877 = vrsqrt.f32 %v4640_v26  ;;  %v4263_v40 = vpop.xlane.xlu1 %4262  ;;  %v4739_v47 = vmul.f32 %v9174_v48, %v4701_v1  ;;  %v4641_v3 = vadd.f32 1e-05, %v4577_v34  ;;  %v4610_v14 = vsub.f32 %v8955_v11, %v9210_v33 }
 0x47a   : > { %6879 = vrcp.f32 %v4901_v24  ;;  %v9260_v39 = vmul.f32 0.0625, %v4263_v40  ;;  %v4518_v53 = vmul.f32 %v9250_v62, %v9250_v62 }
 0x47b   : > { %v4254_v9 = vpop.xlane.xlu0 %4253  ;;  %6881 = vpow2.f32 %v5737_v19  ;;  %v9256_v45 = vadd.f32 %v9183_v49, %v4739_v47 }
 0x47c   : > { %v6868_v61 = vpop.eup %6867  ;;  %6883 = vpow2.f32 %v5738_v56  ;;  %v9274_v25 = vmul.f32 0.0625, %v4254_v9  ;;  %v4519_v24 = vmul.f32 %v9260_v39, %v9260_v39  ;;  %v4608_v56 = vsub.f32 %v8958_v36, %v9221_v38 }
 0x47d   : > { %v4257_v16 = vpop.xlane.xlu1 %4256  ;;  %v4998_v52 = vmul.f32 %v6868_v61, %v9193_v15  ;;  %6885 = vpow2.f32 %v5735_v10  ;;  %v4611_v15 = vsub.f32 %v8961_v8, %v9215_v7  ;;  %v5736_v33 = vmul.f32 -1.442695, %v9256_v45 }
 0x47e   : > { %6887 = vrsqrt.f32 %v4641_v3  ;;  %v9276_v26 = vmul.f32 0.0625, %v4257_v16  ;;  %v4516_v3 = vmul.f32 %v9274_v25, %v9274_v25 }
 0x47f   : > { %v6870_v2 = vpop.eup %6869  ;;  %v4420_v28 = vpop.xlane.xlu0 %4419  ;;  %v5801_v11 = vpack.c.bf16 %v4998_v52, %v4998_v52  ;;  %6889 = vpow2.f32 %v5736_v33 }
 0x480   : > { %v6872_v18 = vpop.eup %6871  ;;  %v4486_v30 = vmul.f32 0.0625, %v4420_v28  ;;  %v4706_v4 = vmul.f32 %v6870_v2, %v4610_v14  ;;  %v4517_v2 = vmul.f32 %v9276_v26, %v9276_v26 }
 0x481   : > { %v6874_v27 = vpop.eup %6873  ;;  %v4423_v22 = vpop.xlane.xlu1 %4422  ;;  %5159 = vst.msk [vmem:[%s9267_s28 + $0x8] sm:$0xf] %vm5156_vm9, %v5801_v11  ;;  %5193 = vrot.lane.b32.xlu1 %v5801_v11, %s7066_s29  ;;  %v4996_v8 = vmul.f32 %v6872_v18, %v9202_v21 }
 0x482   : > { %v6876_v7 = vpop.eup %6875  ;;  %v4550_v34 = vsub.f32 %v4486_v30, %v4518_v53  ;;  %v4487_v19 = vmul.f32 0.0625, %v4423_v22  ;;  %v4707_v1 = vmul.f32 %v6874_v27, %v4611_v15  ;;  %v4744_v61 = vmul.f32 %v9174_v48, %v4706_v4 }
 0x483   : > { %v6878_v40 = vpop.eup %6877  ;;  %v4414_v10 = vpop.xlane.xlu0 %4413  ;;  %v5799_v9 = vpack.c.bf16 %v4996_v8, %v4996_v8  ;;  %v4999_v47 = vmul.f32 %v6876_v7, %v9199_v13 }
 0x484   : > { %v6880_v21 = vpop.eup %6879  ;;  %v4582_v16 = vmax.f32 %v4550_v34, 0.0  ;;  %v4551_v52 = vsub.f32 %v4487_v19, %v4519_v24  ;;  %v4484_v14 = vmul.f32 0.0625, %v4414_v10  ;;  %v4745_v38 = vmul.f32 %v9174_v48, %v4707_v1 }
 0x485   : > { %v4417_v15 = vpop.xlane.xlu1 %4416  ;;  %5157 = vst.msk [vmem:[%s9267_s28] sm:$0xf] %vm5156_vm9, %v5799_v9  ;;  %5189 = vrot.lane.b32.xlu0 %v5799_v9, %s7066_s29  ;;  %v5802_v36 = vpack.c.bf16 %v4999_v47, %v4999_v47  ;;  %v4997_v13 = vmul.f32 %v6880_v21, %v9208_v63  ;;  %v6882_v53 = vpop.eup %6881  ;;  %v9301_v8 = vadd.f32 %v9183_v49, %v4744_v61 }
 0x486   : > { %v4646_v28 = vadd.f32 1e-05, %v4582_v16  ;;  %v4583_v11 = vmax.f32 %v4551_v52, 0.0  ;;  %v4548_v33 = vsub.f32 %v4484_v14, %v4516_v3  ;;  %v4485_v18 = vmul.f32 0.0625, %v4417_v15  ;;  %v6884_v30 = vpop.eup %6883 }
 0x487   : > { %v4272_v4 = vpop.xlane.xlu0 %4271  ;;  %5195 = vrot.lane.b32.xlu1 %v5802_v36, %s7066_s29  ;;  %5160 = vst.msk [vmem:[%s9267_s28 + $0xc] sm:$0xf] %vm5156_vm9, %v5802_v36  ;;  %v5800_v27 = vpack.c.bf16 %v4997_v13, %v4997_v13  ;;  %v4906_v22 = vadd.f32 1.0, %v6882_v53  ;;  %v4704_v63 = vmul.f32 %v6878_v40, %v4608_v56  ;;  %v6886_v7 = vpop.eup %6885  ;;  %v4907_v10 = vadd.f32 1.0, %v6884_v30 }
 0x488   : > { %6891 = vrsqrt.f32 %v4646_v28  ;;  %v4647_v24 = vadd.f32 1e-05, %v4583_v11  ;;  %v4580_v34 = vmax.f32 %v4548_v33, 0.0  ;;  %v4549_v19 = vsub.f32 %v4485_v18, %v4517_v2  ;;  %v6888_v21 = vpop.eup %6887 }
 0x489   : > { %v4275_v1 = vpop.xlane.xlu1 %4274  ;;  %5158 = vst.msk [vmem:[%s9267_s28 + $0x4] sm:$0xf] %vm5156_vm9, %v5800_v27  ;;  %6893 = vrcp.f32 %v4906_v22  ;;  %v4904_v9 = vadd.f32 1.0, %v6886_v7  ;;  %v9306_v47 = vadd.f32 %v9183_v49, %v4745_v38  ;;  %v6890_v61 = vpop.eup %6889  ;;  %v4609_v40 = vsub.f32 %v8966_v35, %v9223_v46 }
 0x48a   : > { %v4644_v3 = vadd.f32 1e-05, %v4580_v34  ;;  %v4581_v16 = vmax.f32 %v4549_v19, 0.0  ;;  %6895 = vrcp.f32 %v4907_v10  ;;  %v9311_v56 = vmul.f32 0.0625, %v4272_v4 }
 0x48b   : > { %v4266_v52 = vpop.xlane.xlu0 %4265  ;;  %5191 = vrot.lane.b32.xlu1 %v5800_v27, %s7066_s29  ;;  %6897 = vrsqrt.f32 %v4647_v24  ;;  %v5741_v14 = vmul.f32 -1.442695, %v9301_v8  ;;  %v4905_v15 = vadd.f32 1.0, %v6890_v61  ;;  %v5742_v36 = vmul.f32 -1.442695, %v9306_v47 }
 0x48c   : > { %6899 = vrcp.f32 %v4904_v9  ;;  %v4742_v13 = vmul.f32 %v9174_v48, %v4704_v63  ;;  %v4645_v38 = vadd.f32 1e-05, %v4581_v16  ;;  %v9316_v53 = vmul.f32 0.0625, %v4275_v1 }
 0x48d   : > { %v4269_v2 = vpop.xlane.xlu1 %4268  ;;  %6901 = vrsqrt.f32 %v4644_v3  ;;  %v4705_v28 = vmul.f32 %v6888_v21, %v4609_v40  ;;  %v9318_v11 = vmul.f32 0.0625, %v4266_v52  ;;  %v4614_v33 = vsub.f32 %v8987_v44, %v9250_v62 }
 0x48e   : > { %6903 = vrcp.f32 %v4905_v15  ;;  %v9321_v46 = vadd.f32 %v9183_v49, %v4742_v13  ;;  %v4522_v18 = vmul.f32 %v9311_v56, %v9311_v56  ;;  %v9327_v4 = vmul.f32 0.0625, %v4269_v2 }
 0x48f   : > { %v4432_v35 = vpop.xlane.xlu0 %4431  ;;  %6905 = vpow2.f32 %v5741_v14  ;;  %v4743_v63 = vmul.f32 %v9174_v48, %v4705_v28  ;;  %v4523_v24 = vmul.f32 %v9316_v53, %v9316_v53  ;;  %v4520_v19 = vmul.f32 %v9318_v11, %v9318_v11 }
 0x490   : > { %v4490_v30 = vmul.f32 0.0625, %v4432_v35  ;;  %6907 = vpow2.f32 %v5742_v36  ;;  %v5739_v22 = vmul.f32 -1.442695, %v9321_v46  ;;  %v4615_v40 = vsub.f32 %v8993_v55, %v9260_v39 }
 0x491   : > { %v4435_v27 = vpop.xlane.xlu1 %4434  ;;  %6909 = vrsqrt.f32 %v4645_v38  ;;  %v9336_v10 = vadd.f32 %v9183_v49, %v4743_v63  ;;  %v4521_v14 = vmul.f32 %v9327_v4, %v9327_v4 }
 0x492   : > { %v6892_v7 = vpop.eup %6891  ;;  %v4554_v34 = vsub.f32 %v4490_v30, %v4522_v18  ;;  %v4491_v44 = vmul.f32 0.0625, %v4435_v27  ;;  %6911 = vpow2.f32 %v5739_v22 }
 0x493   : > { %v6894_v62 = vpop.eup %6893  ;;  %v4426_v1 = vpop.xlane.xlu0 %4425  ;;  %v4710_v9 = vmul.f32 %v6892_v7, %v4614_v33  ;;  %v5740_v15 = vmul.f32 -1.442695, %v9336_v10 }
 0x494   : > { %v4586_v21 = vmax.f32 %v4554_v34, 0.0  ;;  %v4555_v3 = vsub.f32 %v4491_v44, %v4523_v24  ;;  %v4488_v16 = vmul.f32 0.0625, %v4426_v1  ;;  %v5002_v61 = vmul.f32 %v6894_v62, %v9236_v58  ;;  %v6896_v52 = vpop.eup %6895 }
 0x495   : > { %v4429_v2 = vpop.xlane.xlu1 %4428  ;;  %v4748_v36 = vmul.f32 %v9174_v48, %v4710_v9  ;;  %v6898_v13 = vpop.eup %6897  ;;  %v4612_v58 = vsub.f32 %v8990_v12, %v9274_v25  ;;  %v5003_v55 = vmul.f32 %v6896_v52, %v9239_v60  ;;  %6913 = vpow2.f32 %v5740_v15 }
 0x496   : > { %v4650_v38 = vadd.f32 1e-05, %v4586_v21  ;;  %v4587_v28 = vmax.f32 %v4555_v3, 0.0  ;;  %v4552_v35 = vsub.f32 %v4488_v16, %v4520_v19  ;;  %v4489_v33 = vmul.f32 0.0625, %v4429_v2  ;;  %v6900_v18 = vpop.eup %6899 }
 0x497   : > { %v5805_v30 = vpack.c.bf16 %v5002_v61, %v5002_v61  ;;  %v6902_v39 = vpop.eup %6901  ;;  %v4613_v34 = vsub.f32 %v8998_v42, %v9276_v26  ;;  %v5806_v12 = vpack.c.bf16 %v5003_v55, %v5003_v55  ;;  %v5000_v25 = vmul.f32 %v6900_v18, %v9245_v57 }
 0x498   : > { %6915 = vrsqrt.f32 %v4650_v38  ;;  %v4651_v27 = vadd.f32 1e-05, %v4587_v28  ;;  %v4584_v22 = vmax.f32 %v4552_v35, 0.0  ;;  %v4553_v63 = vsub.f32 %v4489_v33, %v4521_v14  ;;  %v4284_v7 = vpop.xlane.xlu0 %4283  ;;  %v6904_v24 = vpop.eup %6903 }
 0x499   : > { %5163 = vst.msk [vmem:[%s9267_s28 + $0x18] sm:$0xf] %vm5156_vm9, %v5805_v30  ;;  %5201 = vrot.lane.b32.xlu0 %v5805_v30, %s7066_s29  ;;  %v9355_v60 = vadd.f32 %v9183_v49, %v4748_v36  ;;  %v6906_v44 = vpop.eup %6905  ;;  %v5001_v9 = vmul.f32 %v6904_v24, %v9256_v45  ;;  %v4711_v21 = vmul.f32 %v6898_v13, %v4615_v40  ;;  %v9360_v26 = vmul.f32 0.0625, %v4284_v7 }
 0x49a   : > { %v4648_v62 = vadd.f32 1e-05, %v4584_v22  ;;  %v4585_v19 = vmax.f32 %v4553_v63, 0.0  ;;  %v4287_v1 = vpop.xlane.xlu1 %4286  ;;  %v6908_v3 = vpop.eup %6907  ;;  %v4618_v42 = vsub.f32 %v9018_v43, %v9311_v56  ;;  %6917 = vrsqrt.f32 %v4651_v27  ;;  %5203 = vrot.lane.b32.xlu1 %v5806_v12, %s7066_s29  ;;  %5164 = vst.msk [vmem:[%s9267_s28 + $0x1c] sm:$0xf] %vm5156_vm9, %v5806_v12 }
 0x49b   : > { %v5803_v57 = vpack.c.bf16 %v5000_v25, %v5000_v25  ;;  %v6910_v16 = vpop.eup %6909  ;;  %v4619_v61 = vsub.f32 %v9025_v31, %v9316_v53  ;;  %v5804_v40 = vpack.c.bf16 %v5001_v9, %v5001_v9  ;;  %v4910_v14 = vadd.f32 1.0, %v6906_v44 }
 0x49c   : > { %v4649_v45 = vadd.f32 1e-05, %v4585_v19  ;;  %v4278_v52 = vpop.xlane.xlu0 %4277  ;;  %v6912_v2 = vpop.eup %6911  ;;  %6919 = vrsqrt.f32 %v4648_v62  ;;  %v9367_v43 = vmul.f32 0.0625, %v4287_v1  ;;  %v4911_v56 = vadd.f32 1.0, %v6908_v3 }
 0x49d   : > { %5161 = vst.msk [vmem:[%s9267_s28 + $0x10] sm:$0xf] %vm5156_vm9, %v5803_v57  ;;  %5197 = vrot.lane.b32.xlu0 %v5803_v57, %s7066_s29  ;;  %v5745_v15 = vmul.f32 -1.442695, %v9355_v60  ;;  %5162 = vst.msk [vmem:[%s9267_s28 + $0x14] sm:$0xf] %vm5156_vm9, %v5804_v40  ;;  %v4749_v38 = vmul.f32 %v9174_v48, %v4711_v21  ;;  %v4708_v28 = vmul.f32 %v6902_v39, %v4612_v58 }
 0x49e   : > { %6921 = vrsqrt.f32 %v4649_v45  ;;  %v4281_v36 = vpop.xlane.xlu1 %4280  ;;  %v4908_v13 = vadd.f32 1.0, %v6912_v2  ;;  %v4616_v35 = vsub.f32 %v9022_v29, %v9318_v11  ;;  %v4526_v33 = vmul.f32 %v9360_v26, %v9360_v26  ;;  %5199 = vrot.lane.b32.xlu1 %v5804_v40, %s7066_s29 }
 0x49f   : > { %v9380_v18 = vmul.f32 0.0625, %v4278_v52  ;;  %6923 = vrcp.f32 %v4910_v14  ;;  %v9384_v55 = vadd.f32 %v9183_v49, %v4749_v38  ;;  %v4746_v27 = vmul.f32 %v9174_v48, %v4708_v28  ;;  %v6914_v58 = vpop.eup %6913 }
 0x4a0   : > { %v4444_v30 = vpop.xlane.xlu0 %4443  ;;  %6925 = vrcp.f32 %v4911_v56  ;;  %v4709_v22 = vmul.f32 %v6910_v16, %v4613_v34  ;;  %v4527_v39 = vmul.f32 %v9367_v43, %v9367_v43  ;;  %v9389_v63 = vmul.f32 0.0625, %v4281_v36 }
 0x4a1   : > { %v4494_v7 = vmul.f32 0.0625, %v4444_v30  ;;  %6927 = vrcp.f32 %v4908_v13  ;;  %v4909_v25 = vadd.f32 1.0, %v6914_v58  ;;  %v5746_v44 = vmul.f32 -1.442695, %v9384_v55 }
 0x4a2   : > { %v6916_v24 = vpop.eup %6915  ;;  %v4447_v12 = vpop.xlane.xlu1 %4446  ;;  %6929 = vpow2.f32 %v5745_v15  ;;  %v9393_v62 = vadd.f32 %v9183_v49, %v4746_v27  ;;  %v4747_v34 = vmul.f32 %v9174_v48, %v4709_v22  ;;  %v4617_v21 = vsub.f32 %v9030_v23, %v9327_v4 }
 0x4a3   : > { %v4558_v19 = vsub.f32 %v4494_v7, %v4526_v33  ;;  %v4495_v1 = vmul.f32 0.0625, %v4447_v12  ;;  %v4714_v9 = vmul.f32 %v6916_v24, %v4618_v42  ;;  %v4524_v3 = vmul.f32 %v9380_v18, %v9380_v18 }
 0x4a4   : > { %v4438_v57 = vpop.xlane.xlu0 %4437  ;;  %6931 = vrcp.f32 %v4909_v25  ;;  %v5743_v16 = vmul.f32 -1.442695, %v9393_v62  ;;  %v6918_v45 = vpop.eup %6917  ;;  %v4525_v2 = vmul.f32 %v9389_v63, %v9389_v63  ;;  %v9404_v42 = vadd.f32 %v9183_v49, %v4747_v34 }
 0x4a5   : > { %v4590_v52 = vmax.f32 %v4558_v19, 0.0  ;;  %v4559_v40 = vsub.f32 %v4495_v1, %v4527_v39  ;;  %v4492_v14 = vmul.f32 0.0625, %v4438_v57  ;;  %6933 = vpow2.f32 %v5746_v44 }
 0x4a6   : > { %v4441_v56 = vpop.xlane.xlu1 %4440  ;;  %6935 = vpow2.f32 %v5743_v16  ;;  %v4752_v15 = vmul.f32 %v9174_v48, %v4714_v9  ;;  %v6920_v36 = vpop.eup %6919  ;;  %v4622_v27 = vsub.f32 %v9051_v37, %v9360_v26  ;;  %v5744_v58 = vmul.f32 -1.442695, %v9404_v42 }
 0x4a7   : > { %v4654_v13 = vadd.f32 1e-05, %v4590_v52  ;;  %v4591_v38 = vmax.f32 %v4559_v40, 0.0  ;;  %v4556_v28 = vsub.f32 %v4492_v14, %v4524_v3  ;;  %v4493_v33 = vmul.f32 0.0625, %v4441_v56 }
 0x4a8   : > { %v9407_v30 = vpop.eup %6921  ;;  %v4296_v22 = vpop.xlane.xlu0 %4295  ;;  %v9413_v39 = vadd.f32 %v9183_v49, %v4752_v15  ;;  %v4715_v7 = vmul.f32 %v6918_v45, %v4619_v61  ;;  %v4623_v1 = vsub.f32 %v9057_v6, %v9367_v43  ;;  %v4620_v34 = vsub.f32 %v9054_v59, %v9380_v18  ;;  %v9542_v59 = vld [vmem:[%s9775_s7] ss:$0 sm:$0xff] }
 0x4a9   : > { %v6924_v24 = vpop.eup %6923  ;;  %6937 = vrsqrt.f32 %v4654_v13  ;;  %v4655_v12 = vadd.f32 1e-05, %v4591_v38  ;;  %v4588_v25 = vmax.f32 %v4556_v28, 0.0  ;;  %v4557_v44 = vsub.f32 %v4493_v33, %v4525_v2 }
 0x4aa   : > { %v6926_v19 = vpop.eup %6925  ;;  %v5006_v9 = vmul.f32 %v6924_v24, %v9301_v8  ;;  %v4299_v3 = vpop.xlane.xlu1 %4298  ;;  %6939 = vpow2.f32 %v5744_v58  ;;  %v9423_v53 = vmul.f32 0.0625, %v4296_v22  ;;  %v4621_v52 = vsub.f32 %v9062_v5, %v9389_v63 }
 0x4ab   : > { %v6928_v57 = vpop.eup %6927  ;;  %v4652_v16 = vadd.f32 1e-05, %v4588_v25  ;;  %v4589_v31 = vmax.f32 %v4557_v44, 0.0  ;;  %v5007_v61 = vmul.f32 %v6926_v19, %v9306_v47  ;;  %v5749_v2 = vmul.f32 -1.442695, %v9413_v39 }
 0x4ac   : > { %v6930_v45 = vpop.eup %6929  ;;  %v5809_v40 = vpack.c.bf16 %v5006_v9, %v5006_v9  ;;  %v4290_v14 = vpop.xlane.xlu0 %4289  ;;  %v4753_v8 = vmul.f32 %v9174_v48, %v4715_v7  ;;  %6941 = vrsqrt.f32 %v4655_v12  ;;  %v9430_v13 = vmul.f32 0.0625, %v4299_v3 }
 0x4ad   : > { %v4653_v56 = vadd.f32 1e-05, %v4589_v31  ;;  %v5810_v15 = vpack.c.bf16 %v5007_v61, %v5007_v61  ;;  %6943 = vrsqrt.f32 %v4652_v16  ;;  %v9435_v47 = vmul.f32 0.0625, %v4290_v14 }
 0x4ae   : > { %v6932_v38 = vpop.eup %6931  ;;  %5167 = vst.msk [vmem:[%s9267_s28 + $0x28] sm:$0xf] %vm5156_vm9, %v5809_v40  ;;  %5209 = vrot.lane.b32.xlu0 %v5809_v40, %s7066_s29  ;;  %v5004_v28 = vmul.f32 %v6928_v57, %v9321_v46  ;;  %v4293_v33 = vpop.xlane.xlu1 %4292  ;;  %v4914_v22 = vadd.f32 1.0, %v6930_v45  ;;  %v4530_v7 = vmul.f32 %v9423_v53, %v9423_v53  ;;  %v4712_v12 = vmul.f32 %v6920_v36, %v4616_v35 }
 0x4af   : > { %v6934_v58 = vpop.eup %6933  ;;  %6945 = vrsqrt.f32 %v4653_v56  ;;  %5211 = vrot.lane.b32.xlu1 %v5810_v15, %s7066_s29  ;;  %5168 = vst.msk [vmem:[%s9267_s28 + $0x2c] sm:$0xf] %vm5156_vm9, %v5810_v15  ;;  %v5005_v24 = vmul.f32 %v6932_v38, %v9336_v10  ;;  %v9447_v44 = vmul.f32 0.0625, %v4293_v33  ;;  %v4531_v31 = vmul.f32 %v9430_v13, %v9430_v13 }
 0x4b0   : > { %v6936_v25 = vpop.eup %6935  ;;  %v5807_v46 = vpack.c.bf16 %v5004_v28, %v5004_v28  ;;  %v4456_v19 = vpop.xlane.xlu0 %4455  ;;  %6947 = vrcp.f32 %v4914_v22  ;;  %v4915_v9 = vadd.f32 1.0, %v6934_v58  ;;  %v4528_v10 = vmul.f32 %v9435_v47, %v9435_v47 }
 0x4b1   : > { %v5808_v3 = vpack.c.bf16 %v5005_v24, %v5005_v24  ;;  %v4498_v57 = vmul.f32 0.0625, %v4456_v19  ;;  %v4912_v16 = vadd.f32 1.0, %v6936_v25  ;;  %6949 = vpow2.f32 %v5749_v2 }
 0x4b2   : > { %5165 = vst.msk [vmem:[%s9267_s28 + $0x20] sm:$0xf] %vm5156_vm9, %v5807_v46  ;;  %5205 = vrot.lane.b32.xlu0 %v5807_v46, %s7066_s29  ;;  %v4459_v29 = vpop.xlane.xlu1 %4458  ;;  %6951 = vrcp.f32 %v4915_v9  ;;  %v9457_v11 = vadd.f32 %v9183_v49, %v4753_v8  ;;  %v4750_v45 = vmul.f32 %v9174_v48, %v4712_v12  ;;  %v4529_v14 = vmul.f32 %v9447_v44, %v9447_v44 }
 0x4b3   : > { %v6938_v35 = vpop.eup %6937  ;;  %5207 = vrot.lane.b32.xlu1 %v5808_v3, %s7066_s29  ;;  %5166 = vst.msk [vmem:[%s9267_s28 + $0x24] sm:$0xf] %vm5156_vm9, %v5808_v3  ;;  %v4562_v36 = vsub.f32 %v4498_v57, %v4530_v7  ;;  %v4499_v61 = vmul.f32 0.0625, %v4459_v29  ;;  %6953 = vrcp.f32 %v4912_v16  ;;  %v4713_v8 = vmul.f32 %v9407_v30, %v4617_v21 }
 0x4b4   : > { %v6940_v40 = vpop.eup %6939  ;;  %v4450_v2 = vpop.xlane.xlu0 %4449  ;;  %v5750_v56 = vmul.f32 -1.442695, %v9457_v11  ;;  %v4718_v15 = vmul.f32 %v6938_v35, %v4622_v27  ;;  %v9474_v7 = vadd.f32 %v9183_v49, %v4750_v45  ;;  %v4626_v26 = vsub.f32 %v9079_v54, %v9423_v53 }
 0x4b5   : > { %v4594_v38 = vmax.f32 %v4562_v36, 0.0  ;;  %v4563_v28 = vsub.f32 %v4499_v61, %v4531_v31  ;;  %v4496_v33 = vmul.f32 0.0625, %v4450_v2  ;;  %v4913_v22 = vadd.f32 1.0, %v6940_v40 }
 0x4b6   : > { %v4453_v58 = vpop.xlane.xlu1 %4452  ;;  %6955 = vpow2.f32 %v5750_v56  ;;  %v4751_v24 = vmul.f32 %v9174_v48, %v4713_v8  ;;  %v4756_v12 = vmul.f32 %v9174_v48, %v4718_v15  ;;  %v6942_v23 = vpop.eup %6941  ;;  %v4627_v27 = vsub.f32 %v9085_v20, %v9430_v13 }
 0x4b7   : > { %v4658_v4 = vadd.f32 1e-05, %v4594_v38  ;;  %v4595_v21 = vmax.f32 %v4563_v28, 0.0  ;;  %v4560_v30 = vsub.f32 %v4496_v33, %v4528_v10  ;;  %v4497_v25 = vmul.f32 0.0625, %v4453_v58  ;;  %v6944_v37 = vpop.eup %6943 }
 0x4b8   : > { %v4308_v46 = vpop.xlane.xlu0 %4307  ;;  %6957 = vrcp.f32 %v4913_v22  ;;  %v5747_v19 = vmul.f32 -1.442695, %v9474_v7  ;;  %v4624_v3 = vsub.f32 %v9091_v17, %v9435_v47  ;;  %v4625_v29 = vsub.f32 %v9096_v0, %v9447_v44 }
 0x4b9   : > { %v6946_v9 = vpop.eup %6945  ;;  %v4659_v57 = vadd.f32 1e-05, %v4595_v21  ;;  %v4592_v16 = vmax.f32 %v4560_v30, 0.0  ;;  %v4561_v31 = vsub.f32 %v4497_v25, %v4529_v14  ;;  %v9488_v36 = vadd.f32 %v9183_v49, %v4751_v24 }
 0x4ba   : > { %v6948_v10 = vpop.eup %6947  ;;  %v4311_v35 = vpop.xlane.xlu1 %4310  ;;  %6959 = vpow2.f32 %v5747_v19  ;;  %v9491_v61 = vadd.f32 %v9183_v49, %v4756_v12  ;;  %v9494_v14 = vmul.f32 0.0625, %v4308_v46 }
 0x4bb   : > { %v6950_v45 = vpop.eup %6949  ;;  %6961 = vrsqrt.f32 %v4658_v4  ;;  %v4656_v40 = vadd.f32 1e-05, %v4592_v16  ;;  %v4593_v2 = vmax.f32 %v4561_v31, 0.0  ;;  %v5010_v56 = vmul.f32 %v6948_v10, %v9355_v60 }
 0x4bc   : > { %v6952_v8 = vpop.eup %6951  ;;  %6963 = vrsqrt.f32 %v4659_v57  ;;  %v9496_v15 = vmul.f32 0.0625, %v4311_v35  ;;  %v4302_v38 = vpop.xlane.xlu0 %4301  ;;  %v4918_v28 = vadd.f32 1.0, %v6950_v45  ;;  %v5748_v21 = vmul.f32 -1.442695, %v9488_v36 }
 0x4bd   : > { %v6954_v33 = vpop.eup %6953  ;;  %6965 = vrsqrt.f32 %v4656_v40  ;;  %v4657_v22 = vadd.f32 1e-05, %v4593_v2  ;;  %v5813_v58 = vpack.c.bf16 %v5010_v56, %v5010_v56  ;;  %v5011_v24 = vmul.f32 %v6952_v8, %v9384_v55 }
 0x4be   : > { %v5008_v12 = vmul.f32 %v6954_v33, %v9393_v62  ;;  %v9500_v4 = vmul.f32 0.0625, %v4302_v38  ;;  %v4305_v60 = vpop.xlane.xlu1 %4304  ;;  %v5753_v30 = vmul.f32 -1.442695, %v9491_v61  ;;  %v4719_v55 = vmul.f32 %v6942_v23, %v4623_v1 }
 0x4bf   : > { %6967 = vrsqrt.f32 %v4657_v22  ;;  %5171 = vst.msk [vmem:[%s9267_s28 + $0x38] sm:$0xf] %vm5156_vm9, %v5813_v58  ;;  %5217 = vrot.lane.b32.xlu0 %v5813_v58, %s7066_s29  ;;  %v5814_v25 = vpack.c.bf16 %v5011_v24, %v5011_v24  ;;  %v9507_v46 = vmul.f32 0.0625, %v4305_v60  ;;  %v4534_v19 = vmul.f32 %v9494_v14, %v9494_v14  ;;  %v9550_v24 = vld [vmem:[%s9776_s8] ss:$0 sm:$0xff] }
 0x4c0   : > { %v6956_v62 = vpop.eup %6955  ;;  %v9516_v57 = vmul.f32 %v9496_v15, %v9496_v15  ;;  %v5811_v16 = vpack.c.bf16 %v5008_v12, %v5008_v12  ;;  %v4462_v31 = vpop.xlane.xlu0 %4461  ;;  %6969 = vrcp.f32 %v4918_v28  ;;  %v4532_v10 = vmul.f32 %v9500_v4, %v9500_v4 }
 0x4c1   : > { %5219 = vrot.lane.b32.xlu1 %v5814_v25, %s7066_s29  ;;  %5172 = vst.msk [vmem:[%s9267_s28 + $0x3c] sm:$0xf] %vm5156_vm9, %v5814_v25  ;;  %v4533_v6 = vmul.f32 %v9507_v46, %v9507_v46  ;;  %v4500_v43 = vmul.f32 0.0625, %v4462_v31  ;;  %v4919_v1 = vadd.f32 1.0, %v6956_v62  ;;  %6971 = vpow2.f32 %v5748_v21 }
 0x4c2   : > { %v6958_v23 = vpop.eup %6957  ;;  %5169 = vst.msk [vmem:[%s9267_s28 + $0x30] sm:$0xf] %vm5156_vm9, %v5811_v16  ;;  %v4465_v35 = vpop.xlane.xlu1 %4464  ;;  %v4757_v45 = vmul.f32 %v9174_v48, %v4719_v55  ;;  %v4716_v40 = vmul.f32 %v6944_v37, %v4620_v34  ;;  %v4717_v2 = vmul.f32 %v6946_v9, %v4621_v52 }
 0x4c3   : > { %5213 = vrot.lane.b32.xlu0 %v5811_v16, %s7066_s29  ;;  %v5009_v56 = vmul.f32 %v6958_v23, %v9404_v42  ;;  %v4564_v8 = vsub.f32 %v4500_v43, %v4532_v10  ;;  %v4501_v38 = vmul.f32 0.0625, %v4465_v35  ;;  %6973 = vrcp.f32 %v4919_v1 }
 0x4c4   : > { %v6960_v28 = vpop.eup %6959  ;;  %v4468_v33 = vpop.xlane.xlu0 %4467  ;;  %6975 = vpow2.f32 %v5753_v30  ;;  %v9537_v48 = vadd.f32 %v9183_v49, %v4757_v45  ;;  %v4754_v5 = vmul.f32 %v9542_v59, %v4716_v40  ;;  %v4755_v18 = vmul.f32 %v9542_v59, %v4717_v2 }
 0x4c5   : > { %v6962_v63 = vpop.eup %6961  ;;  %v5812_v42 = vpack.c.bf16 %v5009_v56, %v5009_v56  ;;  %v4596_v34 = vmax.f32 %v4564_v8, 0.0  ;;  %v4565_v52 = vsub.f32 %v4501_v38, %v4533_v6  ;;  %v4502_v37 = vmul.f32 0.0625, %v4468_v33 }
 0x4c6   : > { %v6964_v9 = vpop.eup %6963  ;;  %v4471_v22 = vpop.xlane.xlu1 %4470  ;;  %v4916_v58 = vadd.f32 1.0, %v6960_v28  ;;  %v5754_v49 = vmul.f32 -1.442695, %v9537_v48  ;;  %v9553_v12 = vadd.f32 %v9550_v24, %v4754_v5  ;;  %v9556_v60 = vadd.f32 %v9550_v24, %v4755_v18 }
 0x4c7   : > { %v6966_v21 = vpop.eup %6965  ;;  %5215 = vrot.lane.b32.xlu1 %v5812_v42, %s7066_s29  ;;  %5170 = vst.msk [vmem:[%s9267_s28 + $0x34] sm:$0xf] %vm5156_vm9, %v5812_v42  ;;  %v4660_v30 = vadd.f32 1e-05, %v4596_v34  ;;  %v4597_v25 = vmax.f32 %v4565_v52, 0.0  ;;  %v4566_v55 = vsub.f32 %v4502_v37, %v4534_v19  ;;  %v4503_v62 = vmul.f32 0.0625, %v4471_v22 }
 0x4c8   : > { %6977 = vrcp.f32 %v4916_v58  ;;  %v5751_v16 = vmul.f32 -1.442695, %v9553_v12  ;;  %v5752_v31 = vmul.f32 -1.442695, %v9556_v60  ;;  %v4722_v10 = vmul.f32 %v6962_v63, %v4626_v26 }
 0x4c9   : > { %v6968_v6 = vpop.eup %6967  ;;  %6979 = vrsqrt.f32 %v4660_v30  ;;  %v4661_v43 = vadd.f32 1e-05, %v4597_v25  ;;  %v4598_v1 = vmax.f32 %v4566_v55, 0.0  ;;  %v4567_v23 = vsub.f32 %v4503_v62, %v9516_v57 }
 0x4ca   : > { %v6970_v35 = vpop.eup %6969  ;;  %6981 = vpow2.f32 %v5754_v49  ;;  %v4760_v19 = vmul.f32 %v9542_v59, %v4722_v10  ;;  %v4723_v45 = vmul.f32 %v6964_v9, %v4627_v27  ;;  %v4720_v40 = vmul.f32 %v6966_v21, %v4624_v3 }
 0x4cb   : > { %6983 = vrsqrt.f32 %v4661_v43  ;;  %v4662_v54 = vadd.f32 1e-05, %v4598_v1  ;;  %v4599_v53 = vmax.f32 %v4567_v23, 0.0  ;;  %v5014_v26 = vmul.f32 %v6970_v35, %v9413_v39  ;;  %v6972_v2 = vpop.eup %6971 }
 0x4cc   : > { %6985 = vpow2.f32 %v5751_v16  ;;  %v9576_v57 = vadd.f32 %v9550_v24, %v4760_v19  ;;  %v4761_v56 = vmul.f32 %v9542_v59, %v4723_v45  ;;  %v4758_v20 = vmul.f32 %v9542_v59, %v4720_v40 }
 0x4cd   : > { %v6974_v13 = vpop.eup %6973  ;;  %6987 = vrsqrt.f32 %v4662_v54  ;;  %v4663_v27 = vadd.f32 1e-05, %v4599_v53  ;;  %v5817_v17 = vpack.c.bf16 %v5014_v26, %v5014_v26  ;;  %v4917_v47 = vadd.f32 1.0, %v6972_v2 }
 0x4ce   : > { %v6976_v3 = vpop.eup %6975  ;;  %v5015_v8 = vmul.f32 %v6974_v13, %v9457_v11  ;;  %6989 = vpow2.f32 %v5752_v31  ;;  %v5757_v39 = vmul.f32 -1.442695, %v9576_v57  ;;  %v9583_v38 = vadd.f32 %v9550_v24, %v4761_v56 }
 0x4cf   : > { %6991 = vrsqrt.f32 %v4663_v27  ;;  %5175 = vst.msk [vmem:[%s9267_s28 + $0x48] sm:$0xf] %vm5156_vm9, %v5817_v17  ;;  %5225 = vrot.lane.b32.xlu0 %v5817_v17, %s7066_s29  ;;  %v4922_v28 = vadd.f32 1.0, %v6976_v3  ;;  %v9589_v33 = vadd.f32 %v9550_v24, %v4758_v20  ;;  %v4721_v11 = vmul.f32 %v6968_v6, %v4625_v29 }
 0x4d0   : > { %v5818_v5 = vpack.c.bf16 %v5015_v8, %v5015_v8  ;;  %6993 = vrcp.f32 %v4917_v47  ;;  %v5758_v18 = vmul.f32 -1.442695, %v9583_v38  ;;  %v4628_v52 = vsub.f32 %v9123_v51, %v9500_v4 }
 0x4d1   : > { %6995 = vrcp.f32 %v4922_v28  ;;  %v5755_v63 = vmul.f32 -1.442695, %v9589_v33  ;;  %v4759_v42 = vmul.f32 %v9542_v59, %v4721_v11  ;;  %v4629_v9 = vsub.f32 %v9128_v50, %v9507_v46 }
 0x4d2   : > { %v6978_v34 = vpop.eup %6977  ;;  %5227 = vrot.lane.b32.xlu1 %v5818_v5, %s7066_s29  ;;  %5176 = vst.msk [vmem:[%s9267_s28 + $0x4c] sm:$0xf] %vm5156_vm9, %v5818_v5  ;;  %6997 = vpow2.f32 %v5757_v39  ;;  %v4631_v62 = vsub.f32 %v9117_v41, %v9496_v15 }
 0x4d3   : > { %v6980_v0 = vpop.eup %6979  ;;  %v5012_v44 = vmul.f32 %v6978_v34, %v9474_v7  ;;  %6999 = vpow2.f32 %v5758_v18  ;;  %v9604_v29 = vadd.f32 %v9550_v24, %v4759_v42  ;;  %v4630_v7 = vsub.f32 %v9111_v32, %v9494_v14 }
 0x4d4   : > { %v6982_v37 = vpop.eup %6981  ;;  %7001 = vpow2.f32 %v5755_v63  ;;  %v4724_v22 = vmul.f32 %v6980_v0, %v4628_v52 }
 0x4d5   : > { %v6984_v51 = vpop.eup %6983  ;;  %v5815_v4 = vpack.c.bf16 %v5012_v44, %v5012_v44  ;;  %v4923_v58 = vadd.f32 1.0, %v6982_v37  ;;  %v5756_v49 = vmul.f32 -1.442695, %v9604_v29 }
 0x4d6   : > { %v6986_v21 = vpop.eup %6985  ;;  %v4762_v30 = vmul.f32 %v9542_v59, %v4724_v22  ;;  %v4725_v25 = vmul.f32 %v6984_v51, %v4629_v9 }
 0x4d7   : > { %v6988_v55 = vpop.eup %6987  ;;  %5173 = vst.msk [vmem:[%s9267_s28 + $0x40] sm:$0xf] %vm5156_vm9, %v5815_v4  ;;  %5221 = vrot.lane.b32.xlu0 %v5815_v4, %s7066_s29  ;;  %7003 = vrcp.f32 %v4923_v58  ;;  %v4920_v50 = vadd.f32 1.0, %v6986_v21 }
 0x4d8   : > { %v6990_v46 = vpop.eup %6989  ;;  %7005 = vpow2.f32 %v5756_v49  ;;  %v9618_v16 = vadd.f32 %v9550_v24, %v4762_v30  ;;  %v4763_v32 = vmul.f32 %v9542_v59, %v4725_v25  ;;  %v4726_v14 = vmul.f32 %v6988_v55, %v4630_v7 }
 0x4d9   : > { %v6992_v31 = vpop.eup %6991  ;;  %7007 = vrcp.f32 %v4920_v50  ;;  %v4921_v10 = vadd.f32 1.0, %v6990_v46 }
 0x4da   : > { %v6994_v6 = vpop.eup %6993  ;;  %v5759_v41 = vmul.f32 -1.442695, %v9618_v16  ;;  %v9623_v15 = vadd.f32 %v9550_v24, %v4763_v32  ;;  %v4764_v43 = vmul.f32 %v9542_v59, %v4726_v14  ;;  %v4727_v1 = vmul.f32 %v6992_v31, %v4631_v62 }
 0x4db   : > { %v6996_v23 = vpop.eup %6995  ;;  %v5013_v35 = vmul.f32 %v6994_v6, %v9488_v36  ;;  %7009 = vrcp.f32 %v4921_v10 }
 0x4dc   : > { %v6998_v19 = vpop.eup %6997  ;;  %v5018_v45 = vmul.f32 %v6996_v23, %v9491_v61  ;;  %7011 = vpow2.f32 %v5759_v41  ;;  %v5760_v40 = vmul.f32 -1.442695, %v9623_v15  ;;  %v9630_v54 = vadd.f32 %v9550_v24, %v4764_v43 }
 0x4dd   : > { %v7000_v53 = vpop.eup %6999  ;;  %v5816_v26 = vpack.c.bf16 %v5013_v35, %v5013_v35  ;;  %v4926_v2 = vadd.f32 1.0, %v6998_v19  ;;  %v4765_v56 = vmul.f32 %v9542_v59, %v4727_v1 }
 0x4de   : > { %v7002_v20 = vpop.eup %7001  ;;  %v5821_v13 = vpack.c.bf16 %v5018_v45, %v5018_v45  ;;  %v4927_v36 = vadd.f32 1.0, %v7000_v53  ;;  %7013 = vpow2.f32 %v5760_v40  ;;  %v5761_v27 = vmul.f32 -1.442695, %v9630_v54 }
 0x4df   : > { %5223 = vrot.lane.b32.xlu1 %v5816_v26, %s7066_s29  ;;  %5174 = vst.msk [vmem:[%s9267_s28 + $0x44] sm:$0xf] %vm5156_vm9, %v5816_v26  ;;  %7015 = vrcp.f32 %v4926_v2  ;;  %v4924_v61 = vadd.f32 1.0, %v7002_v20  ;;  %v9638_v17 = vadd.f32 %v9550_v24, %v4765_v56 }
 0x4e0   : > { %5179 = vst.msk [vmem:[%s9267_s28 + $0x58] sm:$0xf] %vm5156_vm9, %v5821_v13  ;;  %5233 = vrot.lane.b32.xlu0 %v5821_v13, %s7066_s29  ;;  %7017 = vrcp.f32 %v4927_v36 }
 0x4e1   : > { %v7004_v59 = vpop.eup %7003  ;;  %7019 = vrcp.f32 %v4924_v61  ;;  %v5762_v47 = vmul.f32 -1.442695, %v9638_v17 }
 0x4e2   : > { %v7006_v3 = vpop.eup %7005  ;;  %v5019_v8 = vmul.f32 %v7004_v59, %v9537_v48  ;;  %7021 = vpow2.f32 %v5761_v27 }
 0x4e3   : > { %v7008_v39 = vpop.eup %7007  ;;  %v4925_v28 = vadd.f32 1.0, %v7006_v3  ;;  %7023 = vpow2.f32 %v5762_v47 }
 0x4e4   : > { %v5822_v24 = vpack.c.bf16 %v5019_v8, %v5019_v8  ;;  %v5016_v11 = vmul.f32 %v7008_v39, %v9553_v12 }
 0x4e5   : > { %v7010_v5 = vpop.eup %7009  ;;  %7025 = vrcp.f32 %v4925_v28 }
 0x4e6   : > { %v7012_v18 = vpop.eup %7011  ;;  %5235 = vrot.lane.b32.xlu1 %v5822_v24, %s7066_s29  ;;  %5180 = vst.msk [vmem:[%s9267_s28 + $0x5c] sm:$0xf] %vm5156_vm9, %v5822_v24  ;;  %v5819_v63 = vpack.c.bf16 %v5016_v11, %v5016_v11  ;;  %v5017_v42 = vmul.f32 %v7010_v5, %v9556_v60 }
 0x4e7   : > { %v4928_v48 = vadd.f32 1.0, %v7012_v18 }
 0x4e8   : > { %v7014_v34 = vpop.eup %7013  ;;  %5177 = vst.msk [vmem:[%s9267_s28 + $0x50] sm:$0xf] %vm5156_vm9, %v5819_v63  ;;  %5229 = vrot.lane.b32.xlu0 %v5819_v63, %s7066_s29  ;;  %v5820_v52 = vpack.c.bf16 %v5017_v42, %v5017_v42 }
 0x4e9   : > { %v7016_v0 = vpop.eup %7015  ;;  %7027 = vrcp.f32 %v4928_v48  ;;  %v4929_v12 = vadd.f32 1.0, %v7014_v34 }
 0x4ea   : > { %v7018_v44 = vpop.eup %7017  ;;  %5231 = vrot.lane.b32.xlu1 %v5820_v52, %s7066_s29  ;;  %5178 = vst.msk [vmem:[%s9267_s28 + $0x54] sm:$0xf] %vm5156_vm9, %v5820_v52  ;;  %v5022_v37 = vmul.f32 %v7016_v0, %v9576_v57 }
 0x4eb   : > { %v7020_v60 = vpop.eup %7019  ;;  %v5023_v9 = vmul.f32 %v7018_v44, %v9583_v38  ;;  %7029 = vrcp.f32 %v4929_v12 }
 0x4ec   : > { %v7022_v22 = vpop.eup %7021  ;;  %v5825_v51 = vpack.c.bf16 %v5022_v37, %v5022_v37  ;;  %v5020_v4 = vmul.f32 %v7020_v60, %v9589_v33 }
 0x4ed   : > { %v7024_v58 = vpop.eup %7023  ;;  %v5826_v49 = vpack.c.bf16 %v5023_v9, %v5023_v9  ;;  %v4930_v21 = vadd.f32 1.0, %v7022_v22 }
 0x4ee   : > { %5183 = vst.msk [vmem:[%s9267_s28 + $0x68] sm:$0xf] %vm5156_vm9, %v5825_v51  ;;  %5241 = vrot.lane.b32.xlu0 %v5825_v51, %s7066_s29  ;;  %v5823_v57 = vpack.c.bf16 %v5020_v4, %v5020_v4  ;;  %v4931_v7 = vadd.f32 1.0, %v7024_v58 }
 0x4ef   : > { %v7026_v30 = vpop.eup %7025  ;;  %5243 = vrot.lane.b32.xlu1 %v5826_v49, %s7066_s29  ;;  %5184 = vst.msk [vmem:[%s9267_s28 + $0x6c] sm:$0xf] %vm5156_vm9, %v5826_v49  ;;  %7031 = vrcp.f32 %v4930_v21 }
 0x4f0   : > { %5181 = vst.msk [vmem:[%s9267_s28 + $0x60] sm:$0xf] %vm5156_vm9, %v5823_v57  ;;  %v5021_v38 = vmul.f32 %v7026_v30, %v9604_v29  ;;  %7033 = vrcp.f32 %v4931_v7 }
 0x4f2   : > { %5237 = vrot.lane.b32.xlu0 %v5823_v57, %s7066_s29  ;;  %v5824_v33 = vpack.c.bf16 %v5021_v38, %v5021_v38 }
 0x4f3   : > { %v7028_v25 = vpop.eup %7027  ;;  %v5194_v55 = vpop.permute.xlu1 %5193 }
 0x4f4   : > { %5239 = vrot.lane.b32.xlu1 %v5824_v33, %s7066_s29  ;;  %5182 = vst.msk [vmem:[%s9267_s28 + $0x64] sm:$0xf] %vm5156_vm9, %v5824_v33  ;;  %v5024_v29 = vmul.f32 %v7028_v25, %v9618_v16  ;;  %5287 = vst.msk [vmem:[%s9673_s20 + $0x8] sm:$0xf] %vm5156_vm9, %v5194_v55 }
 0x4f5   : > { %v7030_v62 = vpop.eup %7029 }
 0x4f6   : > { %v5827_v50 = vpack.c.bf16 %v5024_v29, %v5024_v29  ;;  %v5025_v46 = vmul.f32 %v7030_v62, %v9623_v15 }
 0x4f7   : > { %v5190_v32 = vpop.permute.xlu0 %5189 }
 0x4f8   : > { %5245 = vrot.lane.b32.xlu0 %v5827_v50, %s7066_s29  ;;  %5185 = vst.msk [vmem:[%s9267_s28 + $0x70] sm:$0xf] %vm5156_vm9, %v5827_v50  ;;  %v5828_v14 = vpack.c.bf16 %v5025_v46, %v5025_v46  ;;  %5285 = vst.msk [vmem:[%s9673_s20] sm:$0xf] %vm5156_vm9, %v5190_v32 }
 0x4f9   : > { %v7032_v31 = vpop.eup %7031  ;;  %v5196_v16 = vpop.permute.xlu1 %5195 }
 0x4fa   : > { %v7034_v10 = vpop.eup %7033  ;;  %5247 = vrot.lane.b32.xlu1 %v5828_v14, %s7066_s29  ;;  %5186 = vst.msk [vmem:[%s9267_s28 + $0x74] sm:$0xf] %vm5156_vm9, %v5828_v14  ;;  %v5026_v6 = vmul.f32 %v7032_v31, %v9630_v54  ;;  %5288 = vst.msk [vmem:[%s9673_s20 + $0xc] sm:$0xf] %vm5156_vm9, %v5196_v16 }
 0x4fb   : > { %v5027_v41 = vmul.f32 %v7034_v10, %v9638_v17 }
 0x4fc   : > { %v5829_v15 = vpack.c.bf16 %v5026_v6, %v5026_v6 }
 0x4fd   : > { %v5830_v43 = vpack.c.bf16 %v5027_v41, %v5027_v41  ;;  %v5192_v1 = vpop.permute.xlu1 %5191 }
 0x4fe   : > { %5249 = vrot.lane.b32.xlu0 %v5829_v15, %s7066_s29  ;;  %5187 = vst.msk [vmem:[%s9267_s28 + $0x78] sm:$0xf] %vm5156_vm9, %v5829_v15  ;;  %5286 = vst.msk [vmem:[%s9673_s20 + $0x4] sm:$0xf] %vm5156_vm9, %v5192_v1 }
 0x4ff   : > { %5251 = vrot.lane.b32.xlu1 %v5830_v43, %s7066_s29  ;;  %5188 = vst.msk [vmem:[%s9267_s28 + $0x7c] sm:$0xf] %vm5156_vm9, %v5830_v43 }
 0x50b   : > { %v5202_v23 = vpop.permute.xlu0 %5201 }
 0x50c   : > { %5291 = vst.msk [vmem:[%s9673_s20 + $0x18] sm:$0xf] %vm5156_vm9, %v5202_v23  ;;  %v5204_v35 = vpop.permute.xlu1 %5203 }
 0x50d   : > { %5292 = vst.msk [vmem:[%s9673_s20 + $0x1c] sm:$0xf] %vm5156_vm9, %v5204_v35 }
 0x50f   : > { %v5198_v19 = vpop.permute.xlu0 %5197 }
 0x510   : > { %5289 = vst.msk [vmem:[%s9673_s20 + $0x10] sm:$0xf] %vm5156_vm9, %v5198_v19  ;;  %v5200_v45 = vpop.permute.xlu1 %5199 }
 0x511   : > { %5290 = vst.msk [vmem:[%s9673_s20 + $0x14] sm:$0xf] %vm5156_vm9, %v5200_v45 }
 0x520   : > { %v5210_v40 = vpop.permute.xlu0 %5209 }
 0x521   : > { %5295 = vst.msk [vmem:[%s9673_s20 + $0x28] sm:$0xf] %vm5156_vm9, %v5210_v40  ;;  %v5212_v54 = vpop.permute.xlu1 %5211 }
 0x522   : > { %5296 = vst.msk [vmem:[%s9673_s20 + $0x2c] sm:$0xf] %vm5156_vm9, %v5212_v54 }
 0x524   : > { %v5206_v53 = vpop.permute.xlu0 %5205 }
 0x525   : > { %5293 = vst.msk [vmem:[%s9673_s20 + $0x20] sm:$0xf] %vm5156_vm9, %v5206_v53  ;;  %v5208_v26 = vpop.permute.xlu1 %5207 }
 0x526   : > { %5294 = vst.msk [vmem:[%s9673_s20 + $0x24] sm:$0xf] %vm5156_vm9, %v5208_v26 }
 0x531   : > { %v5218_v2 = vpop.permute.xlu0 %5217 }
 0x532   : > { %5299 = vst.msk [vmem:[%s9673_s20 + $0x38] sm:$0xf] %vm5156_vm9, %v5218_v2 }
 0x533   : > { %v5220_v56 = vpop.permute.xlu1 %5219 }
 0x534   : > { %5300 = vst.msk [vmem:[%s9673_s20 + $0x3c] sm:$0xf] %vm5156_vm9, %v5220_v56 }
 0x535   : > { %v5214_v20 = vpop.permute.xlu0 %5213 }
 0x536   : > { %5297 = vst.msk [vmem:[%s9673_s20 + $0x30] sm:$0xf] %vm5156_vm9, %v5214_v20 }
 0x539   : > { %v5216_v13 = vpop.permute.xlu1 %5215 }
 0x53a   : > { %5298 = vst.msk [vmem:[%s9673_s20 + $0x34] sm:$0xf] %vm5156_vm9, %v5216_v13 }
 0x541   : > { %v5226_v36 = vpop.permute.xlu0 %5225 }
 0x542   : > { %5303 = vst.msk [vmem:[%s9673_s20 + $0x48] sm:$0xf] %vm5156_vm9, %v5226_v36 }
 0x544   : > { %v5228_v27 = vpop.permute.xlu1 %5227 }
 0x545   : > { %5304 = vst.msk [vmem:[%s9673_s20 + $0x4c] sm:$0xf] %vm5156_vm9, %v5228_v27 }
 0x549   : > { %v5222_v61 = vpop.permute.xlu0 %5221 }
 0x54a   : > { %5301 = vst.msk [vmem:[%s9673_s20 + $0x40] sm:$0xf] %vm5156_vm9, %v5222_v61 }
 0x551   : > { %v5224_v17 = vpop.permute.xlu1 %5223 }
 0x552   : > { %5302 = vst.msk [vmem:[%s9673_s20 + $0x44] sm:$0xf] %vm5156_vm9, %v5224_v17  ;;  %v5234_v59 = vpop.permute.xlu0 %5233 }
 0x553   : > { %5307 = vst.msk [vmem:[%s9673_s20 + $0x58] sm:$0xf] %vm5156_vm9, %v5234_v59 }
 0x558   : > { %v5236_v47 = vpop.permute.xlu1 %5235 }
 0x559   : > { %5308 = vst.msk [vmem:[%s9673_s20 + $0x5c] sm:$0xf] %vm5156_vm9, %v5236_v47 }
 0x55a   : > { %v5230_v3 = vpop.permute.xlu0 %5229 }
 0x55b   : > { %5305 = vst.msk [vmem:[%s9673_s20 + $0x50] sm:$0xf] %vm5156_vm9, %v5230_v3 }
 0x55c   : > { %v5232_v8 = vpop.permute.xlu1 %5231 }
 0x55d   : > { %5306 = vst.msk [vmem:[%s9673_s20 + $0x54] sm:$0xf] %vm5156_vm9, %v5232_v8 }
 0x560   : > { %v5242_v39 = vpop.permute.xlu0 %5241 }
 0x561   : > { %5311 = vst.msk [vmem:[%s9673_s20 + $0x68] sm:$0xf] %vm5156_vm9, %v5242_v39  ;;  %v5244_v28 = vpop.permute.xlu1 %5243 }
 0x562   : > { %5312 = vst.msk [vmem:[%s9673_s20 + $0x6c] sm:$0xf] %vm5156_vm9, %v5244_v28 }
 0x564   : > { %v5238_v24 = vpop.permute.xlu0 %5237 }
 0x565   : > { %5309 = vst.msk [vmem:[%s9673_s20 + $0x60] sm:$0xf] %vm5156_vm9, %v5238_v24 }
 0x566   : > { %v5240_v11 = vpop.permute.xlu1 %5239 }
 0x567   : > { %5310 = vst.msk [vmem:[%s9673_s20 + $0x64] sm:$0xf] %vm5156_vm9, %v5240_v11 }
 0x56a   : > { %v5246_v5 = vpop.permute.xlu0 %5245 }
 0x56b   : > { %5313 = vst.msk [vmem:[%s9673_s20 + $0x70] sm:$0xf] %vm5156_vm9, %v5246_v5 }
 0x56c   : > { %v5248_v18 = vpop.permute.xlu1 %5247 }
 0x56d   : > { %5314 = vst.msk [vmem:[%s9673_s20 + $0x74] sm:$0xf] %vm5156_vm9, %v5248_v18 }
 0x570   : > { %v5250_v63 = vpop.permute.xlu0 %5249 }
 0x571   : > { %5315 = vst.msk [vmem:[%s9673_s20 + $0x78] sm:$0xf] %vm5156_vm9, %v5250_v63  ;;  %v5252_v42 = vpop.permute.xlu1 %5251 }
 0x572   : > { %5316 = vst.msk [vmem:[%s9673_s20 + $0x7c] sm:$0xf] %vm5156_vm9, %v5252_v42 }
 0x573 PF: > { %s21_s15 = sadd.s32 1, %s7064_s15   ;;  %s9875_s13 = smov %s7060_s14 }
 0x574   : > { %p18_p5 = scmp.ge.s32.totalorder %s21_s15, 4   ;;  %s9876_s14 = smov %s9878_s16 }
 0x576   :  { %20 = sbr.rel (!%p18_p5) target bundleno = 2 (0x2), region = 99 }

// kernel: scalable_csp_resblock.5
= control target key start
LH: loop header
LB: loop body
LE: loop exit
PB: predicated region body
PF: predicated region fallthrough
CT: control target
= control target key end

     0   :  { %s10809_s24 = smov 0   ;;  %s10811_s25 = smov 0   ;;  %s14954_s0 = inlined_call_operand.vmem [shape: bf16[2,20,20,8], index: 0, kind: input, shape index: {}]   ;;  %s14955_s1 = inlined_call_operand.vmem [shape: bf16[72,8], index: 1, kind: input, shape index: {}]   ;;  %s14956_s2 = inlined_call_operand.vmem [shape: f32[1,8], index: 2, kind: input, shape index: {}]   ;;  %s14957_s3 = inlined_call_operand.vmem [shape: f32[1,8], index: 3, kind: input, shape index: {}]   ;;  %s14958_s4 = inlined_call_operand.vmem [shape: bf16[72,8], index: 4, kind: input, shape index: {}]   ;;  %s14959_s5 = inlined_call_operand.vmem [shape: f32[1,8], index: 5, kind: input, shape index: {}]   ;;  %s14960_s6 = inlined_call_operand.vmem [shape: f32[1,8], index: 6, kind: input, shape index: {}]   ;;  %s14961_s7 = inlined_call_operand.vmem [shape: bf16[2,256,8], index: 7, kind: output, shape index: {}]  }
   0x1   :  { %s10813_s26 = smov 0  }
   0x2 LB: > { %s29_s27 = sadd.s32 1, %s10761_s25  ;;  %p8235_p0 = scmp.ge.s32.totalorder %s10765_s26, 1  ;;  %s10765_s26 = sphi %s10813_s26, %s17_s26   ;;  %s10761_s25 = sphi %s10811_s25, %s15648_s25   ;;  %s10757_s24 = sphi %s10809_s24, %s15647_s24  }
   0x3   : > { %p31_p1 = scmp.ge.s32.totalorder %s29_s27, 2  ;;  %p251_p2 = scmp.lt.s32.totalorder %s10765_s26, 3 }
   0x5   : > { %s15650_s27 = smov (%p31_p1, %s29_s27), 0  ;;  %p252_p3 = pnand %p8235_p0, %p251_p2 }
   0x7   : > { %255 = sbr.rel (%p252_p3) target bundleno = 2184 (0x888), region = 48 }
   0xe   : > { %v986_v0 = vld [vmem:[%s14955_s1 + $0x4] sm:$0xf]  ;;  %vm1096_vm0 = vcmask 1043456   ;;  %p287_p4 = scmp.lt.s32.totalorder %s10757_s24, 1  ;;  %v802_v2 = vld [vmem:[%s14955_s1] sm:$0xf] }
   0xf   : > { %10282 = vmatprep.subr.msk.bf16.mxu0 %vm1096_vm0, %v986_v0  ;;  %v1098_v1 = vsel %vm1096_vm0, %v986_v0, 0  ;;  %10283 = vmatprep.subr.msk.bf16.mxu1 %vm1096_vm0, %v986_v0  ;;  %vm857_vm1 = vcmask 1042432   ;;  %vm858_vm2 = vcmask 1046532   ;;  %v15237_v6 = vmov 0  ;;  %v10861_v11 = vld [vmem:[%s14955_s1 + $0x8] sm:$0xf] }
  0x10   : > { %9089 = vmatpush3.bf16.msra.mxu0 %v1098_v1  ;;  %s15652_s24 = smov (!%p287_p4, %s10757_s24), 1  ;;  %9737 = vmatpush3.bf16.msra.mxu1 %v1098_v1  ;;  %vm10852_vm3 = vmor %vm857_vm1, %vm858_vm2  ;;  %vm1041_vm4 = vcmask 64512   ;;  %v1386_v18 = vsel %vm1096_vm0, %v802_v2, 0  ;;  %v10871_v19 = vsel %vm1096_vm0, %v10861_v11, 0  ;;  %vm367_vm5 = vsmask.f32 3328 }
  0x11   : > { %10284 = vmatprep.subr.msk.bf16.mxu0 %vm1096_vm0, %v802_v2  ;;  %s10301_s9 = smul.u32 240, %s15652_s24  ;;  %v15238_v6 = vsel %vm10852_vm3, 4294967295, %v15237_v6  ;;  %vm368_vm6 = vsmask.f32 7440  ;;  %vm1565_vm8 = vsmask.f32 2304 }
  0x12   : > { %15239 = vst [vmem:[#allocation2_spill] sm:$0xff] %v15238_v6  ;;  %vm11112_vm7 = vmor %vm367_vm5, %vm368_vm6  ;;  %vm1566_vm9 = vsmask.f32 6416  ;;  %vm4877_vm14 = vcmask 1040384   ;;  %vm4878_vm15 = vsmask.f32 256 }
  0x13   : > { %s10843_s12 = scalar_lea.vmem %s14954_s0, %s10301_s9  ;;  %vm11614_vm10 = vmor %vm1565_vm8, %vm1566_vm9  ;;  %vm4917_vm2 = vsmask.f32 7424  ;;  %s8731_s29 = sshll.u32 %s15652_s24, 7 }
  0x14   : > { %v307_v3 = vld [vmem:[%s10843_s12] sm:$0xf]  ;;  %v10847_v4 = vld [vmem:[%s10843_s12 + $0x4] sm:$0xf]  ;;  %v10850_v5 = vld [vmem:[%s10843_s12 + $0x8] sm:$0x3]  ;;  %s14522_s8 = scalar_lea.vmem %s14961_s7, %s8731_s29 }
  0x15   : > { %v371_v7 = vshrl.u32 %v307_v3, 16  ;;  %v8239_v8 = vrot.slane %v307_v3, 9  ;;  %v862_v9 = vrot.slane %v10847_v4, 5  ;;  %v865_v10 = vrot.slane %v10850_v5, 5  ;;  %v310_v17 = vld [vmem:[%s10843_s12 + $0xc] sm:$0xf]  ;;  %vm12966_vm1 = vmand %vm4877_vm14, %vm4878_vm15 }
  0x16   : > { %v374_v12 = vshll.u32 %v307_v3, 16  ;;  %v384_v13 = vshrl.u32 %v10847_v4, 16  ;;  %v14962_v16 = vshll.u32 %v10847_v4, 16  ;;  %v14966_v21 = vshll.u32 %v10850_v5, 16  ;;  %v311_v23 = vld [vmem:[%s10843_s12 + $0x10] sm:$0xf] }
  0x17   : > { %v863_v14 = vsel %vm10852_vm3, %v8239_v8, %v862_v9  ;;  %v864_v15 = vrot.slane %v862_v9, 4  ;;  %v10873_v20 = vrot.slane %v371_v7, 4  ;;  %v10880_v24 = vld [vmem:[%s10843_s12 + $0x14] sm:$0x3]  ;;  %v395_v28 = vshrl.u32 %v310_v17, 16 }
  0x18   : > { %v10882_v25 = vrot.slane %v374_v12, 5  ;;  %v10886_v26 = vrot.slane %v384_v13, 4  ;;  %v10888_v29 = vrot.slane %v371_v7, 5  ;;  %v398_v30 = vshll.u32 %v310_v17, 16  ;;  %v10891_v33 = vld [vmem:[%s10843_s12 + $0x18] sm:$0xf] }
  0x19   : > { %v866_v22 = vsel %vm10852_vm3, %v864_v15, %v865_v10  ;;  %v408_v31 = vshrl.u32 %v311_v23, 16  ;;  %v8240_v32 = vrot.slane %v310_v17, 9  ;;  %v404_v34 = vshll.u32 %v311_v23, 16  ;;  %v10898_v38 = vld [vmem:[%s10843_s12 + $0x1c] sm:$0xf] }
  0x1a   : > { %v8257_v27 = vcombine.low %v863_v14, %v866_v22  ;;  %v869_v35 = vrot.slane %v311_v23, 5  ;;  %v872_v36 = vrot.slane %v10880_v24, 5  ;;  %v10895_v37 = vrot.slane %v395_v28, 5  ;;  %v10906_v43 = vld [vmem:[%s10843_s12 + $0x20] sm:$0x3] }
  0x1b   : > { %v10900_v39 = vrot.slane %v374_v12, 6  ;;  %v14963_v40 = vshll.u32 %v10880_v24, 16  ;;  %v10903_v41 = vrot.slane %v398_v30, 6  ;;  %v1587_v42 = vrot.slane %v408_v31, 5  ;;  %v10912_v48 = vld [vmem:[%s10843_s12 + $0x24] sm:$0xf] }
  0x1c   : > { %9090 = vmatprep.mubr.msk.bf16.mxu0 %vm1041_vm4, %v8257_v27  ;;  %v870_v44 = vsel %vm10852_vm3, %v8240_v32, %v869_v35  ;;  %v871_v45 = vrot.slane %v869_v35, 4  ;;  %v1588_v46 = vrot.slane %v404_v34, 6  ;;  %v1592_v47 = vshrl.u32 %v10880_v24, 16  ;;  %v10923_v52 = vld [vmem:[%s10843_s12 + $0x28] sm:$0xf] }
  0x1d   : > { %v10914_v49 = vrot.slane %v395_v28, 4  ;;  %v10920_v51 = vrot.slane %v14963_v40, 6  ;;  %v10926_v53 = vld [vmem:[%s10843_s12 + $0x2c] sm:$0x3]  ;;  %v8241_v57 = vrot.slane %v10891_v33, 9  ;;  %v10941_v60 = vrot.slane %v398_v30, 5 }
  0x1e   : > { %v873_v54 = vsel %vm10852_vm3, %v871_v45, %v872_v36  ;;  %v10930_v55 = vor.u32 %v1588_v46, %v1587_v42  ;;  %v10932_v56 = vrot.slane %v1592_v47, 5  ;;  %v10936_v58 = vld [vmem:[%s10843_s12 + $0x30] sm:$0xf]  ;;  %v10939_v59 = vld [vmem:[%s10843_s12 + $0x34] sm:$0xf]  ;;  %v876_v62 = vrot.slane %v10898_v38, 5 }
  0x1f   : > { %v10943_v61 = vcombine.low %v870_v44, %v873_v54  ;;  %v879_v63 = vrot.slane %v10906_v43, 5  ;;  %v10948_v0 = vld [vmem:[%s10843_s12 + $0x38] sm:$0x3]  ;;  %v8242_v2 = vrot.slane %v10912_v48, 9  ;;  %v883_v3 = vrot.slane %v10923_v52, 5 }
  0x20   : > { %15240 = vst [vmem:[#allocation3_spill] sm:$0xff] %v10932_v56  ;;  %v886_v7 = vrot.slane %v10926_v53, 5  ;;  %v10959_v8 = vsel %vm10852_vm3, %v8241_v57, %v876_v62  ;;  %v878_v9 = vrot.slane %v876_v62, 4  ;;  %v8243_v10 = vrot.slane %v10936_v58, 9  ;;  %v10971_v23 = vld [vmem:[%s10843_s12 + $0x3c] sm:$0xf] }
  0x21   : > { %15241 = vst [vmem:[#allocation4_spill] sm:$0xff] %v10943_v61  ;;  %9091 = vmatmul.mubr.msk.bf16.vlgmr.msra.gmra.mrb[0].mxu0 %vm1041_vm4, %v10943_v61  ;;  %15242 = vst [vmem:[#allocation5_spill] sm:$0xff] %v10959_v8  ;;  %v890_v12 = vrot.slane %v10939_v59, 5  ;;  %v10963_v14 = vrot.slane %v404_v34, 5  ;;  %v10967_v15 = vsel %vm10852_vm3, %v8242_v2, %v883_v3  ;;  %v885_v17 = vrot.slane %v883_v3, 4 }
  0x22   : > { %9127 = vmatpush3.bf16.msra.mxu0 %v1386_v18  ;;  %15243 = vst [vmem:[#allocation6_spill] sm:$0xff] %v10967_v15  ;;  %v893_v22 = vrot.slane %v10948_v0, 5  ;;  %v410_v27 = vrot.slane %v408_v31, 4  ;;  %v10975_v28 = vsel %vm10852_vm3, %v878_v9, %v879_v63  ;;  %v10982_v32 = vld [vmem:[%s10843_s12 + $0x40] sm:$0xf]  ;;  %v11008_v45 = vrot.slane %v384_v13, 5 }
  0x23   : > { %15244 = vst [vmem:[#allocation7_spill] sm:$0xff] %v10975_v28  ;;  %v10979_v18 = vsel %vm10852_vm3, %v8243_v10, %v890_v12  ;;  %v892_v30 = vrot.slane %v890_v12, 4  ;;  %v10985_v34 = vld [vmem:[%s10843_s12 + $0x44] sm:$0x3]  ;;  %10285 = vmatprep.subr.msk.bf16.mxu0 %vm1096_vm0, %v10861_v11  ;;  %v10991_v31 = vcombine.low %v10959_v8, %v10975_v28  ;;  %v10995_v35 = vsel %vm10852_vm3, %v885_v17, %v886_v7  ;;  %v10998_v36 = vld [vmem:[%s10843_s12 + $0x48] sm:$0xf] }
  0x24   : > { %15245 = vst [vmem:[#allocation8_spill] sm:$0xff] %v10979_v18  ;;  %15247 = vst [vmem:[#allocation10_spill] sm:$0xff] %v10995_v35  ;;  %v11001_v42 = vld [vmem:[%s10843_s12 + $0x4c] sm:$0xf]  ;;  %v11004_v44 = vld [vmem:[%s10843_s12 + $0x50] sm:$0x3]  ;;  %v11012_v11 = vcombine.low %v10967_v15, %v10995_v35  ;;  %v401_v3 = vor.u32 %v10941_v60, %v10914_v49  ;;  %v411_v17 = vor.u32 %v410_v27, %v10963_v14 }
  0x25   : > { %15246 = vst [vmem:[#allocation9_spill] sm:$0xff] %v10991_v31  ;;  %v11016_v46 = vsel %vm10852_vm3, %v892_v30, %v893_v22  ;;  %v8244_v47 = vrot.slane %v10971_v23, 9  ;;  %v11020_v54 = vld [vmem:[%s10843_s12 + $0x54] sm:$0xf]  ;;  %v11023_v57 = vld [vmem:[%s10843_s12 + $0x58] sm:$0xf]  ;;  %9094 = vmatprep.mubr.msk.bf16.mxu0 %vm1041_vm4, %v10991_v31 }
  0x26   : > { %15248 = vst [vmem:[#allocation11_spill] sm:$0xff] %v11012_v11  ;;  %15249 = vst [vmem:[#allocation12_spill] sm:$0xff] %v11016_v46  ;;  %v11027_v62 = vrot.slane %v14962_v16, 6  ;;  %v11033_v13 = vcombine.low %v10979_v18, %v11016_v46  ;;  %v897_v63 = vrot.slane %v10982_v32, 5  ;;  %v900_v2 = vrot.slane %v10985_v34, 5 }
  0x27   : > { %v8245_v7 = vrot.slane %v10998_v36, 9  ;;  %v904_v9 = vrot.slane %v11001_v42, 5  ;;  %v907_v10 = vrot.slane %v11004_v44, 5  ;;  %v11043_v12 = vld [vmem:[%s10843_s12 + $0x5c] sm:$0x3]  ;;  %v8246_v30 = vrot.slane %v11020_v54, 9 }
  0x28   : > { %15250 = vst [vmem:[#allocation13_spill] sm:$0xff] %v11033_v13  ;;  %v899_v22 = vrot.slane %v897_v63, 4  ;;  %v911_v1 = vrot.slane %v11023_v57, 5  ;;  %v11049_v50 = vld [vmem:[%s10843_s12 + $0x60] sm:$0xf]  ;;  %v1577_v49 = vshrl.u32 %v10850_v5, 16  ;;  %v11060_v27 = vsel %vm10852_vm3, %v8244_v47, %v897_v63 }
  0x29   : > { %v11054_v60 = vrot.slane %v14966_v21, 6  ;;  %9095 = vmatmul.mubr.msk.bf16.gmra.mrb[4].mxu0 %vm1041_vm4, %v11012_v11  ;;  %15251 = vst [vmem:[#allocation14_spill] sm:$0xff] %v11060_v27  ;;  %v906_v16 = vrot.slane %v904_v9, 4  ;;  %v11063_v40 = vld [vmem:[%s10843_s12 + $0x64] sm:$0xf]  ;;  %v11073_v21 = vsel %vm10852_vm3, %v8245_v7, %v904_v9  ;;  %v914_v35 = vrot.slane %v11043_v12, 5 }
  0x2a   : > { %9098 = vmatprep.mubr.msk.bf16.mxu0 %vm1041_vm4, %v11033_v13  ;;  %v11069_v46 = vsel %vm10852_vm3, %v899_v22, %v900_v2  ;;  %15253 = vst [vmem:[#allocation16_spill] sm:$0xff] %v11073_v21  ;;  %v913_v18 = vrot.slane %v911_v1, 4  ;;  %v11077_v28 = vld [vmem:[%s10843_s12 + $0x68] sm:$0x3]  ;;  %v11080_v47 = vld [vmem:[%s10843_s12 + $0x6c] sm:$0xf]  ;;  %v11097_v11 = vsel %vm10852_vm3, %v8246_v30, %v911_v1 }
  0x2b   : > { %15252 = vst [vmem:[#allocation15_spill] sm:$0xff] %v11069_v46  ;;  %v15254_v63 = vshll.u32 %v10880_v24, 16  ;;  %v11086_v8 = vsel %vm10852_vm3, %v906_v16, %v907_v10  ;;  %v8247_v2 = vrot.slane %v11049_v50, 9  ;;  %v11090_v22 = vld [vmem:[%s10843_s12 + $0x70] sm:$0xf]  ;;  %v402_v9 = vrot.slane %v401_v3, 4 }
  0x2c   : > { %15255 = vst [vmem:[#allocation17_spill] sm:$0xff] %v11086_v8  ;;  %v11093_v7 = vld [vmem:[%s10843_s12 + $0x74] sm:$0x3]  ;;  %v412_v13 = vrot.slane %v411_v17, 4  ;;  %15256 = vst [vmem:[#allocation18_spill] sm:$0xff] %v11097_v11  ;;  %v918_v31 = vrot.slane %v11063_v40, 5  ;;  %v11102_v24 = vcombine.low %v11060_v27, %v11069_v46  ;;  %v11106_v16 = vcombine.low %v11073_v21, %v11086_v8 }
  0x2d   : > { %v416_v15 = vrot.slane %v15254_v63, 5  ;;  %v921_v10 = vrot.slane %v11077_v28, 5  ;;  %v8248_v63 = vrot.slane %v11080_v47, 9  ;;  %v11118_v1 = vsel %vm10852_vm3, %v913_v18, %v914_v35 }
  0x2e   : > { %15257 = vst [vmem:[#allocation19_spill] sm:$0xff] %v11102_v24  ;;  %15258 = vst [vmem:[#allocation20_spill] sm:$0xff] %v11106_v16  ;;  %v920_v17 = vrot.slane %v918_v31, 4  ;;  %v925_v30 = vrot.slane %v11090_v22, 5  ;;  %v928_v8 = vrot.slane %v11093_v7, 5  ;;  %v11122_v21 = vrot.slane %v1577_v49, 5 }
  0x2f   : > { %15261 = vst [vmem:[#allocation21_spill] sm:$0xff] %v11118_v1  ;;  %v11126_v46 = vsel %vm10852_vm3, %v8247_v2, %v918_v31  ;;  %v377_v27 = vor.u32 %v10882_v25, %v10873_v20  ;;  %v15263_v61 = vshll.u32 %v10847_v4, 16  ;;  %v407_v31 = vsel %vm11112_vm7, %v402_v9, %v10963_v14 }
  0x30   : > { %15262 = vst [vmem:[#allocation22_spill] sm:$0xff] %v11126_v46  ;;  %v11134_v18 = vsel %vm10852_vm3, %v920_v17, %v921_v10  ;;  %v11138_v35 = vsel %vm10852_vm3, %v8248_v63, %v925_v30  ;;  %v927_v49 = vrot.slane %v925_v30, 4  ;;  %v15266_v2 = vor.u32 %v10903_v41, %v10895_v37 }
  0x31   : > { %v382_v56 = vrot.slane %v15263_v61, 5  ;;  %15264 = vst [vmem:[#allocation23_spill] sm:$0xff] %v11134_v18  ;;  %15265 = vst [vmem:[#allocation24_spill] sm:$0xff] %v11138_v35  ;;  %9099 = vmatmul.mubr.msk.bf16.gmra.mrb[8].mxu0 %vm1041_vm4, %v11102_v24  ;;  %v11152_v4 = vcombine.low %v11097_v11, %v11118_v1  ;;  %v378_v25 = vrot.slane %v377_v27, 4  ;;  %v15268_v61 = vshll.u32 %v10850_v5, 16 }
  0x32   : > { %v11146_v20 = vrot.slane %v15266_v2, 4  ;;  %9102 = vmatprep.mubr.msk.bf16.mxu0 %vm1041_vm4, %v11106_v16  ;;  %v11160_v14 = vsel %vm10852_vm3, %v927_v49, %v928_v8  ;;  %v417_v41 = vsel %vm11112_vm7, %v412_v13, %v416_v15  ;;  %v14991_v9 = vshrl.u32 %v10891_v33, 16 }
  0x33   : > { %15267 = vst [vmem:[#allocation25_spill] sm:$0xff] %v11152_v4  ;;  %v392_v10 = vrot.slane %v15268_v61, 5  ;;  %15269 = vst [vmem:[#allocation26_spill] sm:$0xff] %v11160_v14  ;;  %v387_v37 = vor.u32 %v10886_v26, %v382_v56  ;;  %v11168_v27 = vcombine.low %v11126_v46, %v11134_v18  ;;  %v11172_v5 = vcombine.low %v11138_v35, %v11160_v14 }
  0x34   : > { %v383_v63 = vsel %vm11112_vm7, %v378_v25, %v382_v56  ;;  %v11176_v8 = vcombine.low %v407_v31, %v417_v41  ;;  %v421_v26 = vrot.slane %v14991_v9, 4  ;;  %v14996_v15 = vshll.u32 %v10891_v33, 16 }
  0x35   : > { %15270 = vst [vmem:[#allocation27_spill] sm:$0xff] %v11168_v27  ;;  %15271 = vst [vmem:[#allocation28_spill] sm:$0xff] %v11172_v5  ;;  %v388_v17 = vrot.slane %v387_v37, 4  ;;  %v14997_v13 = vshll.u32 %v10898_v38, 16  ;;  %v14999_v30 = vshrl.u32 %v10898_v38, 16  ;;  %v14998_v49 = vshll.u32 %v10906_v43, 16 }
  0x36   : > { %15272 = vst [vmem:[#allocation29_spill] sm:$0xff] %v11176_v8  ;;  %v424_v31 = vrot.slane %v14996_v15, 5  ;;  %v15000_v37 = vshll.u32 %v10923_v52, 16  ;;  %v15273_v61 = vshrl.u32 %v10912_v48, 16  ;;  %v15019_v11 = vshll.u32 %v10948_v0, 16 }
  0x37   : > { %v393_v56 = vsel %vm11112_vm7, %v388_v17, %v392_v10  ;;  %v430_v25 = vrot.slane %v14997_v13, 5  ;;  %v434_v9 = vrot.slane %v14999_v30, 4  ;;  %v440_v2 = vrot.slane %v14998_v49, 5 }
  0x38   : > { %v8293_v41 = vcombine.low %v383_v63, %v393_v56  ;;  %v445_v14 = vrot.slane %v15273_v61, 4  ;;  %v425_v35 = vor.u32 %v424_v31, %v421_v26  ;;  %v15274_v10 = vshll.u32 %v10912_v48, 16 }
  0x39   : > { %v454_v15 = vrot.slane %v15000_v37, 5  ;;  %v15007_v13 = vshrl.u32 %v10923_v52, 16  ;;  %9103 = vmatmul.mubr.msk.bf16.gmra.mrb[12].mxu0 %vm1041_vm4, %v11152_v4  ;;  %v435_v63 = vor.u32 %v434_v9, %v430_v25  ;;  %v15008_v56 = vshll.u32 %v10926_v53, 16 }
  0x3a   : > { %v448_v17 = vrot.slane %v15274_v10, 5  ;;  %v15011_v49 = vshrl.u32 %v10936_v58, 16  ;;  %v15012_v30 = vshll.u32 %v10936_v58, 16  ;;  %9106 = vmatprep.mubr.msk.bf16.mxu0 %vm1041_vm4, %v11168_v27  ;;  %v426_v26 = vrot.slane %v425_v35, 4 }
  0x3b   : > { %v458_v31 = vrot.slane %v15007_v13, 4  ;;  %v15022_v10 = vshll.u32 %v10939_v59, 16  ;;  %v436_v37 = vrot.slane %v435_v63, 4  ;;  %v464_v9 = vrot.slane %v15008_v56, 5 }
  0x3c   : > { %v449_v61 = vor.u32 %v448_v17, %v445_v14  ;;  %v469_v18 = vrot.slane %v15011_v49, 4  ;;  %v472_v46 = vrot.slane %v15012_v30, 5  ;;  %v431_v1 = vsel %vm11112_vm7, %v426_v26, %v430_v25 }
  0x3d   : > { %v459_v14 = vor.u32 %v458_v31, %v454_v15  ;;  %v478_v17 = vrot.slane %v15022_v10, 5  ;;  %v441_v63 = vsel %vm11112_vm7, %v436_v37, %v440_v2  ;;  %v15023_v56 = vshrl.u32 %v10939_v59, 16 }
  0x3e   : > { %v450_v35 = vrot.slane %v449_v61, 4  ;;  %v473_v13 = vor.u32 %v472_v46, %v469_v18  ;;  %v11228_v49 = vcombine.low %v431_v1, %v441_v63  ;;  %v15015_v25 = vshrl.u32 %v10971_v23, 16 }
  0x3f   : > { %v460_v27 = vrot.slane %v459_v14, 4  ;;  %v482_v61 = vrot.slane %v15023_v56, 4  ;;  %v488_v2 = vrot.slane %v15019_v11, 5  ;;  %v15017_v46 = vshll.u32 %v10971_v23, 16 }
  0x40   : > { %15275 = vst [vmem:[#allocation30_spill] sm:$0xff] %v11228_v49  ;;  %v455_v30 = vsel %vm11112_vm7, %v450_v35, %v454_v15  ;;  %v474_v26 = vrot.slane %v473_v13, 4  ;;  %v493_v1 = vrot.slane %v15015_v25, 4  ;;  %v15016_v15 = vshll.u32 %v10982_v32, 16 }
  0x41   : > { %v465_v18 = vsel %vm11112_vm7, %v460_v27, %v464_v9  ;;  %v15018_v37 = vshrl.u32 %v10982_v32, 16  ;;  %9107 = vmatmul.mubr.msk.bf16.gmra.mrb[16].mxu0 %vm1041_vm4, %v11172_v5  ;;  %v483_v35 = vor.u32 %v482_v61, %v478_v17  ;;  %v496_v14 = vrot.slane %v15017_v46, 5 }
  0x42   : > { %v11246_v13 = vcombine.low %v455_v30, %v465_v18  ;;  %v479_v31 = vsel %vm11112_vm7, %v474_v26, %v478_v17  ;;  %9128 = vmatprep.mubr.msk.bf16.mxu0 %vm1041_vm4, %v8293_v41  ;;  %v502_v27 = vrot.slane %v15016_v15, 5  ;;  %v15020_v63 = vshll.u32 %v10985_v34, 16 }
  0x43   : > { %v506_v9 = vrot.slane %v15018_v37, 4  ;;  %v15021_v30 = vshrl.u32 %v10998_v36, 16  ;;  %v484_v18 = vrot.slane %v483_v35, 4  ;;  %v497_v25 = vor.u32 %v496_v14, %v493_v1 }
  0x44   : > { %15276 = vst [vmem:[#allocation31_spill] sm:$0xff] %v11246_v13  ;;  %v15038_v26 = vshll.u32 %v10998_v36, 16  ;;  %v15024_v17 = vshll.u32 %v11001_v42, 16  ;;  %v512_v41 = vrot.slane %v15020_v63, 5  ;;  %v15029_v46 = vshrl.u32 %v11001_v42, 16 }
  0x45   : > { %v507_v61 = vor.u32 %v506_v9, %v502_v27  ;;  %v517_v15 = vrot.slane %v15021_v30, 4  ;;  %v489_v37 = vsel %vm11112_vm7, %v484_v18, %v488_v2  ;;  %v498_v11 = vrot.slane %v497_v25, 4 }
  0x46   : > { %v520_v1 = vrot.slane %v15038_v26, 5  ;;  %v526_v35 = vrot.slane %v15024_v17, 5  ;;  %v11272_v14 = vcombine.low %v479_v31, %v489_v37  ;;  %v530_v63 = vrot.slane %v15029_v46, 4  ;;  %v11356_v26 = vld [vmem:[%s10843_s12 + $0x7c] sm:$0xf] }
  0x47   : > { %v508_v9 = vrot.slane %v507_v61, 4  ;;  %v15028_v30 = vshll.u32 %v11004_v44, 16  ;;  %v503_v10 = vsel %vm11112_vm7, %v498_v11, %v502_v27  ;;  %v15025_v25 = vshrl.u32 %v11020_v54, 16  ;;  %v11289_v61 = vld [vmem:[%s14955_s1 + $0xc] sm:$0xf] }
  0x48   : > { %15277 = vst [vmem:[#allocation32_spill] sm:$0xff] %v11272_v14  ;;  %v521_v56 = vor.u32 %v520_v1, %v517_v15  ;;  %v15026_v2 = vshll.u32 %v11020_v54, 16  ;;  %v531_v17 = vor.u32 %v530_v63, %v526_v35  ;;  %v15027_v31 = vshll.u32 %v11023_v57, 16 }
  0x49   : > { %v513_v18 = vsel %vm11112_vm7, %v508_v9, %v512_v41  ;;  %v536_v37 = vrot.slane %v15028_v30, 5  ;;  %9129 = vmatmul.mubr.msk.bf16.vlgmr.msra.gmra.mrb[0].mxu0 %vm1041_vm4, %v11176_v8  ;;  %v541_v27 = vrot.slane %v15025_v25, 4  ;;  %v15032_v9 = vshrl.u32 %v11023_v57, 16 }
  0x4a   : > { %v11293_v11 = vcombine.low %v503_v10, %v513_v18  ;;  %v522_v15 = vrot.slane %v521_v56, 4  ;;  %v544_v63 = vrot.slane %v15026_v2, 5  ;;  %9165 = vmatpush3.bf16.msra.mxu0 %v10871_v19  ;;  %9132 = vmatprep.mubr.msk.bf16.mxu0 %vm1041_vm4, %v11228_v49  ;;  %v532_v41 = vrot.slane %v531_v17, 4  ;;  %v11397_v49 = vld [vmem:[%s10843_s12 + $0x8c] sm:$0x3] }
  0x4b   : > { %v550_v1 = vrot.slane %v15027_v31, 5  ;;  %v15030_v10 = vshll.u32 %v11043_v12, 16  ;;  %v15031_v25 = vshrl.u32 %v11049_v50, 16  ;;  %v15034_v2 = vshll.u32 %v11049_v50, 16  ;;  %10286 = vmatprep.subr.msk.bf16.mxu0 %vm1096_vm0, %v11289_v61  ;;  %15287 = vst [vmem:[#allocation39_spill] sm:$0xff] %v11397_v49 }
  0x4c   : > { %15278 = vst [vmem:[#allocation33_spill] sm:$0xff] %v11293_v11  ;;  %v527_v56 = vsel %vm11112_vm7, %v522_v15, %v526_v35  ;;  %v545_v18 = vor.u32 %v544_v63, %v541_v27  ;;  %v537_v19 = vsel %vm11112_vm7, %v532_v41, %v536_v37  ;;  %v554_v17 = vrot.slane %v15032_v9, 4 }
  0x4d   : > { %v560_v31 = vrot.slane %v15030_v10, 5  ;;  %v15033_v30 = vshll.u32 %v11063_v40, 16  ;;  %v11319_v35 = vcombine.low %v527_v56, %v537_v19  ;;  %v565_v27 = vrot.slane %v15031_v25, 4 }
  0x4e   : > { %v546_v15 = vrot.slane %v545_v18, 4  ;;  %v568_v63 = vrot.slane %v15034_v2, 5  ;;  %v555_v46 = vor.u32 %v554_v17, %v550_v1  ;;  %v15036_v41 = vshrl.u32 %v11063_v40, 16 }
  0x4f   : > { %15279 = vst [vmem:[#allocation34_spill] sm:$0xff] %v11319_v35  ;;  %v574_v37 = vrot.slane %v15033_v30, 5  ;;  %v15035_v10 = vshll.u32 %v11077_v28, 16  ;;  %v15037_v18 = vshrl.u32 %v11080_v47, 16  ;;  %v15039_v25 = vshll.u32 %v11080_v47, 16 }
  0x50   : > { %v551_v56 = vsel %vm11112_vm7, %v546_v15, %v550_v1  ;;  %v569_v19 = vor.u32 %v568_v63, %v565_v27  ;;  %v556_v9 = vrot.slane %v555_v46, 4  ;;  %v578_v17 = vrot.slane %v15036_v41, 4  ;;  %v11346_v63 = vld [vmem:[%s10843_s12 + $0x78] sm:$0xf] }
  0x51   : > { %v584_v30 = vrot.slane %v15035_v10, 5  ;;  %v15046_v2 = vshll.u32 %v11090_v22, 16  ;;  %9133 = vmatmul.mubr.msk.bf16.gmra.mrb[4].mxu0 %vm1041_vm4, %v11246_v13  ;;  %v589_v15 = vrot.slane %v15037_v18, 4  ;;  %v592_v27 = vrot.slane %v15039_v25, 5 }
  0x52   : > { %v570_v1 = vrot.slane %v569_v19, 4  ;;  %9136 = vmatprep.mubr.msk.bf16.mxu0 %vm1041_vm4, %v11272_v14  ;;  %v561_v10 = vsel %vm11112_vm7, %v556_v9, %v560_v31  ;;  %v579_v41 = vor.u32 %v578_v17, %v574_v37  ;;  %v15049_v18 = vshll.u32 %v11093_v7, 16  ;;  %v11365_v31 = vld [vmem:[%s10843_s12 + $0x80] sm:$0x3] }
  0x53   : > { %v598_v19 = vrot.slane %v15046_v2, 5  ;;  %v11358_v25 = vcombine.low %v551_v56, %v561_v10  ;;  %v593_v5 = vor.u32 %v592_v27, %v589_v15  ;;  %v15281_v4 = vshrl.u32 %v11090_v22, 16  ;;  %v11374_v15 = vld [vmem:[%s10843_s12 + $0x84] sm:$0xf] }
  0x54   : > { %v575_v46 = vsel %vm11112_vm7, %v570_v1, %v574_v37  ;;  %v580_v9 = vrot.slane %v579_v41, 4  ;;  %v608_v17 = vrot.slane %v15049_v18, 5  ;;  %v15052_v2 = vshrl.u32 %v11346_v63, 16  ;;  %15282 = vst [vmem:[#allocation36_spill] sm:$0xff] %v11374_v15 }
  0x55   : > { %15280 = vst [vmem:[#allocation35_spill] sm:$0xff] %v11358_v25  ;;  %v602_v16 = vrot.slane %v15281_v4, 4  ;;  %v15055_v24 = vshll.u32 %v11346_v63, 16  ;;  %v594_v10 = vrot.slane %v593_v5, 4  ;;  %v15058_v18 = vshll.u32 %v11365_v31, 16 }
  0x56   : > { %v585_v4 = vsel %vm11112_vm7, %v580_v9, %v584_v30  ;;  %v613_v41 = vrot.slane %v15052_v2, 4  ;;  %v15285_v14 = vshll.u32 %v11356_v26, 16  ;;  %v15286_v2 = vshrl.u32 %v11356_v26, 16 }
  0x57   : > { %v603_v56 = vor.u32 %v602_v16, %v598_v19  ;;  %v616_v27 = vrot.slane %v15055_v24, 5  ;;  %v11384_v16 = vld [vmem:[%s10843_s12 + $0x88] sm:$0xf]  ;;  %v11386_v5 = vcombine.low %v575_v46, %v585_v4  ;;  %v599_v1 = vsel %vm11112_vm7, %v594_v10, %v598_v19 }
  0x58   : > { %15283 = vst [vmem:[#allocation37_spill] sm:$0xff] %v11384_v16  ;;  %v622_v30 = vrot.slane %v15285_v14, 5  ;;  %v626_v13 = vrot.slane %v15286_v2, 4  ;;  %v632_v24 = vrot.slane %v15058_v18, 5  ;;  %v15063_v46 = vshrl.u32 %v11374_v15, 16 }
  0x59   : > { %15284 = vst [vmem:[#allocation38_spill] sm:$0xff] %v11386_v5  ;;  %v604_v37 = vrot.slane %v603_v56, 4  ;;  %v617_v9 = vor.u32 %v616_v27, %v613_v41  ;;  %9137 = vmatmul.mubr.msk.bf16.gmra.mrb[8].mxu0 %vm1041_vm4, %v11293_v11  ;;  %v15067_v14 = vshll.u32 %v11374_v15, 16  ;;  %v15068_v10 = vshll.u32 %v11384_v16, 16  ;;  %v11408_v2 = vld [vmem:[%s10843_s12 + $0x90] sm:$0xf] }
  0x5a   : > { %15288 = vst [vmem:[#allocation40_spill] sm:$0xff] %v11408_v2  ;;  %9140 = vmatprep.mubr.msk.bf16.mxu0 %vm1041_vm4, %v11319_v35  ;;  %v627_v27 = vor.u32 %v626_v13, %v622_v30  ;;  %v15291_v11 = vshrl.u32 %v11384_v16, 16  ;;  %v11437_v16 = vld [vmem:[%s10843_s12 + $0x9c] sm:$0xf] }
  0x5b   : > { %v609_v19 = vsel %vm11112_vm7, %v604_v37, %v608_v17  ;;  %v618_v41 = vrot.slane %v617_v9, 4  ;;  %v637_v17 = vrot.slane %v15063_v46, 4  ;;  %v11417_v37 = vld [vmem:[%s10843_s12 + $0x94] sm:$0xf]  ;;  %v640_v18 = vrot.slane %v15067_v14, 5  ;;  %15293 = vst [vmem:[#allocation44_spill] sm:$0xff] %v11437_v16 }
  0x5c   : > { %v11412_v4 = vcombine.low %v599_v1, %v609_v19  ;;  %15290 = vst [vmem:[#allocation42_spill] sm:$0xff] %v11417_v37  ;;  %v646_v56 = vrot.slane %v15068_v10, 5  ;;  %v650_v35 = vrot.slane %v15291_v11, 4  ;;  %v15073_v1 = vshll.u32 %v11397_v49, 16  ;;  %v11433_v10 = vld [vmem:[%s10843_s12 + $0x98] sm:$0x3] }
  0x5d   : > { %v623_v13 = vsel %vm11112_vm7, %v618_v41, %v622_v30  ;;  %v628_v9 = vrot.slane %v627_v27, 4  ;;  %v15076_v19 = vshrl.u32 %v11408_v2, 16  ;;  %v15077_v46 = vshll.u32 %v11408_v2, 16  ;;  %15292 = vst [vmem:[#allocation43_spill] sm:$0xff] %v11433_v10  ;;  %v11447_v41 = vld [vmem:[%s10843_s12 + $0xa0] sm:$0xf] }
  0x5e   : > { %15289 = vst [vmem:[#allocation41_spill] sm:$0xff] %v11412_v4  ;;  %v641_v8 = vor.u32 %v640_v18, %v637_v17  ;;  %v651_v6 = vor.u32 %v650_v35, %v646_v56  ;;  %v656_v14 = vrot.slane %v15073_v1, 5  ;;  %v15078_v11 = vshll.u32 %v11417_v37, 16  ;;  %15294 = vst [vmem:[#allocation45_spill] sm:$0xff] %v11447_v41  ;;  %v11513_v2 = vld [vmem:[%s10843_s12 + $0xb8] sm:$0xf] }
  0x5f   : > { %v633_v15 = vsel %vm11112_vm7, %v628_v9, %v632_v24  ;;  %v661_v30 = vrot.slane %v15076_v19, 4  ;;  %v664_v18 = vrot.slane %v15077_v46, 5  ;;  %v15079_v35 = vshrl.u32 %v11417_v37, 16 }
  0x60   : > { %v11449_v27 = vcombine.low %v623_v13, %v633_v15  ;;  %v642_v17 = vrot.slane %v641_v8, 4  ;;  %v652_v1 = vrot.slane %v651_v6, 4  ;;  %v670_v49 = vrot.slane %v15078_v11, 5  ;;  %v11464_v8 = vld [vmem:[%s10843_s12 + $0xa4] sm:$0x3] }
  0x61   : > { %v665_v24 = vor.u32 %v664_v18, %v661_v30  ;;  %v674_v9 = vrot.slane %v15079_v35, 4  ;;  %v15084_v19 = vshll.u32 %v11433_v10, 16  ;;  %9141 = vmatmul.mubr.msk.bf16.gmra.mrb[12].mxu0 %vm1041_vm4, %v11358_v25  ;;  %15296 = vst [vmem:[#allocation47_spill] sm:$0xff] %v11464_v8  ;;  %v15087_v13 = vshll.u32 %v11437_v16, 16  ;;  %v11469_v18 = vld [vmem:[%s10843_s12 + $0xa8] sm:$0xf] }
  0x62   : > { %15295 = vst [vmem:[#allocation46_spill] sm:$0xff] %v11449_v27  ;;  %v647_v15 = vsel %vm11112_vm7, %v642_v17, %v646_v56  ;;  %v657_v6 = vsel %vm11112_vm7, %v652_v1, %v656_v14  ;;  %15297 = vst [vmem:[#allocation48_spill] sm:$0xff] %v11469_v18  ;;  %9144 = vmatprep.mubr.msk.bf16.mxu0 %vm1041_vm4, %v11386_v5  ;;  %v11478_v56 = vld [vmem:[%s10843_s12 + $0xac] sm:$0xf]  ;;  %v15300_v1 = vshrl.u32 %v11437_v16, 16  ;;  %v15301_v25 = vshll.u32 %v11447_v41, 16 }
  0x63   : > { %v11473_v11 = vcombine.low %v647_v15, %v657_v6  ;;  %v666_v35 = vrot.slane %v665_v24, 4  ;;  %v675_v46 = vor.u32 %v674_v9, %v670_v49  ;;  %v680_v14 = vrot.slane %v15084_v19, 5  ;;  %15299 = vst [vmem:[#allocation50_spill] sm:$0xff] %v11478_v56  ;;  %v11491_v19 = vld [vmem:[%s10843_s12 + $0xb0] sm:$0x3] }
  0x64   : > { %v685_v17 = vrot.slane %v15300_v1, 4  ;;  %v688_v30 = vrot.slane %v15087_v13, 5  ;;  %v694_v37 = vrot.slane %v15301_v25, 5  ;;  %v15092_v15 = vshrl.u32 %v11447_v41, 16  ;;  %15302 = vst [vmem:[#allocation51_spill] sm:$0xff] %v11491_v19 }
  0x65   : > { %15298 = vst [vmem:[#allocation49_spill] sm:$0xff] %v11473_v11  ;;  %v671_v24 = vsel %vm11112_vm7, %v666_v35, %v670_v49  ;;  %v676_v9 = vrot.slane %v675_v46, 4  ;;  %v15097_v6 = vshll.u32 %v11464_v8, 16  ;;  %v15098_v5 = vshrl.u32 %v11469_v18, 16  ;;  %v11499_v10 = vld [vmem:[%s10843_s12 + $0xb4] sm:$0xf] }
  0x66   : > { %v689_v1 = vor.u32 %v688_v30, %v685_v17  ;;  %v698_v13 = vrot.slane %v15092_v15, 4  ;;  %15303 = vst [vmem:[#allocation52_spill] sm:$0xff] %v11499_v10  ;;  %v15101_v30 = vshrl.u32 %v11478_v56, 16  ;;  %v15305_v25 = vshll.u32 %v11469_v18, 16  ;;  %v11567_v18 = vld [vmem:[%s10843_s12 + $0xcc] sm:$0xf] }
  0x67   : > { %v681_v49 = vsel %vm11112_vm7, %v676_v9, %v680_v14  ;;  %v704_v46 = vrot.slane %v15097_v6, 5  ;;  %v709_v35 = vrot.slane %v15098_v5, 4  ;;  %v15306_v14 = vshll.u32 %v11478_v56, 16 }
  0x68   : > { %v11508_v17 = vcombine.low %v671_v24, %v681_v49  ;;  %v690_v15 = vrot.slane %v689_v1, 4  ;;  %v699_v16 = vor.u32 %v698_v13, %v694_v37  ;;  %v712_v41 = vrot.slane %v15305_v25, 5  ;;  %v11526_v25 = vld [vmem:[%s10843_s12 + $0xbc] sm:$0x3] }
  0x69   : > { %v718_v9 = vrot.slane %v15306_v14, 5  ;;  %v722_v6 = vrot.slane %v15101_v30, 4  ;;  %v15107_v5 = vshll.u32 %v11491_v19, 16  ;;  %v15106_v8 = vshrl.u32 %v11499_v10, 16  ;;  %9145 = vmatmul.mubr.msk.bf16.gmra.mrb[16].mxu0 %vm1041_vm4, %v11412_v4  ;;  %15307 = vst [vmem:[#allocation54_spill] sm:$0xff] %v11526_v25 }
  0x6a   : > { %15304 = vst [vmem:[#allocation53_spill] sm:$0xff] %v11508_v17  ;;  %v695_v13 = vsel %vm11112_vm7, %v690_v15, %v694_v37  ;;  %v700_v24 = vrot.slane %v699_v16, 4  ;;  %v713_v1 = vor.u32 %v712_v41, %v709_v35  ;;  %v15112_v49 = vshll.u32 %v11499_v10, 16  ;;  %9148 = vmatprep.mubr.msk.bf16.mxu0 %vm1041_vm4, %v11449_v27  ;;  %v11537_v16 = vld [vmem:[%s10843_s12 + $0xc0] sm:$0xf] }
  0x6b   : > { %v723_v14 = vor.u32 %v722_v6, %v718_v9  ;;  %v728_v30 = vrot.slane %v15107_v5, 5  ;;  %v733_v4 = vrot.slane %v15106_v8, 4  ;;  %v15115_v56 = vshll.u32 %v11513_v2, 16  ;;  %15308 = vst [vmem:[#allocation55_spill] sm:$0xff] %v11537_v16  ;;  %v11545_v35 = vld [vmem:[%s10843_s12 + $0xc4] sm:$0xf] }
  0x6c   : > { %v705_v37 = vsel %vm11112_vm7, %v700_v24, %v704_v46  ;;  %v714_v41 = vrot.slane %v713_v1, 4  ;;  %v736_v15 = vrot.slane %v15112_v49, 5  ;;  %v15118_v6 = vshrl.u32 %v11513_v2, 16  ;;  %15309 = vst [vmem:[#allocation56_spill] sm:$0xff] %v11545_v35  ;;  %v11557_v49 = vld [vmem:[%s10843_s12 + $0xc8] sm:$0x3] }
  0x6d   : > { %v11547_v8 = vcombine.low %v695_v13, %v705_v37  ;;  %v724_v5 = vrot.slane %v723_v14, 4  ;;  %v742_v27 = vrot.slane %v15115_v56, 5  ;;  %v15119_v19 = vshll.u32 %v11526_v25, 16  ;;  %15310 = vst [vmem:[#allocation57_spill] sm:$0xff] %v11557_v49 }
  0x6e   : > { %v719_v46 = vsel %vm11112_vm7, %v714_v41, %v718_v9  ;;  %v737_v24 = vor.u32 %v736_v15, %v733_v4  ;;  %v746_v1 = vrot.slane %v15118_v6, 4  ;;  %v15124_v10 = vshrl.u32 %v11537_v16, 16  ;;  %v11574_v6 = vld [vmem:[%s10843_s12 + $0xd0] sm:$0xf] }
  0x6f   : > { %v729_v13 = vsel %vm11112_vm7, %v724_v5, %v728_v30  ;;  %v752_v14 = vrot.slane %v15119_v19, 5  ;;  %v15122_v37 = vshll.u32 %v11537_v16, 16  ;;  %v15123_v56 = vshll.u32 %v11545_v35, 16  ;;  %v11595_v16 = vld [vmem:[%s10843_s12 + $0xd4] sm:$0x3] }
  0x70   : > { %v11569_v4 = vcombine.low %v719_v46, %v729_v13  ;;  %v738_v9 = vrot.slane %v737_v24, 4  ;;  %v747_v41 = vor.u32 %v746_v1, %v742_v27  ;;  %v757_v15 = vrot.slane %v15124_v10, 4 }
  0x71   : > { %v760_v5 = vrot.slane %v15122_v37, 5  ;;  %v766_v30 = vrot.slane %v15123_v56, 5  ;;  %v15129_v19 = vshrl.u32 %v11545_v35, 16  ;;  %v15132_v25 = vshll.u32 %v11557_v49, 16  ;;  %9149 = vmatmul.mubr.msk.bf16.gmra.mrb[20].mxu0 %vm1041_vm4, %v11473_v11 }
  0x72   : > { %v743_v46 = vsel %vm11112_vm7, %v738_v9, %v742_v27  ;;  %v748_v24 = vrot.slane %v747_v41, 4  ;;  %v15140_v1 = vshrl.u32 %v11567_v18, 16  ;;  %v15139_v13 = vshll.u32 %v11567_v18, 16  ;;  %9152 = vmatprep.mubr.msk.bf16.mxu0 %vm1041_vm4, %v11508_v17 }
  0x73   : > { %v761_v37 = vor.u32 %v760_v5, %v757_v15  ;;  %v770_v56 = vrot.slane %v15129_v19, 4  ;;  %v776_v10 = vrot.slane %v15132_v25, 5  ;;  %v15137_v11 = vshll.u32 %v11574_v6, 16 }
  0x74   : > { %v753_v27 = vsel %vm11112_vm7, %v748_v24, %v752_v14  ;;  %v781_v9 = vrot.slane %v15140_v1, 4  ;;  %v784_v41 = vrot.slane %v15139_v13, 5  ;;  %v15138_v15 = vshrl.u32 %v11574_v6, 16 }
  0x75   : > { %v11605_v5 = vcombine.low %v743_v46, %v753_v27  ;;  %v762_v19 = vrot.slane %v761_v37, 4  ;;  %v771_v17 = vor.u32 %v770_v56, %v766_v30  ;;  %v790_v25 = vrot.slane %v15137_v11, 5 }
  0x76   : > { %v785_v49 = vor.u32 %v784_v41, %v781_v9  ;;  %v794_v35 = vrot.slane %v15138_v15, 4  ;;  %v15141_v14 = vshll.u32 %v11595_v16, 16  ;;  %v1570_v46 = vor.u32 %v10900_v39, %v10888_v29 }
  0x77   : > { %v767_v56 = vsel %vm11112_vm7, %v762_v19, %v766_v30  ;;  %v772_v37 = vrot.slane %v771_v17, 4  ;;  %v1574_v27 = vor.u32 %v11027_v62, %v11008_v45  ;;  %v1581_v9 = vor.u32 %v11054_v60, %v11122_v21 }
  0x78   : > { %v786_v41 = vrot.slane %v785_v49, 4  ;;  %v795_v11 = vor.u32 %v794_v35, %v790_v25  ;;  %v800_v15 = vrot.slane %v15141_v14, 5  ;;  %v1571_v13 = vrot.slane %v1570_v46, 4 }
  0x79   : > { %v777_v1 = vsel %vm11112_vm7, %v772_v37, %v776_v10  ;;  %v1576_v29 = vrot.slane %v1574_v27, 4  ;;  %v1590_v39 = vsel %vm11614_vm10, %v11146_v20, %v10930_v55  ;;  %v1591_v45 = vrot.slane %v10930_v55, 4  ;;  %9153 = vmatmul.mubr.msk.bf16.gmra.mrb[24].mxu0 %vm1041_vm4, %v11547_v8  ;;  %v15313_v55 = vld [vmem:[#allocation3_spill] sm:$0xff] }
  0x7a   : > { %v11637_v21 = vcombine.low %v767_v56, %v777_v1  ;;  %v791_v62 = vsel %vm11112_vm7, %v786_v41, %v790_v25  ;;  %v796_v60 = vrot.slane %v795_v11, 4  ;;  %v1575_v10 = vsel %vm11614_vm10, %v1571_v13, %v1574_v27  ;;  %9156 = vmatprep.mubr.msk.bf16.mxu0 %vm1041_vm4, %v11569_v4 }
  0x7b   : > { %v1582_v20 = vsel %vm11614_vm10, %v1576_v29, %v1581_v9  ;;  %v15314_v19 = vor.u32 %v10920_v51, %v15313_v55  ;;  %v11654_v49 = vsel %vm1096_vm0, %v11289_v61, 0  ;;  %v15315_v11 = vshrl.u32 %v10891_v33, 16 }
  0x7c   : > { %v801_v35 = vsel %vm11112_vm7, %v796_v60, %v800_v15  ;;  %v8329_v30 = vcombine.low %v1575_v10, %v1582_v20  ;;  %v15316_v13 = vshll.u32 %v10891_v33, 16  ;;  %v15317_v56 = vshrl.u32 %v10898_v38, 16 }
  0x7d   : > { %v1597_v17 = vsel %vm11614_vm10, %v1591_v45, %v15314_v19  ;;  %v1598_v25 = vrot.slane %v15315_v11, 5  ;;  %v11664_v51 = vcombine.low %v791_v62, %v801_v35  ;;  %v15318_v61 = vshll.u32 %v10898_v38, 16 }
  0x7e   : > { %v11660_v1 = vcombine.low %v1590_v39, %v1597_v17  ;;  %v1599_v46 = vrot.slane %v15316_v13, 6  ;;  %v1602_v37 = vrot.slane %v15317_v56, 5  ;;  %v1607_v9 = vshrl.u32 %v10906_v43, 16 }
  0x7f   : > { %v1603_v27 = vrot.slane %v15318_v61, 6  ;;  %v15319_v29 = vshll.u32 %v10906_v43, 16  ;;  %v15320_v39 = vshrl.u32 %v10912_v48, 16  ;;  %v15321_v33 = vshll.u32 %v10912_v48, 16 }
  0x80   : > { %v1600_v41 = vor.u32 %v1599_v46, %v1598_v25  ;;  %v1609_v10 = vrot.slane %v1607_v9, 5  ;;  %v15322_v20 = vshrl.u32 %v10923_v52, 16  ;;  %v15323_v38 = vshll.u32 %v10923_v52, 16 }
  0x81   : > { %v1610_v15 = vrot.slane %v15319_v29, 6  ;;  %v1613_v45 = vrot.slane %v15320_v39, 5  ;;  %v1614_v60 = vrot.slane %v15321_v33, 6  ;;  %v1604_v62 = vor.u32 %v1603_v27, %v1602_v37  ;;  %9157 = vmatmul.mubr.msk.bf16.gmra.mrb[28].mxu0 %vm1041_vm4, %v11605_v5 }
  0x82   : > { %v1617_v55 = vrot.slane %v15322_v20, 5  ;;  %v1618_v19 = vrot.slane %v15323_v38, 6  ;;  %v1601_v17 = vrot.slane %v1600_v41, 4  ;;  %v1622_v25 = vshrl.u32 %v10926_v53, 16  ;;  %9160 = vmatprep.mubr.msk.bf16.mxu0 %vm1041_vm4, %v11637_v21 }
  0x83   : > { %v1615_v11 = vor.u32 %v1614_v60, %v1613_v45  ;;  %v15324_v43 = vshll.u32 %v10926_v53, 16  ;;  %v1606_v13 = vrot.slane %v1604_v62, 4  ;;  %v1611_v46 = vor.u32 %v1610_v15, %v1609_v10 }
  0x84   : > { %v1619_v56 = vor.u32 %v1618_v19, %v1617_v55  ;;  %v15325_v48 = vshrl.u32 %v10936_v58, 16  ;;  %v1605_v52 = vsel %vm11614_vm10, %v1601_v17, %v1604_v62  ;;  %v1624_v27 = vrot.slane %v1622_v25, 5 }
  0x85   : > { %v1625_v35 = vrot.slane %v15324_v43, 6  ;;  %v1616_v61 = vrot.slane %v1615_v11, 4  ;;  %v15326_v9 = vshll.u32 %v10936_v58, 16  ;;  %v1612_v53 = vsel %vm11614_vm10, %v1606_v13, %v1611_v46 }
  0x86   : > { %v1628_v37 = vrot.slane %v15325_v48, 5  ;;  %v1621_v29 = vrot.slane %v1619_v56, 4  ;;  %v15327_v15 = vshrl.u32 %v10939_v59, 16  ;;  %v15328_v45 = vshll.u32 %v10939_v59, 16 }
  0x87   : > { %v1629_v41 = vrot.slane %v15326_v9, 6  ;;  %v11700_v60 = vcombine.low %v1605_v52, %v1612_v53  ;;  %v1620_v62 = vsel %vm11614_vm10, %v1616_v61, %v1619_v56  ;;  %v1626_v58 = vor.u32 %v1625_v35, %v1624_v27 }
  0x88   : > { %v1632_v39 = vrot.slane %v15327_v15, 5  ;;  %v1633_v33 = vrot.slane %v15328_v45, 6  ;;  %v1637_v55 = vshrl.u32 %v10948_v0, 16  ;;  %v15329_v38 = vshll.u32 %v10948_v0, 16 }
  0x89   : > { %v1630_v10 = vor.u32 %v1629_v41, %v1628_v37  ;;  %v15330_v17 = vshrl.u32 %v10971_v23, 16  ;;  %v1627_v59 = vsel %vm11614_vm10, %v1621_v29, %v1626_v58  ;;  %v15331_v43 = vshll.u32 %v10971_v23, 16  ;;  %9161 = vmatmul.mubr.msk.bf16.gmra.mrb[32].mxu0 %vm1041_vm4, %v11664_v51 }
  0x8a   : > { %v1634_v20 = vor.u32 %v1633_v33, %v1632_v39  ;;  %v1640_v19 = vrot.slane %v15329_v38, 6  ;;  %v15332_v46 = vshrl.u32 %v10982_v32, 16  ;;  %v11715_v56 = vcombine.low %v1620_v62, %v1627_v59  ;;  %9166 = vmatprep.mubr.msk.bf16.mxu0 %vm1041_vm4, %v8329_v30 }
  0x8b   : > { %v1643_v11 = vrot.slane %v15330_v17, 5  ;;  %v1631_v25 = vrot.slane %v1630_v10, 4  ;;  %v1644_v13 = vrot.slane %v15331_v43, 6  ;;  %v1639_v37 = vrot.slane %v1637_v55, 5 }
  0x8c   : > { %v1647_v35 = vrot.slane %v15332_v46, 5  ;;  %v1636_v48 = vrot.slane %v1634_v20, 4  ;;  %v15333_v0 = vshll.u32 %v10982_v32, 16  ;;  %v1652_v9 = vshrl.u32 %v10985_v34, 16 }
  0x8d   : > { %v1635_v61 = vsel %vm11614_vm10, %v1631_v25, %v1634_v20  ;;  %v1645_v27 = vor.u32 %v1644_v13, %v1643_v11  ;;  %v15334_v41 = vshll.u32 %v10985_v34, 16  ;;  %v1641_v53 = vor.u32 %v1640_v19, %v1639_v37 }
  0x8e   : > { %v1648_v52 = vrot.slane %v15333_v0, 6  ;;  %v15335_v15 = vshrl.u32 %v10998_v36, 16  ;;  %v15336_v45 = vshll.u32 %v10998_v36, 16  ;;  %v1654_v62 = vrot.slane %v1652_v9, 5 }
  0x8f   : > { %v1655_v23 = vrot.slane %v15334_v41, 6  ;;  %v1646_v32 = vrot.slane %v1645_v27, 4  ;;  %v15337_v58 = vshrl.u32 %v11001_v42, 16  ;;  %v15338_v20 = vshll.u32 %v11001_v42, 16 }
  0x90   : > { %v1649_v29 = vor.u32 %v1648_v52, %v1647_v35  ;;  %v1658_v39 = vrot.slane %v15335_v15, 5  ;;  %v1659_v33 = vrot.slane %v15336_v45, 6  ;;  %v1642_v55 = vsel %vm11614_vm10, %v1636_v48, %v1641_v53 }
  0x91   : > { %v1662_v10 = vrot.slane %v15337_v58, 5  ;;  %v1663_v34 = vrot.slane %v15338_v20, 6  ;;  %v1667_v36 = vshrl.u32 %v11004_v44, 16  ;;  %v11738_v17 = vcombine.low %v1635_v61, %v1642_v55  ;;  %9167 = vmatmul.mubr.msk.bf16.vlgmr.msra.gmra.mrb[0].mxu0 %vm1041_vm4, %v11660_v1 }
  0x92   : > { %v1651_v38 = vrot.slane %v1649_v29, 4  ;;  %v1660_v19 = vor.u32 %v1659_v33, %v1658_v39  ;;  %v1650_v11 = vsel %vm11614_vm10, %v1646_v32, %v1649_v29  ;;  %v1656_v59 = vor.u32 %v1655_v23, %v1654_v62  ;;  %9203 = vmatpush3.bf16.msra.mxu0 %v11654_v49  ;;  %9170 = vmatprep.mubr.msk.bf16.mxu0 %vm1041_vm4, %v11700_v60 }
  0x93   : > { %v1664_v25 = vor.u32 %v1663_v34, %v1662_v10  ;;  %v1669_v13 = vrot.slane %v1667_v36, 5  ;;  %v15339_v42 = vshll.u32 %v11004_v44, 16  ;;  %v15340_v30 = vshrl.u32 %v11020_v54, 16  ;;  %v11772_v34 = vld [vmem:[%s14955_s1 + $0x10] sm:$0xf] }
  0x94   : > { %v1661_v43 = vrot.slane %v1660_v19, 4  ;;  %v1657_v48 = vsel %vm11614_vm10, %v1651_v38, %v1656_v59  ;;  %v15341_v0 = vshll.u32 %v11020_v54, 16  ;;  %v15342_v61 = vshrl.u32 %v11023_v57, 16  ;;  %10287 = vmatprep.subr.msk.bf16.mxu0 %vm1096_vm0, %v11772_v34 }
  0x95   : > { %v1670_v46 = vrot.slane %v15339_v42, 6  ;;  %v1673_v35 = vrot.slane %v15340_v30, 5  ;;  %v1666_v37 = vrot.slane %v1664_v25, 4  ;;  %v11752_v9 = vcombine.low %v1650_v11, %v1657_v48 }
  0x96   : > { %v1674_v52 = vrot.slane %v15341_v0, 6  ;;  %v1677_v27 = vrot.slane %v15342_v61, 5  ;;  %v1665_v41 = vsel %vm11614_vm10, %v1661_v43, %v1664_v25  ;;  %v15344_v23 = vshll.u32 %v11023_v57, 16 }
  0x97   : > { %15343 = vst [vmem:[#allocation3_spill] sm:$0xff] %v11752_v9  ;;  %v1671_v44 = vor.u32 %v1670_v46, %v1669_v13  ;;  %v1682_v15 = vshrl.u32 %v11043_v12, 16  ;;  %v15345_v39 = vshll.u32 %v11043_v12, 16  ;;  %v15346_v54 = vshrl.u32 %v11049_v50, 16 }
  0x98   : > { %v1678_v53 = vrot.slane %v15344_v23, 6  ;;  %v1675_v29 = vor.u32 %v1674_v52, %v1673_v35  ;;  %v15347_v58 = vshll.u32 %v11049_v50, 16  ;;  %v15348_v20 = vshrl.u32 %v11063_v40, 16 }
  0x99   : > { %v1685_v45 = vrot.slane %v15345_v39, 6  ;;  %v1688_v33 = vrot.slane %v15346_v54, 5  ;;  %v1672_v32 = vsel %vm11614_vm10, %v1666_v37, %v1671_v44  ;;  %v1684_v38 = vrot.slane %v1682_v15, 5  ;;  %9171 = vmatmul.mubr.msk.bf16.gmra.mrb[4].mxu0 %vm1041_vm4, %v11715_v56 }
  0x9a   : > { %v1679_v62 = vor.u32 %v1678_v53, %v1677_v27  ;;  %v1689_v10 = vrot.slane %v15347_v58, 6  ;;  %v1692_v57 = vrot.slane %v15348_v20, 5  ;;  %v11776_v12 = vcombine.low %v1665_v41, %v1672_v32  ;;  %9174 = vmatprep.mubr.msk.bf16.mxu0 %vm1041_vm4, %v11738_v17 }
  0x9b   : > { %v1676_v55 = vrot.slane %v1675_v29, 4  ;;  %v15350_v19 = vshll.u32 %v11063_v40, 16  ;;  %v1697_v59 = vshrl.u32 %v11077_v28, 16  ;;  %v15351_v25 = vshll.u32 %v11077_v28, 16 }
  0x9c   : > { %15349 = vst [vmem:[#allocation58_spill] sm:$0xff] %v11776_v12  ;;  %v1681_v50 = vrot.slane %v1679_v62, 4  ;;  %v1690_v11 = vor.u32 %v1689_v10, %v1688_v33  ;;  %v1686_v42 = vor.u32 %v1685_v45, %v1684_v38  ;;  %v15352_v40 = vshrl.u32 %v11080_v47, 16 }
  0x9d   : > { %v1693_v36 = vrot.slane %v15350_v19, 6  ;;  %v1700_v43 = vrot.slane %v15351_v25, 6  ;;  %v1680_v13 = vsel %vm11614_vm10, %v1676_v55, %v1679_v62  ;;  %v1699_v35 = vrot.slane %v1697_v59, 5 }
  0x9e   : > { %v1703_v30 = vrot.slane %v15352_v40, 5  ;;  %v1691_v49 = vrot.slane %v1690_v11, 4  ;;  %v15353_v48 = vshll.u32 %v11080_v47, 16  ;;  %v15354_v0 = vshrl.u32 %v11090_v22, 16 }
  0x9f   : > { %v1694_v46 = vor.u32 %v1693_v36, %v1692_v57  ;;  %v1687_v52 = vsel %vm11614_vm10, %v1681_v50, %v1686_v42  ;;  %v15355_v27 = vshll.u32 %v11090_v22, 16  ;;  %v1712_v44 = vshrl.u32 %v11093_v7, 16 }
  0xa0   : > { %v1704_v37 = vrot.slane %v15353_v48, 6  ;;  %v1707_v28 = vrot.slane %v15354_v0, 5  ;;  %v11801_v23 = vcombine.low %v1680_v13, %v1687_v52  ;;  %v1701_v29 = vor.u32 %v1700_v43, %v1699_v35 }
  0xa1   : > { %v1696_v61 = vrot.slane %v1694_v46, 4  ;;  %v1708_v41 = vrot.slane %v15355_v27, 6  ;;  %v1695_v53 = vsel %vm11614_vm10, %v1691_v49, %v1694_v46  ;;  %v1714_v39 = vrot.slane %v1712_v44, 5  ;;  %v15364_v46 = vld [vmem:[#allocation36_spill] sm:$0xff]  ;;  %9175 = vmatmul.mubr.msk.bf16.gmra.mrb[8].mxu0 %vm1041_vm4, %v11752_v9 }
  0xa2   : > { %15356 = vst [vmem:[#allocation59_spill] sm:$0xff] %v11801_v23  ;;  %v1705_v47 = vor.u32 %v1704_v37, %v1703_v30  ;;  %v15357_v45 = vshll.u32 %v11093_v7, 16  ;;  %v15358_v33 = vshrl.u32 %v11346_v63, 16  ;;  %v15359_v58 = vshll.u32 %v11346_v63, 16  ;;  %9178 = vmatprep.mubr.msk.bf16.mxu0 %vm1041_vm4, %v11776_v12 }
  0xa3   : > { %v1709_v15 = vor.u32 %v1708_v41, %v1707_v28  ;;  %v1702_v22 = vsel %vm11614_vm10, %v1696_v61, %v1701_v29  ;;  %v15360_v20 = vshrl.u32 %v11356_v26, 16  ;;  %v15362_v19 = vshll.u32 %v11356_v26, 16  ;;  %v15368_v28 = vld [vmem:[#allocation37_spill] sm:$0xff]  ;;  %v15371_v29 = vld [vmem:[#allocation39_spill] sm:$0xff] }
  0xa4   : > { %v1715_v54 = vrot.slane %v15357_v45, 6  ;;  %v1718_v32 = vrot.slane %v15358_v33, 5  ;;  %v1706_v62 = vrot.slane %v1705_v47, 4  ;;  %v1719_v10 = vrot.slane %v15359_v58, 6  ;;  %v15373_v33 = vld [vmem:[#allocation40_spill] sm:$0xff] }
  0xa5   : > { %v1722_v57 = vrot.slane %v15360_v20, 5  ;;  %v11817_v55 = vcombine.low %v1695_v53, %v1702_v22  ;;  %v1711_v7 = vrot.slane %v1709_v15, 4  ;;  %v1723_v36 = vrot.slane %v15362_v19, 6 }
  0xa6   : > { %v1716_v38 = vor.u32 %v1715_v54, %v1714_v39  ;;  %v1710_v50 = vsel %vm11614_vm10, %v1706_v62, %v1709_v15  ;;  %v1720_v11 = vor.u32 %v1719_v10, %v1718_v32  ;;  %v1727_v59 = vshrl.u32 %v11365_v31, 16 }
  0xa7   : > { %15361 = vst [vmem:[#allocation60_spill] sm:$0xff] %v11817_v55  ;;  %v15363_v25 = vshll.u32 %v11365_v31, 16  ;;  %v1724_v42 = vor.u32 %v1723_v36, %v1722_v57  ;;  %v15365_v40 = vshrl.u32 %v15364_v46, 16  ;;  %v15366_v49 = vshll.u32 %v15364_v46, 16 }
  0xa8   : > { %v1717_v13 = vsel %vm11614_vm10, %v1711_v7, %v1716_v38  ;;  %v1721_v37 = vrot.slane %v1720_v11, 4  ;;  %v1729_v0 = vrot.slane %v1727_v59, 5  ;;  %v15369_v52 = vshrl.u32 %v15368_v28, 16  ;;  %v15376_v38 = vld [vmem:[#allocation42_spill] sm:$0xff]  ;;  %v15379_v59 = vld [vmem:[#allocation43_spill] sm:$0xff] }
  0xa9   : > { %v1730_v43 = vrot.slane %v15363_v25, 6  ;;  %v1733_v30 = vrot.slane %v15365_v40, 5  ;;  %v1734_v35 = vrot.slane %v15366_v49, 6  ;;  %v11834_v48 = vcombine.low %v1710_v50, %v1717_v13  ;;  %9179 = vmatmul.mubr.msk.bf16.gmra.mrb[12].mxu0 %vm1041_vm4, %v11801_v23  ;;  %v15413_v23 = vld [vmem:[#allocation57_spill] sm:$0xff] }
  0xaa   : > { %v1737_v61 = vrot.slane %v15369_v52, 5  ;;  %v1726_v27 = vrot.slane %v1724_v42, 4  ;;  %v15370_v44 = vshll.u32 %v15368_v28, 16  ;;  %v1742_v47 = vshrl.u32 %v15371_v29, 16  ;;  %9182 = vmatprep.mubr.msk.bf16.mxu0 %vm1041_vm4, %v11817_v55  ;;  %v15410_v55 = vld [vmem:[#allocation56_spill] sm:$0xff] }
  0xab   : > { %15367 = vst [vmem:[#allocation36_spill] sm:$0xff] %v11834_v48  ;;  %v1735_v41 = vor.u32 %v1734_v35, %v1733_v30  ;;  %v1725_v15 = vsel %vm11614_vm10, %v1721_v37, %v1724_v42  ;;  %v1731_v39 = vor.u32 %v1730_v43, %v1729_v0  ;;  %v15372_v45 = vshll.u32 %v15371_v29, 16 }
  0xac   : > { %v1738_v53 = vrot.slane %v15370_v44, 6  ;;  %v15374_v32 = vshrl.u32 %v15373_v33, 16  ;;  %v1744_v10 = vrot.slane %v1742_v47, 5  ;;  %v15375_v20 = vshll.u32 %v15373_v33, 16  ;;  %v15385_v47 = vld [vmem:[#allocation45_spill] sm:$0xff] }
  0xad   : > { %v1745_v54 = vrot.slane %v15372_v45, 6  ;;  %v1736_v62 = vrot.slane %v1735_v41, 4  ;;  %v1732_v7 = vsel %vm11614_vm10, %v1726_v27, %v1731_v39  ;;  %v15377_v19 = vshrl.u32 %v15376_v38, 16 }
  0xae   : > { %v1748_v22 = vrot.slane %v15374_v32, 5  ;;  %v1739_v58 = vor.u32 %v1738_v53, %v1737_v61  ;;  %v1749_v57 = vrot.slane %v15375_v20, 6  ;;  %v15378_v50 = vshll.u32 %v15376_v38, 16  ;;  %v15382_v61 = vld [vmem:[#allocation44_spill] sm:$0xff]  ;;  %v15389_v20 = vld [vmem:[#allocation47_spill] sm:$0xff] }
  0xaf   : > { %v1752_v36 = vrot.slane %v15377_v19, 5  ;;  %v1757_v25 = vshrl.u32 %v15379_v59, 16  ;;  %v11858_v43 = vcombine.low %v1725_v15, %v1732_v7  ;;  %v1746_v40 = vor.u32 %v1745_v54, %v1744_v10 }
  0xb0   : > { %v1753_v11 = vrot.slane %v15378_v50, 6  ;;  %v1740_v13 = vsel %vm11614_vm10, %v1736_v62, %v1739_v58  ;;  %v1741_v42 = vrot.slane %v1739_v58, 4  ;;  %v1750_v30 = vor.u32 %v1749_v57, %v1748_v22 }
  0xb1   : > { %15380 = vst [vmem:[#allocation37_spill] sm:$0xff] %v11858_v43  ;;  %v1759_v35 = vrot.slane %v1757_v25, 5  ;;  %v15381_v37 = vshll.u32 %v15379_v59, 16  ;;  %v15383_v27 = vshrl.u32 %v15382_v61, 16  ;;  %v15384_v44 = vshll.u32 %v15382_v61, 16  ;;  %9183 = vmatmul.mubr.msk.bf16.gmra.mrb[16].mxu0 %vm1041_vm4, %v11834_v48 }
  0xb2   : > { %v1754_v49 = vor.u32 %v1753_v11, %v1752_v36  ;;  %v1747_v52 = vsel %vm11614_vm10, %v1741_v42, %v1746_v40  ;;  %v15386_v15 = vshrl.u32 %v15385_v47, 16  ;;  %v1751_v54 = vrot.slane %v1750_v30, 4  ;;  %v15391_v11 = vld [vmem:[#allocation48_spill] sm:$0xff]  ;;  %9186 = vmatprep.mubr.msk.bf16.mxu0 %vm1041_vm4, %v11858_v43 }
  0xb3   : > { %v1760_v0 = vrot.slane %v15381_v37, 6  ;;  %v1763_v41 = vrot.slane %v15383_v27, 5  ;;  %v1764_v53 = vrot.slane %v15384_v44, 6  ;;  %v11874_v45 = vcombine.low %v1740_v13, %v1747_v52  ;;  %v15395_v27 = vld [vmem:[#allocation50_spill] sm:$0xff] }
  0xb4   : > { %v1767_v39 = vrot.slane %v15386_v15, 5  ;;  %v1756_v32 = vrot.slane %v1754_v49, 4  ;;  %v15388_v58 = vshll.u32 %v15385_v47, 16  ;;  %v1772_v57 = vshrl.u32 %v15389_v20, 16  ;;  %v15398_v15 = vld [vmem:[#allocation51_spill] sm:$0xff] }
  0xb5   : > { %15387 = vst [vmem:[#allocation39_spill] sm:$0xff] %v11874_v45  ;;  %v1761_v22 = vor.u32 %v1760_v0, %v1759_v35  ;;  %v1765_v62 = vor.u32 %v1764_v53, %v1763_v41  ;;  %v15390_v7 = vshll.u32 %v15389_v20, 16  ;;  %v1755_v36 = vsel %vm11614_vm10, %v1751_v54, %v1754_v49 }
  0xb6   : > { %v1768_v10 = vrot.slane %v15388_v58, 6  ;;  %v15392_v25 = vshrl.u32 %v15391_v11, 16  ;;  %v15393_v42 = vshll.u32 %v15391_v11, 16  ;;  %v1774_v0 = vrot.slane %v1772_v57, 5 }
  0xb7   : > { %v1775_v19 = vrot.slane %v15390_v7, 6  ;;  %v1762_v50 = vsel %vm11614_vm10, %v1756_v32, %v1761_v22  ;;  %v1766_v35 = vrot.slane %v1765_v62, 4  ;;  %v15396_v41 = vshrl.u32 %v15395_v27, 16 }
  0xb8   : > { %v1778_v13 = vrot.slane %v15392_v25, 5  ;;  %v1779_v40 = vrot.slane %v15393_v42, 6  ;;  %v11889_v30 = vcombine.low %v1755_v36, %v1762_v50  ;;  %v1769_v37 = vor.u32 %v1768_v10, %v1767_v39  ;;  %v15400_v36 = vld [vmem:[#allocation52_spill] sm:$0xff] }
  0xb9   : > { %v1782_v44 = vrot.slane %v15396_v41, 5  ;;  %v15397_v49 = vshll.u32 %v15395_v27, 16  ;;  %v1787_v54 = vshrl.u32 %v15398_v15, 16  ;;  %v1776_v58 = vor.u32 %v1775_v19, %v1774_v0  ;;  %9187 = vmatmul.mubr.msk.bf16.gmra.mrb[20].mxu0 %vm1041_vm4, %v11874_v45 }
  0xba   : > { %15394 = vst [vmem:[#allocation40_spill] sm:$0xff] %v11889_v30  ;;  %v1780_v52 = vor.u32 %v1779_v40, %v1778_v13  ;;  %v1770_v32 = vsel %vm11614_vm10, %v1766_v35, %v1769_v37  ;;  %v1771_v22 = vrot.slane %v1769_v37, 4  ;;  %v15399_v39 = vshll.u32 %v15398_v15, 16  ;;  %9190 = vmatprep.mubr.msk.bf16.mxu0 %vm1041_vm4, %v11889_v30 }
  0xbb   : > { %v1783_v53 = vrot.slane %v15397_v49, 6  ;;  %v1789_v7 = vrot.slane %v1787_v54, 5  ;;  %v15401_v50 = vshrl.u32 %v15400_v36, 16  ;;  %v15402_v42 = vshll.u32 %v15400_v36, 16 }
  0xbc   : > { %v1790_v62 = vrot.slane %v15399_v39, 6  ;;  %v1781_v10 = vrot.slane %v1780_v52, 4  ;;  %v1777_v13 = vsel %vm11614_vm10, %v1771_v22, %v1776_v58  ;;  %v15403_v19 = vshrl.u32 %v11513_v2, 16  ;;  %v15405_v39 = vld [vmem:[#allocation54_spill] sm:$0xff] }
  0xbd   : > { %v1784_v57 = vor.u32 %v1783_v53, %v1782_v44  ;;  %v1793_v25 = vrot.slane %v15401_v50, 5  ;;  %v1794_v40 = vrot.slane %v15402_v42, 6  ;;  %v15404_v37 = vshll.u32 %v11513_v2, 16 }
  0xbe   : > { %v1797_v35 = vrot.slane %v15403_v19, 5  ;;  %v11914_v41 = vcombine.low %v1770_v32, %v1777_v13  ;;  %v1791_v49 = vor.u32 %v1790_v62, %v1789_v7  ;;  %v1802_v22 = vshrl.u32 %v15405_v39, 16  ;;  %v15407_v19 = vld [vmem:[#allocation55_spill] sm:$0xff] }
  0xbf   : > { %v1798_v0 = vrot.slane %v15404_v37, 6  ;;  %v1785_v52 = vsel %vm11614_vm10, %v1781_v10, %v1784_v57  ;;  %v1786_v44 = vrot.slane %v1784_v57, 4  ;;  %v1795_v53 = vor.u32 %v1794_v40, %v1793_v25 }
  0xc0   : > { %v15406_v58 = vshll.u32 %v15405_v39, 16  ;;  %v15408_v14 = vshrl.u32 %v15407_v19, 16  ;;  %v15409_v32 = vshll.u32 %v15407_v19, 16  ;;  %v15411_v10 = vshrl.u32 %v15410_v55, 16 }
  0xc1   : > { %v1799_v54 = vor.u32 %v1798_v0, %v1797_v35  ;;  %v1792_v42 = vsel %vm11614_vm10, %v1786_v44, %v1791_v49  ;;  %v1796_v7 = vrot.slane %v1795_v53, 4  ;;  %v1804_v40 = vrot.slane %v1802_v22, 5  ;;  %9191 = vmatmul.mubr.msk.bf16.gmra.mrb[24].mxu0 %vm1041_vm4, %v11914_v41 }
  0xc2   : > { %v1805_v50 = vrot.slane %v15406_v58, 6  ;;  %v1808_v37 = vrot.slane %v15408_v14, 5  ;;  %v1809_v13 = vrot.slane %v15409_v32, 6  ;;  %v1812_v57 = vrot.slane %v15411_v10, 5 }
  0xc3   : > { %v11929_v62 = vcombine.low %v1785_v52, %v1792_v42  ;;  %v1801_v25 = vrot.slane %v1799_v54, 4  ;;  %v15412_v0 = vshll.u32 %v15410_v55, 16  ;;  %v1817_v44 = vshrl.u32 %v15413_v23, 16 }
  0xc4   : > { %v1810_v35 = vor.u32 %v1809_v13, %v1808_v37  ;;  %v15414_v49 = vshll.u32 %v15413_v23, 16  ;;  %v1800_v32 = vsel %vm11614_vm10, %v1796_v7, %v1799_v54  ;;  %v1806_v52 = vor.u32 %v1805_v50, %v1804_v40 }
  0xc5   : > { %v1813_v58 = vrot.slane %v15412_v0, 6  ;;  %v15415_v53 = vshrl.u32 %v11567_v18, 16  ;;  %v15416_v22 = vshll.u32 %v11567_v18, 16  ;;  %v1819_v0 = vrot.slane %v1817_v44, 5  ;;  %9194 = vmatprep.mubr.msk.bf16.mxu0 %vm1041_vm4, %v11929_v62 }
  0xc6   : > { %v1820_v14 = vrot.slane %v15414_v49, 6  ;;  %v1811_v13 = vrot.slane %v1810_v35, 4  ;;  %v15417_v49 = vshrl.u32 %v11574_v6, 16  ;;  %v1807_v48 = vsel %vm11614_vm10, %v1801_v25, %v1806_v52 }
  0xc7   : > { %v1823_v42 = vrot.slane %v15415_v53, 5  ;;  %v1824_v37 = vrot.slane %v15416_v22, 6  ;;  %v1814_v10 = vor.u32 %v1813_v58, %v1812_v57  ;;  %v15418_v50 = vshll.u32 %v11574_v6, 16 }
  0xc8   : > { %v1827_v12 = vrot.slane %v15417_v49, 5  ;;  %v1832_v40 = vshrl.u32 %v11595_v16, 16  ;;  %v11953_v53 = vcombine.low %v1800_v32, %v1807_v48  ;;  %v1821_v57 = vor.u32 %v1820_v14, %v1819_v0  ;;  %v15466_v0 = vld [vmem:[#allocation59_spill] sm:$0xff] }
  0xc9   : > { %v1825_v54 = vor.u32 %v1824_v37, %v1823_v42  ;;  %v1828_v7 = vrot.slane %v15418_v50, 6  ;;  %v1815_v22 = vsel %vm11614_vm10, %v1811_v13, %v1814_v10  ;;  %v1816_v35 = vrot.slane %v1814_v10, 4 }
  0xca   : > { %v1834_v43 = vrot.slane %v1832_v40, 5  ;;  %v15419_v49 = vshll.u32 %v11595_v16, 16  ;;  %v8249_v37 = vrot.slane %v11346_v63, 9  ;;  %v932_v13 = vrot.slane %v11356_v26, 5  ;;  %9195 = vmatmul.mubr.msk.bf16.gmra.mrb[28].mxu0 %vm1041_vm4, %v11953_v53 }
  0xcb   : > { %v1826_v58 = vrot.slane %v1825_v54, 4  ;;  %v1829_v44 = vor.u32 %v1828_v7, %v1827_v12  ;;  %v1822_v25 = vsel %vm11614_vm10, %v1816_v35, %v1821_v57  ;;  %v935_v10 = vrot.slane %v11365_v31, 5 }
  0xcc   : > { %v1835_v9 = vrot.slane %v15419_v49, 6  ;;  %v11961_v52 = vcombine.low %v1815_v22, %v1822_v25  ;;  %v8250_v26 = vrot.slane %v15364_v46, 9  ;;  %v939_v63 = vrot.slane %v15368_v28, 5 }
  0xcd   : > { %v1830_v48 = vsel %vm11614_vm10, %v1826_v58, %v1829_v44  ;;  %v1831_v32 = vrot.slane %v1829_v44, 4  ;;  %v942_v31 = vrot.slane %v15371_v29, 5  ;;  %v8251_v7 = vrot.slane %v15373_v33, 9 }
  0xce   : > { %v1836_v42 = vor.u32 %v1835_v9, %v1834_v43  ;;  %v11978_v9 = vsel %vm10852_vm3, %v8249_v37, %v932_v13  ;;  %v934_v43 = vrot.slane %v932_v13, 4  ;;  %v946_v40 = vrot.slane %v15376_v38, 5  ;;  %9198 = vmatprep.mubr.msk.bf16.mxu0 %vm1041_vm4, %v11961_v52 }
  0xcf   : > { %15421 = vst [vmem:[#allocation42_spill] sm:$0xff] %v11978_v9  ;;  %v949_v22 = vrot.slane %v15379_v59, 5  ;;  %v12002_v35 = vsel %vm10852_vm3, %v8250_v26, %v939_v63  ;;  %v941_v46 = vrot.slane %v939_v63, 4  ;;  %v8252_v58 = vrot.slane %v15382_v61, 9 }
  0xd0   : > { %v1837_v12 = vsel %vm11614_vm10, %v1831_v32, %v1836_v42  ;;  %v11982_v54 = vsel %vm10852_vm3, %v934_v43, %v935_v10  ;;  %15423 = vst [vmem:[#allocation44_spill] sm:$0xff] %v12002_v35  ;;  %v948_v57 = vrot.slane %v946_v40, 4  ;;  %v12006_v28 = vsel %vm10852_vm3, %v8251_v7, %v946_v40  ;;  %v15431_v10 = vld [vmem:[#allocation29_spill] sm:$0xff] }
  0xd1   : > { %v11971_v14 = vcombine.low %v1830_v48, %v1837_v12  ;;  %15422 = vst [vmem:[#allocation43_spill] sm:$0xff] %v11982_v54  ;;  %v11986_v50 = vcombine.low %v11978_v9, %v11982_v54  ;;  %15424 = vst [vmem:[#allocation45_spill] sm:$0xff] %v12006_v28  ;;  %v12010_v29 = vsel %vm10852_vm3, %v941_v46, %v942_v31  ;;  %v953_v44 = vrot.slane %v15385_v47, 5  ;;  %v2658_v46 = vld [vmem:[%s14955_s1 + $0x14] sm:$0xf] }
  0xd2   : > { %15425 = vst [vmem:[#allocation47_spill] sm:$0xff] %v12010_v29  ;;  %v12014_v33 = vsel %vm10852_vm3, %v948_v57, %v949_v22  ;;  %v12018_v38 = vcombine.low %v12002_v35, %v12010_v29  ;;  %v956_v49 = vrot.slane %v15389_v20, 5  ;;  %v8253_v25 = vrot.slane %v15391_v11, 9  ;;  %v12099_v22 = vld [vmem:[%s10843_s12 + $0xd8] sm:$0xf]  ;;  %v15436_v57 = vld [vmem:[#allocation30_spill] sm:$0xff] }
  0xd3   : > { %9110 = vmatprep.mubr.msk.bf16.mxu1 %vm1041_vm4, %v11986_v50  ;;  %15426 = vst [vmem:[#allocation48_spill] sm:$0xff] %v12014_v33  ;;  %v12022_v59 = vcombine.low %v12006_v28, %v12014_v33  ;;  %v960_v48 = vrot.slane %v15395_v27, 5  ;;  %v963_v32 = vrot.slane %v15398_v15, 5  ;;  %v955_v61 = vrot.slane %v953_v44, 4  ;;  %9199 = vmatmul.mubr.msk.bf16.gmra.mrb[32].mxu0 %vm1041_vm4, %v11971_v14  ;;  %v15461_v33 = vld [vmem:[#allocation60_spill] sm:$0xff]  ;;  %v15463_v28 = vld [vmem:[#allocation37_spill] sm:$0xff] }
  0xd4   : > { %9111 = vmatmul.mubr.msk.bf16.vlgmr.msra.gmra.mrb[0].mxu1 %vm1041_vm4, %v12018_v38  ;;  %v12040_v47 = vsel %vm10852_vm3, %v8252_v58, %v953_v44  ;;  %v8254_v37 = vrot.slane %v15400_v36, 9  ;;  %v967_v13 = vrot.slane %v11513_v2, 5  ;;  %9204 = vmatprep.mubr.msk.bf16.mxu0 %vm1041_vm4, %v15431_v10  ;;  %v970_v43 = vrot.slane %v15405_v39, 5  ;;  %v12107_v58 = vld [vmem:[%s10843_s12 + $0xdc] sm:$0xf] }
  0xd5   : > { %9114 = vmatprep.mubr.msk.bf16.mxu1 %vm1041_vm4, %v12022_v59  ;;  %15427 = vst [vmem:[#allocation50_spill] sm:$0xff] %v12040_v47  ;;  %v962_v42 = vrot.slane %v960_v48, 4  ;;  %v12044_v12 = vsel %vm10852_vm3, %v955_v61, %v956_v49  ;;  %v12048_v20 = vsel %vm10852_vm3, %v8253_v25, %v960_v48  ;;  %v8255_v26 = vrot.slane %v15407_v19, 9  ;;  %v12110_v44 = vld [vmem:[%s10843_s12 + $0xe0] sm:$0x3]  ;;  %v15437_v48 = vld [vmem:[#allocation31_spill] sm:$0xff] }
  0xd6   : > { %15428 = vst [vmem:[#allocation51_spill] sm:$0xff] %v12044_v12  ;;  %15429 = vst [vmem:[#allocation52_spill] sm:$0xff] %v12048_v20  ;;  %v12056_v27 = vcombine.low %v12040_v47, %v12044_v12  ;;  %v974_v63 = vrot.slane %v15410_v55, 5  ;;  %v977_v31 = vrot.slane %v15413_v23, 5  ;;  %v969_v2 = vrot.slane %v967_v13, 4 }
  0xd7   : > { %v12052_v11 = vsel %vm10852_vm3, %v962_v42, %v963_v32  ;;  %v12078_v36 = vsel %vm10852_vm3, %v8254_v37, %v967_v13  ;;  %v2428_v55 = vsel %vm1096_vm0, %v11772_v34, 0  ;;  %v8256_v49 = vrot.slane %v11567_v18, 9 }
  0xd8   : > { %15430 = vst [vmem:[#allocation54_spill] sm:$0xff] %v12052_v11  ;;  %v12060_v15 = vcombine.low %v12048_v20, %v12052_v11  ;;  %15432 = vst [vmem:[#allocation55_spill] sm:$0xff] %v12078_v36  ;;  %v976_v7 = vrot.slane %v974_v63, 4  ;;  %v12082_v39 = vsel %vm10852_vm3, %v969_v2, %v970_v43  ;;  %v12086_v19 = vsel %vm10852_vm3, %v8255_v26, %v974_v63  ;;  %v15441_v2 = vld [vmem:[#allocation33_spill] sm:$0xff] }
  0xd9   : > { %15433 = vst [vmem:[#allocation56_spill] sm:$0xff] %v12082_v39  ;;  %15434 = vst [vmem:[#allocation57_spill] sm:$0xff] %v12086_v19  ;;  %v12096_v40 = vcombine.low %v12078_v36, %v12082_v39  ;;  %v981_v25 = vrot.slane %v11574_v6, 5  ;;  %v984_v32 = vrot.slane %v11595_v16, 5  ;;  %v8384_v61 = vrot.slane %v12099_v22, 9 }
  0xda   : > { %v12090_v23 = vsel %vm10852_vm3, %v976_v7, %v977_v31  ;;  %v2415_v42 = vrot.slane %v12107_v58, 5  ;;  %v2418_v37 = vrot.slane %v12110_v44, 5  ;;  %v15440_v31 = vld [vmem:[#allocation32_spill] sm:$0xff]  ;;  %v15442_v7 = vld [vmem:[#allocation34_spill] sm:$0xff]  ;;  %v2183_v20 = vshll.u32 %v12110_v44, 16 }
  0xdb   : > { %15435 = vst [vmem:[#allocation2_spill] sm:$0xff] %v12090_v23  ;;  %9205 = vmatmul.mubr.msk.bf16.vlgmr.msra.gmra.mrb[0].mxu0 %vm1041_vm4, %v15436_v57  ;;  %v12114_v34 = vcombine.low %v12086_v19, %v12090_v23  ;;  %v983_v18 = vrot.slane %v981_v25, 4  ;;  %v12131_v6 = vsel %vm10852_vm3, %v8256_v49, %v981_v25  ;;  %v15444_v49 = vld [vmem:[#allocation38_spill] sm:$0xff]  ;;  %v15445_v25 = vld [vmem:[#allocation41_spill] sm:$0xff] }
  0xdc   : > { %9115 = vmatmul.mubr.msk.bf16.gmra.mrb[4].mxu1 %vm1041_vm4, %v12056_v27  ;;  %9241 = vmatpush3.bf16.msra.mxu0 %v2428_v55  ;;  %15438 = vst [vmem:[#allocation29_spill] sm:$0xff] %v12131_v6  ;;  %v2416_v13 = vsel %vm10852_vm3, %v8384_v61, %v2415_v42  ;;  %v2417_v16 = vrot.slane %v2415_v42, 4  ;;  %v15443_v55 = vld [vmem:[#allocation35_spill] sm:$0xff]  ;;  %v15447_v61 = vld [vmem:[#allocation49_spill] sm:$0xff]  ;;  %v2185_v36 = vrot.slane %v2183_v20, 5 }
  0xdd   : > { %9118 = vmatprep.mubr.msk.bf16.mxu1 %vm1041_vm4, %v12060_v15  ;;  %9208 = vmatprep.mubr.msk.bf16.mxu0 %vm1041_vm4, %v15437_v48  ;;  %v12137_v10 = vsel %vm10852_vm3, %v983_v18, %v984_v32  ;;  %v15446_v32 = vld [vmem:[#allocation46_spill] sm:$0xff]  ;;  %v15448_v42 = vld [vmem:[#allocation53_spill] sm:$0xff]  ;;  %v2167_v18 = vshll.u32 %v12099_v22, 16 }
  0xde   : > { %10288 = vmatprep.subr.msk.bf16.mxu0 %vm1096_vm0, %v2658_v46  ;;  %15439 = vst [vmem:[#allocation30_spill] sm:$0xff] %v12137_v10  ;;  %v2419_v43 = vsel %vm10852_vm3, %v2417_v16, %v2418_v37  ;;  %v12143_v26 = vcombine.low %v12131_v6, %v12137_v10  ;;  %v2164_v37 = vshrl.u32 %v12099_v22, 16  ;;  %v2177_v16 = vshrl.u32 %v12107_v58, 16 }
  0xdf   : > { %v12145_v63 = vcombine.low %v2416_v13, %v2419_v43  ;;  %v2173_v13 = vshll.u32 %v12107_v58, 16  ;;  %v2169_v10 = vrot.slane %v2167_v18, 5  ;;  %v2644_v35 = vrot.slane %v2167_v18, 6 }
  0xe0   : > { %v2166_v43 = vrot.slane %v2164_v37, 4  ;;  %v2179_v23 = vrot.slane %v2177_v16, 4  ;;  %v2643_v29 = vrot.slane %v2164_v37, 5  ;;  %v2647_v54 = vrot.slane %v2177_v16, 5 }
  0xe1   : > { %v2175_v6 = vrot.slane %v2173_v13, 5  ;;  %v2648_v9 = vrot.slane %v2173_v13, 6 }
  0xe2   : > { %v2170_v19 = vor.u32 %v2169_v10, %v2166_v43  ;;  %v15450_v10 = vld [vmem:[#allocation9_spill] sm:$0xff]  ;;  %v15456_v43 = vld [vmem:[#allocation27_spill] sm:$0xff] }
  0xe3   : > { %9209 = vmatmul.mubr.msk.bf16.gmra.mrb[4].mxu0 %vm1041_vm4, %v15440_v31  ;;  %v2180_v11 = vor.u32 %v2179_v23, %v2175_v6  ;;  %v2905_v23 = vld [vmem:[%s14955_s1 + $0x18] sm:$0xf] }
  0xe4   : > { %9119 = vmatmul.mubr.msk.bf16.gmra.mrb[8].mxu1 %vm1041_vm4, %v12096_v40  ;;  %9212 = vmatprep.mubr.msk.bf16.mxu0 %vm1041_vm4, %v15441_v2  ;;  %v2171_v39 = vrot.slane %v2170_v19, 4  ;;  %v15449_v19 = vld [vmem:[#allocation4_spill] sm:$0xff] }
  0xe5   : > { %9122 = vmatprep.mubr.msk.bf16.mxu1 %vm1041_vm4, %v12114_v34  ;;  %v2181_v22 = vrot.slane %v2180_v11, 4  ;;  %v2666_v11 = vsel %vm1096_vm0, %v2658_v46, 0  ;;  %v15454_v46 = vld [vmem:[#allocation20_spill] sm:$0xff] }
  0xe6   : > { %v2176_v58 = vsel %vm11112_vm7, %v2171_v39, %v2175_v6  ;;  %v15451_v39 = vld [vmem:[#allocation11_spill] sm:$0xff]  ;;  %v15455_v6 = vld [vmem:[#allocation25_spill] sm:$0xff] }
  0xe7   : > { %v2186_v12 = vsel %vm11112_vm7, %v2181_v22, %v2185_v36  ;;  %v15453_v36 = vld [vmem:[#allocation19_spill] sm:$0xff]  ;;  %v15457_v22 = vld [vmem:[#allocation28_spill] sm:$0xff] }
  0xe8   : > { %v12186_v47 = vcombine.low %v2176_v58, %v2186_v12  ;;  %v15452_v12 = vld [vmem:[#allocation13_spill] sm:$0xff]  ;;  %v2913_v58 = vsel %vm1096_vm0, %v2905_v23, 0 }
  0xeb   : > { %9213 = vmatmul.mubr.msk.bf16.gmra.mrb[8].mxu0 %vm1041_vm4, %v15442_v7 }
  0xec   : > { %9123 = vmatmul.mubr.msk.bf16.gmra.mrb[12].mxu1 %vm1041_vm4, %v12143_v26  ;;  %9216 = vmatprep.mubr.msk.bf16.mxu0 %vm1041_vm4, %v15443_v55 }
  0xf3   : > { %9217 = vmatmul.mubr.msk.bf16.gmra.mrb[12].mxu0 %vm1041_vm4, %v15444_v49 }
  0xf4   : > { %9220 = vmatprep.mubr.msk.bf16.mxu0 %vm1041_vm4, %v15445_v25 }
  0xfb   : > { %9221 = vmatmul.mubr.msk.bf16.gmra.mrb[16].mxu0 %vm1041_vm4, %v15446_v32 }
  0xfc   : > { %9224 = vmatprep.mubr.msk.bf16.mxu0 %vm1041_vm4, %v15447_v61 }
 0x103   : > { %9225 = vmatmul.mubr.msk.bf16.gmra.mrb[20].mxu0 %vm1041_vm4, %v15448_v42 }
 0x104   : > { %9228 = vmatprep.mubr.msk.bf16.mxu0 %vm1041_vm4, %v11547_v8 }
 0x10b   : > { %9229 = vmatmul.mubr.msk.bf16.gmra.mrb[24].mxu0 %vm1041_vm4, %v11569_v4 }
 0x10c   : > { %9232 = vmatprep.mubr.msk.bf16.mxu0 %vm1041_vm4, %v11605_v5 }
 0x113   : > { %9233 = vmatmul.mubr.msk.bf16.gmra.mrb[28].mxu0 %vm1041_vm4, %v11637_v21 }
 0x114   : > { %9236 = vmatprep.mubr.msk.bf16.mxu0 %vm1041_vm4, %v11664_v51 }
 0x11b   : > { %9237 = vmatmul.mubr.msk.bf16.gmra.mrb[32].mxu0 %vm1041_vm4, %v12186_v47 }
 0x11c   : > { %9242 = vmatprep.mubr.msk.bf16.mxu0 %vm1041_vm4, %v15449_v19  ;;  %v3138_v19 = vld [vmem:[%s14955_s1 + $0x1c] sm:$0xf] }
 0x123   : > { %9243 = vmatmul.mubr.msk.bf16.vlgmr.msra.gmra.mrb[0].mxu0 %vm1041_vm4, %v15450_v10 }
 0x124   : > { %9279 = vmatpush3.bf16.msra.mxu0 %v2666_v11  ;;  %9246 = vmatprep.mubr.msk.bf16.mxu0 %vm1041_vm4, %v15451_v39  ;;  %v15458_v11 = vld [vmem:[#allocation3_spill] sm:$0xff] }
 0x125   : > { %10289 = vmatprep.subr.msk.bf16.mxu0 %vm1096_vm0, %v2905_v23  ;;  %v15460_v23 = vld [vmem:[#allocation59_spill] sm:$0xff] }
 0x12b   : > { %9247 = vmatmul.mubr.msk.bf16.gmra.mrb[4].mxu0 %vm1041_vm4, %v15452_v12 }
 0x12c   : > { %9250 = vmatprep.mubr.msk.bf16.mxu0 %vm1041_vm4, %v15453_v36 }
 0x133   : > { %9251 = vmatmul.mubr.msk.bf16.gmra.mrb[8].mxu0 %vm1041_vm4, %v15454_v46 }
 0x134   : > { %9254 = vmatprep.mubr.msk.bf16.mxu0 %vm1041_vm4, %v15455_v6 }
 0x13b   : > { %9255 = vmatmul.mubr.msk.bf16.gmra.mrb[12].mxu0 %vm1041_vm4, %v15456_v43 }
 0x13c   : > { %9258 = vmatprep.mubr.msk.bf16.mxu0 %vm1041_vm4, %v15457_v22 }
 0x143   : > { %9259 = vmatmul.mubr.msk.bf16.gmra.mrb[16].mxu0 %vm1041_vm4, %v11986_v50 }
 0x144   : > { %9262 = vmatprep.mubr.msk.bf16.mxu0 %vm1041_vm4, %v12018_v38 }
 0x14b   : > { %9263 = vmatmul.mubr.msk.bf16.gmra.mrb[20].mxu0 %vm1041_vm4, %v12022_v59 }
 0x14c   : > { %9266 = vmatprep.mubr.msk.bf16.mxu0 %vm1041_vm4, %v12056_v27 }
 0x153   : > { %9267 = vmatmul.mubr.msk.bf16.gmra.mrb[24].mxu0 %vm1041_vm4, %v12060_v15 }
 0x154   : > { %9270 = vmatprep.mubr.msk.bf16.mxu0 %vm1041_vm4, %v12096_v40 }
 0x15b   : > { %9271 = vmatmul.mubr.msk.bf16.gmra.mrb[28].mxu0 %vm1041_vm4, %v12114_v34 }
 0x15c   : > { %9274 = vmatprep.mubr.msk.bf16.mxu0 %vm1041_vm4, %v12143_v26 }
 0x163   : > { %9275 = vmatmul.mubr.msk.bf16.gmra.mrb[32].mxu0 %vm1041_vm4, %v12145_v63 }
 0x164   : > { %9280 = vmatprep.mubr.msk.bf16.mxu0 %vm1041_vm4, %v11660_v1  ;;  %v15459_v1 = vld [vmem:[#allocation58_spill] sm:$0xff] }
 0x16b   : > { %9281 = vmatmul.mubr.msk.bf16.vlgmr.msra.gmra.mrb[0].mxu0 %vm1041_vm4, %v11700_v60 }
 0x16c   : > { %9317 = vmatpush3.bf16.msra.mxu0 %v2913_v58  ;;  %9284 = vmatprep.mubr.msk.bf16.mxu0 %vm1041_vm4, %v11715_v56  ;;  %v15462_v58 = vld [vmem:[#allocation36_spill] sm:$0xff] }
 0x16d   : > { %10290 = vmatprep.subr.msk.bf16.mxu0 %vm1096_vm0, %v3138_v19 }
 0x173   : > { %9285 = vmatmul.mubr.msk.bf16.gmra.mrb[4].mxu0 %vm1041_vm4, %v11738_v17 }
 0x174   : > { %9288 = vmatprep.mubr.msk.bf16.mxu0 %vm1041_vm4, %v15458_v11 }
 0x17b   : > { %9289 = vmatmul.mubr.msk.bf16.gmra.mrb[8].mxu0 %vm1041_vm4, %v15459_v1 }
 0x17c   : > { %9292 = vmatprep.mubr.msk.bf16.mxu0 %vm1041_vm4, %v15460_v23  ;;  %v2655_v23 = vrot.slane %v2183_v20, 6 }
 0x183   : > { %9293 = vmatmul.mubr.msk.bf16.gmra.mrb[12].mxu0 %vm1041_vm4, %v15461_v33  ;;  %v2652_v33 = vshrl.u32 %v12110_v44, 16 }
 0x184   : > { %9296 = vmatprep.mubr.msk.bf16.mxu0 %vm1041_vm4, %v15462_v58 }
 0x185   : > { %v2654_v58 = vrot.slane %v2652_v33, 5 }
 0x187   : > { %v2656_v11 = vor.u32 %v2655_v23, %v2654_v58 }
 0x18b   : > { %9297 = vmatmul.mubr.msk.bf16.gmra.mrb[16].mxu0 %vm1041_vm4, %v15463_v28  ;;  %v2645_v28 = vor.u32 %v2644_v35, %v2643_v29 }
 0x18c   : > { %9300 = vmatprep.mubr.msk.bf16.mxu0 %vm1041_vm4, %v11874_v45  ;;  %v2649_v45 = vor.u32 %v2648_v9, %v2647_v54  ;;  %v3146_v9 = vsel %vm1096_vm0, %v3138_v19, 0  ;;  %v3376_v54 = vld [vmem:[%s14955_s1 + $0x20] sm:$0xf] }
 0x18e   : > { %v2651_v1 = vrot.slane %v2649_v45, 4 }
 0x190   : > { %v2657_v37 = vsel %vm11614_vm10, %v2651_v1, %v2656_v11 }
 0x193   : > { %9301 = vmatmul.mubr.msk.bf16.gmra.mrb[20].mxu0 %vm1041_vm4, %v11889_v30  ;;  %v2646_v30 = vrot.slane %v2645_v28, 4 }
 0x194   : > { %9304 = vmatprep.mubr.msk.bf16.mxu0 %vm1041_vm4, %v11914_v41 }
 0x195   : > { %v2650_v44 = vsel %vm11614_vm10, %v2646_v30, %v2649_v45  ;;  %v12307_v45 = vld [vmem:[%s10843_s12 + $0xe4] sm:$0xf]  ;;  %v12310_v30 = vld [vmem:[%s10843_s12 + $0xe8] sm:$0xf] }
 0x196   : > { %v12275_v18 = vcombine.low %v2650_v44, %v2657_v37  ;;  %v2882_v35 = vshrl.u32 %v12307_v45, 16  ;;  %v2885_v28 = vshll.u32 %v12307_v45, 16  ;;  %v2891_v29 = vshll.u32 %v12310_v30, 16 }
 0x197   : > { %v2895_v33 = vshrl.u32 %v12310_v30, 16  ;;  %v3133_v3 = vrot.slane %v12310_v30, 5 }
 0x198   : > { %v2884_v20 = vrot.slane %v2882_v35, 4  ;;  %v3366_v16 = vrot.slane %v2891_v29, 6 }
 0x199   : > { %v3365_v13 = vrot.slane %v2895_v33, 5 }
 0x19b   : > { %9305 = vmatmul.mubr.msk.bf16.gmra.mrb[24].mxu0 %vm1041_vm4, %v11929_v62 }
 0x19c   : > { %9308 = vmatprep.mubr.msk.bf16.mxu0 %vm1041_vm4, %v11953_v53 }
 0x1a3   : > { %9309 = vmatmul.mubr.msk.bf16.gmra.mrb[28].mxu0 %vm1041_vm4, %v11961_v52 }
 0x1a4   : > { %9312 = vmatprep.mubr.msk.bf16.mxu0 %vm1041_vm4, %v11971_v14 }
 0x1ab   : > { %9313 = vmatmul.mubr.msk.bf16.gmra.mrb[32].mxu0 %vm1041_vm4, %v12275_v18 }
 0x1ac   : > { %9318 = vmatprep.mubr.msk.bf16.mxu0 %vm1041_vm4, %v15436_v57  ;;  %v2887_v57 = vrot.slane %v2885_v28, 5 }
 0x1b3   : > { %9319 = vmatmul.mubr.msk.bf16.vlgmr.msra.gmra.mrb[0].mxu0 %vm1041_vm4, %v15437_v48  ;;  %v2893_v48 = vrot.slane %v2891_v29, 5 }
 0x1b4   : > { %9355 = vmatpush3.bf16.msra.mxu0 %v3146_v9  ;;  %9322 = vmatprep.mubr.msk.bf16.mxu0 %vm1041_vm4, %v15440_v31  ;;  %v2897_v31 = vrot.slane %v2895_v33, 4 }
 0x1b5   : > { %10291 = vmatprep.subr.msk.bf16.mxu0 %vm1096_vm0, %v3376_v54 }
 0x1bb   : > { %9323 = vmatmul.mubr.msk.bf16.gmra.mrb[4].mxu0 %vm1041_vm4, %v15441_v2  ;;  %v2898_v2 = vor.u32 %v2897_v31, %v2893_v48 }
 0x1bc   : > { %9326 = vmatprep.mubr.msk.bf16.mxu0 %vm1041_vm4, %v15442_v7 }
 0x1c3   : > { %9327 = vmatmul.mubr.msk.bf16.gmra.mrb[8].mxu0 %vm1041_vm4, %v15443_v55 }
 0x1c4   : > { %9330 = vmatprep.mubr.msk.bf16.mxu0 %vm1041_vm4, %v15444_v49  ;;  %v2899_v49 = vrot.slane %v2898_v2, 4 }
 0x1cb   : > { %9331 = vmatmul.mubr.msk.bf16.gmra.mrb[12].mxu0 %vm1041_vm4, %v15445_v25 }
 0x1cc   : > { %9334 = vmatprep.mubr.msk.bf16.mxu0 %vm1041_vm4, %v15446_v32 }
 0x1d3   : > { %9335 = vmatmul.mubr.msk.bf16.gmra.mrb[16].mxu0 %vm1041_vm4, %v15447_v61  ;;  %v3384_v61 = vsel %vm1096_vm0, %v3376_v54, 0 }
 0x1d4   : > { %9338 = vmatprep.mubr.msk.bf16.mxu0 %vm1041_vm4, %v15448_v42  ;;  %v3362_v42 = vrot.slane %v2885_v28, 6 }
 0x1db   : > { %9339 = vmatmul.mubr.msk.bf16.gmra.mrb[20].mxu0 %vm1041_vm4, %v11547_v8  ;;  %v12325_v8 = vld [vmem:[%s10843_s12 + $0xec] sm:$0x3] }
 0x1dc   : > { %9342 = vmatprep.mubr.msk.bf16.mxu0 %vm1041_vm4, %v11569_v4  ;;  %v2888_v4 = vor.u32 %v2887_v57, %v2884_v20  ;;  %v2901_v7 = vshll.u32 %v12325_v8, 16 }
 0x1de   : > { %v2889_v55 = vrot.slane %v2888_v4, 4  ;;  %v2903_v25 = vrot.slane %v2901_v7, 5 }
 0x1e0   : > { %v2894_v32 = vsel %vm11112_vm7, %v2889_v55, %v2893_v48 }
 0x1e3   : > { %9343 = vmatmul.mubr.msk.bf16.gmra.mrb[24].mxu0 %vm1041_vm4, %v11605_v5  ;;  %v2904_v5 = vsel %vm11112_vm7, %v2899_v49, %v2903_v25 }
 0x1e4   : > { %9346 = vmatprep.mubr.msk.bf16.mxu0 %vm1041_vm4, %v11637_v21  ;;  %v8423_v21 = vcombine.low %v2894_v32, %v2904_v5 }
 0x1eb   : > { %9347 = vmatmul.mubr.msk.bf16.gmra.mrb[28].mxu0 %vm1041_vm4, %v11664_v51  ;;  %v8442_v51 = vrot.slane %v12307_v45, 9 }
 0x1ec   : > { %9350 = vmatprep.mubr.msk.bf16.mxu0 %vm1041_vm4, %v12186_v47 }
 0x1f3   : > { %9351 = vmatmul.mubr.msk.bf16.gmra.mrb[32].mxu0 %vm1041_vm4, %v8423_v21 }
 0x1f4   : > { %9356 = vmatprep.mubr.msk.bf16.mxu0 %vm1041_vm4, %v15450_v10  ;;  %v3370_v10 = vshrl.u32 %v12325_v8, 16 }
 0x1fb   : > { %9357 = vmatmul.mubr.msk.bf16.vlgmr.msra.gmra.mrb[0].mxu0 %vm1041_vm4, %v15451_v39  ;;  %v3367_v39 = vor.u32 %v3366_v16, %v3365_v13 }
 0x1fc   : > { %9393 = vmatpush3.bf16.msra.mxu0 %v3384_v61  ;;  %9360 = vmatprep.mubr.msk.bf16.mxu0 %vm1041_vm4, %v15452_v12  ;;  %v3372_v12 = vrot.slane %v3370_v10, 5 }
 0x203   : > { %9361 = vmatmul.mubr.msk.bf16.gmra.mrb[4].mxu0 %vm1041_vm4, %v15453_v36 }
 0x204   : > { %9364 = vmatprep.mubr.msk.bf16.mxu0 %vm1041_vm4, %v15454_v46  ;;  %v3369_v46 = vrot.slane %v3367_v39, 4 }
 0x20b   : > { %9365 = vmatmul.mubr.msk.bf16.gmra.mrb[8].mxu0 %vm1041_vm4, %v15455_v6 }
 0x20c   : > { %9368 = vmatprep.mubr.msk.bf16.mxu0 %vm1041_vm4, %v15456_v43 }
 0x213   : > { %9369 = vmatmul.mubr.msk.bf16.gmra.mrb[12].mxu0 %vm1041_vm4, %v15457_v22  ;;  %v12428_v22 = vpop.f32.mrb[0].mxu1 }
 0x214   : > { %9372 = vmatprep.mubr.msk.bf16.mxu0 %vm1041_vm4, %v11986_v50  ;;  %v3135_v50 = vrot.slane %v3133_v3, 4  ;;  %v12430_v19 = vpop.f32.mrb[1].mxu1 }
 0x215   : > { %v12432_v11 = vpop.f32.mrb[2].mxu1 }
 0x216   : > { %v12434_v1 = vpop.f32.mrb[3].mxu1 }
 0x21b   : > { %9373 = vmatmul.mubr.msk.bf16.gmra.mrb[16].mxu0 %vm1041_vm4, %v12018_v38  ;;  %v3136_v38 = vrot.slane %v12325_v8, 5 }
 0x21c   : > { %9376 = vmatprep.mubr.msk.bf16.mxu0 %vm1041_vm4, %v12022_v59  ;;  %v3134_v59 = vsel %vm10852_vm3, %v8442_v51, %v3133_v3 }
 0x21d   : > { %v3137_v47 = vsel %vm10852_vm3, %v3135_v50, %v3136_v38 }
 0x223   : > { %9377 = vmatmul.mubr.msk.bf16.gmra.mrb[20].mxu0 %vm1041_vm4, %v12056_v27  ;;  %v8443_v27 = vcombine.low %v3134_v59, %v3137_v47 }
 0x224   : > { %9380 = vmatprep.mubr.msk.bf16.mxu0 %vm1041_vm4, %v12060_v15  ;;  %v15464_v15 = vld [vmem:[#allocation3_spill] sm:$0xff] }
 0x22b   : > { %9381 = vmatmul.mubr.msk.bf16.gmra.mrb[24].mxu0 %vm1041_vm4, %v12096_v40  ;;  %v15465_v40 = vld [vmem:[#allocation58_spill] sm:$0xff] }
 0x22c   : > { %9384 = vmatprep.mubr.msk.bf16.mxu0 %vm1041_vm4, %v12114_v34  ;;  %v15467_v34 = vld [vmem:[#allocation60_spill] sm:$0xff] }
 0x233   : > { %9385 = vmatmul.mubr.msk.bf16.gmra.mrb[28].mxu0 %vm1041_vm4, %v12143_v26  ;;  %v15468_v26 = vld [vmem:[#allocation36_spill] sm:$0xff] }
 0x234   : > { %9388 = vmatprep.mubr.msk.bf16.mxu0 %vm1041_vm4, %v12145_v63  ;;  %v3361_v63 = vrot.slane %v2882_v35, 5 }
 0x23b   : > { %9389 = vmatmul.mubr.msk.bf16.gmra.mrb[32].mxu0 %vm1041_vm4, %v8443_v27 }
 0x23c   : > { %9394 = vmatprep.mubr.msk.bf16.mxu0 %vm1041_vm4, %v11700_v60  ;;  %v15469_v60 = vld [vmem:[#allocation37_spill] sm:$0xff] }
 0x243   : > { %9395 = vmatmul.mubr.msk.bf16.vlgmr.msra.gmra.mrb[0].mxu0 %vm1041_vm4, %v11715_v56  ;;  %v15470_v56 = vld [vmem:[#allocation39_spill] sm:$0xff] }
 0x244   : > { %9398 = vmatprep.mubr.msk.bf16.mxu0 %vm1041_vm4, %v11738_v17  ;;  %v15471_v17 = vld [vmem:[#allocation40_spill] sm:$0xff] }
 0x24b   : > { %9399 = vmatmul.mubr.msk.bf16.gmra.mrb[4].mxu0 %vm1041_vm4, %v15464_v15 }
 0x24c   : > { %9402 = vmatprep.mubr.msk.bf16.mxu0 %vm1041_vm4, %v15465_v40 }
 0x253   : > { %9403 = vmatmul.mubr.msk.bf16.gmra.mrb[8].mxu0 %vm1041_vm4, %v15466_v0 }
 0x254   : > { %9406 = vmatprep.mubr.msk.bf16.mxu0 %vm1041_vm4, %v15467_v34 }
 0x25b   : > { %9407 = vmatmul.mubr.msk.bf16.gmra.mrb[12].mxu0 %vm1041_vm4, %v15468_v26 }
 0x25c   : > { %9410 = vmatprep.mubr.msk.bf16.mxu0 %vm1041_vm4, %v15469_v60 }
 0x263   : > { %9411 = vmatmul.mubr.msk.bf16.gmra.mrb[16].mxu0 %vm1041_vm4, %v15470_v56 }
 0x264   : > { %9414 = vmatprep.mubr.msk.bf16.mxu0 %vm1041_vm4, %v15471_v17 }
 0x26b   : > { %9415 = vmatmul.mubr.msk.bf16.gmra.mrb[20].mxu0 %vm1041_vm4, %v11914_v41  ;;  %v3363_v41 = vor.u32 %v3362_v42, %v3361_v63 }
 0x26c   : > { %9418 = vmatprep.mubr.msk.bf16.mxu0 %vm1041_vm4, %v11929_v62  ;;  %v3373_v62 = vrot.slane %v2901_v7, 6 }
 0x26d   : > { %v3364_v36 = vrot.slane %v3363_v41, 4 }
 0x26e   : > { %v3374_v6 = vor.u32 %v3373_v62, %v3372_v12 }
 0x26f   : > { %v3368_v43 = vsel %vm11614_vm10, %v3364_v36, %v3367_v39 }
 0x273   : > { %9419 = vmatmul.mubr.msk.bf16.gmra.mrb[24].mxu0 %vm1041_vm4, %v11953_v53  ;;  %v3375_v53 = vsel %vm11614_vm10, %v3369_v46, %v3374_v6 }
 0x274   : > { %9422 = vmatprep.mubr.msk.bf16.mxu0 %vm1041_vm4, %v11961_v52  ;;  %v8462_v52 = vcombine.low %v3368_v43, %v3375_v53 }
 0x27b   : > { %9423 = vmatmul.mubr.msk.bf16.gmra.mrb[28].mxu0 %vm1041_vm4, %v11971_v14  ;;  %v12436_v14 = vpop.f32.mrb[4].mxu1 }
 0x27c   : > { %9426 = vmatprep.mubr.msk.bf16.mxu0 %vm1041_vm4, %v12275_v18  ;;  %v12438_v23 = vpop.f32.mrb[5].mxu1 }
 0x27d   : > { %v12440_v58 = vpop.f32.mrb[6].mxu1 }
 0x27e   : > { %v12442_v44 = vpop.f32.mrb[7].mxu1 }
 0x27f   : > { %v12444_v24 = vpop.f32.mrb[8].mxu1 }
 0x280   : > { %v12446_v37 = vpop.f32.mrb[9].mxu1 }
 0x281   : > { %v12448_v18 = vpop.f32.mrb[10].mxu1 }
 0x282   : > { %v12450_v9 = vpop.f32.mrb[11].mxu1 }
 0x283   : > { %9427 = vmatmul.mubr.msk.bf16.gmra.mrb[32].mxu0 %vm1041_vm4, %v8462_v52  ;;  %v12452_v54 = vpop.f32.mrb[12].mxu1 }
 0x284   : > { %v12454_v45 = vpop.f32.mrb[13].mxu1 }
 0x285   : > { %v12456_v30 = vpop.f32.mrb[14].mxu1 }
 0x286   : > { %v12458_v35 = vpop.f32.mrb[15].mxu1 }
 0x316   : > { %v12460_v28 = vpop.f32.mrb[0].mxu0 }
 0x317   : > { %v12462_v29 = vpop.f32.mrb[1].mxu0  ;;  %v3607_v33 = vsel %vm1041_vm4, %v12460_v28, 0.0  ;;  %v3748_v48 = vmul.f32 %v12460_v28, %v12460_v28 }
 0x318   : > { %3608 = vadd.xlane.f32.xlu1 %v3607_v33  ;;  %v12466_v20 = vpop.f32.mrb[2].mxu0  ;;  %v3601_v57 = vsel %vm1041_vm4, %v12462_v29, 0.0  ;;  %v3746_v21 = vmul.f32 %v12462_v29, %v12462_v29 }
 0x319   : > { %3602 = vadd.xlane.f32.xlu0 %v3601_v57  ;;  %v12472_v31 = vpop.f32.mrb[3].mxu0  ;;  %v3610_v8 = vsel %vm1041_vm4, %v12466_v20, 0.0  ;;  %v3749_v4 = vmul.f32 %v12466_v20, %v12466_v20  ;;  %v3788_v2 = vsel %vm1041_vm4, %v3748_v48, 0.0 }
 0x31a   : > { %v3747_v25 = vmul.f32 %v12472_v31, %v12472_v31  ;;  %v3604_v5 = vsel %vm1041_vm4, %v12472_v31, 0.0  ;;  %v3782_v51 = vsel %vm1041_vm4, %v3746_v21, 0.0 }
 0x31b   : > { %v3791_v49 = vsel %vm1041_vm4, %v3749_v4, 0.0 }
 0x31c   : > { %3611 = vadd.xlane.f32.xlu1 %v3610_v8  ;;  %v3785_v3 = vsel %vm1041_vm4, %v3747_v25, 0.0 }
 0x31d   : > { %3789 = vadd.xlane.f32.xlu0 %v3788_v2 }
 0x31e   : > { %v12479_v7 = vpop.f32.mrb[4].mxu0 }
 0x31f   : > { %v12481_v55 = vpop.f32.mrb[5].mxu0  ;;  %v3619_v27 = vsel %vm1041_vm4, %v12479_v7, 0.0  ;;  %v3752_v26 = vmul.f32 %v12479_v7, %v12479_v7 }
 0x320   : > { %3792 = vadd.xlane.f32.xlu1 %v3791_v49  ;;  %v12486_v32 = vpop.f32.mrb[6].mxu0  ;;  %v3613_v34 = vsel %vm1041_vm4, %v12481_v55, 0.0  ;;  %v3750_v16 = vmul.f32 %v12481_v55, %v12481_v55 }
 0x321   : > { %3605 = vadd.xlane.f32.xlu0 %v3604_v5  ;;  %v12492_v61 = vpop.f32.mrb[7].mxu0  ;;  %v3622_v59 = vsel %vm1041_vm4, %v12486_v32, 0.0  ;;  %v3753_v0 = vmul.f32 %v12486_v32, %v12486_v32  ;;  %v3800_v13 = vsel %vm1041_vm4, %v3752_v26, 0.0 }
 0x322   : > { %v3616_v40 = vsel %vm1041_vm4, %v12492_v61, 0.0  ;;  %v3751_v63 = vmul.f32 %v12492_v61, %v12492_v61  ;;  %v3794_v39 = vsel %vm1041_vm4, %v3750_v16, 0.0 }
 0x323   : > { %v3803_v17 = vsel %vm1041_vm4, %v3753_v0, 0.0 }
 0x324   : > { %3786 = vadd.xlane.f32.xlu1 %v3785_v3  ;;  %v3797_v41 = vsel %vm1041_vm4, %v3751_v63, 0.0 }
 0x325   : > { %3783 = vadd.xlane.f32.xlu0 %v3782_v51 }
 0x326   : > { %v12496_v50 = vpop.f32.mrb[8].mxu0 }
 0x327   : > { %v12498_v38 = vpop.f32.mrb[9].mxu0  ;;  %v3631_v6 = vsel %vm1041_vm4, %v12496_v50, 0.0  ;;  %v3756_v57 = vmul.f32 %v12496_v50, %v12496_v50 }
 0x328   : > { %3623 = vadd.xlane.f32.xlu1 %v3622_v59  ;;  %v12502_v47 = vpop.f32.mrb[10].mxu0  ;;  %v3625_v33 = vsel %vm1041_vm4, %v12498_v38, 0.0  ;;  %v3754_v3 = vmul.f32 %v12498_v38, %v12498_v38 }
 0x329   : > { %3620 = vadd.xlane.f32.xlu0 %v3619_v27  ;;  %v12506_v15 = vpop.f32.mrb[11].mxu0  ;;  %v3634_v36 = vsel %vm1041_vm4, %v12502_v47, 0.0  ;;  %v3757_v52 = vmul.f32 %v12502_v47, %v12502_v47  ;;  %v3812_v21 = vsel %vm1041_vm4, %v3756_v57, 0.0 }
 0x32a   : > { %v3628_v53 = vsel %vm1041_vm4, %v12506_v15, 0.0  ;;  %v3755_v49 = vmul.f32 %v12506_v15, %v12506_v15 }
 0x32b   : > { %v3815_v2 = vsel %vm1041_vm4, %v3757_v52, 0.0 }
 0x32c   : > { %3617 = vadd.xlane.f32.xlu1 %v3616_v40  ;;  %v3809_v27 = vsel %vm1041_vm4, %v3755_v49, 0.0 }
 0x32d   : > { %3614 = vadd.xlane.f32.xlu0 %v3613_v34 }
 0x32e   : > { %v12516_v60 = vpop.f32.mrb[12].mxu0 }
 0x32f   : > { %v12518_v56 = vpop.f32.mrb[13].mxu0 }
 0x330   : > { %3804 = vadd.xlane.f32.xlu1 %v3803_v17  ;;  %v12523_v42 = vpop.f32.mrb[14].mxu0  ;;  %v3643_v17 = vsel %vm1041_vm4, %v12516_v60, 0.0 }
 0x331   : > { %3801 = vadd.xlane.f32.xlu0 %v3800_v13  ;;  %v12528_v10 = vpop.f32.mrb[15].mxu0 }
 0x332   : > { %v3640_v16 = vsel %vm1041_vm4, %v12528_v10, 0.0 }
 0x334   : > { %3798 = vadd.xlane.f32.xlu1 %v3797_v41  ;;  %v3637_v41 = vsel %vm1041_vm4, %v12518_v56, 0.0 }
 0x335   : > { %3795 = vadd.xlane.f32.xlu0 %v3794_v39  ;;  %v3760_v39 = vmul.f32 %v12516_v60, %v12516_v60 }
 0x336   : > { %v12532_v12 = vpop.f32.mrb[16].mxu0 }
 0x337   : > { %v12534_v62 = vpop.f32.mrb[17].mxu0  ;;  %v3824_v57 = vsel %vm1041_vm4, %v3760_v39, 0.0 }
 0x338   : > { %3635 = vadd.xlane.f32.xlu1 %v3634_v36  ;;  %v12538_v46 = vpop.f32.mrb[18].mxu0 }
 0x339   : > { %3632 = vadd.xlane.f32.xlu0 %v3631_v6  ;;  %v12542_v43 = vpop.f32.mrb[19].mxu0 }
 0x33c   : > { %3629 = vadd.xlane.f32.xlu1 %v3628_v53  ;;  %v3759_v53 = vmul.f32 %v12528_v10, %v12528_v10 }
 0x33d   : > { %3626 = vadd.xlane.f32.xlu0 %v3625_v33 }
 0x33e   : > { %v9416_v48 = vpop.f32.mrb[20].mxu0  ;;  %v3821_v49 = vsel %vm1041_vm4, %v3759_v53, 0.0 }
 0x33f   : > { %v12553_v8 = vadd.f32 %v9416_v48, %v12428_v22  ;;  %v3500_v4 = vpop.f32.mrb[21].mxu0  ;;  %v3758_v48 = vmul.f32 %v12518_v56, %v12518_v56 }
 0x340   : > { %v12559_v25 = vadd.f32 %v3500_v4, %v12430_v19  ;;  %3816 = vadd.xlane.f32.xlu1 %v3815_v2  ;;  %v9417_v5 = vpop.f32.mrb[22].mxu0  ;;  %v3806_v19 = vsel %vm1041_vm4, %v3754_v3, 0.0 }
 0x341   : > { %15472 = vst [vmem:[#allocation31_spill] sm:$0xff] %v12553_v8  ;;  %v12565_v51 = vadd.f32 %v9417_v5, %v12432_v11  ;;  %3813 = vadd.xlane.f32.xlu0 %v3812_v21  ;;  %v3503_v22 = vpop.f32.mrb[23].mxu0  ;;  %v3646_v11 = vsel %vm1041_vm4, %v12523_v42, 0.0  ;;  %v3667_v39 = vsel %vm1041_vm4, %v12553_v8, 0.0  ;;  %v3768_v53 = vmul.f32 %v12553_v8, %v12553_v8 }
 0x342   : > { %15473 = vst [vmem:[#allocation32_spill] sm:$0xff] %v12559_v25  ;;  %v12568_v59 = vadd.f32 %v3503_v22, %v12434_v1 }
 0x343   : > { %15474 = vst [vmem:[#allocation33_spill] sm:$0xff] %v12565_v51 }
 0x344   : > { %15475 = vst [vmem:[#allocation34_spill] sm:$0xff] %v12568_v59  ;;  %3810 = vadd.xlane.f32.xlu1 %v3809_v27  ;;  %v3655_v27 = vsel %vm1041_vm4, %v12532_v12, 0.0 }
 0x345   : > { %3807 = vadd.xlane.f32.xlu0 %v3806_v19 }
 0x346   : > { %v9420_v40 = vpop.f32.mrb[24].mxu0 }
 0x347   : > { %v12573_v0 = vadd.f32 %v9420_v40, %v12436_v14  ;;  %v3516_v34 = vpop.f32.mrb[25].mxu0 }
 0x348   : > { %v12578_v26 = vadd.f32 %v3516_v34, %v12438_v23  ;;  %3647 = vadd.xlane.f32.xlu1 %v3646_v11  ;;  %v9421_v1 = vpop.f32.mrb[26].mxu0  ;;  %v3761_v23 = vmul.f32 %v12523_v42, %v12523_v42  ;;  %v3652_v34 = vsel %vm1041_vm4, %v12542_v43, 0.0  ;;  %v3649_v11 = vsel %vm1041_vm4, %v12534_v62, 0.0 }
 0x349   : > { %15476 = vst [vmem:[#allocation35_spill] sm:$0xff] %v12573_v0  ;;  %v12583_v63 = vadd.f32 %v9421_v1, %v12440_v58  ;;  %3644 = vadd.xlane.f32.xlu0 %v3643_v17  ;;  %v3519_v13 = vpop.f32.mrb[27].mxu0  ;;  %v3764_v1 = vmul.f32 %v12532_v12, %v12532_v12 }
 0x34a   : > { %15477 = vst [vmem:[#allocation38_spill] sm:$0xff] %v12578_v26  ;;  %v12586_v14 = vadd.f32 %v3519_v13, %v12442_v44  ;;  %v3827_v6 = vsel %vm1041_vm4, %v3761_v23, 0.0  ;;  %v3762_v13 = vmul.f32 %v12534_v62, %v12534_v62 }
 0x34b   : > { %15478 = vst [vmem:[#allocation41_spill] sm:$0xff] %v12583_v63  ;;  %v3836_v17 = vsel %vm1041_vm4, %v3764_v1, 0.0 }
 0x34c   : > { %15479 = vst [vmem:[#allocation46_spill] sm:$0xff] %v12586_v14  ;;  %3641 = vadd.xlane.f32.xlu1 %v3640_v16  ;;  %v3830_v23 = vsel %vm1041_vm4, %v3762_v13, 0.0  ;;  %v3771_v1 = vmul.f32 %v12586_v14, %v12586_v14 }
 0x34d   : > { %3638 = vadd.xlane.f32.xlu0 %v3637_v41  ;;  %v3670_v41 = vsel %vm1041_vm4, %v12565_v51, 0.0 }
 0x34e   : > { %v9424_v58 = vpop.f32.mrb[28].mxu0 }
 0x34f   : > { %v12597_v36 = vadd.f32 %v9424_v58, %v12444_v24  ;;  %v3532_v44 = vpop.f32.mrb[29].mxu0  ;;  %v3664_v58 = vsel %vm1041_vm4, %v12568_v59, 0.0 }
 0x350   : > { %v12603_v52 = vadd.f32 %v3532_v44, %v12446_v37  ;;  %3828 = vadd.xlane.f32.xlu1 %v3827_v6  ;;  %v9425_v33 = vpop.f32.mrb[30].mxu0  ;;  %v3818_v37 = vsel %vm1041_vm4, %v3758_v48, 0.0  ;;  %v3769_v44 = vmul.f32 %v12565_v51, %v12565_v51  ;;  %v3661_v6 = vsel %vm1041_vm4, %v12559_v25, 0.0 }
 0x351   : > { %15480 = vst [vmem:[#allocation49_spill] sm:$0xff] %v12597_v36  ;;  %v12609_v4 = vadd.f32 %v9425_v33, %v12448_v18  ;;  %3825 = vadd.xlane.f32.xlu0 %v3824_v57  ;;  %v3535_v24 = vpop.f32.mrb[31].mxu0  ;;  %v3658_v18 = vsel %vm1041_vm4, %v12538_v46, 0.0  ;;  %v3767_v57 = vmul.f32 %v12568_v59, %v12568_v59  ;;  %v3848_v48 = vsel %vm1041_vm4, %v3768_v53, 0.0 }
 0x352   : > { %15481 = vst [vmem:[#allocation53_spill] sm:$0xff] %v12603_v52  ;;  %v12612_v2 = vadd.f32 %v3535_v24, %v12450_v9  ;;  %v3851_v33 = vsel %vm1041_vm4, %v3769_v44, 0.0  ;;  %v3766_v24 = vmul.f32 %v12559_v25, %v12559_v25  ;;  %v3774_v44 = vmul.f32 %v12603_v52, %v12603_v52 }
 0x353   : > { %15482 = vst [vmem:[#allocation4_spill] sm:$0xff] %v12609_v4  ;;  %v3777_v53 = vmul.f32 %v12609_v4, %v12609_v4 }
 0x354   : > { %15483 = vst [vmem:[#allocation9_spill] sm:$0xff] %v12612_v2  ;;  %3822 = vadd.xlane.f32.xlu1 %v3821_v49  ;;  %v3845_v49 = vsel %vm1041_vm4, %v3767_v57, 0.0  ;;  %v3776_v57 = vmul.f32 %v12597_v36, %v12597_v36 }
 0x355   : > { %3819 = vadd.xlane.f32.xlu0 %v3818_v37  ;;  %v3842_v37 = vsel %vm1041_vm4, %v3766_v24, 0.0 }
 0x356   : > { %v9428_v5 = vpop.f32.mrb[32].mxu0  ;;  %v3872_v24 = vsel %vm1041_vm4, %v3776_v57, 0.0 }
 0x357   : > { %v12617_v21 = vadd.f32 %v9428_v5, %v12452_v54  ;;  %v3548_v3 = vpop.f32.mrb[33].mxu0  ;;  %v3682_v5 = vsel %vm1041_vm4, %v12583_v63, 0.0 }
 0x358   : > { %v12622_v22 = vadd.f32 %v3548_v3, %v12454_v45  ;;  %3659 = vadd.xlane.f32.xlu1 %v3658_v18  ;;  %v9429_v9 = vpop.f32.mrb[34].mxu0  ;;  %v3765_v45 = vmul.f32 %v12538_v46, %v12538_v46  ;;  %v5110_v3 = vld [vmem:[%s14958_s4 + $0x4] sm:$0xf]  ;;  %v3679_v18 = vsel %vm1041_vm4, %v12573_v0, 0.0 }
 0x359   : > { %15484 = vst [vmem:[#allocation11_spill] sm:$0xff] %v12617_v21  ;;  %v12627_v19 = vadd.f32 %v9429_v9, %v12456_v30  ;;  %3656 = vadd.xlane.f32.xlu0 %v3655_v27  ;;  %v3551_v40 = vpop.f32.mrb[35].mxu0  ;;  %10292 = vmatprep.subr.msk.bf16.mxu1 %vm1096_vm0, %v5110_v3  ;;  %v5160_v9 = vsel %vm1096_vm0, %v5110_v3, 0  ;;  %v3676_v27 = vsel %vm1041_vm4, %v12586_v14, 0.0 }
 0x35a   : > { %15485 = vst [vmem:[#allocation13_spill] sm:$0xff] %v12622_v22  ;;  %v12630_v54 = vadd.f32 %v3551_v40, %v12458_v35  ;;  %v3839_v30 = vsel %vm1041_vm4, %v3765_v45, 0.0  ;;  %v3763_v35 = vmul.f32 %v12542_v43, %v12542_v43  ;;  %9431 = vmatpush3.bf16.msra.mxu1 %v5160_v9  ;;  %v3773_v40 = vmul.f32 %v12583_v63, %v12583_v63 }
 0x35b   : > { %15486 = vst [vmem:[#allocation19_spill] sm:$0xff] %v12627_v19  ;;  %v3772_v45 = vmul.f32 %v12573_v0, %v12573_v0  ;;  %v3778_v3 = vmul.f32 %v12622_v22, %v12622_v22 }
 0x35c   : > { %15487 = vst [vmem:[#allocation20_spill] sm:$0xff] %v12630_v54  ;;  %3653 = vadd.xlane.f32.xlu1 %v3652_v34  ;;  %v3833_v16 = vsel %vm1041_vm4, %v3763_v35, 0.0  ;;  %v3673_v34 = vsel %vm1041_vm4, %v12578_v26, 0.0  ;;  %v3770_v35 = vmul.f32 %v12578_v26, %v12578_v26 }
 0x35d   : > { %3650 = vadd.xlane.f32.xlu0 %v3649_v11  ;;  %v3863_v11 = vsel %vm1041_vm4, %v3773_v40, 0.0  ;;  %v3878_v9 = vsel %vm1041_vm4, %v3778_v3, 0.0  ;;  %v3781_v40 = vmul.f32 %v12627_v19, %v12627_v19 }
 0x35e   : > { %v3854_v13 = vsel %vm1041_vm4, %v3770_v35, 0.0 }
 0x360   : > { %3840 = vadd.xlane.f32.xlu1 %v3839_v30  ;;  %v3860_v30 = vsel %vm1041_vm4, %v3772_v45, 0.0  ;;  %v3780_v45 = vmul.f32 %v12617_v21, %v12617_v21 }
 0x361   : > { %3837 = vadd.xlane.f32.xlu0 %v3836_v17  ;;  %v3857_v17 = vsel %vm1041_vm4, %v3771_v1, 0.0 }
 0x362   : > { %v3884_v1 = vsel %vm1041_vm4, %v3780_v45, 0.0 }
 0x364   : > { %3834 = vadd.xlane.f32.xlu1 %v3833_v16  ;;  %v3694_v16 = vsel %vm1041_vm4, %v12609_v4, 0.0 }
 0x365   : > { %3831 = vadd.xlane.f32.xlu0 %v3830_v23  ;;  %v3691_v23 = vsel %vm1041_vm4, %v12597_v36, 0.0 }
 0x368   : > { %3671 = vadd.xlane.f32.xlu1 %v3670_v41  ;;  %v3688_v41 = vsel %vm1041_vm4, %v12612_v2, 0.0 }
 0x369   : > { %3668 = vadd.xlane.f32.xlu0 %v3667_v39  ;;  %v3775_v39 = vmul.f32 %v12612_v2, %v12612_v2 }
 0x36c   : > { %3665 = vadd.xlane.f32.xlu1 %v3664_v58  ;;  %v3685_v58 = vsel %vm1041_vm4, %v12603_v52, 0.0 }
 0x36d   : > { %3662 = vadd.xlane.f32.xlu0 %v3661_v6  ;;  %v3869_v6 = vsel %vm1041_vm4, %v3775_v39, 0.0 }
 0x370   : > { %3852 = vadd.xlane.f32.xlu1 %v3851_v33  ;;  %v3866_v33 = vsel %vm1041_vm4, %v3774_v44, 0.0 }
 0x371   : > { %3849 = vadd.xlane.f32.xlu0 %v3848_v48  ;;  %v3875_v48 = vsel %vm1041_vm4, %v3777_v53, 0.0 }
 0x374   : > { %3846 = vadd.xlane.f32.xlu1 %v3845_v49  ;;  %v3700_v49 = vsel %vm1041_vm4, %v12630_v54, 0.0 }
 0x375   : > { %3843 = vadd.xlane.f32.xlu0 %v3842_v37  ;;  %v3779_v37 = vmul.f32 %v12630_v54, %v12630_v54 }
 0x378   : > { %3683 = vadd.xlane.f32.xlu1 %v3682_v5  ;;  %v3697_v5 = vsel %vm1041_vm4, %v12622_v22, 0.0 }
 0x379   : > { %3680 = vadd.xlane.f32.xlu0 %v3679_v18  ;;  %v3881_v18 = vsel %vm1041_vm4, %v3779_v37, 0.0 }
 0x37c   : > { %3677 = vadd.xlane.f32.xlu1 %v3676_v27  ;;  %v3706_v27 = vsel %vm1041_vm4, %v12627_v19, 0.0 }
 0x37d   : > { %3674 = vadd.xlane.f32.xlu0 %v3673_v34  ;;  %v3703_v34 = vsel %vm1041_vm4, %v12617_v21, 0.0 }
 0x380   : > { %3864 = vadd.xlane.f32.xlu1 %v3863_v11  ;;  %v3887_v11 = vsel %vm1041_vm4, %v3781_v40, 0.0 }
 0x381   : > { %3861 = vadd.xlane.f32.xlu0 %v3860_v30 }
 0x384   : > { %3858 = vadd.xlane.f32.xlu1 %v3857_v17 }
 0x385   : > { %3855 = vadd.xlane.f32.xlu0 %v3854_v13 }
 0x388   : > { %3695 = vadd.xlane.f32.xlu1 %v3694_v16 }
 0x389   : > { %3692 = vadd.xlane.f32.xlu0 %v3691_v23 }
 0x38c   : > { %3689 = vadd.xlane.f32.xlu1 %v3688_v41 }
 0x38d   : > { %3686 = vadd.xlane.f32.xlu0 %v3685_v58 }
 0x390   : > { %3870 = vadd.xlane.f32.xlu1 %v3869_v6 }
 0x391   : > { %3867 = vadd.xlane.f32.xlu0 %v3866_v33 }
 0x394   : > { %3876 = vadd.xlane.f32.xlu1 %v3875_v48 }
 0x395   : > { %3873 = vadd.xlane.f32.xlu0 %v3872_v24 }
 0x398   : > { %3701 = vadd.xlane.f32.xlu1 %v3700_v49 }
 0x399   : > { %3698 = vadd.xlane.f32.xlu0 %v3697_v5 }
 0x39c   : > { %3882 = vadd.xlane.f32.xlu1 %v3881_v18 }
 0x39d   : > { %3879 = vadd.xlane.f32.xlu0 %v3878_v9 }
 0x3a0   : > { %3707 = vadd.xlane.f32.xlu1 %v3706_v27 }
 0x3a1   : > { %3704 = vadd.xlane.f32.xlu0 %v3703_v34 }
 0x3a4   : > { %3888 = vadd.xlane.f32.xlu1 %v3887_v11 }
 0x3a5   : > { %v3609_v30 = vpop.xlane.xlu1 %3608  ;;  %3885 = vadd.xlane.f32.xlu0 %v3884_v1 }
 0x3a6   : > { %v3603_v35 = vpop.xlane.xlu0 %3602  ;;  %v3712_v17 = vmul.f32 0.125, %v3609_v30 }
 0x3a7   : > { %v12733_v57 = vmul.f32 0.125, %v3603_v35 }
 0x3a8   : > { %v3928_v41 = vmul.f32 %v3712_v17, %v3712_v17 }
 0x3a9   : > { %v3612_v13 = vpop.xlane.xlu1 %3611  ;;  %v3926_v40 = vmul.f32 %v12733_v57, %v12733_v57 }
 0x3aa   : > { %v3713_v16 = vmul.f32 0.125, %v3612_v13  ;;  %v3790_v23 = vpop.xlane.xlu0 %3789 }
 0x3ab   : > { %v3892_v39 = vmul.f32 0.125, %v3790_v23 }
 0x3ac   : > { %v3929_v6 = vmul.f32 %v3713_v16, %v3713_v16 }
 0x3ad   : > { %v3964_v58 = vsub.f32 %v3892_v39, %v3928_v41  ;;  %v3793_v44 = vpop.xlane.xlu1 %3792 }
 0x3ae   : > { %v3893_v53 = vmul.f32 0.125, %v3793_v44  ;;  %v3606_v33 = vpop.xlane.xlu0 %3605 }
 0x3af   : > { %v4000_v48 = vmax.f32 %v3964_v58, 0.0  ;;  %v3711_v24 = vmul.f32 0.125, %v3606_v33  ;;  %v12741_v33 = vld [vmem:[%s14956_s2] ss:$0 sm:$0xff] }
 0x3b0   : > { %v3965_v49 = vsub.f32 %v3893_v53, %v3929_v6  ;;  %v4036_v6 = vsub.f32 %v12460_v28, %v3712_v17  ;;  %v12751_v28 = vld [vmem:[%s14957_s3] ss:$0 sm:$0xff] }
 0x3b1   : > { %v4072_v37 = vadd.f32 1e-05, %v4000_v48  ;;  %v3927_v5 = vmul.f32 %v3711_v24, %v3711_v24  ;;  %v3787_v3 = vpop.xlane.xlu1 %3786 }
 0x3b2   : > { %v4001_v18 = vmax.f32 %v3965_v49, 0.0  ;;  %v3891_v9 = vmul.f32 0.125, %v3787_v3  ;;  %v3784_v27 = vpop.xlane.xlu0 %3783  ;;  %v4514_v49 = vlaneseq }
 0x3b3   : > { %10328 = vrsqrt.f32 %v4072_v37  ;;  %v3890_v34 = vmul.f32 0.125, %v3784_v27 }
 0x3b4   : > { %v4073_v45 = vadd.f32 1e-05, %v4001_v18  ;;  %v3963_v11 = vsub.f32 %v3891_v9, %v3927_v5  ;;  %v4037_v9 = vsub.f32 %v12466_v20, %v3713_v16 }
 0x3b5   : > { %v3962_v1 = vsub.f32 %v3890_v34, %v3926_v40  ;;  %v3624_v30 = vpop.xlane.xlu1 %3623 }
 0x3b6   : > { %10330 = vrsqrt.f32 %v4073_v45  ;;  %v3999_v35 = vmax.f32 %v3963_v11, 0.0  ;;  %v3621_v13 = vpop.xlane.xlu0 %3620  ;;  %v4035_v11 = vsub.f32 %v12472_v31, %v3711_v24 }
 0x3b7   : > { %v3998_v23 = vmax.f32 %v3962_v1, 0.0  ;;  %v12743_v5 = vmul.f32 0.125, %v3621_v13  ;;  %v12757_v1 = vmul.f32 0.125, %v3624_v30  ;;  %v12759_v13 = vshrl.u32 %v4514_v49, 7 }
 0x3b8   : > { %v4071_v41 = vadd.f32 1e-05, %v3999_v35 }
 0x3b9   : > { %v4070_v39 = vadd.f32 1e-05, %v3998_v23  ;;  %v3618_v58 = vpop.xlane.xlu1 %3617  ;;  %15488 = vst [vmem:[#allocation25_spill] sm:$0xff] %v12759_v13  ;;  %v3932_v16 = vmul.f32 %v12743_v5, %v12743_v5  ;;  %v4040_v4 = vsub.f32 %v12479_v7, %v12743_v5 }
 0x3ba   : > { %10332 = vrsqrt.f32 %v4071_v41  ;;  %v3615_v44 = vpop.xlane.xlu0 %3614  ;;  %v12745_v3 = vmul.f32 0.125, %v3618_v58 }
 0x3bb   : > { %10334 = vrsqrt.f32 %v4070_v39  ;;  %v12753_v17 = vmul.f32 0.125, %v3615_v44 }
 0x3bc   : > { %v3931_v23 = vmul.f32 %v12745_v3, %v12745_v3 }
 0x3bd   : > { %v10329_v53 = vpop.eup %10328  ;;  %v3805_v48 = vpop.xlane.xlu1 %3804  ;;  %v3930_v31 = vmul.f32 %v12753_v17, %v12753_v17 }
 0x3be   : > { %v4144_v37 = vmul.f32 %v10329_v53, %v4036_v6  ;;  %v3802_v18 = vpop.xlane.xlu0 %3801  ;;  %v3897_v24 = vmul.f32 0.125, %v3805_v48  ;;  %v4034_v6 = vsub.f32 %v12462_v29, %v12733_v57 }
 0x3bf   : > { %v3896_v34 = vmul.f32 0.125, %v3802_v18 }
 0x3c0   : > { %v10331_v27 = vpop.eup %10330  ;;  %v4186_v40 = vmul.f32 %v12741_v33, %v4144_v37 }
 0x3c1   : > { %v4145_v45 = vmul.f32 %v10331_v27, %v4037_v9  ;;  %v3799_v35 = vpop.xlane.xlu1 %3798  ;;  %v3968_v49 = vsub.f32 %v3896_v34, %v3932_v16 }
 0x3c2   : > { %v12762_v20 = vadd.f32 %v12751_v28, %v4186_v40  ;;  %v3895_v41 = vmul.f32 0.125, %v3799_v35  ;;  %v3796_v39 = vpop.xlane.xlu0 %3795  ;;  %v3933_v40 = vmul.f32 %v12757_v1, %v12757_v1 }
 0x3c3   : > { %v4187_v58 = vmul.f32 %v12741_v33, %v4145_v45  ;;  %v3894_v30 = vmul.f32 0.125, %v3796_v39 }
 0x3c4   : > { %v10333_v44 = vpop.eup %10332  ;;  %v8485_v53 = vmul.f32 -1.442695, %v12762_v20  ;;  %v3967_v37 = vsub.f32 %v3895_v41, %v3931_v23  ;;  %v3969_v34 = vsub.f32 %v3897_v24, %v3933_v40  ;;  %v4004_v41 = vmax.f32 %v3968_v49, 0.0 }
 0x3c5   : > { %v10335_v18 = vpop.eup %10334  ;;  %v12775_v9 = vadd.f32 %v12751_v28, %v4187_v58  ;;  %v4143_v27 = vmul.f32 %v10333_v44, %v4035_v11  ;;  %v3966_v45 = vsub.f32 %v3894_v30, %v3930_v31  ;;  %v3636_v35 = vpop.xlane.xlu1 %3635  ;;  %v4520_v31 = vadd.s32 4294967295, %v12759_v13 }
 0x3c6   : > { %10336 = vpow2.f32 %v8485_v53  ;;  %v4142_v48 = vmul.f32 %v10335_v18, %v4034_v6  ;;  %v4003_v39 = vmax.f32 %v3967_v37, 0.0  ;;  %v3633_v19 = vpop.xlane.xlu0 %3632  ;;  %v4005_v37 = vmax.f32 %v3969_v34, 0.0 }
 0x3c7   : > { %v8486_v29 = vmul.f32 -1.442695, %v12775_v9  ;;  %v4185_v57 = vmul.f32 %v12741_v33, %v4143_v27  ;;  %v4002_v16 = vmax.f32 %v3966_v45, 0.0  ;;  %v4076_v24 = vadd.f32 1e-05, %v4004_v41 }
 0x3c8   : > { %v4184_v23 = vmul.f32 %v12741_v33, %v4142_v48  ;;  %v4075_v11 = vadd.f32 1e-05, %v4003_v39  ;;  %vm4523_vm11 = vcmp.ge.s32.totalorder %v4520_v31, 0  ;;  %v12794_v45 = vsub.s32 1, %v12759_v13 }
 0x3c9   : > { %10338 = vpow2.f32 %v8486_v29  ;;  %v4074_v58 = vadd.f32 1e-05, %v4002_v16  ;;  %v12782_v44 = vpop.xlane.xlu1 %3629  ;;  %v12789_v53 = vadd.f32 %v12751_v28, %v4185_v57  ;;  %v4077_v39 = vadd.f32 1e-05, %v4005_v37 }
 0x3ca   : > { %v3627_v30 = vpop.xlane.xlu0 %3626  ;;  %v12786_v6 = vadd.f32 %v12751_v28, %v4184_v23  ;;  %15489 = vst [vmem:[#allocation27_spill] sm:$0xff] %v12794_v45  ;;  %v15183_v29 = vmov 0   ;;  %v12812_v52 = vmul.f32 0.125, %v3633_v19 }
 0x3cb   : > { %10340 = vrsqrt.f32 %v4074_v58  ;;  %v8484_v49 = vmul.f32 -1.442695, %v12789_v53  ;;  %v12797_v57 = vsel %vm4523_vm11, 1, %v15183_v29  ;;  %v12806_v37 = vmul.f32 0.125, %v3627_v30 }
 0x3cc   : > { %v8483_v18 = vmul.f32 -1.442695, %v12786_v6  ;;  %10342 = vrsqrt.f32 %v4075_v11  ;;  %v12800_v11 = vsub.s32 0, %v12759_v13  ;;  %v4542_v58 = vrot.slane %v12797_v57, %v12794_v45 }
 0x3cd   : > { %v3817_v27 = vpop.xlane.xlu1 %3816  ;;  %v3934_v30 = vmul.f32 %v12806_v37, %v12806_v37 }
 0x3ce   : > { %v3814_v40 = vpop.xlane.xlu0 %3813  ;;  %10344 = vpow2.f32 %v8483_v18  ;;  %15490 = vst [vmem:[#allocation28_spill] sm:$0xff] %v12800_v11  ;;  %v12804_v18 = vmul.f32 0.125, %v3636_v35  ;;  %vm12820_vm12 = vcmp.ne.s32.totalorder %v4542_v58, 0 }
 0x3cf   : > { %10346 = vpow2.f32 %v8484_v49  ;;  %v4038_v49 = vsub.f32 %v12481_v55, %v12753_v17  ;;  %v4538_v55 = vrot.slane %v12797_v57, %v12800_v11  ;;  %v3900_v19 = vmul.f32 0.125, %v3814_v40  ;;  %v12839_v40 = vld [vmem:[%s14958_s4] sm:$0xf] }
 0x3d0   : > { %v10337_v48 = vpop.eup %10336  ;;  %10348 = vrsqrt.f32 %v4076_v24  ;;  %v3937_v35 = vmul.f32 %v12804_v18, %v12804_v18  ;;  %10293 = vmatprep.subr.msk.bf16.mxu1 %vm1096_vm0, %v12839_v40 }
 0x3d1   : > { %v4372_v34 = vadd.f32 1.0, %v10337_v48  ;;  %v3811_v16 = vpop.xlane.xlu1 %3810  ;;  %vm12873_vm13 = vcmp.ne.s32.totalorder %v4538_v55, 0 }
 0x3d2   : > { %v3808_v23 = vpop.xlane.xlu0 %3807 }
 0x3d3   : > { %v10339_v41 = vpop.eup %10338  ;;  %10350 = vrcp.f32 %v4372_v34  ;;  %v3901_v34 = vmul.f32 0.125, %v3817_v27  ;;  %v3898_v29 = vmul.f32 0.125, %v3808_v23 }
 0x3d4   : > { %v4373_v31 = vadd.f32 1.0, %v10339_v41  ;;  %10352 = vrsqrt.f32 %v4077_v39  ;;  %v4039_v39 = vsub.f32 %v12492_v61, %v12745_v3  ;;  %v3936_v61 = vmul.f32 %v12812_v52, %v12812_v52 }
 0x3d5   : > { %v10341_v24 = vpop.eup %10340  ;;  %v12810_v48 = vpop.xlane.xlu1 %3647  ;;  %v3973_v45 = vsub.f32 %v3901_v34, %v3937_v35  ;;  %v3970_v2 = vsub.f32 %v3898_v29, %v3934_v30  ;;  %v15197_v3 = vsub.s32 4, %v12759_v13  ;;  %v12842_v29 = vmul.f32 0.125, %v12782_v44 }
 0x3d6   : > { %10354 = vrcp.f32 %v4373_v31  ;;  %v3645_v21 = vpop.xlane.xlu0 %3644  ;;  %v10343_v54 = vpop.eup %10342  ;;  %v4146_v22 = vmul.f32 %v10341_v24, %v4038_v49  ;;  %v15199_v31 = vsub.s32 2, %v12759_v13  ;;  %v15198_v24 = vsub.s32 3, %v12759_v13 }
 0x3d7   : > { %v4147_v34 = vmul.f32 %v10343_v54, %v4039_v39  ;;  %v3972_v5 = vsub.f32 %v3900_v19, %v3936_v61  ;;  %v3899_v44 = vmul.f32 0.125, %v3811_v16  ;;  %v4006_v39 = vmax.f32 %v3970_v2, 0.0 }
 0x3d8   : > { %v10345_v41 = vpop.eup %10344  ;;  %v4188_v26 = vmul.f32 %v12741_v33, %v4146_v22  ;;  %v12850_v30 = vrot.slane %v12797_v57, %v15199_v31  ;;  %v3935_v61 = vmul.f32 %v12842_v29, %v12842_v29  ;;  %v12885_v55 = vmul.f32 0.125, %v12810_v48 }
 0x3d9   : > { %v10347_v27 = vpop.eup %10346  ;;  %v12826_v23 = vpop.xlane.xlu1 %3641  ;;  %v4370_v11 = vadd.f32 1.0, %v10345_v41  ;;  %v12855_v41 = vrot.slane %v12797_v57, %v15198_v24  ;;  %v4189_v16 = vmul.f32 %v12741_v33, %v4147_v34  ;;  %v4078_v14 = vadd.f32 1e-05, %v4006_v39 }
 0x3da   : > { %v10349_v49 = vpop.eup %10348  ;;  %v3639_v36 = vpop.xlane.xlu0 %3638  ;;  %v4371_v58 = vadd.f32 1.0, %v10347_v27  ;;  %v4009_v27 = vmax.f32 %v3973_v45, 0.0  ;;  %v12866_v45 = vrot.slane %v12797_v57, %v15197_v3  ;;  %v4008_v3 = vmax.f32 %v3972_v5, 0.0 }
 0x3db   : > { %10356 = vrcp.f32 %v4370_v11  ;;  %v4148_v22 = vmul.f32 %v10349_v49, %v4040_v4  ;;  %v4041_v4 = vsub.f32 %v12486_v32, %v12757_v1  ;;  %v12861_v49 = vadd.f32 %v12751_v28, %v4188_v26 }
 0x3dc   : > { %10358 = vrcp.f32 %v4371_v58  ;;  %v15495_v26 = vsub.s32 5, %v12759_v13  ;;  %v4081_v31 = vadd.f32 1e-05, %v4009_v27  ;;  %v3971_v58 = vsub.f32 %v3899_v44, %v3935_v61 }
 0x3dd   : > { %v10351_v7 = vpop.eup %10350  ;;  %v3829_v35 = vpop.xlane.xlu1 %3828  ;;  %v12887_v63 = vmul.f32 0.125, %v3645_v21  ;;  %v12894_v5 = vmul.f32 0.125, %v3639_v36  ;;  %v12897_v44 = vadd.f32 %v12751_v28, %v4189_v16  ;;  %10360 = vrsqrt.f32 %v4078_v14 }
 0x3de   : > { %v10353_v54 = vpop.eup %10352  ;;  %v3826_v11 = vpop.xlane.xlu0 %3825  ;;  %v4480_v19 = vmul.f32 %v10351_v7, %v12762_v20  ;;  %v12880_v1 = vrot.slane %v12797_v57, %v15495_v26  ;;  %v4190_v7 = vmul.f32 %v12741_v33, %v4148_v22  ;;  %v8487_v22 = vmul.f32 -1.442695, %v12861_v49 }
 0x3df   : > { %v4149_v20 = vmul.f32 %v10353_v54, %v4041_v4  ;;  %v3904_v39 = vmul.f32 0.125, %v3826_v11  ;;  %v3941_v36 = vmul.f32 %v12885_v55, %v12885_v55  ;;  %v4007_v61 = vmax.f32 %v3971_v58, 0.0 }
 0x3e0   : > { %v10355_v2 = vpop.eup %10354  ;;  %15496 = vst [vmem:[#allocation3_spill] sm:$0xff] %v12880_v1  ;;  %v4663_v26 = vsel %vm12820_vm12, %v4480_v19, 0.0  ;;  %v12903_v4 = vadd.f32 %v12751_v28, %v4190_v7  ;;  %v4080_v19 = vadd.f32 1e-05, %v4008_v3  ;;  %v3940_v11 = vmul.f32 %v12887_v63, %v12887_v63 }
 0x3e1   : > { %v3823_v34 = vpop.xlane.xlu1 %3822  ;;  %v4481_v24 = vmul.f32 %v10355_v2, %v12775_v9  ;;  %v3905_v9 = vmul.f32 0.125, %v3829_v35  ;;  %v4191_v48 = vmul.f32 %v12741_v33, %v4149_v20  ;;  %v12913_v20 = vmul.f32 0.125, %v12826_v23 }
 0x3e2   : > { %v3820_v0 = vpop.xlane.xlu0 %3819  ;;  %10362 = vpow2.f32 %v8487_v22  ;;  %v3938_v3 = vmul.f32 %v12894_v5, %v12894_v5  ;;  %v3976_v7 = vsub.f32 %v3904_v39, %v3940_v11  ;;  %v8489_v23 = vmul.f32 -1.442695, %v12903_v4 }
 0x3e3   : > { %v4664_v54 = vsel %vm12820_vm12, %v4481_v24, 0.0  ;;  %v3902_v35 = vmul.f32 0.125, %v3820_v0  ;;  %10364 = vrsqrt.f32 %v4081_v31  ;;  %v3977_v14 = vsub.f32 %v3905_v9, %v3941_v36 }
 0x3e4   : > { %v4698_v27 = vpack.c.bf16 %v4664_v54, %v4663_v26  ;;  %v8488_v0 = vmul.f32 -1.442695, %v12897_v44  ;;  %v12922_v54 = vadd.f32 %v12751_v28, %v4191_v48  ;;  %v3903_v22 = vmul.f32 0.125, %v3823_v34 }
 0x3e5   : > { %v12900_v21 = vpop.xlane.xlu1 %3659  ;;  %v10357_v24 = vpop.eup %10356  ;;  %v3974_v31 = vsub.f32 %v3902_v35, %v3938_v3  ;;  %10366 = vrsqrt.f32 %v4080_v19  ;;  %v4079_v1 = vadd.f32 1e-05, %v4007_v61  ;;  %v3939_v39 = vmul.f32 %v12913_v20, %v12913_v20 }
 0x3e6   : > { %v12908_v2 = vpop.xlane.xlu0 %3656  ;;  %v10359_v16 = vpop.eup %10358  ;;  %v4478_v58 = vmul.f32 %v10357_v24, %v12786_v6  ;;  %v4723_v36 = vshrl.u32 %v4698_v27, 16  ;;  %v4013_v24 = vmax.f32 %v3977_v14, 0.0  ;;  %10368 = vpow2.f32 %v8488_v0 }
 0x3e7   : > { %v4479_v9 = vmul.f32 %v10359_v16, %v12789_v53  ;;  %v4012_v34 = vmax.f32 %v3976_v7, 0.0  ;;  %v8490_v53 = vmul.f32 -1.442695, %v12922_v54  ;;  %v15208_v19 = vsub.s32 7, %v12759_v13  ;;  %v10361_v7 = vpop.eup %10360 }
 0x3e8   : > { %v4661_v6 = vsel %vm12873_vm13, %v4478_v58, 0.0  ;;  %v4725_v11 = vrot.slane %v4723_v36, 7  ;;  %v3975_v16 = vsub.f32 %v3903_v22, %v3939_v39  ;;  %v4010_v61 = vmax.f32 %v3974_v31, 0.0 }
 0x3e9   : > { %v12918_v26 = vpop.xlane.xlu1 %3653  ;;  %v4662_v48 = vsel %vm12873_vm13, %v4479_v9, 0.0  ;;  %v4726_v59 = vshll.u32 %v4698_v27, 16  ;;  %10370 = vpow2.f32 %v8489_v23  ;;  %v4044_v14 = vsub.f32 %v12496_v50, %v12812_v52 }
 0x3ea   : > { %v12925_v17 = vpop.xlane.xlu0 %3650  ;;  %v4697_v3 = vpack.c.bf16 %v4662_v48, %v4661_v6  ;;  %10372 = vrsqrt.f32 %v4079_v1  ;;  %v4042_v58 = vsub.f32 %v12498_v38, %v12806_v37  ;;  %v4085_v9 = vadd.f32 1e-05, %v4013_v24 }
 0x3eb   : > { %v4728_v36 = vor.u32 %v4726_v59, %v4725_v11  ;;  %v15497_v22 = vsub.s32 6, %v12759_v13  ;;  %v4084_v23 = vadd.f32 1e-05, %v4012_v34  ;;  %10374 = vpow2.f32 %v8490_v53 }
 0x3ec   : > { %v4716_v0 = vshrl.u32 %v4697_v3, 16  ;;  %v10363_v27 = vpop.eup %10362  ;;  %v4719_v52 = vshll.u32 %v4697_v3, 16  ;;  %v4011_v48 = vmax.f32 %v3975_v16, 0.0  ;;  %v4082_v38 = vadd.f32 1e-05, %v4010_v61 }
 0x3ed   : > { %v3841_v35 = vpop.xlane.xlu1 %3840  ;;  %v12945_v31 = vrot.slane %v12797_v57, %v15497_v22  ;;  %v10365_v1 = vpop.eup %10364  ;;  %v12956_v59 = vrot.slane %v12797_v57, %v15208_v19  ;;  %v4150_v61 = vmul.f32 %v10361_v7, %v4042_v58  ;;  %10376 = vrsqrt.f32 %v4085_v9 }
 0x3ee   : > { %v3838_v25 = vpop.xlane.xlu0 %3837  ;;  %v4718_v50 = vrot.slane %v4716_v0, 7  ;;  %v12972_v57 = vsel %vm12966_vm1, 0, %v4728_v36  ;;  %v4374_v0 = vadd.f32 1.0, %v10363_v27  ;;  %10378 = vrsqrt.f32 %v4084_v23 }
 0x3ef   : > { %15498 = vst [vmem:[#allocation58_spill] sm:$0xff] %v12945_v31  ;;  %15499 = vst [vmem:[#allocation59_spill] sm:$0xff] %v12956_v59  ;;  %v10367_v22 = vpop.eup %10366  ;;  %v12975_v19 = vmul.f32 0.125, %v12900_v21  ;;  %v12984_v3 = vsel %vm1096_vm0, %v12839_v40, 0  ;;  %v15503_v58 = vsub.f32 %v12502_v47, %v12804_v18  ;;  %v4083_v36 = vadd.f32 1e-05, %v4011_v48 }
 0x3f0   : > { %v4721_v53 = vor.u32 %v4719_v52, %v4718_v50  ;;  %15502 = vst [vmem:[#allocation60_spill] sm:$0xff] %v12972_v57  ;;  %v12978_v52 = vmul.f32 0.125, %v12908_v2  ;;  %v10369_v7 = vpop.eup %10368  ;;  %10380 = vrsqrt.f32 %v4082_v38  ;;  %v3909_v27 = vmul.f32 0.125, %v3841_v35 }
 0x3f1   : > { %v12947_v39 = vpop.xlane.xlu1 %3834  ;;  %v12989_v9 = vmul.f32 %v10365_v1, %v15503_v58  ;;  %v12999_v40 = vsel %vm12966_vm1, %v4718_v50, 0  ;;  %v13003_v23 = vsel %vm12966_vm1, %v4725_v11, 0  ;;  %v4933_v47 = vshll.u32 %v12972_v57, 16 }
 0x3f2   : > { %v12951_v37 = vpop.xlane.xlu0 %3831  ;;  %v12995_v2 = vsel %vm12966_vm1, 0, %v4721_v53  ;;  %15504 = vst [vmem:[#allocation36_spill] sm:$0xff] %v12999_v40  ;;  %15505 = vst [vmem:[#allocation37_spill] sm:$0xff] %v13003_v23  ;;  %v4152_v1 = vmul.f32 %v10367_v22, %v4044_v14  ;;  %v4192_v35 = vmul.f32 %v12741_v33, %v4150_v61  ;;  %v3908_v48 = vmul.f32 0.125, %v3838_v25 }
 0x3f3   : > { %v10371_v18 = vpop.eup %10370  ;;  %10382 = vrcp.f32 %v4374_v0  ;;  %v3945_v53 = vmul.f32 %v12975_v19, %v12975_v19  ;;  %v3944_v50 = vmul.f32 %v12978_v52, %v12978_v52  ;;  %v13012_v58 = vmul.f32 0.125, %v12918_v26 }
 0x3f4   : > { %v10373_v38 = vpop.eup %10372  ;;  %v4375_v24 = vadd.f32 1.0, %v10369_v7  ;;  %10384 = vrsqrt.f32 %v4083_v36  ;;  %v4921_v14 = vshll.u32 %v12995_v2, 16  ;;  %v4926_v61 = vshll.u32 %v12999_v40, 16 }
 0x3f5   : > { %v12980_v34 = vpop.xlane.xlu1 %3671  ;;  %v4938_v25 = vshll.u32 %v13003_v23, 16  ;;  %v10375_v22 = vpop.eup %10374  ;;  %v3981_v6 = vsub.f32 %v3909_v27, %v3945_v53  ;;  %v4931_v32 = vshrl.u32 %v12972_v57, 16  ;;  %v4935_v13 = vrot.slane %v4933_v47, 1 }
 0x3f6   : > { %v12991_v21 = vpop.xlane.xlu0 %3668  ;;  %v4376_v59 = vadd.f32 1.0, %v10371_v18  ;;  %v15506_v26 = vsub.f32 %v12506_v15, %v12842_v29  ;;  %v3980_v7 = vsub.f32 %v3908_v48, %v3944_v50  ;;  %v4919_v36 = vshrl.u32 %v12995_v2, 16 }
 0x3f7   : > { %v4923_v8 = vrot.slane %v4921_v14, 1  ;;  %v3943_v40 = vmul.f32 %v13012_v58, %v13012_v58  ;;  %v13029_v23 = vmul.f32 0.125, %v12925_v17  ;;  %v4936_v51 = vor.u32 %v4935_v13, %v4931_v32  ;;  %v10377_v53 = vpop.eup %10376 }
 0x3f8   : > { %v4151_v31 = vmul.f32 %v10373_v38, %v15506_v26  ;;  %10386 = vrcp.f32 %v4375_v24  ;;  %v3907_v47 = vmul.f32 0.125, %v12947_v39  ;;  %v4928_v57 = vrot.slane %v4926_v61, 1  ;;  %v10379_v48 = vpop.eup %10378 }
 0x3f9   : > { %v13014_v11 = vpop.xlane.xlu1 %3665  ;;  %v4924_v18 = vor.u32 %v4923_v8, %v4919_v36  ;;  %vm4609_vm3 = vcmp.ne.s32.totalorder %v12850_v30, 0  ;;  %v4377_v29 = vadd.f32 1.0, %v10375_v22  ;;  %v4017_v38 = vmax.f32 %v3981_v6, 0.0 }
 0x3fa   : > { %v13019_v0 = vpop.xlane.xlu0 %3662  ;;  %v4940_v50 = vrot.slane %v4938_v25, 1  ;;  %10388 = vrcp.f32 %v4376_v59  ;;  %v13036_v17 = vadd.f32 %v12751_v28, %v4192_v35  ;;  %v10381_v13 = vpop.eup %10380  ;;  %v4016_v32 = vmax.f32 %v3980_v7, 0.0 }
 0x3fb   : > { %v3906_v24 = vmul.f32 0.125, %v12951_v37  ;;  %v4929_v39 = vsel %vm4917_vm2, %v4924_v18, %v4928_v57  ;;  %10390 = vrcp.f32 %v4377_v29  ;;  %v4193_v8 = vmul.f32 %v12741_v33, %v4151_v31 }
 0x3fc   : > { %9432 = vmatprep.mubr.msk.bf16.mxu1 %vm1041_vm4, %v4929_v39  ;;  %v13043_v14 = vsel %vm4917_vm2, %v4936_v51, %v4940_v50  ;;  %vm4610_vm5 = vcmp.ne.s32.totalorder %v12855_v41, 0  ;;  %v8491_v59 = vmul.f32 -1.442695, %v13036_v17  ;;  %v13049_v61 = vmul.f32 %v12741_v33, %v12989_v9 }
 0x3fd   : > { %v3853_v27 = vpop.xlane.xlu1 %3852  ;;  %15507 = vst [vmem:[#allocation39_spill] sm:$0xff] %v13043_v14  ;;  %v10383_v35 = vpop.eup %10382  ;;  %v15508_v37 = vsub.f32 %v12523_v42, %v12885_v55  ;;  %v3942_v31 = vmul.f32 %v13029_v23, %v13029_v23  ;;  %v3979_v25 = vsub.f32 %v3907_v47, %v3943_v40  ;;  %9433 = vmatmul.mubr.msk.bf16.vlgmr.msra.gmra.mrb[16].mxu1 %vm1041_vm4, %v13043_v14  ;;  %v4089_v36 = vadd.f32 1e-05, %v4017_v38 }
 0x3fe   : > { %v13032_v15 = vpop.xlane.xlu0 %3849  ;;  %v4194_v22 = vmul.f32 %v12741_v33, %v4152_v1  ;;  %v15509_v26 = vsub.f32 %v12516_v60, %v12887_v63  ;;  %9465 = vmatpush3.bf16.msra.mxu1 %v12984_v3  ;;  %v10385_v42 = vpop.eup %10384  ;;  %v15510_v55 = vsub.f32 %v12518_v56, %v12894_v5  ;;  %10392 = vpow2.f32 %v8491_v59 }
 0x3ff   : > { %v4157_v57 = vmul.f32 %v10377_v53, %v15508_v37  ;;  %v4088_v53 = vadd.f32 1e-05, %v4016_v32  ;;  %v3978_v47 = vsub.f32 %v3906_v24, %v3942_v31  ;;  %v13071_v60 = vmul.f32 0.125, %v12980_v34 }
 0x400   : > { %v4156_v7 = vmul.f32 %v10379_v48, %v15509_v26  ;;  %v4154_v40 = vmul.f32 %v10381_v13, %v15510_v55  ;;  %v4482_v18 = vmul.f32 %v10383_v35, %v12861_v49  ;;  %v13075_v29 = vadd.f32 %v12751_v28, %v4193_v8 }
 0x401   : > { %v3847_v6 = vpop.xlane.xlu1 %3846  ;;  %v13078_v3 = vmul.f32 %v12741_v33, %v4157_v57  ;;  %v4015_v48 = vmax.f32 %v3979_v25, 0.0  ;;  %v15511_v49 = vsub.f32 %v12528_v10, %v12913_v20  ;;  %10394 = vrsqrt.f32 %v4089_v36 }
 0x402   : > { %v3844_v51 = vpop.xlane.xlu0 %3843  ;;  %v10387_v50 = vpop.eup %10386  ;;  %v13085_v34 = vmul.f32 %v12741_v33, %v4156_v7  ;;  %v3913_v32 = vmul.f32 0.125, %v3853_v27  ;;  %v13093_v24 = vmul.f32 %v12741_v33, %v4154_v40  ;;  %10396 = vrsqrt.f32 %v4088_v53 }
 0x403   : > { %v13090_v13 = vmul.f32 %v10385_v42, %v15511_v49  ;;  %v4014_v39 = vmax.f32 %v3978_v47, 0.0  ;;  %v13096_v8 = vmul.f32 0.125, %v12991_v21  ;;  %v3949_v35 = vmul.f32 %v13071_v60, %v13071_v60 }
 0x404   : > { %v10389_v59 = vpop.eup %10388  ;;  %v4483_v37 = vmul.f32 %v10387_v50, %v12897_v44  ;;  %v4665_v10 = vsel %vm4609_vm3, %v4482_v18, 0.0  ;;  %v8492_v27 = vmul.f32 -1.442695, %v13075_v29  ;;  %v4087_v31 = vadd.f32 1e-05, %v4015_v48 }
 0x405   : > { %v3684_v63 = vpop.xlane.xlu1 %3683  ;;  %v10391_v57 = vpop.eup %10390  ;;  %v13107_v25 = vmul.f32 0.125, %v13014_v11  ;;  %v13110_v21 = vmul.f32 0.125, %v13019_v0  ;;  %v4484_v26 = vmul.f32 %v10389_v59, %v12903_v4  ;;  %v3985_v44 = vsub.f32 %v3913_v32, %v3949_v35 }
 0x406   : > { %v3681_v38 = vpop.xlane.xlu0 %3680  ;;  %v3912_v36 = vmul.f32 0.125, %v13032_v15  ;;  %v4666_v42 = vsel %vm4609_vm3, %v4483_v37, 0.0  ;;  %v4485_v55 = vmul.f32 %v10391_v57, %v12922_v54  ;;  %v3948_v40 = vmul.f32 %v13096_v8, %v13096_v8 }
 0x407   : > { %v4699_v11 = vpack.c.bf16 %v4666_v42, %v4665_v10  ;;  %v4667_v0 = vsel %vm4610_vm5, %v4484_v26, 0.0  ;;  %v13124_v53 = vadd.f32 %v12751_v28, %v4194_v22  ;;  %v3911_v4 = vmul.f32 0.125, %v3847_v6 }
 0x408   : > { %v3910_v47 = vmul.f32 0.125, %v3844_v51  ;;  %v4668_v15 = vsel %vm4610_vm5, %v4485_v55, 0.0  ;;  %10398 = vpow2.f32 %v8492_v27  ;;  %v10393_v30 = vpop.eup %10392  ;;  %v4086_v54 = vadd.f32 1e-05, %v4014_v39 }
 0x409   : > { %v13103_v20 = vpop.xlane.xlu1 %3677  ;;  %10400 = vrsqrt.f32 %v4087_v31  ;;  %v4730_v48 = vshrl.u32 %v4699_v11, 16  ;;  %v4700_v50 = vpack.c.bf16 %v4668_v15, %v4667_v0  ;;  %v3947_v32 = vmul.f32 %v13107_v25, %v13107_v25 }
 0x40a   : > { %v13113_v7 = vpop.xlane.xlu0 %3674  ;;  %v3946_v22 = vmul.f32 %v13110_v21, %v13110_v21  ;;  %v4021_v59 = vmax.f32 %v3985_v44, 0.0  ;;  %v3984_v6 = vsub.f32 %v3912_v36, %v3948_v40  ;;  %v4733_v35 = vshll.u32 %v4699_v11, 16 }
 0x40b   : > { %v4732_v51 = vrot.slane %v4730_v48, 7  ;;  %v4737_v41 = vshrl.u32 %v4700_v50, 16  ;;  %v8493_v37 = vmul.f32 -1.442695, %v13124_v53  ;;  %v13133_v10 = vpop.eup %10394  ;;  %v3983_v27 = vsub.f32 %v3911_v4, %v3947_v32 }
 0x40c   : > { %v3982_v39 = vsub.f32 %v3910_v47, %v3946_v22  ;;  %v13135_v57 = vmul.f32 0.125, %v3684_v63  ;;  %v4378_v26 = vadd.f32 1.0, %v10393_v30  ;;  %v13137_v42 = vpop.eup %10396  ;;  %v4740_v40 = vshll.u32 %v4700_v50, 16 }
 0x40d   : > { %v3865_v18 = vpop.xlane.xlu1 %3864  ;;  %v4735_v55 = vor.u32 %v4733_v35, %v4732_v51  ;;  %v13141_v44 = vsel %vm12966_vm1, %v4732_v51, 0  ;;  %v4739_v36 = vrot.slane %v4737_v41, 7  ;;  %v4020_v0 = vmax.f32 %v3984_v6, 0.0 }
 0x40e   : > { %v3862_v49 = vpop.xlane.xlu0 %3861  ;;  %15512 = vst [vmem:[#allocation40_spill] sm:$0xff] %v13141_v44  ;;  %v13143_v15 = vmul.f32 0.125, %v3681_v38  ;;  %v3917_v48 = vmul.f32 0.125, %v3865_v18  ;;  %v13147_v63 = vadd.f32 %v12751_v28, %v13049_v61  ;;  %10402 = vpow2.f32 %v8493_v37 }
 0x40f   : > { %v13151_v4 = vsel %vm12966_vm1, 0, %v4735_v55  ;;  %v4742_v47 = vor.u32 %v4740_v40, %v4739_v36  ;;  %v13155_v30 = vsel %vm12966_vm1, %v4739_v36, 0  ;;  %v4019_v50 = vmax.f32 %v3983_v27, 0.0 }
 0x410   : > { %15513 = vst [vmem:[#allocation61_spill] sm:$0xff] %v13151_v4  ;;  %15514 = vst [vmem:[#allocation62_spill] sm:$0xff] %v13155_v30  ;;  %v4018_v32 = vmax.f32 %v3982_v39, 0.0  ;;  %v4945_v38 = vshll.u32 %v13151_v4, 16  ;;  %v4950_v18 = vshll.u32 %v13141_v44, 16  ;;  %v3953_v61 = vmul.f32 %v13135_v57, %v13135_v57 }
 0x411   : > { %v3859_v31 = vpop.xlane.xlu1 %3858  ;;  %v13165_v6 = vsel %vm12966_vm1, 0, %v4742_v47  ;;  %v3916_v51 = vmul.f32 0.125, %v3862_v49  ;;  %10404 = vrcp.f32 %v4378_v26  ;;  %v4943_v41 = vshrl.u32 %v13151_v4, 16 }
 0x412   : > { %v3856_v11 = vpop.xlane.xlu0 %3855  ;;  %v10399_v35 = vpop.eup %10398  ;;  %v4947_v37 = vrot.slane %v4945_v38, 1  ;;  %v4957_v27 = vshll.u32 %v13165_v6, 16  ;;  %v4962_v39 = vshll.u32 %v13155_v30, 16  ;;  %v3952_v40 = vmul.f32 %v13143_v15, %v13143_v15 }
 0x413   : > { %v13172_v36 = vpop.eup %10400  ;;  %v13177_v47 = vmul.f32 0.125, %v13103_v20  ;;  %v13180_v49 = vmul.f32 0.125, %v13113_v7  ;;  %v3989_v26 = vsub.f32 %v3917_v48, %v3953_v61  ;;  %v4952_v38 = vrot.slane %v4950_v18, 1  ;;  %v5600_v20 = vld [vmem:[%s14958_s4 + $0x8] sm:$0xf] }
 0x414   : > { %v4948_v5 = vor.u32 %v4947_v37, %v4943_v41  ;;  %v4955_v56 = vshrl.u32 %v13165_v6, 16  ;;  %v4959_v1 = vrot.slane %v4957_v27, 1  ;;  %10406 = vrsqrt.f32 %v4086_v54  ;;  %10294 = vmatprep.subr.msk.bf16.mxu1 %vm1096_vm0, %v5600_v20 }
 0x415   : > { %v13159_v22 = vpop.xlane.xlu1 %3695  ;;  %v3915_v9 = vmul.f32 0.125, %v3859_v31  ;;  %v4379_v14 = vadd.f32 1.0, %v10399_v35  ;;  %v8494_v44 = vmul.f32 -1.442695, %v13147_v63  ;;  %v4964_v48 = vrot.slane %v4962_v39, 1 }
 0x416   : > { %v13170_v55 = vpop.xlane.xlu0 %3692  ;;  %v13188_v4 = vsel %vm4917_vm2, %v4948_v5, %v4952_v38  ;;  %v4960_v7 = vor.u32 %v4959_v1, %v4955_v56  ;;  %v3988_v61 = vsub.f32 %v3916_v51, %v3952_v40  ;;  %v4197_v54 = vmul.f32 %v12741_v33, %v13090_v13  ;;  %v15515_v13 = vld [vmem:[#allocation33_spill] sm:$0xff]  ;;  %v15517_v38 = vld [vmem:[#allocation31_spill] sm:$0xff] }
 0x417   : > { %v4093_v31 = vadd.f32 1e-05, %v4021_v59  ;;  %9436 = vmatprep.mubr.msk.bf16.mxu1 %vm1041_vm4, %v13188_v4  ;;  %v3951_v18 = vmul.f32 %v13177_v47, %v13177_v47  ;;  %v4025_v35 = vmax.f32 %v3989_v26, 0.0  ;;  %v4092_v41 = vadd.f32 1e-05, %v4020_v0 }
 0x418   : > { %v13198_v5 = vsel %vm4917_vm2, %v4960_v7, %v4964_v48  ;;  %v3914_v1 = vmul.f32 0.125, %v3856_v11  ;;  %10408 = vrcp.f32 %v4379_v14  ;;  %vm4611_vm6 = vcmp.ne.s32.totalorder %v12866_v45, 0  ;;  %v10403_v51 = vpop.eup %10402 }
 0x419   : > { %v3690_v30 = vpop.xlane.xlu1 %3689  ;;  %v4091_v37 = vadd.f32 1e-05, %v4019_v50  ;;  %9437 = vmatmul.mubr.msk.bf16.gmra.mrb[20].mxu1 %vm1041_vm4, %v13198_v5  ;;  %v3987_v27 = vsub.f32 %v3915_v9, %v3951_v18  ;;  %10410 = vpow2.f32 %v8494_v44  ;;  %v4090_v39 = vadd.f32 1e-05, %v4018_v32  ;;  %v15518_v32 = vld [vmem:[#allocation34_spill] sm:$0xff]  ;;  %v15524_v18 = vld [vmem:[#allocation41_spill] sm:$0xff] }
 0x41a   : > { %v3687_v56 = vpop.xlane.xlu0 %3686  ;;  %v3950_v0 = vmul.f32 %v13180_v49, %v13180_v49  ;;  %v4024_v40 = vmax.f32 %v3988_v61, 0.0  ;;  %v13209_v14 = vadd.f32 %v12751_v28, %v13093_v24  ;;  %v15516_v26 = vsub.f32 %v12538_v46, %v12975_v19  ;;  %v15519_v24 = vld [vmem:[#allocation32_spill] sm:$0xff] }
 0x41b   : > { %v10405_v11 = vpop.eup %10404  ;;  %v4056_v20 = vsub.f32 %v15517_v38, %v13096_v8  ;;  %10412 = vrsqrt.f32 %v4093_v31  ;;  %v4097_v9 = vadd.f32 1e-05, %v4025_v35  ;;  %v4380_v61 = vadd.f32 1.0, %v10403_v51 }
 0x41c   : > { %v4161_v50 = vmul.f32 %v13133_v10, %v15516_v26  ;;  %10414 = vrsqrt.f32 %v4092_v41  ;;  %v3986_v48 = vsub.f32 %v3914_v1, %v3950_v0  ;;  %v4023_v59 = vmax.f32 %v3987_v27, 0.0 }
 0x41d   : > { %v3871_v44 = vpop.xlane.xlu1 %3870  ;;  %10416 = vrsqrt.f32 %v4091_v37  ;;  %v13221_v46 = vmul.f32 0.125, %v3690_v30  ;;  %v15520_v19 = vsub.f32 %v12532_v12, %v12978_v52  ;;  %v4096_v31 = vadd.f32 1e-05, %v4024_v40 }
 0x41e   : > { %10418 = vrsqrt.f32 %v4090_v39  ;;  %v3868_v35 = vpop.xlane.xlu0 %3867  ;;  %v8495_v26 = vmul.f32 -1.442695, %v13209_v14  ;;  %v10407_v41 = vpop.eup %10406  ;;  %v13229_v1 = vmul.f32 %v12741_v33, %v4161_v50  ;;  %v4486_v51 = vmul.f32 %v10405_v11, %v13036_v17 }
 0x41f   : > { %v4160_v10 = vmul.f32 %v13137_v42, %v15520_v19  ;;  %10420 = vrsqrt.f32 %v4097_v9  ;;  %v3919_v37 = vmul.f32 0.125, %v3871_v44  ;;  %v15521_v30 = vsub.f32 %v12542_v43, %v13012_v58 }
 0x420   : > { %v4022_v52 = vmax.f32 %v3986_v48, 0.0  ;;  %10422 = vrcp.f32 %v4380_v61  ;;  %v13236_v42 = vmul.f32 0.125, %v3687_v56  ;;  %v4095_v27 = vadd.f32 1e-05, %v4023_v59 }
 0x421   : > { %v4159_v12 = vmul.f32 %v13172_v36, %v15521_v30  ;;  %v3955_v39 = vmul.f32 %v13221_v46, %v13221_v46  ;;  %v3877_v0 = vpop.xlane.xlu1 %3876  ;;  %v13241_v33 = vadd.f32 %v12751_v28, %v4197_v54  ;;  %10424 = vpow2.f32 %v8495_v26 }
 0x422   : > { %v10409_v17 = vpop.eup %10408  ;;  %v15522_v40 = vsub.f32 %v12534_v62, %v13029_v23  ;;  %10426 = vrsqrt.f32 %v4096_v31  ;;  %v13247_v58 = vmul.f32 0.125, %v13159_v22  ;;  %v3918_v36 = vmul.f32 0.125, %v3868_v35  ;;  %v3874_v22 = vpop.xlane.xlu0 %3873  ;;  %v15523_v35 = vld [vmem:[#allocation3_spill] sm:$0xff] }
 0x423   : > { %v10411_v56 = vpop.eup %10410  ;;  %v4487_v59 = vmul.f32 %v10409_v17, %v13075_v29  ;;  %v4669_v11 = vsel %vm4611_vm6, %v4486_v51, 0.0  ;;  %v3991_v50 = vsub.f32 %v3919_v37, %v3955_v39  ;;  %v13254_v54 = vadd.f32 %v12751_v28, %v13085_v34 }
 0x424   : > { %v4158_v43 = vmul.f32 %v10407_v41, %v15522_v40  ;;  %v4094_v9 = vadd.f32 1e-05, %v4022_v52  ;;  %v4381_v44 = vadd.f32 1.0, %v10411_v56  ;;  %v3954_v62 = vmul.f32 %v13236_v42, %v13236_v42 }
 0x425   : > { %v3921_v23 = vmul.f32 0.125, %v3877_v0  ;;  %v10413_v48 = vpop.eup %10412  ;;  %10428 = vrsqrt.f32 %v4095_v27  ;;  %v13259_v61 = vmul.f32 0.125, %v13170_v55  ;;  %v4670_v29 = vsel %vm4611_vm6, %v4487_v59, 0.0  ;;  %v13270_v55 = vld [vmem:[%s14957_s3] ss:$0 sm:$0xff] }
 0x426   : > { %v8496_v19 = vmul.f32 -1.442695, %v13241_v33  ;;  %v10415_v31 = vpop.eup %10414  ;;  %v3957_v28 = vmul.f32 %v13247_v58, %v13247_v58  ;;  %v4701_v34 = vpack.c.bf16 %v4670_v29, %v4669_v11  ;;  %10430 = vrcp.f32 %v4381_v44  ;;  %v13280_v27 = vld [vmem:[%s14956_s2] ss:$0 sm:$0xff] }
 0x427   : > { %vm4612_vm7 = vcmp.ne.s32.totalorder %v15523_v35, 0  ;;  %v3990_v26 = vsub.f32 %v3918_v36, %v3954_v62  ;;  %v10417_v41 = vpop.eup %10416  ;;  %v4027_v51 = vmax.f32 %v3991_v50, 0.0  ;;  %v3920_v37 = vmul.f32 0.125, %v3874_v22  ;;  %v15532_v35 = vld [vmem:[#allocation4_spill] sm:$0xff] }
 0x428   : > { %v13274_v45 = vadd.f32 %v13270_v55, %v13078_v3  ;;  %v8497_v30 = vmul.f32 -1.442695, %v13254_v54  ;;  %v10419_v52 = vpop.eup %10418  ;;  %v13283_v39 = vmul.f32 %v13280_v27, %v4160_v10  ;;  %10432 = vrsqrt.f32 %v4094_v9 }
 0x429   : > { %v4744_v0 = vshrl.u32 %v4701_v34, 16  ;;  %v3993_v17 = vsub.f32 %v3921_v23, %v3957_v28  ;;  %v13285_v40 = vpop.eup %10420  ;;  %v13288_v36 = vmul.f32 %v13280_v27, %v4159_v12  ;;  %v3956_v3 = vmul.f32 %v13259_v61, %v13259_v61 }
 0x42a   : > { %10434 = vpow2.f32 %v8496_v19  ;;  %v8498_v56 = vmul.f32 -1.442695, %v13274_v45  ;;  %v10423_v59 = vpop.eup %10422  ;;  %v4200_v11 = vmul.f32 %v13280_v27, %v4158_v43  ;;  %v4747_v10 = vshll.u32 %v4701_v34, 16  ;;  %v15525_v43 = vld [vmem:[#allocation35_spill] sm:$0xff] }
 0x42b   : > { %v4746_v50 = vrot.slane %v4744_v0, 7  ;;  %10436 = vpow2.f32 %v8497_v30  ;;  %v10425_v9 = vpop.eup %10424  ;;  %v4099_v44 = vadd.f32 1e-05, %v4027_v51  ;;  %v4026_v62 = vmax.f32 %v3990_v26, 0.0  ;;  %v15526_v30 = vld [vmem:[#allocation46_spill] sm:$0xff] }
 0x42c   : > { %v3992_v23 = vsub.f32 %v3920_v37, %v3956_v3  ;;  %10438 = vpow2.f32 %v8498_v56  ;;  %v10427_v22 = vpop.eup %10426  ;;  %v4029_v19 = vmax.f32 %v3993_v17, 0.0  ;;  %v4382_v28 = vadd.f32 1.0, %v10425_v9 }
 0x42d   : > { %v4749_v12 = vor.u32 %v4747_v10, %v4746_v50  ;;  %v13296_v29 = vsel %vm12966_vm1, %v4746_v50, 0  ;;  %v4061_v7 = vsub.f32 %v15524_v18, %v13135_v57  ;;  %v4060_v34 = vsub.f32 %v15525_v43, %v13143_v15 }
 0x42e   : > { %v4059_v51 = vsub.f32 %v15526_v30, %v13177_v47  ;;  %v4488_v26 = vmul.f32 %v10423_v59, %v13124_v53  ;;  %v15527_v37 = vsub.f32 %v15515_v13, %v13071_v60  ;;  %v4164_v17 = vmul.f32 %v10415_v31, %v4056_v20 }
 0x42f   : > { %v15528_v3 = vsub.f32 %v15518_v32, %v13107_v25  ;;  %v13316_v15 = vsel %vm12966_vm1, 0, %v4749_v12  ;;  %v10429_v18 = vpop.eup %10428  ;;  %v4974_v53 = vshll.u32 %v13296_v29, 16  ;;  %v4098_v56 = vadd.f32 1e-05, %v4026_v62 }
 0x430   : > { %v4165_v0 = vmul.f32 %v10413_v48, %v15527_v37  ;;  %v4969_v47 = vshll.u32 %v13316_v15, 16  ;;  %10440 = vrcp.f32 %v4382_v28  ;;  %v10431_v60 = vpop.eup %10430  ;;  %v15529_v8 = vsub.f32 %v15519_v24, %v13110_v21  ;;  %v15530_v24 = vld [vmem:[#allocation38_spill] sm:$0xff] }
 0x431   : > { %v4163_v57 = vmul.f32 %v10417_v41, %v15528_v3  ;;  %10442 = vrsqrt.f32 %v4099_v44  ;;  %v4101_v38 = vadd.f32 1e-05, %v4029_v19  ;;  %v4028_v25 = vmax.f32 %v3992_v23, 0.0 }
 0x432   : > { %v4162_v13 = vmul.f32 %v10419_v52, %v15529_v8  ;;  %v4967_v20 = vshrl.u32 %v13316_v15, 16  ;;  %v4971_v32 = vrot.slane %v4969_v47, 1  ;;  %v4489_v48 = vmul.f32 %v10431_v60, %v13147_v63  ;;  %v10433_v41 = vpop.eup %10432 }
 0x433   : > { %v4671_v31 = vsel %vm4612_vm7, %v4488_v26, 0.0  ;;  %v13328_v59 = vmul.f32 %v13280_v27, %v4165_v0  ;;  %v13331_v50 = vmul.f32 %v13280_v27, %v4164_v17  ;;  %v13334_v21 = vmul.f32 %v13280_v27, %v4163_v57  ;;  %v15531_v26 = vld [vmem:[#allocation58_spill] sm:$0xff] }
 0x434   : > { %v4058_v52 = vsub.f32 %v15530_v24, %v13180_v49  ;;  %v10435_v10 = vpop.eup %10434  ;;  %v4972_v9 = vor.u32 %v4971_v32, %v4967_v20  ;;  %v4976_v44 = vrot.slane %v4974_v53, 1  ;;  %v4672_v63 = vsel %vm4612_vm7, %v4489_v48, 0.0  ;;  %v15534_v20 = vld [vmem:[#allocation59_spill] sm:$0xff]  ;;  %v15536_v48 = vld [vmem:[#allocation53_spill] sm:$0xff] }
 0x435   : > { %10444 = vrsqrt.f32 %v4098_v56  ;;  %v10437_v62 = vpop.eup %10436  ;;  %v4204_v23 = vmul.f32 %v13280_v27, %v4162_v13  ;;  %v4702_v12 = vpack.c.bf16 %v4672_v63, %v4671_v31  ;;  %v4383_v19 = vadd.f32 1.0, %v10435_v10 }
 0x436   : > { %v13342_v28 = vadd.f32 %v13270_v55, %v4200_v11  ;;  %v10439_v43 = vpop.eup %10438  ;;  %v13345_v30 = vsel %vm4917_vm2, %v4972_v9, %v4976_v44  ;;  %10446 = vrsqrt.f32 %v4101_v38  ;;  %v4100_v49 = vadd.f32 1e-05, %v4028_v25  ;;  %v15533_v38 = vld [vmem:[#allocation49_spill] sm:$0xff] }
 0x437   : > { %vm4613_vm8 = vcmp.ne.s32.totalorder %v15531_v26, 0  ;;  %v4384_v37 = vadd.f32 1.0, %v10437_v62  ;;  %v4065_v0 = vsub.f32 %v15532_v35, %v13247_v58  ;;  %9440 = vmatprep.mubr.msk.bf16.mxu1 %vm1041_vm4, %v13345_v30  ;;  %v4751_v17 = vshrl.u32 %v4702_v12, 16 }
 0x438   : > { %10448 = vrcp.f32 %v4383_v19  ;;  %v4385_v3 = vadd.f32 1.0, %v10439_v43  ;;  %v4169_v11 = vmul.f32 %v13285_v40, %v4061_v7  ;;  %v4168_v57 = vmul.f32 %v10427_v22, %v4060_v34 }
 0x439   : > { %10450 = vrcp.f32 %v4384_v37  ;;  %v13355_v47 = vadd.f32 %v13270_v55, %v13288_v36  ;;  %v4753_v53 = vrot.slane %v4751_v17, 7  ;;  %v4754_v56 = vshll.u32 %v4702_v12, 16 }
 0x43a   : > { %10452 = vrcp.f32 %v4385_v3  ;;  %v8499_v60 = vmul.f32 -1.442695, %v13342_v28  ;;  %v10441_v58 = vpop.eup %10440  ;;  %v4167_v8 = vmul.f32 %v10429_v18, %v4059_v51  ;;  %v4166_v13 = vmul.f32 %v10433_v41, %v4058_v52  ;;  %v15535_v18 = vld [vmem:[#allocation9_spill] sm:$0xff] }
 0x43b   : > { %v4064_v25 = vsub.f32 %v15533_v38, %v13259_v61  ;;  %10454 = vrsqrt.f32 %v4100_v49  ;;  %vm4614_vm9 = vcmp.ne.s32.totalorder %v15534_v20, 0  ;;  %v10443_v7 = vpop.eup %10442  ;;  %v4756_v40 = vor.u32 %v4754_v56, %v4753_v53 }
 0x43c   : > { %v13363_v36 = vsel %vm12966_vm1, %v4753_v53, 0  ;;  %10456 = vpow2.f32 %v8499_v60  ;;  %v8500_v22 = vmul.f32 -1.442695, %v13355_v47  ;;  %v13367_v34 = vmul.f32 %v13280_v27, %v4169_v11 }
 0x43d   : > { %v13370_v51 = vmul.f32 %v13280_v27, %v4168_v57  ;;  %v4063_v32 = vsub.f32 %v15535_v18, %v13221_v46  ;;  %v4062_v31 = vsub.f32 %v15536_v48, %v13236_v42  ;;  %v13378_v41 = vsel %vm12966_vm1, 0, %v4756_v40 }
 0x43e   : > { %v4490_v24 = vmul.f32 %v10441_v58, %v13209_v14  ;;  %v13383_v52 = vadd.f32 %v13270_v55, %v13283_v39  ;;  %v13387_v10 = vadd.f32 %v13270_v55, %v13229_v1  ;;  %v4209_v46 = vmul.f32 %v13280_v27, %v4167_v8 }
 0x43f   : > { %v10445_v9 = vpop.eup %10444  ;;  %v4208_v44 = vmul.f32 %v13280_v27, %v4166_v13  ;;  %v4981_v42 = vshll.u32 %v13378_v41, 16  ;;  %v4986_v63 = vshll.u32 %v13363_v36, 16  ;;  %v4171_v62 = vmul.f32 %v10443_v7, %v4063_v32 }
 0x440   : > { %10458 = vpow2.f32 %v8500_v22  ;;  %v8501_v14 = vmul.f32 -1.442695, %v13383_v52  ;;  %v8502_v39 = vmul.f32 -1.442695, %v13387_v10  ;;  %v10447_v12 = vpop.eup %10446  ;;  %v4979_v19 = vshrl.u32 %v13378_v41, 16 }
 0x441   : > { %v4983_v1 = vrot.slane %v4981_v42, 1  ;;  %v13397_v43 = vadd.f32 %v13270_v55, %v4204_v23  ;;  %v13401_v49 = vadd.f32 %v13270_v55, %v13334_v21  ;;  %v4170_v35 = vmul.f32 %v10445_v9, %v4062_v31 }
 0x442   : > { %v10449_v37 = vpop.eup %10448  ;;  %v4673_v17 = vsel %vm4613_vm8, %v4490_v24, 0.0  ;;  %10460 = vpow2.f32 %v8501_v14  ;;  %v13407_v3 = vadd.f32 %v13270_v55, %v13331_v50  ;;  %v4988_v53 = vrot.slane %v4986_v63, 1  ;;  %v15537_v63 = vld [vmem:[#allocation28_spill] sm:$0xff] }
 0x443   : > { %v10451_v11 = vpop.eup %10450  ;;  %v4984_v57 = vor.u32 %v4983_v1, %v4979_v19  ;;  %v4491_v23 = vmul.f32 %v10449_v37, %v13241_v33  ;;  %10462 = vpow2.f32 %v8502_v39  ;;  %v4173_v60 = vmul.f32 %v10447_v12, %v4065_v0 }
 0x444   : > { %v10453_v56 = vpop.eup %10452  ;;  %v4492_v21 = vmul.f32 %v10451_v11, %v13254_v54  ;;  %v8503_v58 = vmul.f32 -1.442695, %v13397_v43  ;;  %v8504_v8 = vmul.f32 -1.442695, %v13401_v49  ;;  %v13421_v33 = vadd.f32 %v13270_v55, %v13328_v59 }
 0x445   : > { %v10455_v13 = vpop.eup %10454  ;;  %v13414_v7 = vsel %vm4917_vm2, %v4984_v57, %v4988_v53  ;;  %v4674_v50 = vsel %vm4613_vm8, %v4491_v23, 0.0  ;;  %v4493_v40 = vmul.f32 %v10453_v56, %v13274_v45  ;;  %v8505_v18 = vmul.f32 -1.442695, %v13407_v3 }
 0x446   : > { %v10457_v0 = vpop.eup %10456  ;;  %9441 = vmatmul.mubr.msk.bf16.gmra.mrb[24].mxu1 %vm1041_vm4, %v13414_v7  ;;  %v4703_v54 = vpack.c.bf16 %v4674_v50, %v4673_v17  ;;  %v4675_v22 = vsel %vm4614_vm9, %v4492_v21, 0.0  ;;  %10464 = vpow2.f32 %v8503_v58  ;;  %v8506_v45 = vmul.f32 -1.442695, %v13421_v33 }
 0x447   : > { %v4676_v26 = vsel %vm4614_vm9, %v4493_v40, 0.0  ;;  %v4386_v32 = vadd.f32 1.0, %v10457_v0  ;;  %10466 = vpow2.f32 %v8504_v8  ;;  %v13432_v59 = vmul.f32 %v13280_v27, %v4171_v62 }
 0x448   : > { %v13435_v48 = vmul.f32 %v13280_v27, %v4170_v35  ;;  %v4758_v31 = vshrl.u32 %v4703_v54, 16  ;;  %v4704_v24 = vpack.c.bf16 %v4676_v26, %v4675_v22  ;;  %v13438_v9 = vmul.f32 %v13280_v27, %v4173_v60 }
 0x449   : > { %v4172_v20 = vmul.f32 %v10455_v13, %v4064_v25  ;;  %10468 = vrcp.f32 %v4386_v32  ;;  %v10768_v42 = vmov 1   ;;  %v4761_v12 = vshll.u32 %v4703_v54, 16 }
 0x44a   : > { %v13445_v14 = vrot.slane %v10768_v42, %v15537_v63  ;;  %v10459_v62 = vpop.eup %10458  ;;  %v4760_v39 = vrot.slane %v4758_v31, 7  ;;  %v4765_v19 = vshrl.u32 %v4704_v24, 16  ;;  %10470 = vpow2.f32 %v8505_v18 }
 0x44b   : > { %v4387_v1 = vadd.f32 1.0, %v10459_v62  ;;  %10472 = vpow2.f32 %v8506_v45  ;;  %v13448_v37 = vadd.f32 %v13270_v55, %v4208_v44  ;;  %v13451_v35 = vadd.f32 %v13270_v55, %v4209_v46 }
 0x44c   : > { %v10461_v61 = vpop.eup %10460  ;;  %v4763_v38 = vor.u32 %v4761_v12, %v4760_v39  ;;  %v13455_v25 = vsel %vm12966_vm1, %v4760_v39, 0  ;;  %v4767_v17 = vrot.slane %v4765_v19, 7  ;;  %v4768_v11 = vshll.u32 %v4704_v24, 16 }
 0x44d   : > { %v10463_v57 = vpop.eup %10462  ;;  %v4214_v53 = vmul.f32 %v13280_v27, %v4172_v20  ;;  %v4998_v23 = vshll.u32 %v13455_v25, 16  ;;  %10474 = vrcp.f32 %v4387_v1  ;;  %v4388_v56 = vadd.f32 1.0, %v10461_v61 }
 0x44e   : > { %v13461_v44 = vsel %vm12966_vm1, 0, %v4763_v38  ;;  %v4770_v46 = vor.u32 %v4768_v11, %v4767_v17  ;;  %v13465_v60 = vsel %vm12966_vm1, %v4767_v17, 0  ;;  %v4389_v21 = vadd.f32 1.0, %v10463_v57  ;;  %v15538_v38 = vld [vmem:[#allocation27_spill] sm:$0xff] }
 0x44f   : > { %v4993_v58 = vshll.u32 %v13461_v44, 16  ;;  %vm4615_vm10 = vcmp.ne.s32.totalorder %v13445_v14, 0  ;;  %v8507_v27 = vmul.f32 -1.442695, %v13448_v37  ;;  %v8508_v8 = vmul.f32 -1.442695, %v13451_v35 }
 0x450   : > { %v10465_v13 = vpop.eup %10464  ;;  %v4991_v50 = vshrl.u32 %v13461_v44, 16  ;;  %v13474_v40 = vsel %vm12966_vm1, 0, %v4770_v46  ;;  %v5010_v0 = vshll.u32 %v13465_v60, 16  ;;  %10476 = vrcp.f32 %v4388_v56 }
 0x451   : > { %v10467_v54 = vpop.eup %10466  ;;  %v4995_v22 = vrot.slane %v4993_v58, 1  ;;  %v5000_v18 = vrot.slane %v4998_v23, 1  ;;  %v5005_v26 = vshll.u32 %v13474_v40, 16  ;;  %v13480_v32 = vadd.f32 %v13270_v55, %v13370_v51 }
 0x452   : > { %v5003_v45 = vshrl.u32 %v13474_v40, 16  ;;  %10478 = vrcp.f32 %v4389_v21  ;;  %v4390_v31 = vadd.f32 1.0, %v10465_v13  ;;  %v4391_v24 = vadd.f32 1.0, %v10467_v54 }
 0x453   : > { %v10469_v20 = vpop.eup %10468  ;;  %v4996_v62 = vor.u32 %v4995_v22, %v4991_v50  ;;  %v5007_v39 = vrot.slane %v5005_v26, 1  ;;  %10480 = vpow2.f32 %v8507_v27  ;;  %v13485_v12 = vadd.f32 %v13270_v55, %v13367_v34  ;;  %v15539_v34 = vld [vmem:[#allocation25_spill] sm:$0xff] }
 0x454   : > { %v10471_v19 = vpop.eup %10470  ;;  %v5012_v1 = vrot.slane %v5010_v0, 1  ;;  %v4494_v61 = vmul.f32 %v10469_v20, %v13342_v28  ;;  %v4574_v51 = vrot.slane %v10768_v42, %v15538_v38  ;;  %10482 = vrcp.f32 %v4390_v31 }
 0x455   : > { %v10473_v17 = vpop.eup %10472  ;;  %v13491_v11 = vsel %vm4917_vm2, %v4996_v62, %v5000_v18  ;;  %v5008_v57 = vor.u32 %v5007_v39, %v5003_v45  ;;  %10484 = vrcp.f32 %v4391_v24  ;;  %v4392_v23 = vadd.f32 1.0, %v10471_v19 }
 0x456   : > { %9444 = vmatprep.mubr.msk.bf16.mxu1 %vm1041_vm4, %v13491_v11  ;;  %v15540_v56 = vsub.s32 2, %v15539_v34  ;;  %v4393_v21 = vadd.f32 1.0, %v10473_v17  ;;  %10486 = vpow2.f32 %v8508_v8  ;;  %v8509_v28 = vmul.f32 -1.442695, %v13480_v32 }
 0x457   : > { %v10475_v58 = vpop.eup %10474  ;;  %v13500_v27 = vsel %vm4917_vm2, %v5008_v57, %v5012_v1  ;;  %10488 = vrcp.f32 %v4392_v23  ;;  %v8510_v13 = vmul.f32 -1.442695, %v13485_v12  ;;  %v13505_v50 = vadd.f32 %v13270_v55, %v13435_v48 }
 0x458   : > { %v4578_v46 = vrot.slane %v10768_v42, %v15540_v56  ;;  %9445 = vmatmul.mubr.msk.bf16.gmra.mrb[28].mxu1 %vm1041_vm4, %v13500_v27  ;;  %v4495_v0 = vmul.f32 %v10475_v58, %v13355_v47  ;;  %v4677_v8 = vsel %vm4615_vm10, %v4494_v61, 0.0  ;;  %10490 = vrcp.f32 %v4393_v21 }
 0x459   : > { %v13514_v54 = vadd.f32 %v13270_v55, %v13432_v59  ;;  %vm4616_vm11 = vcmp.ne.s32.totalorder %v4574_v51, 0  ;;  %v15541_v22 = vsub.s32 3, %v15539_v34  ;;  %v8511_v48 = vmul.f32 -1.442695, %v13505_v50 }
 0x45a   : > { %v13521_v26 = vadd.f32 %v13270_v55, %v4214_v53  ;;  %v10477_v45 = vpop.eup %10476  ;;  %v4678_v47 = vsel %vm4615_vm10, %v4495_v0, 0.0  ;;  %10492 = vpow2.f32 %v8509_v28  ;;  %v13528_v59 = vadd.f32 %v13270_v55, %v13438_v9 }
 0x45b   : > { %v4582_v18 = vrot.slane %v10768_v42, %v15541_v22  ;;  %v8512_v31 = vmul.f32 -1.442695, %v13514_v54  ;;  %v4705_v24 = vpack.c.bf16 %v4678_v47, %v4677_v8  ;;  %v4496_v20 = vmul.f32 %v10477_v45, %v13383_v52 }
 0x45c   : > { %10494 = vpow2.f32 %v8510_v13  ;;  %v10479_v62 = vpop.eup %10478  ;;  %vm4617_vm12 = vcmp.ne.s32.totalorder %v4578_v46, 0  ;;  %v8513_v1 = vmul.f32 -1.442695, %v13521_v26  ;;  %v8514_v55 = vmul.f32 -1.442695, %v13528_v59 }
 0x45d   : > { %10496 = vpow2.f32 %v8511_v48  ;;  %v10481_v53 = vpop.eup %10480  ;;  %v4772_v39 = vshrl.u32 %v4705_v24, 16  ;;  %v4497_v19 = vmul.f32 %v10479_v62, %v13387_v10  ;;  %v4679_v14 = vsel %vm4616_vm11, %v4496_v20, 0.0 }
 0x45e   : > { %v10483_v61 = vpop.eup %10482  ;;  %vm4618_vm13 = vcmp.ne.s32.totalorder %v4582_v18, 0  ;;  %v4394_v17 = vadd.f32 1.0, %v10481_v53  ;;  %10498 = vpow2.f32 %v8512_v31  ;;  %v4775_v57 = vshll.u32 %v4705_v24, 16 }
 0x45f   : > { %v10485_v9 = vpop.eup %10484  ;;  %v4774_v52 = vrot.slane %v4772_v39, 7  ;;  %v4680_v23 = vsel %vm4616_vm11, %v4497_v19, 0.0  ;;  %v4498_v56 = vmul.f32 %v10483_v61, %v13397_v43  ;;  %v15542_v58 = vsub.s32 4, %v15539_v34 }
 0x460   : > { %v10487_v21 = vpop.eup %10486  ;;  %v4706_v28 = vpack.c.bf16 %v4680_v23, %v4679_v14  ;;  %v4499_v10 = vmul.f32 %v10485_v9, %v13401_v49  ;;  %10500 = vrcp.f32 %v4394_v17  ;;  %vm5551_vm6 = vcmask 1046528  }
 0x461   : > { %v13541_v13 = vrot.slane %v10768_v42, %v15542_v58  ;;  %v10489_v0 = vpop.eup %10488  ;;  %v4777_v8 = vor.u32 %v4775_v57, %v4774_v52  ;;  %v13545_v22 = vsel %vm12966_vm1, %v4774_v52, 0  ;;  %v4681_v51 = vsel %vm4617_vm12, %v4498_v56, 0.0 }
 0x462   : > { %10502 = vpow2.f32 %v8513_v1  ;;  %v10491_v43 = vpop.eup %10490  ;;  %v4779_v48 = vshrl.u32 %v4706_v28, 16  ;;  %v4682_v45 = vsel %vm4617_vm12, %v4499_v10, 0.0  ;;  %v4395_v49 = vadd.f32 1.0, %v10487_v21 }
 0x463   : > { %10504 = vpow2.f32 %v8514_v55  ;;  %v13551_v47 = vsel %vm12966_vm1, 0, %v4777_v8  ;;  %v4707_v31 = vpack.c.bf16 %v4682_v45, %v4681_v51  ;;  %v4500_v24 = vmul.f32 %v10489_v0, %v13407_v3 }
 0x464   : > { %v4501_v20 = vmul.f32 %v10491_v43, %v13421_v33  ;;  %v10493_v62 = vpop.eup %10492  ;;  %v5017_v53 = vshll.u32 %v13551_v47, 16  ;;  %v5022_v39 = vshll.u32 %v13545_v22, 16  ;;  %v4781_v19 = vrot.slane %v4779_v48, 7 }
 0x465   : > { %v4782_v14 = vshll.u32 %v4706_v28, 16  ;;  %v5015_v1 = vshrl.u32 %v13551_v47, 16  ;;  %v4786_v61 = vshrl.u32 %v4707_v31, 16  ;;  %v4683_v17 = vsel %vm4618_vm13, %v4500_v24, 0.0 }
 0x466   : > { %v10495_v46 = vpop.eup %10494  ;;  %v4684_v55 = vsel %vm4618_vm13, %v4501_v20, 0.0  ;;  %v5019_v52 = vrot.slane %v5017_v53, 1  ;;  %v13562_v33 = vsel %vm12966_vm1, %v4781_v19, 0  ;;  %v4789_v56 = vshll.u32 %v4707_v31, 16 }
 0x467   : > { %v10497_v9 = vpop.eup %10496  ;;  %v4784_v3 = vor.u32 %v4782_v14, %v4781_v19  ;;  %v4708_v57 = vpack.c.bf16 %v4684_v55, %v4683_v17  ;;  %v4788_v23 = vrot.slane %v4786_v61, 7  ;;  %10506 = vrcp.f32 %v4395_v49 }
 0x468   : > { %vm4619_vm14 = vcmp.ne.s32.totalorder %v13541_v13, 0  ;;  %v10499_v21 = vpop.eup %10498  ;;  %v5020_v28 = vor.u32 %v5019_v52, %v5015_v1  ;;  %v5024_v10 = vrot.slane %v5022_v39, 1  ;;  %v5034_v8 = vshll.u32 %v13562_v33, 16 }
 0x469   : > { %v13567_v18 = vsel %vm12966_vm1, 0, %v4784_v3  ;;  %v4793_v58 = vshrl.u32 %v4708_v57, 16  ;;  %v4791_v51 = vor.u32 %v4789_v56, %v4788_v23  ;;  %v4396_v43 = vadd.f32 1.0, %v10493_v62 }
 0x46a   : > { %v5029_v0 = vshll.u32 %v13567_v18, 16  ;;  %v10501_v48 = vpop.eup %10500  ;;  %v13572_v45 = vsel %vm4917_vm2, %v5020_v28, %v5024_v10  ;;  %v13576_v49 = vsel %vm12966_vm1, %v4788_v23, 0  ;;  %v4796_v24 = vshll.u32 %v4708_v57, 16 }
 0x46b   : > { %v4795_v31 = vrot.slane %v4793_v58, 7  ;;  %9448 = vmatprep.mubr.msk.bf16.mxu1 %vm1041_vm4, %v13572_v45  ;;  %v5027_v53 = vshrl.u32 %v13567_v18, 16  ;;  %v13583_v62 = vsel %vm12966_vm1, 0, %v4791_v51  ;;  %v5046_v19 = vshll.u32 %v13576_v49, 16 }
 0x46c   : > { %v10503_v20 = vpop.eup %10502  ;;  %v5031_v39 = vrot.slane %v5029_v0, 1  ;;  %v5041_v1 = vshll.u32 %v13583_v62, 16  ;;  %v4397_v55 = vadd.f32 1.0, %v10495_v46  ;;  %v5036_v3 = vrot.slane %v5034_v8, 1 }
 0x46d   : > { %v10505_v14 = vpop.eup %10504  ;;  %v4798_v61 = vor.u32 %v4796_v24, %v4795_v31  ;;  %v13589_v17 = vsel %vm12966_vm1, %v4795_v31, 0  ;;  %v5039_v57 = vshrl.u32 %v13583_v62, 16  ;;  %v4502_v23 = vmul.f32 %v10501_v48, %v13448_v37 }
 0x46e   : > { %v5032_v52 = vor.u32 %v5031_v39, %v5027_v53  ;;  %v5043_v56 = vrot.slane %v5041_v1, 1  ;;  %10508 = vrcp.f32 %v4396_v43  ;;  %v4398_v10 = vadd.f32 1.0, %v10497_v9 }
 0x46f   : > { %v13595_v28 = vsel %vm12966_vm1, 0, %v4798_v61  ;;  %v5048_v0 = vrot.slane %v5046_v19, 1  ;;  %v5058_v46 = vshll.u32 %v13589_v17, 16  ;;  %10510 = vrcp.f32 %v4397_v55 }
 0x470   : > { %v13598_v58 = vsel %vm4917_vm2, %v5032_v52, %v5036_v3  ;;  %v5053_v51 = vshll.u32 %v13595_v28, 16  ;;  %v5044_v8 = vor.u32 %v5043_v56, %v5039_v57  ;;  %v4399_v37 = vadd.f32 1.0, %v10499_v21 }
 0x471   : > { %9449 = vmatmul.mubr.msk.bf16.gmra.mrb[32].mxu1 %vm1041_vm4, %v13598_v58  ;;  %v4400_v48 = vadd.f32 1.0, %v10503_v20  ;;  %v10507_v31 = vpop.eup %10506  ;;  %v5051_v24 = vshrl.u32 %v13595_v28, 16  ;;  %10512 = vrcp.f32 %v4398_v10  ;;  %v4401_v9 = vadd.f32 1.0, %v10505_v14 }
 0x472   : > { %v5055_v43 = vrot.slane %v5053_v51, 1  ;;  %v13606_v53 = vsel %vm4917_vm2, %v5044_v8, %v5048_v0  ;;  %v4503_v39 = vmul.f32 %v10507_v31, %v13451_v35  ;;  %v4685_v19 = vsel %vm4619_vm14, %v4502_v23, 0.0 }
 0x473   : > { %10514 = vrcp.f32 %v4399_v37  ;;  %9452 = vmatprep.mubr.msk.bf16.mxu1 %vm1041_vm4, %v13606_v53  ;;  %v15543_v1 = vsub.s32 5, %v15539_v34  ;;  %v5060_v61 = vrot.slane %v5058_v46, 1  ;;  %v15544_v57 = vsub.s32 6, %v15539_v34 }
 0x474   : > { %v5056_v21 = vor.u32 %v5055_v43, %v5051_v24  ;;  %10516 = vrcp.f32 %v4400_v48  ;;  %v4686_v20 = vsel %vm4619_vm14, %v4503_v39, 0.0  ;;  %v15545_v51 = vsub.s32 7, %v15539_v34 }
 0x475   : > { %v4590_v14 = vrot.slane %v10768_v42, %v15543_v1  ;;  %10518 = vrcp.f32 %v4401_v9  ;;  %v4709_v55 = vpack.c.bf16 %v4686_v20, %v4685_v19  ;;  %v4594_v13 = vrot.slane %v10768_v42, %v15544_v57 }
 0x476   : > { %v13619_v35 = vsel %vm4917_vm2, %v5056_v21, %v5060_v61  ;;  %v4598_v46 = vrot.slane %v10768_v42, %v15545_v51 }
 0x477   : > { %v4800_v52 = vshrl.u32 %v4709_v55, 16  ;;  %vm4620_vm15 = vcmp.ne.s32.totalorder %v4590_v14, 0  ;;  %v4803_v56 = vshll.u32 %v4709_v55, 16  ;;  %vm4621_vm3 = vcmp.ne.s32.totalorder %v4594_v13, 0 }
 0x478   : > { %v10509_v3 = vpop.eup %10508  ;;  %vm4622_vm5 = vcmp.ne.s32.totalorder %v4598_v46, 0 }
 0x479   : > { %9453 = vmatmul.mubr.msk.bf16.gmra.mrb[36].mxu1 %vm1041_vm4, %v13619_v35  ;;  %v4802_v23 = vrot.slane %v4800_v52, 7  ;;  %v4504_v10 = vmul.f32 %v10509_v3, %v13480_v32  ;;  %v10511_v0 = vpop.eup %10510 }
 0x47a   : > { %v4505_v31 = vmul.f32 %v10511_v0, %v13485_v12 }
 0x47b   : > { %v10513_v8 = vpop.eup %10512  ;;  %v4805_v37 = vor.u32 %v4803_v56, %v4802_v23  ;;  %v13632_v48 = vsel %vm12966_vm1, %v4802_v23, 0  ;;  %v4687_v24 = vsel %vm4620_vm15, %v4504_v10, 0.0 }
 0x47c   : > { %v4506_v9 = vmul.f32 %v10513_v8, %v13505_v50  ;;  %v5070_v42 = vshll.u32 %v13632_v48, 16  ;;  %v4688_v19 = vsel %vm4620_vm15, %v4505_v31, 0.0 }
 0x47d   : > { %v10515_v43 = vpop.eup %10514  ;;  %v13639_v39 = vsel %vm12966_vm1, 0, %v4805_v37  ;;  %v4710_v1 = vpack.c.bf16 %v4688_v19, %v4687_v24 }
 0x47e   : > { %v10517_v32 = vpop.eup %10516  ;;  %v4507_v21 = vmul.f32 %v10515_v43, %v13514_v54  ;;  %v5065_v12 = vshll.u32 %v13639_v39, 16  ;;  %v4689_v61 = vsel %vm4621_vm3, %v4506_v9, 0.0  ;;  %v5063_v3 = vshrl.u32 %v13639_v39, 16 }
 0x47f   : > { %v10519_v20 = vpop.eup %10518  ;;  %v4508_v50 = vmul.f32 %v10517_v32, %v13521_v26  ;;  %v4807_v13 = vshrl.u32 %v4710_v1, 16  ;;  %v5072_v14 = vrot.slane %v5070_v42, 1  ;;  %v4810_v51 = vshll.u32 %v4710_v1, 16 }
 0x480   : > { %v4690_v55 = vsel %vm4621_vm3, %v4507_v21, 0.0  ;;  %v4509_v52 = vmul.f32 %v10519_v20, %v13528_v59  ;;  %v5067_v57 = vrot.slane %v5065_v12, 1 }
 0x481   : > { %v4711_v23 = vpack.c.bf16 %v4690_v55, %v4689_v61  ;;  %v4691_v56 = vsel %vm4622_vm5, %v4508_v50, 0.0  ;;  %v4809_v0 = vrot.slane %v4807_v13, 7 }
 0x482   : > { %v4692_v10 = vsel %vm4622_vm5, %v4509_v52, 0.0  ;;  %v5068_v54 = vor.u32 %v5067_v57, %v5063_v3 }
 0x483   : > { %v4814_v8 = vshrl.u32 %v4711_v23, 16  ;;  %v4817_v37 = vshll.u32 %v4711_v23, 16  ;;  %v4712_v46 = vpack.c.bf16 %v4692_v10, %v4691_v56  ;;  %v4812_v26 = vor.u32 %v4810_v51, %v4809_v0 }
 0x484   : > { %v13649_v31 = vsel %vm4917_vm2, %v5068_v54, %v5072_v14  ;;  %v13653_v59 = vsel %vm12966_vm1, %v4809_v0, 0 }
 0x485   : > { %v4816_v24 = vrot.slane %v4814_v8, 7  ;;  %9456 = vmatprep.mubr.msk.bf16.mxu1 %vm1041_vm4, %v13649_v31  ;;  %v4821_v43 = vshrl.u32 %v4712_v46, 16  ;;  %v13659_v9 = vsel %vm12966_vm1, 0, %v4812_v26  ;;  %v5082_v21 = vshll.u32 %v13653_v59, 16 }
 0x486   : > { %v5077_v19 = vshll.u32 %v13659_v9, 16  ;;  %v4824_v61 = vshll.u32 %v4712_v46, 16  ;;  %v5075_v55 = vshrl.u32 %v13659_v9, 16 }
 0x487   : > { %v4819_v32 = vor.u32 %v4817_v37, %v4816_v24  ;;  %v13663_v42 = vsel %vm12966_vm1, %v4816_v24, 0  ;;  %v4823_v1 = vrot.slane %v4821_v43, 7  ;;  %v5084_v23 = vrot.slane %v5082_v21, 1  ;;  %v10738_v21 = vld [vmem:[%s14958_s4 + $0x8] sm:$0xf] }
 0x488   : > { %v5094_v12 = vshll.u32 %v13663_v42, 16  ;;  %v5079_v50 = vrot.slane %v5077_v19, 1 }
 0x489   : > { %v13669_v20 = vsel %vm12966_vm1, 0, %v4819_v32  ;;  %v4826_v3 = vor.u32 %v4824_v61, %v4823_v1  ;;  %v13676_v57 = vsel %vm12966_vm1, %v4823_v1, 0  ;;  %v5845_v1 = vld [vmem:[%s14958_s4 + $0xc] sm:$0xf]  ;;  %v15546_v61 = vld [vmem:[#allocation60_spill] sm:$0xff] }
 0x48a   : > { %v5089_v52 = vshll.u32 %v13669_v20, 16  ;;  %v5080_v13 = vor.u32 %v5079_v50, %v5075_v55  ;;  %v5087_v14 = vshrl.u32 %v13669_v20, 16  ;;  %v5096_v10 = vrot.slane %v5094_v12, 1  ;;  %v15547_v55 = vld [vmem:[#allocation61_spill] sm:$0xff] }
 0x48b   : > { %v13681_v54 = vsel %vm12966_vm1, 0, %v4826_v3  ;;  %v5106_v37 = vshll.u32 %v13676_v57, 16  ;;  %v5650_v12 = vsel %vm1096_vm0, %v10738_v21, 0  ;;  %v5552_v50 = vrot.slane %v12995_v2, 1  ;;  %v15551_v21 = vld [vmem:[#allocation62_spill] sm:$0xff] }
 0x48c   : > { %v5091_v56 = vrot.slane %v5089_v52, 1  ;;  %v13684_v0 = vsel %vm4917_vm2, %v5080_v13, %v5084_v23  ;;  %v5101_v8 = vshll.u32 %v13681_v54, 16  ;;  %v5099_v26 = vshrl.u32 %v13681_v54, 16  ;;  %v15548_v52 = vld [vmem:[#allocation36_spill] sm:$0xff] }
 0x48d   : > { %9457 = vmatmul.mubr.msk.bf16.gmra.mrb[40].mxu1 %vm1041_vm4, %v13684_v0  ;;  %v5108_v32 = vrot.slane %v5106_v37, 1  ;;  %v5553_v3 = vrot.slane %v15548_v52, 1  ;;  %v5555_v23 = vrot.slane %v15546_v61, 1 }
 0x48e   : > { %v5092_v51 = vor.u32 %v5091_v56, %v5087_v14  ;;  %v5103_v24 = vrot.slane %v5101_v8, 1  ;;  %v5558_v14 = vrot.slane %v15547_v55, 1  ;;  %v15549_v56 = vld [vmem:[#allocation37_spill] sm:$0xff]  ;;  %v15550_v8 = vld [vmem:[#allocation40_spill] sm:$0xff] }
 0x48f   : > { %v5554_v13 = vsel %vm5551_vm6, %v5552_v50, %v5553_v3  ;;  %v3699_v3 = vpop.xlane.xlu0 %3698 }
 0x490   : > { %v13691_v46 = vsel %vm4917_vm2, %v5092_v51, %v5096_v10  ;;  %v5104_v43 = vor.u32 %v5103_v24, %v5099_v26  ;;  %v5556_v10 = vrot.slane %v15549_v56, 1  ;;  %v5850_v51 = vsel %vm1096_vm0, %v5845_v1, 0  ;;  %v13756_v26 = vld [vmem:[%s14958_s4 + $0x10] sm:$0xf] }
 0x491   : > { %9460 = vmatprep.mubr.msk.bf16.mxu1 %vm1041_vm4, %v13691_v46  ;;  %v5571_v56 = vrot.slane %v13455_v25, 1  ;;  %v5576_v25 = vrot.slane %v13551_v47, 1 }
 0x492   : > { %v13697_v19 = vsel %vm4917_vm2, %v5104_v43, %v5108_v32  ;;  %v13751_v37 = vsel %vm5551_vm6, %v5555_v23, %v5556_v10  ;;  %v5561_v43 = vrot.slane %v13165_v6, 1  ;;  %v5564_v32 = vrot.slane %v13316_v15, 1  ;;  %v3702_v23 = vpop.xlane.xlu1 %3701 }
 0x495   : > { %9461 = vmatmul.mubr.msk.bf16.gmra.mrb[44].mxu1 %vm1041_vm4, %v13697_v19 }
 0x496   : > { %9466 = vmatprep.mubr.msk.bf16.mxu1 %vm1041_vm4, %v12995_v2  ;;  %v5559_v2 = vrot.slane %v15550_v8, 1  ;;  %v3880_v8 = vpop.xlane.xlu0 %3879 }
 0x498   : > { %v13761_v24 = vsel %vm5551_vm6, %v5558_v14, %v5559_v2  ;;  %v5570_v14 = vrot.slane %v13461_v44, 1  ;;  %v3742_v2 = vmul.f32 0.125, %v3699_v3 }
 0x49d   : > { %9467 = vmatmul.mubr.msk.bf16.vlgmr.msra.gmra.mrb[16].mxu1 %vm1041_vm4, %v15546_v61 }
 0x49e   : > { %9499 = vmatpush3.bf16.msra.mxu1 %v5650_v12  ;;  %9470 = vmatprep.mubr.msk.bf16.mxu1 %vm1041_vm4, %v15547_v55  ;;  %v5562_v12 = vrot.slane %v15551_v21, 1  ;;  %v3922_v21 = vmul.f32 0.125, %v3880_v8 }
 0x49f   : > { %10295 = vmatprep.subr.msk.bf16.mxu1 %vm1096_vm0, %v5845_v1  ;;  %v5565_v1 = vrot.slane %v13296_v29, 1  ;;  %v5568_v29 = vrot.slane %v13363_v36, 1  ;;  %v5573_v36 = vrot.slane %v13474_v40, 1 }
 0x4a0   : > { %v13772_v50 = vsel %vm5551_vm6, %v5561_v43, %v5562_v12  ;;  %v3883_v43 = vpop.xlane.xlu1 %3882 }
 0x4a1   : > { %v13777_v52 = vsel %vm5551_vm6, %v5564_v32, %v5565_v1  ;;  %v3743_v32 = vmul.f32 0.125, %v3702_v23  ;;  %v3923_v12 = vmul.f32 0.125, %v3883_v43  ;;  %v5574_v1 = vrot.slane %v13465_v60, 1 }
 0x4a2   : > { %v5579_v60 = vrot.slane %v13567_v18, 1 }
 0x4a5   : > { %9471 = vmatmul.mubr.msk.bf16.gmra.mrb[20].mxu1 %vm1041_vm4, %v13165_v6 }
 0x4a6   : > { %9474 = vmatprep.mubr.msk.bf16.mxu1 %vm1041_vm4, %v13316_v15 }
 0x4ad   : > { %9475 = vmatmul.mubr.msk.bf16.gmra.mrb[24].mxu1 %vm1041_vm4, %v13378_v41 }
 0x4ae   : > { %9478 = vmatprep.mubr.msk.bf16.mxu1 %vm1041_vm4, %v13461_v44 }
 0x4b5   : > { %9479 = vmatmul.mubr.msk.bf16.gmra.mrb[28].mxu1 %vm1041_vm4, %v13474_v40 }
 0x4b6   : > { %9482 = vmatprep.mubr.msk.bf16.mxu1 %vm1041_vm4, %v13551_v47 }
 0x4bd   : > { %9483 = vmatmul.mubr.msk.bf16.gmra.mrb[32].mxu1 %vm1041_vm4, %v13567_v18 }
 0x4be   : > { %9486 = vmatprep.mubr.msk.bf16.mxu1 %vm1041_vm4, %v13583_v62 }
 0x4c5   : > { %9487 = vmatmul.mubr.msk.bf16.gmra.mrb[36].mxu1 %vm1041_vm4, %v13595_v28 }
 0x4c6   : > { %9490 = vmatprep.mubr.msk.bf16.mxu1 %vm1041_vm4, %v13639_v39 }
 0x4cd   : > { %9491 = vmatmul.mubr.msk.bf16.gmra.mrb[40].mxu1 %vm1041_vm4, %v13659_v9 }
 0x4ce   : > { %9494 = vmatprep.mubr.msk.bf16.mxu1 %vm1041_vm4, %v13669_v20 }
 0x4d5   : > { %9495 = vmatmul.mubr.msk.bf16.gmra.mrb[44].mxu1 %vm1041_vm4, %v13681_v54 }
 0x4d6   : > { %9500 = vmatprep.mubr.msk.bf16.mxu1 %vm1041_vm4, %v5554_v13  ;;  %v5567_v13 = vrot.slane %v13378_v41, 1 }
 0x4d8   : > { %v13786_v10 = vsel %vm5551_vm6, %v5567_v13, %v5568_v29  ;;  %v3958_v13 = vmul.f32 %v3742_v2, %v3742_v2  ;;  %v5577_v29 = vrot.slane %v13545_v22, 1  ;;  %v5582_v22 = vrot.slane %v13583_v62, 1 }
 0x4da   : > { %v3994_v38 = vsub.f32 %v3922_v21, %v3958_v13  ;;  %v13805_v3 = vsel %vm5551_vm6, %v5576_v25, %v5577_v29  ;;  %v5583_v21 = vrot.slane %v13576_v49, 1  ;;  %v5586_v49 = vrot.slane %v13589_v17, 1 }
 0x4db   : > { %v5589_v29 = vrot.slane %v13632_v48, 1  ;;  %v5592_v17 = vrot.slane %v13653_v59, 1  ;;  %v5595_v48 = vrot.slane %v13663_v42, 1  ;;  %v5597_v42 = vrot.slane %v13681_v54, 1 }
 0x4dc   : > { %v4030_v8 = vmax.f32 %v3994_v38, 0.0  ;;  %v13819_v25 = vsel %vm5551_vm6, %v5582_v22, %v5583_v21  ;;  %v5585_v38 = vrot.slane %v13595_v28, 1 }
 0x4dd   : > { %9501 = vmatmul.mubr.msk.bf16.vlgmr.msra.gmra.mrb[16].mxu1 %vm1041_vm4, %v13751_v37 }
 0x4de   : > { %9533 = vmatpush3.bf16.msra.mxu1 %v5850_v51  ;;  %9504 = vmatprep.mubr.msk.bf16.mxu1 %vm1041_vm4, %v13761_v24  ;;  %v13791_v51 = vsel %vm5551_vm6, %v5570_v14, %v5571_v56  ;;  %v3959_v14 = vmul.f32 %v3743_v32, %v3743_v32  ;;  %v13800_v56 = vsel %vm5551_vm6, %v5573_v36, %v5574_v1  ;;  %v5580_v36 = vrot.slane %v13562_v33, 1 }
 0x4df   : > { %10296 = vmatprep.subr.msk.bf16.mxu1 %vm1096_vm0, %v13756_v26  ;;  %15552 = vst [vmem:[#allocation33_spill] sm:$0xff] %v13791_v51  ;;  %v4102_v13 = vadd.f32 1e-05, %v4030_v8  ;;  %v5588_v33 = vrot.slane %v13639_v39, 1  ;;  %v5594_v8 = vrot.slane %v13669_v20, 1 }
 0x4e0   : > { %v3995_v23 = vsub.f32 %v3923_v12, %v3959_v14  ;;  %v13814_v1 = vsel %vm5551_vm6, %v5579_v60, %v5580_v36  ;;  %v13828_v14 = vsel %vm5551_vm6, %v5585_v38, %v5586_v49  ;;  %v5591_v60 = vrot.slane %v13659_v9, 1  ;;  %v15553_v36 = vld [vmem:[#allocation13_spill] sm:$0xff] }
 0x4e1   : > { %10520 = vrsqrt.f32 %v4102_v13  ;;  %v4066_v21 = vsub.f32 %v15553_v36, %v3742_v2  ;;  %v13857_v2 = vld [vmem:[%s14956_s2] ss:$0 sm:$0xff] }
 0x4e2   : > { %v4031_v43 = vmax.f32 %v3995_v23, 0.0  ;;  %v13833_v23 = vsel %vm5551_vm6, %v5588_v33, %v5589_v29  ;;  %v13843_v13 = vsel %vm5551_vm6, %v5591_v60, %v5592_v17  ;;  %v13849_v33 = vsel %vm5551_vm6, %v5594_v8, %v5595_v48  ;;  %v13872_v17 = vld [vmem:[%s14957_s3] ss:$0 sm:$0xff] }
 0x4e3   : > { %v5598_v29 = vrot.slane %v13676_v57, 1 }
 0x4e4   : > { %v4103_v12 = vadd.f32 1e-05, %v4031_v43 }
 0x4e5   : > { %9505 = vmatmul.mubr.msk.bf16.gmra.mrb[20].mxu1 %vm1041_vm4, %v13772_v50  ;;  %v13863_v8 = vsel %vm5551_vm6, %v5597_v42, %v5598_v29  ;;  %v15555_v42 = vmov 0  }
 0x4e6   : > { %9508 = vmatprep.mubr.msk.bf16.mxu1 %vm1041_vm4, %v13777_v52  ;;  %10522 = vrsqrt.f32 %v4103_v12  ;;  %v15554_v12 = vld [vmem:[#allocation20_spill] sm:$0xff]  ;;  %v15560_v16 = vld [vmem:[#allocation33_spill] sm:$0xff] }
 0x4e7   : > { %v4067_v38 = vsub.f32 %v15554_v12, %v3743_v32 }
 0x4eb   : > { %v10521_v22 = vpop.eup %10520 }
 0x4ec   : > { %v4174_v49 = vmul.f32 %v10521_v22, %v4066_v21  ;;  %v6261_v21 = vld [vmem:[%s14958_s4 + $0x14] sm:$0xf] }
 0x4ed   : > { %9509 = vmatmul.mubr.msk.bf16.gmra.mrb[24].mxu1 %vm1041_vm4, %v13786_v10 }
 0x4ee   : > { %9512 = vmatprep.mubr.msk.bf16.mxu1 %vm1041_vm4, %v13791_v51  ;;  %v4216_v32 = vmul.f32 %v13857_v2, %v4174_v49  ;;  %v4517_v49 = vadd.s32 16, %v15539_v34 }
 0x4f0   : > { %v10523_v43 = vpop.eup %10522  ;;  %v4258_v22 = vadd.f32 %v13872_v17, %v4216_v32 }
 0x4f1   : > { %v4175_v59 = vmul.f32 %v10523_v43, %v4067_v38  ;;  %v6061_v43 = vsel %vm1096_vm0, %v13756_v26, 0 }
 0x4f2   : > { %v8515_v48 = vmul.f32 -1.442695, %v4258_v22 }
 0x4f3   : > { %v4217_v60 = vmul.f32 %v13857_v2, %v4175_v59  ;;  %v4522_v59 = vadd.s32 4294967295, %v4517_v49  ;;  %v15556_v49 = vld [vmem:[#allocation39_spill] sm:$0xff] }
 0x4f4   : > { %10524 = vpow2.f32 %v8515_v48 }
 0x4f5   : > { %9513 = vmatmul.mubr.msk.bf16.gmra.mrb[28].mxu1 %vm1041_vm4, %v13800_v56  ;;  %v4259_v57 = vadd.f32 %v13872_v17, %v4217_v60  ;;  %vm4528_vm7 = vcmp.lt.s32.totalorder %v4522_v59, 16  ;;  %v6266_v59 = vsel %vm1096_vm0, %v6261_v21, 0 }
 0x4f6   : > { %9516 = vmatprep.mubr.msk.bf16.mxu1 %vm1041_vm4, %v13805_v3  ;;  %v13900_v32 = vsel %vm4528_vm7, 1, %v15555_v42  ;;  %v6461_v42 = vld [vmem:[%s14958_s4 + $0x18] sm:$0xf] }
 0x4f7   : > { %v8516_v36 = vmul.f32 -1.442695, %v4259_v57  ;;  %v4602_v60 = vrot.slane %v13900_v32, %v15537_v63 }
 0x4f9   : > { %10526 = vpow2.f32 %v8516_v36  ;;  %vm4623_vm8 = vcmp.ne.s32.totalorder %v4602_v60, 0 }
 0x4fd   : > { %9517 = vmatmul.mubr.msk.bf16.gmra.mrb[32].mxu1 %vm1041_vm4, %v13814_v1 }
 0x4fe   : > { %9520 = vmatprep.mubr.msk.bf16.mxu1 %vm1041_vm4, %v13819_v25 }
 0x505   : > { %9521 = vmatmul.mubr.msk.bf16.gmra.mrb[36].mxu1 %vm1041_vm4, %v13828_v14 }
 0x506   : > { %9524 = vmatprep.mubr.msk.bf16.mxu1 %vm1041_vm4, %v13833_v23 }
 0x50d   : > { %9525 = vmatmul.mubr.msk.bf16.gmra.mrb[40].mxu1 %vm1041_vm4, %v13843_v13 }
 0x50e   : > { %9528 = vmatprep.mubr.msk.bf16.mxu1 %vm1041_vm4, %v13849_v33 }
 0x515   : > { %9529 = vmatmul.mubr.msk.bf16.gmra.mrb[44].mxu1 %vm1041_vm4, %v13863_v8 }
 0x516   : > { %9534 = vmatprep.mubr.msk.bf16.mxu1 %vm1041_vm4, %v15546_v61  ;;  %v10525_v61 = vpop.eup %10524 }
 0x517   : > { %v10527_v26 = vpop.eup %10526  ;;  %v4402_v12 = vadd.f32 1.0, %v10525_v61 }
 0x518   : > { %v4403_v38 = vadd.f32 1.0, %v10527_v26 }
 0x519   : > { %10528 = vrcp.f32 %v4402_v12 }
 0x51a   : > { %10530 = vrcp.f32 %v4403_v38 }
 0x51d   : > { %9535 = vmatmul.mubr.msk.bf16.vlgmr.msra.gmra.mrb[16].mxu1 %vm1041_vm4, %v15547_v55 }
 0x51e   : > { %9567 = vmatpush3.bf16.msra.mxu1 %v6061_v43  ;;  %9538 = vmatprep.mubr.msk.bf16.mxu1 %vm1041_vm4, %v13165_v6 }
 0x51f   : > { %10297 = vmatprep.subr.msk.bf16.mxu1 %vm1096_vm0, %v6261_v21 }
 0x523   : > { %v10529_v34 = vpop.eup %10528 }
 0x524   : > { %v10531_v29 = vpop.eup %10530  ;;  %v4510_v48 = vmul.f32 %v10529_v34, %v4258_v22 }
 0x525   : > { %9539 = vmatmul.mubr.msk.bf16.gmra.mrb[20].mxu1 %vm1041_vm4, %v13316_v15  ;;  %v4511_v43 = vmul.f32 %v10531_v29, %v4259_v57 }
 0x526   : > { %9542 = vmatprep.mubr.msk.bf16.mxu1 %vm1041_vm4, %v13378_v41  ;;  %v4693_v36 = vsel %vm4623_vm8, %v4510_v48, 0.0 }
 0x527   : > { %v4694_v61 = vsel %vm4623_vm8, %v4511_v43, 0.0 }
 0x528   : > { %v4713_v26 = vpack.c.bf16 %v4694_v61, %v4693_v36 }
 0x52a   : > { %v4828_v12 = vshrl.u32 %v4713_v26, 16  ;;  %v4831_v22 = vshll.u32 %v4713_v26, 16  ;;  %v6466_v26 = vsel %vm1096_vm0, %v6461_v42, 0 }
 0x52c   : > { %v4830_v63 = vrot.slane %v4828_v12, 7  ;;  %v6672_v12 = vld [vmem:[%s14958_s4 + $0x1c] sm:$0xf] }
 0x52d   : > { %9543 = vmatmul.mubr.msk.bf16.gmra.mrb[24].mxu1 %vm1041_vm4, %v13461_v44 }
 0x52e   : > { %9546 = vmatprep.mubr.msk.bf16.mxu1 %vm1041_vm4, %v13474_v40  ;;  %v4833_v57 = vor.u32 %v4831_v22, %v4830_v63  ;;  %v4914_v34 = vsel %vm12966_vm1, %v4830_v63, 0  ;;  %v3708_v63 = vpop.xlane.xlu1 %3707 }
 0x52f   : > { %v6052_v48 = vshll.u32 %v4914_v34, 16 }
 0x530   : > { %v13918_v38 = vsel %vm12966_vm1, 0, %v4833_v57 }
 0x531   : > { %v6047_v21 = vshll.u32 %v13918_v38, 16  ;;  %v6045_v60 = vshrl.u32 %v13918_v38, 16  ;;  %v6054_v36 = vrot.slane %v6052_v48, 1 }
 0x533   : > { %v6049_v29 = vrot.slane %v6047_v21, 1 }
 0x535   : > { %9547 = vmatmul.mubr.msk.bf16.gmra.mrb[28].mxu1 %vm1041_vm4, %v13551_v47  ;;  %v6050_v43 = vor.u32 %v6049_v29, %v6045_v60 }
 0x536   : > { %9550 = vmatprep.mubr.msk.bf16.mxu1 %vm1041_vm4, %v13567_v18 }
 0x537   : > { %v13962_v61 = vsel %vm4917_vm2, %v6050_v43, %v6054_v36 }
 0x53d   : > { %9551 = vmatmul.mubr.msk.bf16.gmra.mrb[32].mxu1 %vm1041_vm4, %v13583_v62 }
 0x53e   : > { %9554 = vmatprep.mubr.msk.bf16.mxu1 %vm1041_vm4, %v13595_v28 }
 0x545   : > { %9555 = vmatmul.mubr.msk.bf16.gmra.mrb[36].mxu1 %vm1041_vm4, %v13639_v39 }
 0x546   : > { %9558 = vmatprep.mubr.msk.bf16.mxu1 %vm1041_vm4, %v13659_v9 }
 0x54d   : > { %9559 = vmatmul.mubr.msk.bf16.gmra.mrb[40].mxu1 %vm1041_vm4, %v13669_v20 }
 0x54e   : > { %9562 = vmatprep.mubr.msk.bf16.mxu1 %vm1041_vm4, %v13681_v54 }
 0x555   : > { %9563 = vmatmul.mubr.msk.bf16.gmra.mrb[44].mxu1 %vm1041_vm4, %v13918_v38 }
 0x556   : > { %9568 = vmatprep.mubr.msk.bf16.mxu1 %vm1041_vm4, %v15556_v49  ;;  %v3889_v49 = vpop.xlane.xlu1 %3888 }
 0x557   : > { %v3925_v21 = vmul.f32 0.125, %v3889_v49  ;;  %v15557_v49 = vld [vmem:[#allocation11_spill] sm:$0xff] }
 0x55d   : > { %9569 = vmatmul.mubr.msk.bf16.vlgmr.msra.gmra.mrb[16].mxu1 %vm1041_vm4, %v13188_v4 }
 0x55e   : > { %9601 = vmatpush3.bf16.msra.mxu1 %v6266_v59  ;;  %9572 = vmatprep.mubr.msk.bf16.mxu1 %vm1041_vm4, %v13198_v5  ;;  %v3745_v59 = vmul.f32 0.125, %v3708_v63 }
 0x55f   : > { %10298 = vmatprep.subr.msk.bf16.mxu1 %vm1096_vm0, %v6461_v42 }
 0x560   : > { %v3961_v60 = vmul.f32 %v3745_v59, %v3745_v59 }
 0x562   : > { %v3997_v43 = vsub.f32 %v3925_v21, %v3961_v60  ;;  %v15558_v21 = vld [vmem:[#allocation19_spill] sm:$0xff] }
 0x565   : > { %9573 = vmatmul.mubr.msk.bf16.gmra.mrb[20].mxu1 %vm1041_vm4, %v13345_v30 }
 0x566   : > { %9576 = vmatprep.mubr.msk.bf16.mxu1 %vm1041_vm4, %v13414_v7 }
 0x56d   : > { %9577 = vmatmul.mubr.msk.bf16.gmra.mrb[24].mxu1 %vm1041_vm4, %v13491_v11 }
 0x56e   : > { %9580 = vmatprep.mubr.msk.bf16.mxu1 %vm1041_vm4, %v13500_v27 }
 0x575   : > { %9581 = vmatmul.mubr.msk.bf16.gmra.mrb[28].mxu1 %vm1041_vm4, %v13572_v45 }
 0x576   : > { %9584 = vmatprep.mubr.msk.bf16.mxu1 %vm1041_vm4, %v13598_v58 }
 0x57d   : > { %9585 = vmatmul.mubr.msk.bf16.gmra.mrb[32].mxu1 %vm1041_vm4, %v13606_v53 }
 0x57e   : > { %9588 = vmatprep.mubr.msk.bf16.mxu1 %vm1041_vm4, %v13619_v35 }
 0x585   : > { %9589 = vmatmul.mubr.msk.bf16.gmra.mrb[36].mxu1 %vm1041_vm4, %v13649_v31 }
 0x586   : > { %9592 = vmatprep.mubr.msk.bf16.mxu1 %vm1041_vm4, %v13684_v0 }
 0x58d   : > { %9593 = vmatmul.mubr.msk.bf16.gmra.mrb[40].mxu1 %vm1041_vm4, %v13691_v46 }
 0x58e   : > { %9596 = vmatprep.mubr.msk.bf16.mxu1 %vm1041_vm4, %v13697_v19 }
 0x595   : > { %9597 = vmatmul.mubr.msk.bf16.gmra.mrb[44].mxu1 %vm1041_vm4, %v13962_v61 }
 0x596   : > { %9602 = vmatprep.mubr.msk.bf16.mxu1 %vm1041_vm4, %v13751_v37  ;;  %v3705_v37 = vpop.xlane.xlu0 %3704 }
 0x597   : > { %v3744_v57 = vmul.f32 0.125, %v3705_v37 }
 0x599   : > { %v3960_v29 = vmul.f32 %v3744_v57, %v3744_v57 }
 0x59a   : > { %v3886_v22 = vpop.xlane.xlu0 %3885 }
 0x59b   : > { %v3924_v42 = vmul.f32 0.125, %v3886_v22 }
 0x59d   : > { %9603 = vmatmul.mubr.msk.bf16.vlgmr.msra.gmra.mrb[16].mxu1 %vm1041_vm4, %v13761_v24  ;;  %v3996_v48 = vsub.f32 %v3924_v42, %v3960_v29  ;;  %v4068_v42 = vsub.f32 %v15557_v49, %v3744_v57  ;;  %v4069_v29 = vsub.f32 %v15558_v21, %v3745_v59 }
 0x59e   : > { %9635 = vmatpush3.bf16.msra.mxu1 %v6466_v26  ;;  %9606 = vmatprep.mubr.msk.bf16.mxu1 %vm1041_vm4, %v13772_v50  ;;  %v4033_v26 = vmax.f32 %v3997_v43, 0.0  ;;  %v6259_v43 = vrot.slane %v4914_v34, 1  ;;  %v6677_v34 = vsel %vm1096_vm0, %v6672_v12, 0 }
 0x59f   : > { %10299 = vmatprep.subr.msk.bf16.mxu1 %vm1096_vm0, %v6672_v12  ;;  %v4032_v36 = vmax.f32 %v3996_v48, 0.0  ;;  %v6258_v48 = vrot.slane %v13918_v38, 1 }
 0x5a0   : > { %v4105_v37 = vadd.f32 1e-05, %v4033_v26 }
 0x5a5   : > { %9607 = vmatmul.mubr.msk.bf16.gmra.mrb[20].mxu1 %vm1041_vm4, %v13777_v52 }
 0x5a6   : > { %9610 = vmatprep.mubr.msk.bf16.mxu1 %vm1041_vm4, %v13786_v10 }
 0x5ad   : > { %9611 = vmatmul.mubr.msk.bf16.gmra.mrb[24].mxu1 %vm1041_vm4, %v13791_v51  ;;  %v4104_v51 = vadd.f32 1e-05, %v4032_v36 }
 0x5ae   : > { %9614 = vmatprep.mubr.msk.bf16.mxu1 %vm1041_vm4, %v13800_v56 }
 0x5af   : > { %10532 = vrsqrt.f32 %v4104_v51 }
 0x5b0   : > { %10534 = vrsqrt.f32 %v4105_v37  ;;  %v14007_v37 = vsel %vm5551_vm6, %v6258_v48, %v6259_v43 }
 0x5b5   : > { %9615 = vmatmul.mubr.msk.bf16.gmra.mrb[28].mxu1 %vm1041_vm4, %v13805_v3 }
 0x5b6   : > { %9618 = vmatprep.mubr.msk.bf16.mxu1 %vm1041_vm4, %v13814_v1 }
 0x5b9   : > { %v10533_v63 = vpop.eup %10532 }
 0x5ba   : > { %v10535_v22 = vpop.eup %10534  ;;  %v4176_v60 = vmul.f32 %v10533_v63, %v4068_v42 }
 0x5bb   : > { %v4177_v51 = vmul.f32 %v10535_v22, %v4069_v29 }
 0x5bc   : > { %v4218_v36 = vmul.f32 %v13857_v2, %v4176_v60 }
 0x5bd   : > { %9619 = vmatmul.mubr.msk.bf16.gmra.mrb[32].mxu1 %vm1041_vm4, %v13819_v25  ;;  %v4219_v26 = vmul.f32 %v13857_v2, %v4177_v51  ;;  %v6877_v2 = vld [vmem:[%s14958_s4 + $0x20] sm:$0xf] }
 0x5be   : > { %9622 = vmatprep.mubr.msk.bf16.mxu1 %vm1041_vm4, %v13828_v14  ;;  %v4260_v57 = vadd.f32 %v13872_v17, %v4218_v36 }
 0x5bf   : > { %v4261_v59 = vadd.f32 %v13872_v17, %v4219_v26 }
 0x5c0   : > { %v8517_v63 = vmul.f32 -1.442695, %v4260_v57 }
 0x5c1   : > { %v8518_v22 = vmul.f32 -1.442695, %v4261_v59 }
 0x5c2   : > { %10536 = vpow2.f32 %v8517_v63 }
 0x5c3   : > { %10538 = vpow2.f32 %v8518_v22 }
 0x5c5   : > { %9623 = vmatmul.mubr.msk.bf16.gmra.mrb[36].mxu1 %vm1041_vm4, %v13833_v23 }
 0x5c6   : > { %9626 = vmatprep.mubr.msk.bf16.mxu1 %vm1041_vm4, %v13843_v13 }
 0x5cd   : > { %9627 = vmatmul.mubr.msk.bf16.gmra.mrb[40].mxu1 %vm1041_vm4, %v13849_v33 }
 0x5ce   : > { %9630 = vmatprep.mubr.msk.bf16.mxu1 %vm1041_vm4, %v13863_v8 }
 0x5d5   : > { %9631 = vmatmul.mubr.msk.bf16.gmra.mrb[44].mxu1 %vm1041_vm4, %v14007_v37 }
 0x5d6   : > { %9636 = vmatprep.mubr.msk.bf16.mxu1 %vm1041_vm4, %v15547_v55  ;;  %v10537_v55 = vpop.eup %10536 }
 0x5d7   : > { %v10539_v17 = vpop.eup %10538  ;;  %v4404_v12 = vadd.f32 1.0, %v10537_v55 }
 0x5d8   : > { %v4405_v49 = vadd.f32 1.0, %v10539_v17 }
 0x5d9   : > { %10540 = vrcp.f32 %v4404_v12 }
 0x5da   : > { %10542 = vrcp.f32 %v4405_v49 }
 0x5dd   : > { %9637 = vmatmul.mubr.msk.bf16.vlgmr.msra.gmra.mrb[16].mxu1 %vm1041_vm4, %v13165_v6 }
 0x5de   : > { %9669 = vmatpush3.bf16.msra.mxu1 %v6677_v34  ;;  %9640 = vmatprep.mubr.msk.bf16.mxu1 %vm1041_vm4, %v13316_v15 }
 0x5df   : > { %10300 = vmatprep.subr.msk.bf16.mxu1 %vm1096_vm0, %v6877_v2 }
 0x5e3   : > { %v10541_v6 = vpop.eup %10540 }
 0x5e4   : > { %v10543_v15 = vpop.eup %10542 }
 0x5e5   : > { %9641 = vmatmul.mubr.msk.bf16.gmra.mrb[20].mxu1 %vm1041_vm4, %v13378_v41  ;;  %v15559_v41 = vld [vmem:[#allocation27_spill] sm:$0xff]  ;;  %v4513_v42 = vmul.f32 %v10543_v15, %v4261_v59 }
 0x5e6   : > { %9644 = vmatprep.mubr.msk.bf16.mxu1 %vm1041_vm4, %v13461_v44  ;;  %v4606_v44 = vrot.slane %v13900_v32, %v15559_v41 }
 0x5e8   : > { %vm4624_vm9 = vcmp.ne.s32.totalorder %v4606_v44, 0 }
 0x5e9   : > { %v4696_v21 = vsel %vm4624_vm9, %v4513_v42, 0.0 }
 0x5ed   : > { %9645 = vmatmul.mubr.msk.bf16.gmra.mrb[24].mxu1 %vm1041_vm4, %v13474_v40  ;;  %v4512_v40 = vmul.f32 %v10541_v6, %v4260_v57 }
 0x5ee   : > { %9648 = vmatprep.mubr.msk.bf16.mxu1 %vm1041_vm4, %v13551_v47 }
 0x5ef   : > { %v4695_v47 = vsel %vm4624_vm9, %v4512_v40, 0.0 }
 0x5f5   : > { %9649 = vmatmul.mubr.msk.bf16.gmra.mrb[28].mxu1 %vm1041_vm4, %v13567_v18  ;;  %v4714_v18 = vpack.c.bf16 %v4696_v21, %v4695_v47 }
 0x5f6   : > { %9652 = vmatprep.mubr.msk.bf16.mxu1 %vm1041_vm4, %v13583_v62 }
 0x5f7   : > { %v4835_v62 = vshrl.u32 %v4714_v18, 16 }
 0x5f9   : > { %v4837_v32 = vrot.slane %v4835_v62, 7 }
 0x5fd   : > { %9653 = vmatmul.mubr.msk.bf16.gmra.mrb[32].mxu1 %vm1041_vm4, %v13595_v28  ;;  %v4838_v28 = vshll.u32 %v4714_v18, 16 }
 0x5fe   : > { %9656 = vmatprep.mubr.msk.bf16.mxu1 %vm1041_vm4, %v13639_v39 }
 0x5ff   : > { %v4840_v39 = vor.u32 %v4838_v28, %v4837_v32 }
 0x601   : > { %v4897_v29 = vsel %vm12966_vm1, 0, %v4840_v39 }
 0x605   : > { %9657 = vmatmul.mubr.msk.bf16.gmra.mrb[36].mxu1 %vm1041_vm4, %v13659_v9  ;;  %v6882_v9 = vsel %vm1096_vm0, %v6877_v2, 0  ;;  %vm8115_vm0 = vcmask 60416  }
 0x606   : > { %9660 = vmatprep.mubr.msk.bf16.mxu1 %vm1041_vm4, %v13669_v20 }
 0x60d   : > { %9661 = vmatmul.mubr.msk.bf16.gmra.mrb[40].mxu1 %vm1041_vm4, %v13681_v54 }
 0x60e   : > { %9664 = vmatprep.mubr.msk.bf16.mxu1 %vm1041_vm4, %v13918_v38 }
 0x615   : > { %9665 = vmatmul.mubr.msk.bf16.gmra.mrb[44].mxu1 %vm1041_vm4, %v4897_v29 }
 0x616   : > { %9670 = vmatprep.mubr.msk.bf16.mxu1 %vm1041_vm4, %v13188_v4  ;;  %v6663_v4 = vshll.u32 %v4897_v29, 16 }
 0x61d   : > { %9671 = vmatmul.mubr.msk.bf16.vlgmr.msra.gmra.mrb[16].mxu1 %vm1041_vm4, %v13198_v5  ;;  %v4915_v5 = vsel %vm12966_vm1, %v4837_v32, 0 }
 0x61e   : > { %9703 = vmatpush3.bf16.msra.mxu1 %v6882_v9  ;;  %9674 = vmatprep.mubr.msk.bf16.mxu1 %vm1041_vm4, %v13345_v30  ;;  %v6665_v30 = vrot.slane %v6663_v4, 1 }
 0x625   : > { %9675 = vmatmul.mubr.msk.bf16.gmra.mrb[20].mxu1 %vm1041_vm4, %v13414_v7  ;;  %v6661_v7 = vshrl.u32 %v4897_v29, 16 }
 0x626   : > { %9678 = vmatprep.mubr.msk.bf16.mxu1 %vm1041_vm4, %v13491_v11  ;;  %v6668_v11 = vshll.u32 %v4915_v5, 16 }
 0x62d   : > { %9679 = vmatmul.mubr.msk.bf16.gmra.mrb[24].mxu1 %vm1041_vm4, %v13500_v27  ;;  %v6666_v27 = vor.u32 %v6665_v30, %v6661_v7 }
 0x62e   : > { %9682 = vmatprep.mubr.msk.bf16.mxu1 %vm1041_vm4, %v13572_v45  ;;  %v6670_v45 = vrot.slane %v6668_v11, 1 }
 0x635   : > { %9683 = vmatmul.mubr.msk.bf16.gmra.mrb[28].mxu1 %vm1041_vm4, %v13598_v58  ;;  %v6671_v58 = vsel %vm4917_vm2, %v6666_v27, %v6670_v45 }
 0x636   : > { %9686 = vmatprep.mubr.msk.bf16.mxu1 %vm1041_vm4, %v13606_v53  ;;  %v6874_v53 = vrot.slane %v4897_v29, 1 }
 0x63d   : > { %9687 = vmatmul.mubr.msk.bf16.gmra.mrb[32].mxu1 %vm1041_vm4, %v13619_v35  ;;  %v6875_v35 = vrot.slane %v4915_v5, 1 }
 0x63e   : > { %9690 = vmatprep.mubr.msk.bf16.mxu1 %vm1041_vm4, %v13649_v31 }
 0x63f   : > { %v6876_v31 = vsel %vm5551_vm6, %v6874_v53, %v6875_v35 }
 0x645   : > { %9691 = vmatmul.mubr.msk.bf16.gmra.mrb[36].mxu1 %vm1041_vm4, %v13684_v0 }
 0x646   : > { %9694 = vmatprep.mubr.msk.bf16.mxu1 %vm1041_vm4, %v13691_v46 }
 0x64d   : > { %9695 = vmatmul.mubr.msk.bf16.gmra.mrb[40].mxu1 %vm1041_vm4, %v13697_v19 }
 0x64e   : > { %9698 = vmatprep.mubr.msk.bf16.mxu1 %vm1041_vm4, %v13962_v61 }
 0x655   : > { %9699 = vmatmul.mubr.msk.bf16.gmra.mrb[44].mxu1 %vm1041_vm4, %v6671_v58 }
 0x656   : > { %9704 = vmatprep.mubr.msk.bf16.mxu1 %vm1041_vm4, %v13761_v24 }
 0x65d   : > { %9705 = vmatmul.mubr.msk.bf16.vlgmr.msra.gmra.mrb[16].mxu1 %vm1041_vm4, %v13772_v50 }
 0x65e   : > { %9708 = vmatprep.mubr.msk.bf16.mxu1 %vm1041_vm4, %v13777_v52 }
 0x665   : > { %9709 = vmatmul.mubr.msk.bf16.gmra.mrb[20].mxu1 %vm1041_vm4, %v13786_v10 }
 0x666   : > { %9712 = vmatprep.mubr.msk.bf16.mxu1 %vm1041_vm4, %v15560_v16 }
 0x66d   : > { %9713 = vmatmul.mubr.msk.bf16.gmra.mrb[24].mxu1 %vm1041_vm4, %v13800_v56 }
 0x66e   : > { %9716 = vmatprep.mubr.msk.bf16.mxu1 %vm1041_vm4, %v13805_v3 }
 0x675   : > { %9717 = vmatmul.mubr.msk.bf16.gmra.mrb[28].mxu1 %vm1041_vm4, %v13814_v1 }
 0x676   : > { %9720 = vmatprep.mubr.msk.bf16.mxu1 %vm1041_vm4, %v13819_v25 }
 0x67d   : > { %9721 = vmatmul.mubr.msk.bf16.gmra.mrb[32].mxu1 %vm1041_vm4, %v13828_v14 }
 0x67e   : > { %9724 = vmatprep.mubr.msk.bf16.mxu1 %vm1041_vm4, %v13833_v23 }
 0x685   : > { %9725 = vmatmul.mubr.msk.bf16.gmra.mrb[36].mxu1 %vm1041_vm4, %v13843_v13 }
 0x686   : > { %9728 = vmatprep.mubr.msk.bf16.mxu1 %vm1041_vm4, %v13849_v33 }
 0x68d   : > { %9729 = vmatmul.mubr.msk.bf16.gmra.mrb[40].mxu1 %vm1041_vm4, %v13863_v8 }
 0x68e   : > { %9732 = vmatprep.mubr.msk.bf16.mxu1 %vm1041_vm4, %v14007_v37 }
 0x695   : > { %9733 = vmatmul.mubr.msk.bf16.gmra.mrb[44].mxu1 %vm1041_vm4, %v6876_v31 }
 0x730   : > { %v14120_v20 = vpop.f32.mrb[16].mxu1 }
 0x731   : > { %v14122_v54 = vpop.f32.mrb[17].mxu1  ;;  %v7085_v0 = vsel %vm1041_vm4, %v14120_v20, 0.0  ;;  %v7209_v52 = vmul.f32 %v14120_v20, %v14120_v20 }
 0x732   : > { %7086 = vadd.xlane.f32.xlu0 %v7085_v0  ;;  %v14126_v46 = vpop.f32.mrb[18].mxu1  ;;  %v7079_v50 = vsel %vm1041_vm4, %v14122_v54, 0.0  ;;  %v7207_v14 = vmul.f32 %v14122_v54, %v14122_v54 }
 0x733   : > { %v14128_v19 = vpop.f32.mrb[19].mxu1  ;;  %v7088_v24 = vsel %vm1041_vm4, %v14126_v46, 0.0  ;;  %v7210_v56 = vmul.f32 %v14126_v46, %v14126_v46  ;;  %v7245_v25 = vsel %vm1041_vm4, %v7209_v52, 0.0 }
 0x734   : > { %7089 = vadd.xlane.f32.xlu1 %v7088_v24  ;;  %v7082_v10 = vsel %vm1041_vm4, %v14128_v19, 0.0  ;;  %v7208_v8 = vmul.f32 %v14128_v19, %v14128_v19  ;;  %v7239_v38 = vsel %vm1041_vm4, %v7207_v14, 0.0 }
 0x735   : > { %v7248_v33 = vsel %vm1041_vm4, %v7210_v56, 0.0 }
 0x736   : > { %7080 = vadd.xlane.f32.xlu0 %v7079_v50  ;;  %v7242_v61 = vsel %vm1041_vm4, %v7208_v8, 0.0 }
 0x738   : > { %7083 = vadd.xlane.f32.xlu1 %v7082_v10  ;;  %v14140_v3 = vpop.f32.mrb[20].mxu1 }
 0x739   : > { %v14142_v1 = vpop.f32.mrb[21].mxu1  ;;  %v7097_v48 = vsel %vm1041_vm4, %v14140_v3, 0.0  ;;  %v7213_v57 = vmul.f32 %v14140_v3, %v14140_v3 }
 0x73a   : > { %7246 = vadd.xlane.f32.xlu0 %v7245_v25  ;;  %v14147_v23 = vpop.f32.mrb[22].mxu1  ;;  %v7091_v37 = vsel %vm1041_vm4, %v14142_v1, 0.0  ;;  %v7211_v55 = vmul.f32 %v14142_v1, %v14142_v1 }
 0x73b   : > { %v14149_v13 = vpop.f32.mrb[23].mxu1  ;;  %v7100_v26 = vsel %vm1041_vm4, %v14147_v23, 0.0  ;;  %v7214_v63 = vmul.f32 %v14147_v23, %v14147_v23  ;;  %v7257_v2 = vsel %vm1041_vm4, %v7213_v57, 0.0 }
 0x73c   : > { %7249 = vadd.xlane.f32.xlu1 %v7248_v33  ;;  %v7094_v59 = vsel %vm1041_vm4, %v14149_v13, 0.0  ;;  %v7212_v6 = vmul.f32 %v14149_v13, %v14149_v13  ;;  %v7251_v15 = vsel %vm1041_vm4, %v7211_v55, 0.0 }
 0x73d   : > { %v7260_v49 = vsel %vm1041_vm4, %v7214_v63, 0.0 }
 0x73e   : > { %7240 = vadd.xlane.f32.xlu0 %v7239_v38  ;;  %v7254_v41 = vsel %vm1041_vm4, %v7212_v6, 0.0 }
 0x740   : > { %7243 = vadd.xlane.f32.xlu1 %v7242_v61  ;;  %v14156_v60 = vpop.f32.mrb[24].mxu1 }
 0x741   : > { %v14158_v51 = vpop.f32.mrb[25].mxu1  ;;  %v7109_v42 = vsel %vm1041_vm4, %v14156_v60, 0.0  ;;  %v7217_v32 = vmul.f32 %v14156_v60, %v14156_v60 }
 0x742   : > { %7098 = vadd.xlane.f32.xlu0 %v7097_v48  ;;  %v14162_v43 = vpop.f32.mrb[26].mxu1  ;;  %v7103_v62 = vsel %vm1041_vm4, %v14158_v51, 0.0  ;;  %v7215_v5 = vmul.f32 %v14158_v51, %v14158_v51 }
 0x743   : > { %v14164_v36 = vpop.f32.mrb[27].mxu1  ;;  %v7112_v18 = vsel %vm1041_vm4, %v14162_v43, 0.0  ;;  %v7218_v39 = vmul.f32 %v14162_v43, %v14162_v43  ;;  %v7269_v4 = vsel %vm1041_vm4, %v7217_v32, 0.0 }
 0x744   : > { %7101 = vadd.xlane.f32.xlu1 %v7100_v26  ;;  %v7106_v28 = vsel %vm1041_vm4, %v14164_v36, 0.0  ;;  %v7216_v27 = vmul.f32 %v14164_v36, %v14164_v36  ;;  %v7263_v45 = vsel %vm1041_vm4, %v7215_v5, 0.0 }
 0x745   : > { %v7272_v11 = vsel %vm1041_vm4, %v7218_v39, 0.0 }
 0x746   : > { %7092 = vadd.xlane.f32.xlu0 %v7091_v37  ;;  %v7266_v58 = vsel %vm1041_vm4, %v7216_v27, 0.0 }
 0x748   : > { %7095 = vadd.xlane.f32.xlu1 %v7094_v59  ;;  %v14176_v34 = vpop.f32.mrb[28].mxu1 }
 0x749   : > { %v14178_v22 = vpop.f32.mrb[29].mxu1  ;;  %v7121_v35 = vsel %vm1041_vm4, %v14176_v34, 0.0  ;;  %v7221_v50 = vmul.f32 %v14176_v34, %v14176_v34 }
 0x74a   : > { %7258 = vadd.xlane.f32.xlu0 %v7257_v2  ;;  %v14183_v17 = vpop.f32.mrb[30].mxu1  ;;  %v7115_v52 = vsel %vm1041_vm4, %v14178_v22, 0.0  ;;  %v7219_v14 = vmul.f32 %v14178_v22, %v14178_v22 }
 0x74b   : > { %v14185_v12 = vpop.f32.mrb[31].mxu1  ;;  %v7124_v24 = vsel %vm1041_vm4, %v14183_v17, 0.0  ;;  %v7222_v10 = vmul.f32 %v14183_v17, %v14183_v17  ;;  %v7281_v8 = vsel %vm1041_vm4, %v7221_v50, 0.0 }
 0x74c   : > { %7261 = vadd.xlane.f32.xlu1 %v7260_v49  ;;  %v7118_v56 = vsel %vm1041_vm4, %v14185_v12, 0.0  ;;  %v7220_v61 = vmul.f32 %v14185_v12, %v14185_v12  ;;  %v7275_v37 = vsel %vm1041_vm4, %v7219_v14, 0.0 }
 0x74d   : > { %v7284_v26 = vsel %vm1041_vm4, %v7222_v10, 0.0 }
 0x74e   : > { %7252 = vadd.xlane.f32.xlu0 %v7251_v15  ;;  %v7278_v57 = vsel %vm1041_vm4, %v7220_v61, 0.0 }
 0x750   : > { %7255 = vadd.xlane.f32.xlu1 %v7254_v41  ;;  %v14192_v44 = vpop.f32.mrb[32].mxu1 }
 0x751   : > { %v14194_v40 = vpop.f32.mrb[33].mxu1  ;;  %v7133_v59 = vsel %vm1041_vm4, %v14192_v44, 0.0  ;;  %v7225_v2 = vmul.f32 %v14192_v44, %v14192_v44 }
 0x752   : > { %7110 = vadd.xlane.f32.xlu0 %v7109_v42  ;;  %v14198_v47 = vpop.f32.mrb[34].mxu1  ;;  %v7127_v55 = vsel %vm1041_vm4, %v14194_v40, 0.0  ;;  %v7223_v15 = vmul.f32 %v14194_v40, %v14194_v40 }
 0x753   : > { %v14200_v21 = vpop.f32.mrb[35].mxu1  ;;  %v7136_v63 = vsel %vm1041_vm4, %v14198_v47, 0.0  ;;  %v7226_v49 = vmul.f32 %v14198_v47, %v14198_v47  ;;  %v7293_v41 = vsel %vm1041_vm4, %v7225_v2, 0.0 }
 0x754   : > { %7113 = vadd.xlane.f32.xlu1 %v7112_v18  ;;  %v7130_v6 = vsel %vm1041_vm4, %v14200_v21, 0.0  ;;  %v7224_v42 = vmul.f32 %v14200_v21, %v14200_v21 }
 0x755   : > { %v7296_v18 = vsel %vm1041_vm4, %v7226_v49, 0.0 }
 0x756   : > { %7104 = vadd.xlane.f32.xlu0 %v7103_v62  ;;  %v7287_v62 = vsel %vm1041_vm4, %v7223_v15, 0.0  ;;  %v7290_v32 = vsel %vm1041_vm4, %v7224_v42, 0.0 }
 0x758   : > { %7107 = vadd.xlane.f32.xlu1 %v7106_v28  ;;  %v14212_v29 = vpop.f32.mrb[36].mxu1 }
 0x759   : > { %v14214_v9 = vpop.f32.mrb[37].mxu1  ;;  %v7145_v28 = vsel %vm1041_vm4, %v14212_v29, 0.0 }
 0x75a   : > { %15561 = vst [vmem:[#allocation31_spill] sm:$0xff] %v14214_v9  ;;  %7270 = vadd.xlane.f32.xlu0 %v7269_v4  ;;  %v14219_v30 = vpop.f32.mrb[38].mxu1  ;;  %v7229_v4 = vmul.f32 %v14212_v29, %v14212_v29  ;;  %v7139_v5 = vsel %vm1041_vm4, %v14214_v9, 0.0 }
 0x75b   : > { %v14221_v7 = vpop.f32.mrb[39].mxu1  ;;  %v7148_v39 = vsel %vm1041_vm4, %v14219_v30, 0.0 }
 0x75c   : > { %15562 = vst [vmem:[#allocation34_spill] sm:$0xff] %v14221_v7  ;;  %7273 = vadd.xlane.f32.xlu1 %v7272_v11  ;;  %v7230_v11 = vmul.f32 %v14219_v30, %v14219_v30  ;;  %v7142_v27 = vsel %vm1041_vm4, %v14221_v7, 0.0 }
 0x75e   : > { %7264 = vadd.xlane.f32.xlu0 %v7263_v45  ;;  %v7227_v45 = vmul.f32 %v14214_v9, %v14214_v9 }
 0x760   : > { %7267 = vadd.xlane.f32.xlu1 %v7266_v58  ;;  %v14228_v16 = vpop.f32.mrb[40].mxu1  ;;  %v7305_v58 = vsel %vm1041_vm4, %v7229_v4, 0.0  ;;  %v7299_v50 = vsel %vm1041_vm4, %v7227_v45, 0.0 }
 0x761   : > { %15563 = vst [vmem:[#allocation32_spill] sm:$0xff] %v14228_v16  ;;  %v14230_v53 = vpop.f32.mrb[41].mxu1  ;;  %v7157_v10 = vsel %vm1041_vm4, %v14228_v16, 0.0  ;;  %v7233_v14 = vmul.f32 %v14228_v16, %v14228_v16 }
 0x762   : > { %15564 = vst [vmem:[#allocation3_spill] sm:$0xff] %v14230_v53  ;;  %7122 = vadd.xlane.f32.xlu0 %v7121_v35  ;;  %v14234_v31 = vpop.f32.mrb[42].mxu1  ;;  %v7228_v35 = vmul.f32 %v14221_v7, %v14221_v7 }
 0x763   : > { %15565 = vst [vmem:[#allocation41_spill] sm:$0xff] %v14234_v31  ;;  %v14236_v0 = vpop.f32.mrb[43].mxu1  ;;  %v7234_v61 = vmul.f32 %v14234_v31, %v14234_v31 }
 0x764   : > { %15566 = vst [vmem:[#allocation35_spill] sm:$0xff] %v14236_v0  ;;  %7125 = vadd.xlane.f32.xlu1 %v7124_v24  ;;  %v7308_v24 = vsel %vm1041_vm4, %v7230_v11, 0.0 }
 0x766   : > { %7116 = vadd.xlane.f32.xlu0 %v7115_v52  ;;  %v7302_v52 = vsel %vm1041_vm4, %v7228_v35, 0.0 }
 0x768   : > { %7119 = vadd.xlane.f32.xlu1 %v7118_v56  ;;  %v14248_v25 = vpop.f32.mrb[44].mxu1  ;;  %v7160_v56 = vsel %vm1041_vm4, %v14234_v31, 0.0 }
 0x769   : > { %15567 = vst [vmem:[#allocation46_spill] sm:$0xff] %v14248_v25  ;;  %v14252_v33 = vpop.f32.mrb[45].mxu1  ;;  %v7169_v49 = vsel %vm1041_vm4, %v14248_v25, 0.0 }
 0x76a   : > { %15568 = vst [vmem:[#allocation38_spill] sm:$0xff] %v14252_v33  ;;  %7282 = vadd.xlane.f32.xlu0 %v7281_v8  ;;  %v14255_v38 = vpop.f32.mrb[46].mxu1  ;;  %v7151_v8 = vsel %vm1041_vm4, %v14230_v53, 0.0  ;;  %v7235_v15 = vmul.f32 %v14252_v33, %v14252_v33 }
 0x76b   : > { %15569 = vst [vmem:[#allocation58_spill] sm:$0xff] %v14255_v38  ;;  %v14259_v48 = vpop.f32.mrb[47].mxu1 }
 0x76c   : > { %15570 = vst [vmem:[#allocation4_spill] sm:$0xff] %v14259_v48  ;;  %7285 = vadd.xlane.f32.xlu1 %v7284_v26  ;;  %v7154_v26 = vsel %vm1041_vm4, %v14236_v0, 0.0  ;;  %v7236_v42 = vmul.f32 %v14259_v48, %v14259_v48 }
 0x76e   : > { %7276 = vadd.xlane.f32.xlu0 %v7275_v37  ;;  %v7231_v37 = vmul.f32 %v14230_v53, %v14230_v53 }
 0x770   : > { %7279 = vadd.xlane.f32.xlu1 %v7278_v57  ;;  %v7317_v57 = vsel %vm1041_vm4, %v7233_v14, 0.0  ;;  %v7311_v2 = vsel %vm1041_vm4, %v7231_v37, 0.0 }
 0x772   : > { %7134 = vadd.xlane.f32.xlu0 %v7133_v59  ;;  %v7232_v59 = vmul.f32 %v14236_v0, %v14236_v0 }
 0x774   : > { %7137 = vadd.xlane.f32.xlu1 %v7136_v63  ;;  %v7320_v63 = vsel %vm1041_vm4, %v7234_v61, 0.0 }
 0x776   : > { %7128 = vadd.xlane.f32.xlu0 %v7127_v55  ;;  %v7314_v55 = vsel %vm1041_vm4, %v7232_v59, 0.0 }
 0x778   : > { %7131 = vadd.xlane.f32.xlu1 %v7130_v6  ;;  %v7172_v6 = vsel %vm1041_vm4, %v14255_v38, 0.0 }
 0x77a   : > { %7294 = vadd.xlane.f32.xlu0 %v7293_v41  ;;  %v7163_v41 = vsel %vm1041_vm4, %v14252_v33, 0.0 }
 0x77c   : > { %7297 = vadd.xlane.f32.xlu1 %v7296_v18  ;;  %v7166_v18 = vsel %vm1041_vm4, %v14259_v48, 0.0 }
 0x77e   : > { %7288 = vadd.xlane.f32.xlu0 %v7287_v62  ;;  %v7237_v62 = vmul.f32 %v14248_v25, %v14248_v25  ;;  %v14396_v25 = vld [vmem:[%s14960_s6] ss:$0 sm:$0xff] }
 0x780   : > { %7291 = vadd.xlane.f32.xlu1 %v7290_v32  ;;  %v7323_v32 = vsel %vm1041_vm4, %v7235_v15, 0.0  ;;  %v7329_v4 = vsel %vm1041_vm4, %v7237_v62, 0.0 }
 0x782   : > { %7146 = vadd.xlane.f32.xlu0 %v7145_v28  ;;  %v7238_v28 = vmul.f32 %v14255_v38, %v14255_v38 }
 0x784   : > { %7149 = vadd.xlane.f32.xlu1 %v7148_v39  ;;  %v7326_v39 = vsel %vm1041_vm4, %v7236_v42, 0.0 }
 0x786   : > { %7140 = vadd.xlane.f32.xlu0 %v7139_v5  ;;  %v7332_v5 = vsel %vm1041_vm4, %v7238_v28, 0.0 }
 0x788   : > { %7143 = vadd.xlane.f32.xlu1 %v7142_v27 }
 0x78a   : > { %7306 = vadd.xlane.f32.xlu0 %v7305_v58 }
 0x78c   : > { %7309 = vadd.xlane.f32.xlu1 %v7308_v24 }
 0x78e   : > { %7300 = vadd.xlane.f32.xlu0 %v7299_v50 }
 0x790   : > { %7303 = vadd.xlane.f32.xlu1 %v7302_v52 }
 0x792   : > { %7158 = vadd.xlane.f32.xlu0 %v7157_v10 }
 0x794   : > { %7161 = vadd.xlane.f32.xlu1 %v7160_v56 }
 0x796   : > { %7152 = vadd.xlane.f32.xlu0 %v7151_v8 }
 0x798   : > { %7155 = vadd.xlane.f32.xlu1 %v7154_v26 }
 0x79a   : > { %7318 = vadd.xlane.f32.xlu0 %v7317_v57 }
 0x79c   : > { %7321 = vadd.xlane.f32.xlu1 %v7320_v63 }
 0x79e   : > { %7312 = vadd.xlane.f32.xlu0 %v7311_v2 }
 0x7a0   : > { %7315 = vadd.xlane.f32.xlu1 %v7314_v55 }
 0x7a2   : > { %7170 = vadd.xlane.f32.xlu0 %v7169_v49 }
 0x7a4   : > { %7173 = vadd.xlane.f32.xlu1 %v7172_v6 }
 0x7a6   : > { %7164 = vadd.xlane.f32.xlu0 %v7163_v41 }
 0x7a8   : > { %7167 = vadd.xlane.f32.xlu1 %v7166_v18 }
 0x7aa   : > { %7324 = vadd.xlane.f32.xlu0 %v7323_v32 }
 0x7ac   : > { %7327 = vadd.xlane.f32.xlu1 %v7326_v39 }
 0x7ae   : > { %7330 = vadd.xlane.f32.xlu0 %v7329_v4 }
 0x7b0   : > { %7333 = vadd.xlane.f32.xlu1 %v7332_v5 }
 0x7bf   : > { %v7087_v11 = vpop.xlane.xlu0 %7086 }
 0x7c0   : > { %v14344_v58 = vmul.f32 0.125, %v7087_v11 }
 0x7c1   : > { %v7090_v27 = vpop.xlane.xlu1 %7089 }
 0x7c2   : > { %v14346_v24 = vmul.f32 0.125, %v7090_v27  ;;  %v7369_v52 = vmul.f32 %v14344_v58, %v14344_v58 }
 0x7c3   : > { %v7081_v45 = vpop.xlane.xlu0 %7080 }
 0x7c4   : > { %v14350_v10 = vmul.f32 0.125, %v7081_v45  ;;  %v7370_v61 = vmul.f32 %v14346_v24, %v14346_v24 }
 0x7c5   : > { %v7084_v35 = vpop.xlane.xlu1 %7083 }
 0x7c6   : > { %v14352_v14 = vmul.f32 0.125, %v7084_v35  ;;  %v7367_v59 = vmul.f32 %v14350_v10, %v14350_v10 }
 0x7c7   : > { %v7247_v50 = vpop.xlane.xlu0 %7246 }
 0x7c8   : > { %v7337_v56 = vmul.f32 0.125, %v7247_v50  ;;  %v7368_v49 = vmul.f32 %v14352_v14, %v14352_v14 }
 0x7c9   : > { %v7250_v8 = vpop.xlane.xlu1 %7249 }
 0x7ca   : > { %v7401_v26 = vsub.f32 %v7337_v56, %v7369_v52  ;;  %v7338_v37 = vmul.f32 0.125, %v7250_v8  ;;  %v15571_v52 = vld [vmem:[#allocation5_spill] sm:$0xff]  ;;  %v15572_v8 = vld [vmem:[#allocation6_spill] sm:$0xff] }
 0x7cb   : > { %v7241_v57 = vpop.xlane.xlu0 %7240  ;;  %v15582_v56 = vld [vmem:[#allocation21_spill] sm:$0xff] }
 0x7cc   : > { %v7433_v63 = vmax.f32 %v7401_v26, 0.0  ;;  %v7402_v2 = vsub.f32 %v7338_v37, %v7370_v61  ;;  %v7335_v55 = vmul.f32 0.125, %v7241_v57  ;;  %v7701_v61 = vunpack.c.l.bf16 %v15572_v8  ;;  %v15573_v37 = vld [vmem:[#allocation7_spill] sm:$0xff] }
 0x7cd   : > { %v7244_v6 = vpop.xlane.xlu1 %7243  ;;  %v7463_v57 = vsub.f32 %v14122_v54, %v14350_v10 }
 0x7ce   : > { %v7497_v15 = vadd.f32 1e-05, %v7433_v63  ;;  %v7434_v41 = vmax.f32 %v7402_v2, 0.0  ;;  %v7399_v42 = vsub.f32 %v7335_v55, %v7367_v59  ;;  %v7336_v18 = vmul.f32 0.125, %v7244_v6  ;;  %v15574_v59 = vld [vmem:[#allocation10_spill] sm:$0xff]  ;;  %v15575_v2 = vld [vmem:[#allocation8_spill] sm:$0xff] }
 0x7cf   : > { %v7099_v62 = vpop.xlane.xlu0 %7098  ;;  %v7702_v63 = vunpack.c.l.bf16 %v15574_v59  ;;  %v15580_v6 = vld [vmem:[#allocation18_spill] sm:$0xff] }
 0x7d0   : > { %10544 = vrsqrt.f32 %v7497_v15  ;;  %v7498_v32 = vadd.f32 1e-05, %v7434_v41  ;;  %v7431_v28 = vmax.f32 %v7399_v42, 0.0  ;;  %v7400_v39 = vsub.f32 %v7336_v18, %v7368_v49  ;;  %v15576_v49 = vld [vmem:[#allocation12_spill] sm:$0xff]  ;;  %v15577_v41 = vld [vmem:[#allocation14_spill] sm:$0xff] }
 0x7d1   : > { %v7102_v4 = vpop.xlane.xlu1 %7101  ;;  %v14360_v35 = vmul.f32 0.125, %v7099_v62  ;;  %v14385_v42 = vld [vmem:[%s14959_s5] ss:$0 sm:$0xff] }
 0x7d2   : > { %10546 = vrsqrt.f32 %v7498_v32  ;;  %v7495_v5 = vadd.f32 1e-05, %v7431_v28  ;;  %v7432_v11 = vmax.f32 %v7400_v39, 0.0  ;;  %v14364_v26 = vmul.f32 0.125, %v7102_v4  ;;  %v15578_v28 = vld [vmem:[#allocation15_spill] sm:$0xff]  ;;  %v15579_v4 = vld [vmem:[#allocation16_spill] sm:$0xff] }
 0x7d3   : > { %v7093_v27 = vpop.xlane.xlu0 %7092  ;;  %v7373_v18 = vmul.f32 %v14360_v35, %v14360_v35 }
 0x7d4   : > { %10548 = vrsqrt.f32 %v7495_v5  ;;  %v7496_v45 = vadd.f32 1e-05, %v7432_v11  ;;  %v14373_v62 = vmul.f32 0.125, %v7093_v27  ;;  %v7465_v11 = vsub.f32 %v14120_v20, %v14344_v58  ;;  %v15581_v5 = vld [vmem:[#allocation17_spill] sm:$0xff] }
 0x7d5   : > { %v7096_v50 = vpop.xlane.xlu1 %7095  ;;  %v7374_v27 = vmul.f32 %v14364_v26, %v14364_v26  ;;  %v7466_v58 = vsub.f32 %v14126_v46, %v14346_v24 }
 0x7d6   : > { %10550 = vrsqrt.f32 %v7496_v45  ;;  %v14379_v45 = vmul.f32 0.125, %v7096_v50  ;;  %v7371_v48 = vmul.f32 %v14373_v62, %v14373_v62 }
 0x7d7   : > { %v7259_v15 = vpop.xlane.xlu0 %7258 }
 0x7d8   : > { %v7341_v32 = vmul.f32 0.125, %v7259_v15  ;;  %v7372_v24 = vmul.f32 %v14379_v45, %v14379_v45 }
 0x7d9   : > { %v7262_v8 = vpop.xlane.xlu1 %7261 }
 0x7da   : > { %v10545_v59 = vpop.eup %10544  ;;  %v7405_v15 = vsub.f32 %v7341_v32, %v7373_v18  ;;  %v7342_v39 = vmul.f32 0.125, %v7262_v8 }
 0x7db   : > { %v7561_v50 = vmul.f32 %v10545_v59, %v7465_v11  ;;  %v7253_v38 = vpop.xlane.xlu0 %7252 }
 0x7dc   : > { %v10547_v55 = vpop.eup %10546  ;;  %v7437_v18 = vmax.f32 %v7405_v15, 0.0  ;;  %v7406_v32 = vsub.f32 %v7342_v39, %v7374_v27  ;;  %v7339_v8 = vmul.f32 0.125, %v7253_v38  ;;  %v7464_v15 = vsub.f32 %v14128_v19, %v14352_v14  ;;  %v15583_v19 = vld [vmem:[#allocation22_spill] sm:$0xff] }
 0x7dd   : > { %v7599_v20 = vmul.f32 %v14385_v42, %v7561_v50  ;;  %v7562_v46 = vmul.f32 %v10547_v55, %v7466_v58  ;;  %v7256_v11 = vpop.xlane.xlu1 %7255 }
 0x7de   : > { %v10549_v59 = vpop.eup %10548  ;;  %v7501_v33 = vadd.f32 1e-05, %v7437_v18  ;;  %v7438_v0 = vmax.f32 %v7406_v32, 0.0  ;;  %v7403_v53 = vsub.f32 %v7339_v8, %v7371_v48  ;;  %v7340_v31 = vmul.f32 0.125, %v7256_v11 }
 0x7df   : > { %v7637_v38 = vadd.f32 %v14396_v25, %v7599_v20  ;;  %v7600_v39 = vmul.f32 %v14385_v42, %v7562_v46  ;;  %v7559_v54 = vmul.f32 %v10549_v59, %v7463_v57  ;;  %v7111_v10 = vpop.xlane.xlu0 %7110 }
 0x7e0   : > { %v10551_v27 = vpop.eup %10550  ;;  %10552 = vrsqrt.f32 %v7501_v33  ;;  %v7502_v55 = vadd.f32 1e-05, %v7438_v0  ;;  %v7435_v58 = vmax.f32 %v7403_v53, 0.0  ;;  %v7404_v50 = vsub.f32 %v7340_v31, %v7372_v24  ;;  %v15584_v33 = vld [vmem:[#allocation23_spill] sm:$0xff]  ;;  %v15585_v24 = vld [vmem:[#allocation24_spill] sm:$0xff] }
 0x7e1   : > { %v14409_v16 = vadd.f32 %v7701_v61, %v7637_v38  ;;  %v7638_v18 = vadd.f32 %v14396_v25, %v7600_v39  ;;  %v7597_v48 = vmul.f32 %v14385_v42, %v7559_v54  ;;  %v7560_v32 = vmul.f32 %v10551_v27, %v7464_v15  ;;  %v7114_v8 = vpop.xlane.xlu1 %7113 }
 0x7e2   : > { %10554 = vrsqrt.f32 %v7502_v55  ;;  %v7499_v20 = vadd.f32 1e-05, %v7435_v58  ;;  %v7436_v46 = vmax.f32 %v7404_v50, 0.0  ;;  %v15586_v39 = vunpack.c.l.bf16 %v15571_v52  ;;  %v15587_v55 = vld [vmem:[#allocation26_spill] sm:$0xff] }
 0x7e3   : > { %v8667_v57 = vmul.f32 -1.442695, %v14409_v16  ;;  %v14415_v11 = vadd.f32 %v7702_v63, %v7638_v18  ;;  %v7635_v53 = vadd.f32 %v14396_v25, %v7597_v48  ;;  %v7598_v31 = vmul.f32 %v14385_v42, %v7560_v32  ;;  %v7105_v0 = vpop.xlane.xlu0 %7104 }
 0x7e4   : > { %10556 = vrsqrt.f32 %v7499_v20  ;;  %v7500_v15 = vadd.f32 1e-05, %v7436_v46  ;;  %v14429_v48 = vmul.f32 0.125, %v7111_v10  ;;  %v14440_v18 = vmul.f32 0.125, %v7114_v8 }
 0x7e5   : > { %10558 = vpow2.f32 %v8667_v57  ;;  %v8668_v38 = vmul.f32 -1.442695, %v14415_v11  ;;  %v14424_v54 = vadd.f32 %v15586_v39, %v7635_v53  ;;  %v7636_v63 = vadd.f32 %v14396_v25, %v7598_v31  ;;  %v7108_v27 = vpop.xlane.xlu1 %7107  ;;  %v15591_v39 = vld [vmem:[#allocation44_spill] sm:$0xff] }
 0x7e6   : > { %10560 = vrsqrt.f32 %v7500_v15  ;;  %v15590_v57 = vunpack.c.l.bf16 %v15573_v37  ;;  %v7469_v20 = vsub.f32 %v14140_v3, %v14360_v35  ;;  %v14448_v31 = vmul.f32 0.125, %v7105_v0 }
 0x7e7   : > { %10562 = vpow2.f32 %v8668_v38  ;;  %v8665_v46 = vmul.f32 -1.442695, %v14424_v54  ;;  %v7271_v53 = vpop.xlane.xlu0 %7270  ;;  %v7378_v3 = vmul.f32 %v14440_v18, %v14440_v18  ;;  %v14455_v35 = vmul.f32 0.125, %v7108_v27 }
 0x7e8   : > { %v14435_v52 = vadd.f32 %v15590_v57, %v7636_v63  ;;  %v7377_v57 = vmul.f32 %v14429_v48, %v14429_v48  ;;  %v7345_v14 = vmul.f32 0.125, %v7271_v53  ;;  %v7467_v53 = vsub.f32 %v14142_v1, %v14373_v62 }
 0x7e9   : > { %10564 = vpow2.f32 %v8665_v46  ;;  %v7274_v37 = vpop.xlane.xlu1 %7273  ;;  %v7470_v46 = vsub.f32 %v14147_v23, %v14364_v26 }
 0x7ea   : > { %v8666_v38 = vmul.f32 -1.442695, %v14435_v52  ;;  %v10553_v63 = vpop.eup %10552  ;;  %v7346_v32 = vmul.f32 0.125, %v7274_v37  ;;  %v7409_v50 = vsub.f32 %v7345_v14, %v7377_v57  ;;  %v7468_v14 = vsub.f32 %v14149_v13, %v14379_v45 }
 0x7eb   : > { %v7565_v15 = vmul.f32 %v10553_v63, %v7469_v20  ;;  %v7265_v10 = vpop.xlane.xlu0 %7264  ;;  %v7375_v63 = vmul.f32 %v14448_v31, %v14448_v31 }
 0x7ec   : > { %10566 = vpow2.f32 %v8666_v38  ;;  %v10555_v58 = vpop.eup %10554  ;;  %v7343_v7 = vmul.f32 0.125, %v7265_v10  ;;  %v7410_v59 = vsub.f32 %v7346_v32, %v7378_v3  ;;  %v7441_v20 = vmax.f32 %v7409_v50, 0.0 }
 0x7ed   : > { %v7603_v38 = vmul.f32 %v14385_v42, %v7565_v15  ;;  %v7566_v37 = vmul.f32 %v10555_v58, %v7470_v46  ;;  %v7268_v8 = vpop.xlane.xlu1 %7267  ;;  %v7376_v46 = vmul.f32 %v14455_v35, %v14455_v35  ;;  %v15598_v32 = vunpack.c.l.bf16 %v15577_v41 }
 0x7ee   : > { %v10557_v23 = vpop.eup %10556  ;;  %v7344_v27 = vmul.f32 0.125, %v7268_v8  ;;  %v7407_v9 = vsub.f32 %v7343_v7, %v7375_v63  ;;  %v15599_v7 = vunpack.c.l.bf16 %v15578_v28 }
 0x7ef   : > { %v10559_v61 = vpop.eup %10558  ;;  %v7641_v10 = vadd.f32 %v14396_v25, %v7603_v38  ;;  %v7604_v1 = vmul.f32 %v14385_v42, %v7566_v37  ;;  %v7563_v62 = vmul.f32 %v10557_v23, %v7467_v53  ;;  %v7123_v15 = vpop.xlane.xlu0 %7122  ;;  %v7442_v37 = vmax.f32 %v7410_v59, 0.0 }
 0x7f0   : > { %v10561_v58 = vpop.eup %10560  ;;  %v7861_v57 = vadd.f32 1.0, %v10559_v61  ;;  %v7408_v61 = vsub.f32 %v7344_v27, %v7376_v46 }
 0x7f1   : > { %v10563_v26 = vpop.eup %10562  ;;  %v14472_v8 = vadd.f32 %v15598_v32, %v7641_v10  ;;  %v7642_v13 = vadd.f32 %v14396_v25, %v7604_v1  ;;  %v7601_v45 = vmul.f32 %v14385_v42, %v7563_v62  ;;  %v7564_v3 = vmul.f32 %v10561_v58, %v7468_v14  ;;  %v7126_v38 = vpop.xlane.xlu1 %7125 }
 0x7f2   : > { %10568 = vrcp.f32 %v7861_v57  ;;  %v7862_v53 = vadd.f32 1.0, %v10563_v26  ;;  %v7505_v14 = vadd.f32 1e-05, %v7441_v20  ;;  %v7439_v62 = vmax.f32 %v7407_v9, 0.0 }
 0x7f3   : > { %v10565_v23 = vpop.eup %10564  ;;  %v8671_v0 = vmul.f32 -1.442695, %v14472_v8  ;;  %v14479_v50 = vadd.f32 %v15599_v7, %v7642_v13  ;;  %v7639_v41 = vadd.f32 %v14396_v25, %v7601_v45  ;;  %v7602_v63 = vmul.f32 %v14385_v42, %v7564_v3  ;;  %v7117_v10 = vpop.xlane.xlu0 %7116 }
 0x7f4   : > { %10570 = vrcp.f32 %v7862_v53  ;;  %v7859_v1 = vadd.f32 1.0, %v10565_v23  ;;  %v15600_v26 = vunpack.c.l.bf16 %v15575_v2  ;;  %v7440_v32 = vmax.f32 %v7408_v61, 0.0 }
 0x7f5   : > { %10572 = vpow2.f32 %v8671_v0  ;;  %v8672_v59 = vmul.f32 -1.442695, %v14479_v50  ;;  %v7640_v28 = vadd.f32 %v14396_v25, %v7602_v63  ;;  %v7120_v57 = vpop.xlane.xlu1 %7119  ;;  %v14489_v13 = vmul.f32 0.125, %v7123_v15 }
 0x7f6   : > { %v10567_v58 = vpop.eup %10566  ;;  %v14486_v27 = vadd.f32 %v15600_v26, %v7639_v41  ;;  %10574 = vrcp.f32 %v7859_v1  ;;  %v15601_v0 = vunpack.c.l.bf16 %v15576_v49  ;;  %v7473_v2 = vsub.f32 %v14156_v60, %v14429_v48 }
 0x7f7   : > { %v7860_v46 = vadd.f32 1.0, %v10567_v58  ;;  %10576 = vpow2.f32 %v8672_v59  ;;  %v7283_v45 = vpop.xlane.xlu0 %7282  ;;  %v7506_v3 = vadd.f32 1e-05, %v7442_v37  ;;  %v14498_v53 = vmul.f32 0.125, %v7126_v38 }
 0x7f8   : > { %v8669_v9 = vmul.f32 -1.442695, %v14486_v27  ;;  %v14494_v20 = vadd.f32 %v15601_v0, %v7640_v28  ;;  %v14500_v23 = vmul.f32 0.125, %v7117_v10  ;;  %v7503_v61 = vadd.f32 1e-05, %v7439_v62 }
 0x7f9   : > { %10578 = vrcp.f32 %v7860_v46  ;;  %v7349_v7 = vmul.f32 0.125, %v7283_v45  ;;  %v7286_v41 = vpop.xlane.xlu1 %7285  ;;  %v7504_v63 = vadd.f32 1e-05, %v7440_v32  ;;  %v7381_v1 = vmul.f32 %v14489_v13, %v14489_v13 }
 0x7fa   : > { %10580 = vpow2.f32 %v8669_v9  ;;  %v8670_v15 = vmul.f32 -1.442695, %v14494_v20  ;;  %v7382_v38 = vmul.f32 %v14498_v53, %v14498_v53  ;;  %v7379_v37 = vmul.f32 %v14500_v23, %v14500_v23 }
 0x7fb   : > { %10582 = vrsqrt.f32 %v7505_v14  ;;  %v14512_v10 = vmul.f32 0.125, %v7120_v57  ;;  %v7277_v62 = vpop.xlane.xlu0 %7276  ;;  %v7413_v59 = vsub.f32 %v7349_v7, %v7381_v1  ;;  %v7350_v26 = vmul.f32 0.125, %v7286_v41 }
 0x7fc   : > { %10584 = vpow2.f32 %v8670_v15  ;;  %v10569_v58 = vpop.eup %10568  ;;  %v7347_v14 = vmul.f32 0.125, %v7277_v62  ;;  %v15602_v60 = vsub.f32 %v14162_v43, %v14440_v18  ;;  %v15604_v18 = vsub.f32 %v14164_v36, %v14455_v35 }
 0x7fd   : > { %10586 = vrsqrt.f32 %v7506_v3  ;;  %v7957_v28 = vmul.f32 %v10569_v58, %v14409_v16  ;;  %v7280_v9 = vpop.xlane.xlu1 %7279  ;;  %v7445_v57 = vmax.f32 %v7413_v59, 0.0  ;;  %v7414_v45 = vsub.f32 %v7350_v26, %v7382_v38 }
 0x7fe   : > { %10588 = vrsqrt.f32 %v7503_v61  ;;  %v10571_v0 = vpop.eup %10570  ;;  %v7411_v3 = vsub.f32 %v7347_v14, %v7379_v37  ;;  %v7380_v41 = vmul.f32 %v14512_v10, %v14512_v10  ;;  %v7348_v61 = vmul.f32 0.125, %v7280_v9 }
 0x7ff   : > { %10590 = vrsqrt.f32 %v7504_v63  ;;  %v10573_v16 = vpop.eup %10572  ;;  %v8734_v15 = vpack.c.bf16 %v7957_v28, %v7957_v28  ;;  %v7958_v7 = vmul.f32 %v10571_v0, %v14415_v11  ;;  %v7135_v1 = vpop.xlane.xlu0 %7134  ;;  %v7509_v32 = vadd.f32 1e-05, %v7445_v57 }
 0x800   : > { %v10575_v62 = vpop.eup %10574  ;;  %v7865_v58 = vadd.f32 1.0, %v10573_v16  ;;  %v7446_v46 = vmax.f32 %v7414_v45, 0.0  ;;  %v7443_v49 = vmax.f32 %v7411_v3, 0.0  ;;  %v7477_v11 = vsub.f32 %v14176_v34, %v14489_v13 }
 0x801   : > { %v10577_v63 = vpop.eup %10576  ;;  %8118 = vst.msk [vmem:[%s14522_s8 + $0x8] sm:$0xf] %vm8115_vm0, %v8734_v15  ;;  %v8735_v38 = vpack.c.bf16 %v7958_v7, %v7958_v7  ;;  %v7955_v37 = vmul.f32 %v10575_v62, %v14424_v54  ;;  %v7412_v59 = vsub.f32 %v7348_v61, %v7380_v41  ;;  %v7138_v26 = vpop.xlane.xlu1 %7137  ;;  %v7478_v41 = vsub.f32 %v14183_v17, %v14498_v53 }
 0x802   : > { %10592 = vrcp.f32 %v7865_v58  ;;  %v7866_v28 = vadd.f32 1.0, %v10577_v63  ;;  %v7510_v9 = vadd.f32 1e-05, %v7446_v46  ;;  %v7507_v0 = vadd.f32 1e-05, %v7443_v49 }
 0x803   : > { %v10579_v14 = vpop.eup %10578  ;;  %8119 = vst.msk [vmem:[%s14522_s8 + $0xc] sm:$0xf] %vm8115_vm0, %v8735_v38  ;;  %v8732_v45 = vpack.c.bf16 %v7955_v37, %v7955_v37  ;;  %10594 = vrsqrt.f32 %v7509_v32  ;;  %v7444_v16 = vmax.f32 %v7412_v59, 0.0  ;;  %v7129_v54 = vpop.xlane.xlu0 %7128  ;;  %v14537_v61 = vmul.f32 0.125, %v7135_v1 }
 0x804   : > { %v10581_v57 = vpop.eup %10580  ;;  %v7956_v3 = vmul.f32 %v10579_v14, %v14435_v52  ;;  %10596 = vrcp.f32 %v7866_v28  ;;  %v7475_v38 = vsub.f32 %v14178_v22, %v14500_v23  ;;  %v14546_v37 = vmul.f32 0.125, %v7138_v26 }
 0x805   : > { %v10583_v15 = vpop.eup %10582  ;;  %v7863_v7 = vadd.f32 1.0, %v10581_v57  ;;  %8116 = vst.msk [vmem:[%s14522_s8] sm:$0xf] %vm8115_vm0, %v8732_v45  ;;  %10598 = vrsqrt.f32 %v7510_v9  ;;  %v7508_v32 = vadd.f32 1e-05, %v7444_v16  ;;  %v7132_v62 = vpop.xlane.xlu1 %7131  ;;  %v15603_v9 = vsub.f32 %v14158_v51, %v14448_v31 }
 0x806   : > { %v10585_v46 = vpop.eup %10584  ;;  %v8733_v49 = vpack.c.bf16 %v7956_v3, %v7956_v3  ;;  %v7569_v52 = vmul.f32 %v10583_v15, %v7473_v2  ;;  %v14554_v2 = vmul.f32 0.125, %v7129_v54  ;;  %v7476_v57 = vsub.f32 %v14185_v12, %v14512_v10 }
 0x807   : > { %v10587_v58 = vpop.eup %10586  ;;  %10600 = vrcp.f32 %v7863_v7  ;;  %v7864_v63 = vadd.f32 1.0, %v10585_v46  ;;  %v7295_v14 = vpop.xlane.xlu0 %7294  ;;  %v7385_v45 = vmul.f32 %v14537_v61, %v14537_v61  ;;  %v7481_v51 = vsub.f32 %v14192_v44, %v14537_v61 }
 0x808   : > { %v10589_v1 = vpop.eup %10588  ;;  %8117 = vst.msk [vmem:[%s14522_s8 + $0x4] sm:$0xf] %vm8115_vm0, %v8733_v49  ;;  %v7607_v59 = vmul.f32 %v14385_v42, %v7569_v52  ;;  %v7570_v48 = vmul.f32 %v10587_v58, %v15602_v60  ;;  %10602 = vrsqrt.f32 %v7507_v0  ;;  %v7386_v31 = vmul.f32 %v14546_v37, %v14546_v37 }
 0x809   : > { %v10591_v28 = vpop.eup %10590  ;;  %10604 = vrcp.f32 %v7864_v63  ;;  %v7567_v26 = vmul.f32 %v10589_v1, %v15603_v9  ;;  %v7298_v16 = vpop.xlane.xlu1 %7297  ;;  %v14573_v15 = vmul.f32 0.125, %v7132_v62  ;;  %v15605_v7 = vunpack.c.l.bf16 %v15580_v6 }
 0x80a   : > { %v7645_v3 = vadd.f32 %v14396_v25, %v7607_v59  ;;  %v7608_v43 = vmul.f32 %v14385_v42, %v7570_v48  ;;  %v7568_v0 = vmul.f32 %v10591_v28, %v15604_v18  ;;  %10606 = vrsqrt.f32 %v7508_v32 }
 0x80b   : > { %v7605_v54 = vmul.f32 %v14385_v42, %v7567_v26  ;;  %v14583_v35 = vmul.f32 %v14554_v2, %v14554_v2  ;;  %v7289_v52 = vpop.xlane.xlu0 %7288  ;;  %v7353_v63 = vmul.f32 0.125, %v7295_v14  ;;  %v7354_v1 = vmul.f32 0.125, %v7298_v16 }
 0x80c   : > { %v14577_v46 = vadd.f32 %v15605_v7, %v7645_v3  ;;  %v7646_v49 = vadd.f32 %v14396_v25, %v7608_v43  ;;  %v7606_v36 = vmul.f32 %v14385_v42, %v7568_v0  ;;  %v10593_v32 = vpop.eup %10592  ;;  %v14586_v62 = vmul.f32 0.125, %v7289_v52 }
 0x80d   : > { %v7643_v58 = vadd.f32 %v14396_v25, %v7605_v54  ;;  %v10595_v59 = vpop.eup %10594  ;;  %v7961_v6 = vmul.f32 %v10593_v32, %v14472_v8  ;;  %v15606_v48 = vunpack.c.l.bf16 %v15582_v56  ;;  %v7292_v26 = vpop.xlane.xlu1 %7291  ;;  %v15607_v43 = vunpack.c.l.bf16 %v15579_v4 }
 0x80e   : > { %v8675_v60 = vmul.f32 -1.442695, %v14577_v46  ;;  %v7644_v9 = vadd.f32 %v14396_v25, %v7606_v36  ;;  %v10597_v3 = vpop.eup %10596  ;;  %v7573_v14 = vmul.f32 %v10595_v59, %v7477_v11  ;;  %v7417_v8 = vsub.f32 %v7353_v63, %v7385_v45 }
 0x80f   : > { %v14592_v28 = vadd.f32 %v15606_v48, %v7646_v49  ;;  %v14597_v18 = vadd.f32 %v15607_v43, %v7643_v58  ;;  %v7418_v0 = vsub.f32 %v7354_v1, %v7386_v31  ;;  %v10599_v16 = vpop.eup %10598  ;;  %v8738_v54 = vpack.c.bf16 %v7961_v6, %v7961_v6  ;;  %v7147_v49 = vpop.xlane.xlu0 %7146 }
 0x810   : > { %v7962_v56 = vmul.f32 %v10597_v3, %v14479_v50  ;;  %10608 = vpow2.f32 %v8675_v60  ;;  %v15608_v52 = vunpack.c.l.bf16 %v15581_v5  ;;  %v7611_v34 = vmul.f32 %v14385_v42, %v7573_v14 }
 0x811   : > { %v8676_v7 = vmul.f32 -1.442695, %v14592_v28  ;;  %v10601_v36 = vpop.eup %10600  ;;  %v8673_v4 = vmul.f32 -1.442695, %v14597_v18  ;;  %v7574_v13 = vmul.f32 %v10599_v16, %v7478_v41  ;;  %8122 = vst.msk [vmem:[%s14522_s8 + $0x18] sm:$0xf] %vm8115_vm0, %v8738_v54  ;;  %v7150_v58 = vpop.xlane.xlu1 %7149  ;;  %v15609_v48 = vunpack.c.l.bf16 %v15585_v24 }
 0x812   : > { %v14607_v32 = vadd.f32 %v15608_v52, %v7644_v9  ;;  %v10603_v11 = vpop.eup %10602  ;;  %v8739_v50 = vpack.c.bf16 %v7962_v56, %v7962_v56  ;;  %v7959_v45 = vmul.f32 %v10601_v36, %v14486_v27  ;;  %v7449_v31 = vmax.f32 %v7417_v8, 0.0 }
 0x813   : > { %10610 = vpow2.f32 %v8676_v7  ;;  %v10605_v63 = vpop.eup %10604  ;;  %v7649_v1 = vadd.f32 %v14396_v25, %v7611_v34  ;;  %v7612_v59 = vmul.f32 %v14385_v42, %v7574_v13  ;;  %v7571_v27 = vmul.f32 %v10603_v11, %v7475_v38  ;;  %v7141_v60 = vpop.xlane.xlu0 %7140 }
 0x814   : > { %10612 = vpow2.f32 %v8673_v4  ;;  %v8674_v5 = vmul.f32 -1.442695, %v14607_v32  ;;  %v10607_v17 = vpop.eup %10606  ;;  %8123 = vst.msk [vmem:[%s14522_s8 + $0x1c] sm:$0xf] %vm8115_vm0, %v8739_v50  ;;  %v8736_v53 = vpack.c.bf16 %v7959_v45, %v7959_v45  ;;  %v7960_v41 = vmul.f32 %v10605_v63, %v14494_v20 }
 0x815   : > { %v7513_v6 = vadd.f32 1e-05, %v7449_v31  ;;  %v14627_v9 = vadd.f32 %v15609_v48, %v7649_v1  ;;  %v7650_v3 = vadd.f32 %v14396_v25, %v7612_v59  ;;  %v7572_v43 = vmul.f32 %v10607_v17, %v7476_v57  ;;  %v7144_v38 = vpop.xlane.xlu1 %7143 }
 0x816   : > { %10614 = vpow2.f32 %v8674_v5  ;;  %8120 = vst.msk [vmem:[%s14522_s8 + $0x10] sm:$0xf] %vm8115_vm0, %v8736_v53  ;;  %v8737_v20 = vpack.c.bf16 %v7960_v41, %v7960_v41  ;;  %v7609_v22 = vmul.f32 %v14385_v42, %v7571_v27  ;;  %v7450_v23 = vmax.f32 %v7418_v0, 0.0 }
 0x817   : > { %10616 = vrsqrt.f32 %v7513_v6  ;;  %v8679_v14 = vmul.f32 -1.442695, %v14627_v9  ;;  %v15610_v24 = vunpack.c.l.bf16 %v15587_v55  ;;  %v7610_v16 = vmul.f32 %v14385_v42, %v7572_v43  ;;  %v7307_v56 = vpop.xlane.xlu0 %7306 }
 0x818   : > { %v7415_v12 = vsub.f32 %v14586_v62, %v14583_v35  ;;  %8121 = vst.msk [vmem:[%s14522_s8 + $0x14] sm:$0xf] %vm8115_vm0, %v8737_v20  ;;  %v7647_v10 = vadd.f32 %v14396_v25, %v7609_v22  ;;  %v7384_v57 = vmul.f32 %v14573_v15, %v14573_v15  ;;  %v7514_v0 = vadd.f32 1e-05, %v7450_v23 }
 0x819   : > { %v14639_v8 = vadd.f32 %v15610_v24, %v7650_v3  ;;  %v7352_v54 = vmul.f32 0.125, %v7292_v26  ;;  %10618 = vpow2.f32 %v8679_v14  ;;  %v7648_v7 = vadd.f32 %v14396_v25, %v7610_v16  ;;  %v7310_v13 = vpop.xlane.xlu1 %7309 }
 0x81a   : > { %v14651_v36 = vmul.f32 0.125, %v7147_v49  ;;  %v10609_v4 = vpop.eup %10608  ;;  %v15611_v35 = vunpack.c.l.bf16 %v15583_v19  ;;  %10620 = vrsqrt.f32 %v7514_v0  ;;  %v7447_v52 = vmax.f32 %v7415_v12, 0.0 }
 0x81b   : > { %v8680_v55 = vmul.f32 -1.442695, %v14639_v8  ;;  %v7416_v34 = vsub.f32 %v7352_v54, %v7384_v57  ;;  %v7869_v11 = vadd.f32 1.0, %v10609_v4  ;;  %v15612_v26 = vunpack.c.l.bf16 %v15584_v33  ;;  %v7301_v1 = vpop.xlane.xlu0 %7300 }
 0x81c   : > { %v14655_v62 = vadd.f32 %v15611_v35, %v7647_v10  ;;  %v7482_v45 = vsub.f32 %v14198_v47, %v14546_v37  ;;  %v7479_v19 = vsub.f32 %v14194_v40, %v14554_v2  ;;  %v14666_v5 = vmul.f32 0.125, %v7150_v58  ;;  %v15616_v2 = vld [vmem:[#allocation31_spill] sm:$0xff] }
 0x81d   : > { %10622 = vpow2.f32 %v8680_v55  ;;  %v14659_v50 = vadd.f32 %v15612_v26, %v7648_v7  ;;  %v10611_v49 = vpop.eup %10610  ;;  %v7448_v63 = vmax.f32 %v7416_v34, 0.0  ;;  %v14669_v53 = vmul.f32 0.125, %v7141_v60  ;;  %v7304_v27 = vpop.xlane.xlu1 %7303 }
 0x81e   : > { %v8677_v31 = vmul.f32 -1.442695, %v14655_v62  ;;  %v10613_v59 = vpop.eup %10612  ;;  %10624 = vrcp.f32 %v7869_v11  ;;  %v7870_v17 = vadd.f32 1.0, %v10611_v49  ;;  %v7511_v47 = vadd.f32 1e-05, %v7447_v52 }
 0x81f   : > { %v8678_v33 = vmul.f32 -1.442695, %v14659_v50  ;;  %v7867_v41 = vadd.f32 1.0, %v10613_v59  ;;  %v7389_v37 = vmul.f32 %v14651_v36, %v14651_v36  ;;  %v7512_v48 = vadd.f32 1e-05, %v7448_v63  ;;  %v7159_v23 = vpop.xlane.xlu0 %7158 }
 0x820   : > { %10626 = vpow2.f32 %v8677_v31  ;;  %v10615_v6 = vpop.eup %10614  ;;  %v7390_v58 = vmul.f32 %v14666_v5, %v14666_v5  ;;  %v7387_v3 = vmul.f32 %v14669_v53, %v14669_v53  ;;  %v14677_v20 = vmul.f32 0.125, %v7144_v38 }
 0x821   : > { %10628 = vrcp.f32 %v7870_v17  ;;  %v10617_v43 = vpop.eup %10616  ;;  %v7868_v60 = vadd.f32 1.0, %v10615_v6  ;;  %v7357_v22 = vmul.f32 0.125, %v7307_v56  ;;  %v7358_v24 = vmul.f32 0.125, %v7310_v13  ;;  %v14686_v0 = vpop.xlane.xlu1 %7161 }
 0x822   : > { %10630 = vrcp.f32 %v7867_v41  ;;  %v7577_v14 = vmul.f32 %v10617_v43, %v7481_v51  ;;  %v7355_v16 = vmul.f32 0.125, %v7301_v1  ;;  %v7480_v12 = vsub.f32 %v14200_v21, %v14573_v15 }
 0x823   : > { %10632 = vpow2.f32 %v8678_v33  ;;  %v7388_v10 = vmul.f32 %v14677_v20, %v14677_v20  ;;  %v7421_v57 = vsub.f32 %v7357_v22, %v7389_v37  ;;  %v10619_v38 = vpop.eup %10618  ;;  %v7422_v56 = vsub.f32 %v7358_v24, %v7390_v58  ;;  %v7153_v4 = vpop.xlane.xlu0 %7152 }
 0x824   : > { %10634 = vrcp.f32 %v7868_v60  ;;  %v7615_v54 = vmul.f32 %v14385_v42, %v7577_v14  ;;  %v7419_v55 = vsub.f32 %v7355_v16, %v7387_v3  ;;  %v10621_v44 = vpop.eup %10620  ;;  %v7873_v61 = vadd.f32 1.0, %v10619_v38 }
 0x825   : > { %10636 = vrsqrt.f32 %v7511_v47  ;;  %v7453_v51 = vmax.f32 %v7421_v57, 0.0  ;;  %v7356_v7 = vmul.f32 0.125, %v7304_v27  ;;  %v7578_v34 = vmul.f32 %v10621_v44, %v7482_v45  ;;  %v7156_v63 = vpop.xlane.xlu1 %7155  ;;  %v15614_v57 = vld [vmem:[#allocation47_spill] sm:$0xff] }
 0x826   : > { %10638 = vrsqrt.f32 %v7512_v48  ;;  %v7653_v52 = vadd.f32 %v14396_v25, %v7615_v54  ;;  %v7454_v13 = vmax.f32 %v7422_v56, 0.0  ;;  %v7451_v11 = vmax.f32 %v7419_v55, 0.0 }
 0x827   : > { %v10623_v35 = vpop.eup %10622  ;;  %10640 = vrcp.f32 %v7873_v61  ;;  %v7517_v49 = vadd.f32 1e-05, %v7453_v51  ;;  %v7420_v31 = vsub.f32 %v7356_v7, %v7388_v10  ;;  %v15613_v59 = vunpack.c.l.bf16 %v15591_v39  ;;  %v7319_v48 = vpop.xlane.xlu0 %7318 }
 0x828   : > { %v7874_v26 = vadd.f32 1.0, %v10623_v35  ;;  %v10625_v1 = vpop.eup %10624  ;;  %v7616_v33 = vmul.f32 %v14385_v42, %v7578_v34  ;;  %v7485_v41 = vsub.f32 %v14212_v29, %v14651_v36  ;;  %v7518_v47 = vadd.f32 1e-05, %v7454_v13 }
 0x829   : > { %v14692_v17 = vadd.f32 %v15613_v59, %v7653_v52  ;;  %v7965_v45 = vmul.f32 %v10625_v1, %v14577_v46  ;;  %v7515_v27 = vadd.f32 1e-05, %v7451_v11  ;;  %v7452_v6 = vmax.f32 %v7420_v31, 0.0  ;;  %v7322_v46 = vpop.xlane.xlu1 %7321 }
 0x82a   : > { %v10627_v37 = vpop.eup %10626  ;;  %10642 = vrcp.f32 %v7874_v26  ;;  %v7654_v43 = vadd.f32 %v14396_v25, %v7616_v33  ;;  %v7486_v24 = vsub.f32 %v14219_v30, %v14666_v5  ;;  %v15615_v38 = vunpack.c.l.bf16 %v15614_v57  ;;  %v15620_v57 = vld [vmem:[#allocation43_spill] sm:$0xff] }
 0x82b   : > { %v10629_v58 = vpop.eup %10628  ;;  %v7871_v3 = vadd.f32 1.0, %v10627_v37  ;;  %v8683_v39 = vmul.f32 -1.442695, %v14692_v17  ;;  %10644 = vrsqrt.f32 %v7517_v49  ;;  %v8742_v22 = vpack.c.bf16 %v7965_v45, %v7965_v45  ;;  %v7313_v51 = vpop.xlane.xlu0 %7312 }
 0x82c   : > { %v10631_v60 = vpop.eup %10630  ;;  %v7966_v14 = vmul.f32 %v10629_v58, %v14592_v28  ;;  %10646 = vrsqrt.f32 %v7518_v47  ;;  %v14706_v54 = vadd.f32 %v15615_v38, %v7654_v43  ;;  %v14708_v56 = vmul.f32 0.125, %v7159_v23  ;;  %v15618_v43 = vld [vmem:[#allocation42_spill] sm:$0xff] }
 0x82d   : > { %v10633_v16 = vpop.eup %10632  ;;  %v7963_v10 = vmul.f32 %v10631_v60, %v14597_v18  ;;  %10648 = vrcp.f32 %v7871_v3  ;;  %8126 = vst.msk [vmem:[%s14522_s8 + $0x28] sm:$0xf] %vm8115_vm0, %v8742_v22  ;;  %v7516_v61 = vadd.f32 1e-05, %v7452_v6  ;;  %v14720_v13 = vmul.f32 0.125, %v14686_v0  ;;  %v14724_v26 = vpop.xlane.xlu1 %7315  ;;  %v15617_v0 = vld [vmem:[#allocation34_spill] sm:$0xff] }
 0x82e   : > { %v10635_v55 = vpop.eup %10634  ;;  %v8743_v28 = vpack.c.bf16 %v7966_v14, %v7966_v14  ;;  %v7872_v44 = vadd.f32 1.0, %v10633_v16  ;;  %10650 = vpow2.f32 %v8683_v39  ;;  %v8684_v52 = vmul.f32 -1.442695, %v14706_v54 }
 0x82f   : > { %v10637_v7 = vpop.eup %10636  ;;  %v8740_v35 = vpack.c.bf16 %v7963_v10, %v7963_v10  ;;  %v7964_v18 = vmul.f32 %v10635_v55, %v14607_v32  ;;  %10652 = vrsqrt.f32 %v7515_v27  ;;  %v14722_v11 = vmul.f32 0.125, %v7153_v4  ;;  %v14755_v47 = vpop.xlane.xlu0 %7170 }
 0x830   : > { %v10639_v34 = vpop.eup %10638  ;;  %8127 = vst.msk [vmem:[%s14522_s8 + $0x2c] sm:$0xf] %vm8115_vm0, %v8743_v28  ;;  %10654 = vrcp.f32 %v7872_v44  ;;  %v7575_v23 = vmul.f32 %v10637_v7, %v7479_v19  ;;  %v14731_v31 = vmul.f32 0.125, %v7156_v63  ;;  %v7483_v19 = vsub.f32 %v15616_v2, %v14669_v53 }
 0x831   : > { %8124 = vst.msk [vmem:[%s14522_s8 + $0x20] sm:$0xf] %vm8115_vm0, %v8740_v35  ;;  %v8741_v32 = vpack.c.bf16 %v7964_v18, %v7964_v18  ;;  %10656 = vpow2.f32 %v8684_v52  ;;  %v7576_v49 = vmul.f32 %v10639_v34, %v7480_v12  ;;  %v10641_v1 = vpop.eup %10640  ;;  %v7484_v4 = vsub.f32 %v15617_v0, %v14677_v20  ;;  %v14759_v3 = vpop.xlane.xlu1 %7173 }
 0x832   : > { %v7613_v40 = vmul.f32 %v14385_v42, %v7575_v23  ;;  %10658 = vrsqrt.f32 %v7516_v61  ;;  %v7969_v59 = vmul.f32 %v10641_v1, %v14627_v9  ;;  %v7393_v21 = vmul.f32 %v14708_v56, %v14708_v56 }
 0x833   : > { %8125 = vst.msk [vmem:[%s14522_s8 + $0x24] sm:$0xf] %vm8115_vm0, %v8741_v32  ;;  %v7614_v33 = vmul.f32 %v14385_v42, %v7576_v49  ;;  %v7394_v15 = vmul.f32 %v14720_v13, %v14720_v13  ;;  %v14749_v53 = vmul.f32 %v14722_v11, %v14722_v11  ;;  %v14753_v20 = vmul.f32 %v14731_v31, %v14731_v31  ;;  %v7165_v34 = vpop.xlane.xlu0 %7164 }
 0x834   : > { %v10643_v12 = vpop.eup %10642  ;;  %v7651_v63 = vadd.f32 %v14396_v25, %v7613_v40  ;;  %v7361_v9 = vmul.f32 0.125, %v7319_v48  ;;  %v8746_v45 = vpack.c.bf16 %v7969_v59, %v7969_v59  ;;  %v7362_v58 = vmul.f32 0.125, %v7322_v46  ;;  %v15622_v59 = vld [vmem:[#allocation50_spill] sm:$0xff] }
 0x835   : > { %v10645_v37 = vpop.eup %10644  ;;  %v7970_v27 = vmul.f32 %v10643_v12, %v14639_v8  ;;  %v7652_v6 = vadd.f32 %v14396_v25, %v7614_v33  ;;  %v15619_v60 = vunpack.c.l.bf16 %v15618_v43  ;;  %v7359_v16 = vmul.f32 0.125, %v7313_v51  ;;  %v7168_v40 = vpop.xlane.xlu1 %7167  ;;  %v15624_v12 = vld [vmem:[#allocation51_spill] sm:$0xff]  ;;  %v15626_v43 = vld [vmem:[#allocation56_spill] sm:$0xff] }
 0x836   : > { %v10647_v39 = vpop.eup %10646  ;;  %v7581_v48 = vmul.f32 %v10645_v37, %v7485_v41  ;;  %v7425_v14 = vsub.f32 %v7361_v9, %v7393_v21  ;;  %8130 = vst.msk [vmem:[%s14522_s8 + $0x38] sm:$0xf] %vm8115_vm0, %v8746_v45  ;;  %v15621_v46 = vunpack.c.l.bf16 %v15620_v57  ;;  %v7426_v28 = vsub.f32 %v7362_v58, %v7394_v15  ;;  %v14822_v57 = vld [vmem:[%s14960_s6] ss:$0 sm:$0xff] }
 0x837   : > { %v14763_v22 = vadd.f32 %v15619_v60, %v7651_v63  ;;  %v10649_v10 = vpop.eup %10648  ;;  %v8747_v8 = vpack.c.bf16 %v7970_v27, %v7970_v27  ;;  %v7582_v55 = vmul.f32 %v10647_v39, %v7486_v24  ;;  %v15623_v33 = vunpack.c.l.bf16 %v15622_v59 }
 0x838   : > { %v14772_v38 = vadd.f32 %v15621_v46, %v7652_v6  ;;  %v10651_v44 = vpop.eup %10650  ;;  %v7967_v29 = vmul.f32 %v10649_v10, %v14655_v62  ;;  %v7619_v41 = vmul.f32 %v14385_v42, %v7581_v48  ;;  %v7457_v61 = vmax.f32 %v7425_v14, 0.0 }
 0x839   : > { %v8681_v36 = vmul.f32 -1.442695, %v14763_v22  ;;  %v10653_v51 = vpop.eup %10652  ;;  %8131 = vst.msk [vmem:[%s14522_s8 + $0x3c] sm:$0xf] %vm8115_vm0, %v8747_v8  ;;  %v7877_v7 = vadd.f32 1.0, %v10651_v44  ;;  %v7620_v18 = vmul.f32 %v14385_v42, %v7582_v55  ;;  %v7458_v30 = vmax.f32 %v7426_v28, 0.0  ;;  %v7325_v8 = vpop.xlane.xlu0 %7324 }
 0x83a   : > { %v8682_v35 = vmul.f32 -1.442695, %v14772_v38  ;;  %v10655_v5 = vpop.eup %10654  ;;  %v8744_v24 = vpack.c.bf16 %v7967_v29, %v7967_v29  ;;  %v7657_v62 = vadd.f32 %v14396_v25, %v7619_v41  ;;  %v7579_v52 = vmul.f32 %v10653_v51, %v7483_v19  ;;  %v7328_v46 = vpop.xlane.xlu1 %7327  ;;  %v15629_v28 = vld [vmem:[#allocation32_spill] sm:$0xff] }
 0x83b   : > { %10660 = vpow2.f32 %v8681_v36  ;;  %v10657_v23 = vpop.eup %10656  ;;  %v7968_v32 = vmul.f32 %v10655_v5, %v14659_v50  ;;  %v7658_v49 = vadd.f32 %v14396_v25, %v7620_v18  ;;  %v7521_v1 = vadd.f32 1e-05, %v7457_v61  ;;  %v15630_v29 = vld [vmem:[#allocation48_spill] sm:$0xff]  ;;  %v15632_v61 = vld [vmem:[#allocation41_spill] sm:$0xff]  ;;  %v15633_v18 = vld [vmem:[#allocation3_spill] sm:$0xff] }
 0x83c   : > { %10662 = vrcp.f32 %v7877_v7  ;;  %v10659_v2 = vpop.eup %10658  ;;  %8128 = vst.msk [vmem:[%s14522_s8 + $0x30] sm:$0xf] %vm8115_vm0, %v8744_v24  ;;  %v7878_v0 = vadd.f32 1.0, %v10657_v23  ;;  %v14791_v21 = vadd.f32 %v15623_v33, %v7657_v62  ;;  %v7617_v19 = vmul.f32 %v14385_v42, %v7579_v52  ;;  %v14806_v42 = vld [vmem:[%s14959_s5] ss:$0 sm:$0xff] }
 0x83d   : > { %10664 = vpow2.f32 %v8682_v35  ;;  %v8745_v15 = vpack.c.bf16 %v7968_v32, %v7968_v32  ;;  %v15625_v50 = vunpack.c.l.bf16 %v15624_v12  ;;  %v7580_v9 = vmul.f32 %v10659_v2, %v7484_v4 }
 0x83e   : > { %10666 = vrsqrt.f32 %v7521_v1  ;;  %v8687_v37 = vmul.f32 -1.442695, %v14791_v21  ;;  %v7655_v45 = vadd.f32 %v14396_v25, %v7617_v19  ;;  %v7522_v27 = vadd.f32 1e-05, %v7458_v30  ;;  %v15627_v25 = vld [vmem:[#allocation45_spill] sm:$0xff]  ;;  %v7334_v59 = vpop.xlane.xlu1 %7333 }
 0x83f   : > { %v14796_v63 = vadd.f32 %v15625_v50, %v7658_v49  ;;  %10668 = vrcp.f32 %v7878_v0  ;;  %8129 = vst.msk [vmem:[%s14522_s8 + $0x34] sm:$0xf] %vm8115_vm0, %v8745_v15  ;;  %v7618_v58 = vmul.f32 %v14806_v42, %v7580_v9  ;;  %v7423_v4 = vsub.f32 %v7359_v16, %v14749_v53 }
 0x840   : > { %v7360_v39 = vmul.f32 0.125, %v14724_v26  ;;  %v7726_v60 = vunpack.c.l.bf16 %v15626_v43  ;;  %10670 = vpow2.f32 %v8687_v37  ;;  %v15628_v48 = vunpack.c.l.bf16 %v15627_v25 }
 0x841   : > { %v8688_v6 = vmul.f32 -1.442695, %v14796_v63  ;;  %v14817_v10 = vmul.f32 0.125, %v14755_v47  ;;  %v7656_v53 = vadd.f32 %v14822_v57, %v7618_v58  ;;  %v7455_v26 = vmax.f32 %v7423_v4, 0.0 }
 0x842   : > { %v14814_v14 = vadd.f32 %v15628_v48, %v7655_v45  ;;  %v7424_v16 = vsub.f32 %v7360_v39, %v14753_v20  ;;  %v7489_v44 = vsub.f32 %v15629_v28, %v14708_v56  ;;  %v14830_v47 = vmul.f32 0.125, %v14759_v3 }
 0x843   : > { %10672 = vpow2.f32 %v8688_v6  ;;  %v15631_v36 = vunpack.c.l.bf16 %v15630_v29  ;;  %v7490_v51 = vsub.f32 %v15632_v61, %v14720_v13  ;;  %v7519_v7 = vadd.f32 1e-05, %v7455_v26  ;;  %v15634_v29 = vld [vmem:[#allocation55_spill] sm:$0xff] }
 0x844   : > { %v8685_v55 = vmul.f32 -1.442695, %v14814_v14  ;;  %10674 = vrsqrt.f32 %v7522_v27  ;;  %v7456_v35 = vmax.f32 %v7424_v16, 0.0  ;;  %v7487_v30 = vsub.f32 %v15633_v18, %v14722_v11 }
 0x845   : > { %v14834_v41 = vadd.f32 %v15631_v36, %v7656_v53  ;;  %v10661_v20 = vpop.eup %10660  ;;  %v14840_v5 = vmul.f32 0.125, %v7165_v34  ;;  %v14842_v56 = vmul.f32 0.125, %v7168_v40  ;;  %v7397_v52 = vmul.f32 %v14817_v10, %v14817_v10  ;;  %v7331_v34 = vpop.xlane.xlu0 %7330 }
 0x846   : > { %10676 = vpow2.f32 %v8685_v55  ;;  %v10663_v3 = vpop.eup %10662  ;;  %v7875_v24 = vadd.f32 1.0, %v10661_v20  ;;  %v7520_v32 = vadd.f32 1e-05, %v7456_v35  ;;  %v7398_v49 = vmul.f32 %v14830_v47, %v14830_v47 }
 0x847   : > { %v8686_v62 = vmul.f32 -1.442695, %v14834_v41  ;;  %10678 = vrsqrt.f32 %v7519_v7  ;;  %v10665_v13 = vpop.eup %10664  ;;  %v7973_v23 = vmul.f32 %v10663_v3, %v14692_v17  ;;  %v7395_v11 = vmul.f32 %v14840_v5, %v14840_v5 }
 0x848   : > { %v10667_v1 = vpop.eup %10666  ;;  %10680 = vrcp.f32 %v7875_v24  ;;  %v7876_v40 = vadd.f32 1.0, %v10665_v13  ;;  %v7396_v2 = vmul.f32 %v14842_v56, %v14842_v56  ;;  %v7363_v0 = vmul.f32 0.125, %v7325_v8 }
 0x849   : > { %v10669_v33 = vpop.eup %10668  ;;  %v8750_v19 = vpack.c.bf16 %v7973_v23, %v7973_v23  ;;  %10682 = vpow2.f32 %v8686_v62  ;;  %v7585_v17 = vmul.f32 %v10667_v1, %v7489_v44  ;;  %v7364_v15 = vmul.f32 0.125, %v7328_v46 }
 0x84a   : > { %v7974_v12 = vmul.f32 %v10669_v33, %v14706_v54  ;;  %10684 = vrcp.f32 %v7876_v40  ;;  %v7427_v50 = vsub.f32 %v7363_v0, %v7395_v11  ;;  %v7365_v9 = vmul.f32 0.125, %v7331_v34  ;;  %v10671_v37 = vpop.eup %10670  ;;  %v15637_v0 = vld [vmem:[#allocation35_spill] sm:$0xff] }
 0x84b   : > { %8134 = vst.msk [vmem:[%s14522_s8 + $0x48] sm:$0xf] %vm8115_vm0, %v8750_v19  ;;  %v7623_v45 = vmul.f32 %v14806_v42, %v7585_v17  ;;  %10686 = vrsqrt.f32 %v7520_v32  ;;  %v7428_v27 = vsub.f32 %v7364_v15, %v7396_v2  ;;  %v7366_v6 = vmul.f32 0.125, %v7334_v59 }
 0x84c   : > { %v8751_v4 = vpack.c.bf16 %v7974_v12, %v7974_v12  ;;  %v7881_v39 = vadd.f32 1.0, %v10671_v37  ;;  %v7459_v25 = vmax.f32 %v7427_v50, 0.0  ;;  %v7429_v48 = vsub.f32 %v7365_v9, %v7397_v52 }
 0x84d   : > { %v10673_v58 = vpop.eup %10672  ;;  %v7661_v54 = vadd.f32 %v14822_v57, %v7623_v45  ;;  %v7460_v26 = vmax.f32 %v7428_v27, 0.0  ;;  %v7430_v16 = vsub.f32 %v7366_v6, %v7398_v49  ;;  %v15635_v36 = vunpack.c.l.bf16 %v15634_v29  ;;  %v15636_v49 = vld [vmem:[#allocation52_spill] sm:$0xff]  ;;  %v15639_v6 = vld [vmem:[#allocation38_spill] sm:$0xff] }
 0x84e   : > { %v10675_v8 = vpop.eup %10674  ;;  %v7882_v53 = vadd.f32 1.0, %v10673_v58  ;;  %8135 = vst.msk [vmem:[%s14522_s8 + $0x4c] sm:$0xf] %vm8115_vm0, %v8751_v4  ;;  %10688 = vrcp.f32 %v7881_v39  ;;  %v7523_v55 = vadd.f32 1e-05, %v7459_v25  ;;  %v7461_v28 = vmax.f32 %v7429_v48, 0.0 }
 0x84f   : > { %v7586_v46 = vmul.f32 %v10675_v8, %v7490_v51  ;;  %v14863_v61 = vadd.f32 %v15635_v36, %v7661_v54  ;;  %v7524_v7 = vadd.f32 1e-05, %v7460_v26  ;;  %v7462_v35 = vmax.f32 %v7430_v16, 0.0  ;;  %v15640_v48 = vld [vmem:[#allocation4_spill] sm:$0xff]  ;;  %v15641_v16 = vld [vmem:[#allocation57_spill] sm:$0xff]  ;;  %v15642_v29 = vld [vmem:[#allocation2_spill] sm:$0xff] }
 0x850   : > { %v10677_v44 = vpop.eup %10676  ;;  %10690 = vrcp.f32 %v7882_v53  ;;  %v7525_v24 = vadd.f32 1e-05, %v7461_v28  ;;  %v7723_v11 = vunpack.c.l.bf16 %v15636_v49  ;;  %v7491_v58 = vsub.f32 %v15639_v6, %v14840_v5 }
 0x851   : > { %v10679_v20 = vpop.eup %10678  ;;  %v7879_v18 = vadd.f32 1.0, %v10677_v44  ;;  %v7624_v3 = vmul.f32 %v14806_v42, %v7586_v46  ;;  %10692 = vrsqrt.f32 %v7523_v55  ;;  %v8691_v62 = vmul.f32 -1.442695, %v14863_v61 }
 0x852   : > { %v7583_v52 = vmul.f32 %v10679_v20, %v7487_v30  ;;  %10694 = vrsqrt.f32 %v7524_v7  ;;  %v7526_v51 = vadd.f32 1e-05, %v7462_v35  ;;  %v10681_v13 = vpop.eup %10680  ;;  %v7488_v30 = vsub.f32 %v15637_v0, %v14731_v31  ;;  %v15646_v0 = vld [vmem:[#allocation30_spill] sm:$0xff] }
 0x853   : > { %10696 = vrcp.f32 %v7879_v18  ;;  %v7662_v23 = vadd.f32 %v14822_v57, %v7624_v3  ;;  %v10683_v32 = vpop.eup %10682  ;;  %v7971_v34 = vmul.f32 %v10681_v13, %v14763_v22  ;;  %v7492_v8 = vsub.f32 %v15640_v48, %v14842_v56  ;;  %v15643_v56 = vld [vmem:[#allocation46_spill] sm:$0xff] }
 0x854   : > { %10698 = vpow2.f32 %v8691_v62  ;;  %v7621_v1 = vmul.f32 %v14806_v42, %v7583_v52  ;;  %v10685_v40 = vpop.eup %10684  ;;  %v7880_v2 = vadd.f32 1.0, %v10683_v32  ;;  %v7727_v46 = vunpack.c.l.bf16 %v15641_v16  ;;  %v15645_v32 = vld [vmem:[#allocation29_spill] sm:$0xff] }
 0x855   : > { %v14875_v59 = vadd.f32 %v7726_v60, %v7662_v23  ;;  %10700 = vrsqrt.f32 %v7525_v24  ;;  %v10687_v33 = vpop.eup %10686  ;;  %v8748_v19 = vpack.c.bf16 %v7971_v34, %v7971_v34  ;;  %v7972_v17 = vmul.f32 %v10685_v40, %v14772_v38  ;;  %v15638_v60 = vld [vmem:[#allocation54_spill] sm:$0xff] }
 0x856   : > { %v7659_v22 = vadd.f32 %v14822_v57, %v7621_v1  ;;  %10702 = vrsqrt.f32 %v7526_v51  ;;  %v7584_v12 = vmul.f32 %v10687_v33, %v7488_v30  ;;  %v7724_v9 = vunpack.c.l.bf16 %v15638_v60  ;;  %v15644_v24 = vld [vmem:[#allocation58_spill] sm:$0xff] }
 0x857   : > { %10704 = vrcp.f32 %v7880_v2  ;;  %v8692_v15 = vmul.f32 -1.442695, %v14875_v59  ;;  %8132 = vst.msk [vmem:[%s14522_s8 + $0x40] sm:$0xf] %vm8115_vm0, %v8748_v19  ;;  %v8749_v31 = vpack.c.bf16 %v7972_v17, %v7972_v17  ;;  %v7493_v7 = vsub.f32 %v15643_v56, %v14817_v10 }
 0x858   : > { %v14882_v50 = vadd.f32 %v7723_v11, %v7659_v22  ;;  %v10689_v43 = vpop.eup %10688  ;;  %v7622_v37 = vmul.f32 %v14806_v42, %v7584_v12  ;;  %v7494_v62 = vsub.f32 %v15644_v24, %v14830_v47  ;;  %v7729_v49 = vunpack.c.l.bf16 %v15645_v32 }
 0x859   : > { %10706 = vpow2.f32 %v8692_v15  ;;  %8133 = vst.msk [vmem:[%s14522_s8 + $0x44] sm:$0xf] %vm8115_vm0, %v8749_v31  ;;  %v7977_v38 = vmul.f32 %v10689_v43, %v14791_v21  ;;  %v7730_v30 = vunpack.c.l.bf16 %v15646_v0 }
 0x85a   : > { %v10691_v45 = vpop.eup %10690  ;;  %v8689_v27 = vmul.f32 -1.442695, %v14882_v50  ;;  %v7660_v25 = vadd.f32 %v14822_v57, %v7622_v37 }
 0x85b   : > { %v10693_v4 = vpop.eup %10692  ;;  %v7978_v39 = vmul.f32 %v10691_v45, %v14796_v63  ;;  %v8754_v54 = vpack.c.bf16 %v7977_v38, %v7977_v38  ;;  %v7728_v63 = vunpack.c.l.bf16 %v15642_v29 }
 0x85c   : > { %v10695_v53 = vpop.eup %10694  ;;  %10708 = vpow2.f32 %v8689_v27  ;;  %v7587_v26 = vmul.f32 %v10693_v4, %v7491_v58  ;;  %v14897_v28 = vadd.f32 %v7724_v9, %v7660_v25 }
 0x85d   : > { %v10697_v21 = vpop.eup %10696  ;;  %v8755_v55 = vpack.c.bf16 %v7978_v39, %v7978_v39  ;;  %v7588_v5 = vmul.f32 %v10695_v53, %v7492_v8  ;;  %8138 = vst.msk [vmem:[%s14522_s8 + $0x58] sm:$0xf] %vm8115_vm0, %v8754_v54 }
 0x85e   : > { %v10699_v44 = vpop.eup %10698  ;;  %v7975_v36 = vmul.f32 %v10697_v21, %v14814_v14  ;;  %v7625_v35 = vmul.f32 %v14806_v42, %v7587_v26  ;;  %v8690_v3 = vmul.f32 -1.442695, %v14897_v28 }
 0x85f   : > { %v10701_v20 = vpop.eup %10700  ;;  %8139 = vst.msk [vmem:[%s14522_s8 + $0x5c] sm:$0xf] %vm8115_vm0, %v8755_v55  ;;  %v7885_v18 = vadd.f32 1.0, %v10699_v44  ;;  %v7626_v52 = vmul.f32 %v14806_v42, %v7588_v5 }
 0x860   : > { %v10703_v51 = vpop.eup %10702  ;;  %v8752_v13 = vpack.c.bf16 %v7975_v36, %v7975_v36  ;;  %v7663_v14 = vadd.f32 %v14822_v57, %v7625_v35  ;;  %v7589_v23 = vmul.f32 %v10701_v20, %v7493_v7 }
 0x861   : > { %v10705_v10 = vpop.eup %10704  ;;  %10710 = vrcp.f32 %v7885_v18  ;;  %v7664_v11 = vadd.f32 %v14822_v57, %v7626_v52  ;;  %v7590_v34 = vmul.f32 %v10703_v51, %v7494_v62 }
 0x862   : > { %8136 = vst.msk [vmem:[%s14522_s8 + $0x50] sm:$0xf] %vm8115_vm0, %v8752_v13  ;;  %v7976_v1 = vmul.f32 %v10705_v10, %v14834_v41  ;;  %10712 = vpow2.f32 %v8690_v3  ;;  %v7759_v47 = vadd.f32 %v7727_v46, %v7663_v14  ;;  %v7627_v40 = vmul.f32 %v14806_v42, %v7589_v23 }
 0x863   : > { %v10707_v2 = vpop.eup %10706  ;;  %v7760_v33 = vadd.f32 %v7728_v63, %v7664_v11  ;;  %v7628_v19 = vmul.f32 %v14806_v42, %v7590_v34 }
 0x864   : > { %v8753_v17 = vpack.c.bf16 %v7976_v1, %v7976_v1  ;;  %v7886_v22 = vadd.f32 1.0, %v10707_v2  ;;  %v8693_v15 = vmul.f32 -1.442695, %v7759_v47  ;;  %v7665_v12 = vadd.f32 %v14822_v57, %v7627_v40 }
 0x865   : > { %v8694_v31 = vmul.f32 -1.442695, %v7760_v33  ;;  %v7666_v43 = vadd.f32 %v14822_v57, %v7628_v19 }
 0x866   : > { %v10709_v60 = vpop.eup %10708  ;;  %8137 = vst.msk [vmem:[%s14522_s8 + $0x54] sm:$0xf] %vm8115_vm0, %v8753_v17  ;;  %10714 = vrcp.f32 %v7886_v22  ;;  %v7761_v41 = vadd.f32 %v7729_v49, %v7665_v12 }
 0x867   : > { %v7883_v9 = vadd.f32 1.0, %v10709_v60  ;;  %10716 = vpow2.f32 %v8693_v15  ;;  %v7762_v37 = vadd.f32 %v7730_v30, %v7666_v43 }
 0x868   : > { %10718 = vpow2.f32 %v8694_v31  ;;  %v8695_v45 = vmul.f32 -1.442695, %v7761_v41 }
 0x869   : > { %10720 = vrcp.f32 %v7883_v9  ;;  %v8696_v42 = vmul.f32 -1.442695, %v7762_v37 }
 0x86a   : > { %10722 = vpow2.f32 %v8695_v45 }
 0x86b   : > { %v10711_v38 = vpop.eup %10710  ;;  %10724 = vpow2.f32 %v8696_v42 }
 0x86c   : > { %v10713_v27 = vpop.eup %10712  ;;  %v7981_v6 = vmul.f32 %v10711_v38, %v14863_v61 }
 0x86d   : > { %v7884_v57 = vadd.f32 1.0, %v10713_v27 }
 0x86e   : > { %v8758_v58 = vpack.c.bf16 %v7981_v6, %v7981_v6 }
 0x86f   : > { %10726 = vrcp.f32 %v7884_v57 }
 0x870   : > { %v10715_v4 = vpop.eup %10714  ;;  %8142 = vst.msk [vmem:[%s14522_s8 + $0x68] sm:$0xf] %vm8115_vm0, %v8758_v58 }
 0x871   : > { %v10717_v39 = vpop.eup %10716  ;;  %v7982_v25 = vmul.f32 %v10715_v4, %v14875_v59 }
 0x872   : > { %v10719_v48 = vpop.eup %10718  ;;  %v7887_v8 = vadd.f32 1.0, %v10717_v39 }
 0x873   : > { %v10721_v53 = vpop.eup %10720  ;;  %v8759_v54 = vpack.c.bf16 %v7982_v25, %v7982_v25  ;;  %v7888_v26 = vadd.f32 1.0, %v10719_v48 }
 0x874   : > { %v10723_v21 = vpop.eup %10722  ;;  %v7979_v61 = vmul.f32 %v10721_v53, %v14882_v50  ;;  %10728 = vrcp.f32 %v7887_v8 }
 0x875   : > { %v10725_v16 = vpop.eup %10724  ;;  %8143 = vst.msk [vmem:[%s14522_s8 + $0x6c] sm:$0xf] %vm8115_vm0, %v8759_v54  ;;  %10730 = vrcp.f32 %v7888_v26  ;;  %v7889_v46 = vadd.f32 1.0, %v10723_v21 }
 0x876   : > { %v8756_v55 = vpack.c.bf16 %v7979_v61, %v7979_v61  ;;  %v7890_v5 = vadd.f32 1.0, %v10725_v16 }
 0x877   : > { %10732 = vrcp.f32 %v7889_v46 }
 0x878   : > { %8140 = vst.msk [vmem:[%s14522_s8 + $0x60] sm:$0xf] %vm8115_vm0, %v8756_v55  ;;  %10734 = vrcp.f32 %v7890_v5 }
 0x879   : > { %v10727_v59 = vpop.eup %10726 }
 0x87a   : > { %v7980_v44 = vmul.f32 %v10727_v59, %v14897_v28 }
 0x87c   : > { %v8757_v29 = vpack.c.bf16 %v7980_v44, %v7980_v44 }
 0x87e   : > { %v10729_v50 = vpop.eup %10728  ;;  %8141 = vst.msk [vmem:[%s14522_s8 + $0x64] sm:$0xf] %vm8115_vm0, %v8757_v29 }
 0x87f   : > { %v10731_v63 = vpop.eup %10730  ;;  %v7983_v36 = vmul.f32 %v10729_v50, %v7759_v47 }
 0x880   : > { %v7984_v56 = vmul.f32 %v10731_v63, %v7760_v33 }
 0x881   : > { %v10733_v7 = vpop.eup %10732  ;;  %v8760_v35 = vpack.c.bf16 %v7983_v36, %v7983_v36 }
 0x882   : > { %v10735_v20 = vpop.eup %10734  ;;  %v8761_v18 = vpack.c.bf16 %v7984_v56, %v7984_v56  ;;  %v7985_v3 = vmul.f32 %v10733_v7, %v7761_v41 }
 0x883   : > { %8144 = vst.msk [vmem:[%s14522_s8 + $0x70] sm:$0xf] %vm8115_vm0, %v8760_v35  ;;  %v7986_v24 = vmul.f32 %v10735_v20, %v7762_v37 }
 0x884   : > { %8145 = vst.msk [vmem:[%s14522_s8 + $0x74] sm:$0xf] %vm8115_vm0, %v8761_v18  ;;  %v8762_v28 = vpack.c.bf16 %v7985_v3, %v7985_v3 }
 0x885   : > { %v8763_v62 = vpack.c.bf16 %v7986_v24, %v7986_v24 }
 0x886   : > { %8146 = vst.msk [vmem:[%s14522_s8 + $0x78] sm:$0xf] %vm8115_vm0, %v8762_v28 }
 0x887   : > { %8147 = vst.msk [vmem:[%s14522_s8 + $0x7c] sm:$0xf] %vm8115_vm0, %v8763_v62 }
 0x888 PF: > { %s17_s26 = sadd.s32 1, %s10765_s26   ;;  %s15647_s24 = smov %s10761_s25 }
 0x889   : > { %p14_p5 = scmp.ge.s32.totalorder %s17_s26, 4   ;;  %s15648_s25 = smov %s15650_s27 }
 0x88b   :  { %16 = sbr.rel (!%p14_p5) target bundleno = 2 (0x2), region = 79 }

</bundles_post_ra>
